<compile_context>
chip_gen: v6e
topology: v6e:2x2x1
jax: 0.10.0
libtpu: 0.0.40
codegen_flags: <defaults>
</compile_context>

<pallas_src>
import jax
import jax.numpy as jnp
from jax import lax
from jax.experimental import pallas as pl
from jax.experimental.pallas import tpu as pltpu

DISEASE = "disease"
DRUG = "drug"
PROTEIN = "protein"
SIDEEFFECT = "sideeffect"
_NODE_TYPES = (DRUG, PROTEIN, DISEASE, SIDEEFFECT)

# Which Linear layers consume which source node features.  The order defines
# each layer's column slot inside the concatenated weight / fused h matrix.
_SRC_LINEARS = {
    DRUG: ("fc_DDI", "fc_D_ch", "fc_P_D", "fc_Di_D", "fc_Side_D"),
    PROTEIN: ("fc_D_P", "fc_PPI", "fc_P_seq", "fc_Di_P"),
    DISEASE: ("fc_D_Di", "fc_P_Di"),
    SIDEEFFECT: ("fc_D_Side",),
}
_LINEAR_NAMES = [n for names in _SRC_LINEARS.values() for n in names]

_MIB = 1024 * 1024


def _vmem_capacity_bytes():
    """Trace-time VMEM capacity query with a conservative (v7x) fallback."""
    try:
        info = pltpu.get_tpu_info()
        cap = getattr(info, "vmem_capacity_bytes", None)
        if cap:
            return int(cap)
    except Exception:
        pass
    return 64 * _MIB


_VMEM_CAP = _vmem_capacity_bytes()
# Leave headroom for compiler-internal scratch / semaphores / double-buffering:
#   v7x (64 MiB per TC) -> ~54 MiB ; v5e/v6e (128 MiB) -> 112 MiB.
_VMEM_LIMIT_BYTES = min(int(_VMEM_CAP * 0.85), 112 * _MIB)
# Budget for a kernel's full working set (pipelined tiles x2 + resident blocks).
_WORKSET_BUDGET_BYTES = int(_VMEM_LIMIT_BYTES * 0.75)


def _round_up(n, m=128):
    return ((n + m - 1) // m) * m


def _pad2d(x, rows, cols):
    r, c = x.shape
    if r == rows and c == cols:
        return x
    return jnp.pad(x, ((0, rows - r), (0, cols - c)))


def _pick_row_tile(n, pipelined_row_bytes, resident_bytes, budget):
    """Destination-row tile size.

    `n` is already padded to a multiple of 128 (tm can land on the lane axis of
    a transposed adjacency block).  Among tile sizes that keep the fully
    accounted working set (2x double-buffered pipelined tiles + resident
    blocks) under `budget`, prefer the largest one that still yields >= 2 grid
    steps (megacore split on v7x + DMA/compute overlap).
    """
    fits = [t for t in (1024, 512, 256, 128)
            if t <= n and n % t == 0
            and 2 * t * pipelined_row_bytes + resident_bytes <= budget]
    multi = [t for t in fits if n // t >= 2]
    if multi:
        return multi[0]
    if fits:
        return fits[0]
    # TODO(synk): K-tile the source axis instead of relying on vmem_limit here.
    return 128


# ----------------------------------------------------------------------------
# Stage 1: lane-dense fused linear + relu, one call per source node type.
# ----------------------------------------------------------------------------
def _linear_relu_kernel(x_ref, wt_ref, b_ref, h_ref):
    # h = relu(X @ W_cat^T + b_cat); W is passed pre-transposed (in_dim, out_dim)
    # so no in-kernel transpose is needed; accumulate in f32 on the MXU.
    h = jnp.dot(x_ref[...], wt_ref[...], preferred_element_type=jnp.float32)
    h_ref[...] = jnp.maximum(h + b_ref[...], 0.0)


def fused_linear_relu(x, wt_cat, b_cat):
    """relu(x @ wt_cat + b_cat) with a (dim, k*dim) concatenated weight block."""
    m, d = x.shape
    d2, dw = wt_cat.shape
    assert d == d2, (x.shape, wt_cat.shape)
    # Pipelined per-row bytes: x row + out row.  Residents: weights + bias (x2).
    tm = _pick_row_tile(m, 4 * (d + dw), 2 * 4 * (d * dw + dw),
                        _WORKSET_BUDGET_BYTES)
    return pl.pallas_call(
        _linear_relu_kernel,
        out_shape=jax.ShapeDtypeStruct((m, dw), jnp.float32),
        grid=(m // tm,),
        in_specs=[
            pl.BlockSpec((tm, d), lambda i: (i, 0)),
            pl.BlockSpec((d, dw), lambda i: (0, 0)),
            pl.BlockSpec((1, dw), lambda i: (0, 0)),
        ],
        out_specs=pl.BlockSpec((tm, dw), lambda i: (i, 0)),
        compiler_params=pltpu.CompilerParams(
            dimension_semantics=("parallel",),
            vmem_limit_bytes=_VMEM_LIMIT_BYTES,
        ),
    )(x, wt_cat, b_cat)


# ----------------------------------------------------------------------------
# Stage 2: per-destination fused aggregation + mean, gridded over row tiles.
# ----------------------------------------------------------------------------
def _make_dst_agg_kernel(terms, n_adj, n_h, n_terms):
    """terms: tuple of (adj_idx, h_idx, transposed) -- static config."""
    inv_count = 1.0 / float(n_terms + 1)     # mean over all terms + self feature

    def kernel(*refs):
        adj_refs = refs[:n_adj]
        h_refs = refs[n_adj:n_adj + n_h]
        inv_ref = refs[n_adj + n_h]           # (tm, n_terms) precomputed 1/deg
        self_ref = refs[n_adj + n_h + 1]
        out_ref = refs[n_adj + n_h + 2]

        acc = self_ref[...].astype(jnp.float32)
        for t, (adj_idx, h_idx, transposed) in enumerate(terms):
            # bf16 binary adjacencies are cast to f32 in-register (exact).
            a = adj_refs[adj_idx][...].astype(jnp.float32)
            h = h_refs[h_idx][...]            # already the dim-wide column block
            if transposed:
                # `a` is an [M, tm] column tile of the original (src x dst)
                # adjacency.  Contracting over axis 0 realizes the (A.T @ h)
                # tile on the MXU without materializing the transpose in HBM.
                agg = lax.dot_general(a, h, (((0,), (0,)), ((), ())),
                                      preferred_element_type=jnp.float32)
            else:
                agg = jnp.dot(a, h, preferred_element_type=jnp.float32)
            # row_normalize applied on the output side with the precomputed
            # inverse degree: diag(1/rowsum(A)) @ (A @ h) == row_normalize(A) @ h
            acc = acc + agg * inv_ref[:, t:t + 1]
        out_ref[...] = acc * inv_count

    return kernel


def fused_dst_aggregate(term_list, self_feat):
    """One pallas_call producing the final feature of one destination node type.

    term_list: list of (adj, transposed, h_cat, slot, inv_deg) where
      adj     : [N, M] if not transposed, else the ORIGINAL [M, N] matrix,
      h_cat   : [M, k*dim] fused relu(X W^T + b) of the source node type,
      slot    : column-block index of this term's Linear inside h_cat,
      inv_deg : [N] precomputed exact 1/rowsum for this orientation.
    self_feat: [N, dim] the node type's own features (last term of the mean).
    All N / M are already padded to multiples of 128.
    """
    n, dim = self_feat.shape
    n_terms = len(term_list)

    # --- Full VMEM working-set accounting (drives the row-tile size).
    pipelined_row_bytes = 2 * dim * 4 + n_terms * 4      # self + out + inv rows
    resident_bytes = 0
    seen_h = set()
    for adj, transposed, h_cat, slot, _ in term_list:
        m = adj.shape[0] if transposed else adj.shape[1]
        pipelined_row_bytes += m * jnp.dtype(adj.dtype).itemsize
        key = (id(h_cat), slot)
        if key not in seen_h:
            seen_h.add(key)
            resident_bytes += 2 * h_cat.shape[0] * dim * 4   # dim-wide block, x2
    tm = _pick_row_tile(n, pipelined_row_bytes, resident_bytes,
                        _WORKSET_BUDGET_BYTES)

    adj_arrays, adj_specs = [], []
    h_arrays, h_specs = [], []
    h_index_of = {}
    kernel_terms = []
    inv_cols = []

    for adj, transposed, h_cat, slot, inv in term_list:
        adj_idx = len(adj_arrays)
        adj_arrays.append(adj)
        if transposed:
            m = adj.shape[0]
            assert adj.shape[1] == n, (adj.shape, n)
            adj_specs.append(pl.BlockSpec((m, tm), lambda i: (0, i)))
        else:
            m = adj.shape[1]
            assert adj.shape[0] == n, (adj.shape, n)
            adj_specs.append(pl.BlockSpec((tm, m), lambda i: (i, 0)))
        key = (id(h_cat), slot)
        if key not in h_index_of:
            h_index_of[key] = len(h_arrays)
            h_arrays.append(h_cat)
            # DMA only the dim-wide column block this term's Linear produced.
            h_specs.append(
                pl.BlockSpec((h_cat.shape[0], dim), lambda i, s=slot: (0, s)))
        kernel_terms.append((adj_idx, h_index_of[key], transposed))
        inv_cols.append(inv.reshape(-1, 1).astype(jnp.float32))

    inv_stack = jnp.concatenate(inv_cols, axis=1)        # (n, n_terms) f32

    kernel = _make_dst_agg_kernel(tuple(kernel_terms), len(adj_arrays),
                                  len(h_arrays), n_terms)

    io_spec = pl.BlockSpec((tm, dim), lambda i: (i, 0))
    return pl.pallas_call(
        kernel,
        out_shape=jax.ShapeDtypeStruct((n, dim), jnp.float32),
        grid=(n // tm,),
        in_specs=adj_specs + h_specs
                 + [pl.BlockSpec((tm, n_terms), lambda i: (i, 0)), io_spec],
        out_specs=io_spec,
        compiler_params=pltpu.CompilerParams(
            dimension_semantics=("parallel",),
            vmem_limit_bytes=_VMEM_LIMIT_BYTES,
        ),
    )(*adj_arrays, *h_arrays, inv_stack, self_feat)


# ----------------------------------------------------------------------------
# Parameters (mirrors reset_parameters: weight ~ Normal(0, 0.1), bias = 0.1)
# ----------------------------------------------------------------------------
def init_params(key, dim):
    params = {}
    for i, name in enumerate(sorted(_LINEAR_NAMES)):
        k = jax.random.fold_in(key, i)
        w = 0.1 * jax.random.normal(k, (dim, dim), dtype=jnp.float32)  # (out, in)
        b = jnp.full((dim,), 0.1, dtype=jnp.float32)
        params[name] = (w, b)
    return params


def _concat_weights(params, names):
    wt = jnp.concatenate([params[n][0].T for n in names], axis=1)       # (dim, k*dim)
    b = jnp.concatenate([params[n][1] for n in names]).reshape(1, -1)   # (1, k*dim)
    return wt, b


# ----------------------------------------------------------------------------
# NVEncoder forward (semantics of the PyTorch module; 8 pallas_calls total)
# ----------------------------------------------------------------------------
def nv_encoder_forward(params, drug_drug, drug_chemical, drug_disease,
                       drug_sideeffect, protein_protein, protein_sequence,
                       protein_disease, drug_protein, node_feature):
    dim = node_feature[DRUG].shape[1]
    n_orig = {t: node_feature[t].shape[0] for t in _NODE_TYPES}
    n_pad = {t: _round_up(n_orig[t], 128) for t in _NODE_TYPES}
    feat = {t: _pad2d(node_feature[t].astype(jnp.float32), n_pad[t], dim)
            for t in _NODE_TYPES}

    # Stage 1: one lane-dense fused linear+relu per source node type.
    h, col_slot = {}, {}
    for src, names in _SRC_LINEARS.items():
        wt_cat, b_cat = _concat_weights(params, names)
        h[src] = fused_linear_relu(feat[src], wt_cat, b_cat)
        for j, name in enumerate(names):
            col_slot[name] = (src, j)

    # Static graph preprocessing: zero-pad adjacencies to 128-multiples and
    # precompute the exact f32 inverse degree for every orientation used.
    # The graph is constant across forward calls, so in training these fold
    # into cached constants (hoist them out of the step function).
    adjs = {
        "drug_drug": (drug_drug, DRUG, DRUG),
        "drug_chemical": (drug_chemical, DRUG, DRUG),
        "drug_disease": (drug_disease, DRUG, DISEASE),
        "drug_sideeffect": (drug_sideeffect, DRUG, SIDEEFFECT),
        "protein_protein": (protein_protein, PROTEIN, PROTEIN),
        "protein_sequence": (protein_sequence, PROTEIN, PROTEIN),
        "protein_disease": (protein_disease, PROTEIN, DISEASE),
        "drug_protein": (drug_protein, DRUG, PROTEIN),
    }
    adj_p = {k: _pad2d(a, n_pad[rt], n_pad[ct]) for k, (a, rt, ct) in adjs.items()}

    def inv_degree(a, transposed):
        # f32 accumulation: exact for 0/1 adjacencies even when stored as bf16.
        s = jnp.sum(a.astype(jnp.float32), axis=0 if transposed else 1)
        return jnp.where(s != 0.0, 1.0 / s, 0.0)

    def term(adj_name, transposed, lin_name):
        a = adj_p[adj_name]
        src, slot = col_slot[lin_name]
        return (a, transposed, h[src], slot, inv_degree(a, transposed))

    # Stage 2: one fused aggregation kernel per destination node type.
    drug_feat = fused_dst_aggregate(
        [term("drug_drug", False, "fc_DDI"),
         term("drug_chemical", False, "fc_D_ch"),
         term("drug_disease", False, "fc_D_Di"),
         term("drug_sideeffect", False, "fc_D_Side"),
         term("drug_protein", False, "fc_D_P")],
        feat[DRUG])[: n_orig[DRUG]]

    protein_feat = fused_dst_aggregate(
        [term("protein_protein", False, "fc_PPI"),
         term("protein_sequence", False, "fc_P_seq"),
         term("protein_disease", False, "fc_P_Di"),
         term("drug_protein", True, "fc_P_D")],       # drug_protein.T, no HBM transpose
        feat[PROTEIN])[: n_orig[PROTEIN]]

    disease_feat = fused_dst_aggregate(
        [term("drug_disease", True, "fc_Di_D"),       # drug_disease.T
         term("protein_disease", True, "fc_Di_P")],   # protein_disease.T
        feat[DISEASE])[: n_orig[DISEASE]]

    sideeffect_feat = fused_dst_aggregate(
        [term("drug_sideeffect", True, "fc_Side_D")],  # drug_sideeffect.T
        feat[SIDEEFFECT])[: n_orig[SIDEEFFECT]]

    return {DRUG: drug_feat, PROTEIN: protein_feat,
            SIDEEFFECT: sideeffect_feat, DISEASE: disease_feat}


# ----------------------------------------------------------------------------
# Pure-JAX reference (row_normalize(A) @ h applied as diag(1/rowsum) @ (A @ h),
# algebraically identical to the module; zero rows map to zero).
# ----------------------------------------------------------------------------
def nv_encoder_forward_ref(params, dd, dc, ddi, dse, pp, ps, pdi, dp, nf):
    def agg(adj, feat, name):
        adj = adj.astype(jnp.float32)
        w, b = params[name]
        hh = jnp.maximum(feat @ w.T + b, 0.0)
        rowsum = jnp.sum(adj, axis=1, keepdims=True)
        inv = jnp.where(rowsum != 0.0, 1.0 / rowsum, 0.0)
        return (adj @ hh) * inv

    disease_agg = [agg(ddi.T, nf[DRUG], "fc_Di_D"),
                   agg(pdi.T, nf[PROTEIN], "fc_Di_P"), nf[DISEASE]]
    drug_agg = [agg(dd, nf[DRUG], "fc_DDI"), agg(dc, nf[DRUG], "fc_D_ch"),
                agg(ddi, nf[DISEASE], "fc_D_Di"), agg(dse, nf[SIDEEFFECT], "fc_D_Side"),
                agg(dp, nf[PROTEIN], "fc_D_P"), nf[DRUG]]
    protein_agg = [agg(pp, nf[PROTEIN], "fc_PPI"), agg(ps, nf[PROTEIN], "fc_P_seq"),
                   agg(pdi, nf[DISEASE], "fc_P_Di"), agg(dp.T, nf[DRUG], "fc_P_D"),
                   nf[PROTEIN]]
    sideeffect_agg = [agg(dse.T, nf[DRUG], "fc_Side_D"), nf[SIDEEFFECT]]
    mean = lambda xs: sum(xs) / float(len(xs))
    return {DRUG: mean(drug_agg), PROTEIN: mean(protein_agg),
            SIDEEFFECT: mean(sideeffect_agg), DISEASE: mean(disease_agg)}


# ----------------------------------------------------------------------------
if __name__ == "__main__":
    key = jax.random.PRNGKey(0)
    dim = 128                                   # lane-dense embedding dim
    n_drug, n_protein, n_disease, n_side = 256, 384, 128, 128

    params = init_params(jax.random.fold_in(key, 100), dim)

    ks = jax.random.split(key, 16)

    def rand_binary(k, shape):
        return (jax.random.uniform(k, shape) > 0.7).astype(jnp.float32)

    drug_drug = rand_binary(ks[0], (n_drug, n_drug))
    drug_chemical = jax.random.uniform(ks[1], (n_drug, n_drug), dtype=jnp.float32)
    drug_disease = rand_binary(ks[2], (n_drug, n_disease))
    drug_sideeffect = rand_binary(ks[3], (n_drug, n_side))
    protein_protein = rand_binary(ks[4], (n_protein, n_protein))
    protein_sequence = jax.random.uniform(ks[5], (n_protein, n_protein), dtype=jnp.float32)
    protein_disease = rand_binary(ks[6], (n_protein, n_disease))
    drug_protein = rand_binary(ks[7], (n_drug, n_protein))

    # Force zero rows/columns to exercise the zero-degree guard in both the
    # forward and the transposed aggregation paths.
    drug_disease = drug_disease.at[0, :].set(0.0)
    drug_disease = drug_disease.at[:, 0].set(0.0)

    # Binary adjacencies live in HBM as bf16 (exact for 0/1, half the HBM
    # bytes and half the adjacency VMEM footprint); weighted matrices
    # (drug_chemical, protein_sequence) stay f32 for accuracy.
    drug_drug = drug_drug.astype(jnp.bfloat16)
    drug_disease = drug_disease.astype(jnp.bfloat16)
    drug_sideeffect = drug_sideeffect.astype(jnp.bfloat16)
    protein_protein = protein_protein.astype(jnp.bfloat16)
    protein_disease = protein_disease.astype(jnp.bfloat16)
    drug_protein = drug_protein.astype(jnp.bfloat16)

    node_feature = {
        DISEASE: jax.random.normal(ks[8], (n_disease, dim), dtype=jnp.float32),
        DRUG: jax.random.normal(ks[9], (n_drug, dim), dtype=jnp.float32),
        PROTEIN: jax.random.normal(ks[10], (n_protein, dim), dtype=jnp.float32),
        SIDEEFFECT: jax.random.normal(ks[11], (n_side, dim), dtype=jnp.float32),
    }

    fwd = jax.jit(nv_encoder_forward)
    out = fwd(params, drug_drug, drug_chemical, drug_disease, drug_sideeffect,
              protein_protein, protein_sequence, protein_disease, drug_protein,
              node_feature)
    out = jax.tree_util.tree_map(jax.block_until_ready, out)

    ref = nv_encoder_forward_ref(params, drug_drug, drug_chemical, drug_disease,
                                 drug_sideeffect, protein_protein, protein_sequence,
                                 protein_disease, drug_protein, node_feature)

    for k_ in (DRUG, PROTEIN, SIDEEFFECT, DISEASE):
        assert out[k_].shape == ref[k_].shape, (k_, out[k_].shape, ref[k_].shape)
        err = float(jnp.max(jnp.abs(out[k_] - ref[k_])))
        assert err <= 1e-4, (k_, err)

    print("KERNEL_OK")
</pallas_src>

<mosaic_0001>
module attributes {stable_mosaic.version = 11 : i64} {
  func.func @_linear_relu_kernel(%arg0: i32, %arg1: memref<128x128xf32, #tpu.memory_space<vmem>>, %arg2: memref<128x512xf32, #tpu.memory_space<vmem>>, %arg3: memref<1x512xf32, #tpu.memory_space<vmem>>, %arg4: memref<128x512xf32, #tpu.memory_space<vmem>>) attributes {dimension_semantics = [#tpu.dimension_semantics<parallel>], iteration_bounds = array<i64: 3>, scalar_prefetch = 0 : i64, scratch_operands = 0 : i64, tpu.core_type = #tpu.core_type<tc>, window_params = [{transform_indices = @transform_0, window_bounds = array<i64: 128, 128>}, {pipeline_mode = #tpu.pipeline_mode<synchronous>, transform_indices = @transform_1, window_bounds = array<i64: 128, 512>}, {pipeline_mode = #tpu.pipeline_mode<synchronous>, transform_indices = @transform_2, window_bounds = array<i64: 1, 512>}, {transform_indices = @transform_3, window_bounds = array<i64: 128, 512>}]} {
    %c0 = arith.constant 0 : index
    %c0_0 = arith.constant 0 : index
    %0 = vector.load %arg1[%c0, %c0_0] : memref<128x128xf32, #tpu.memory_space<vmem>>, vector<128x128xf32>
    %c0_1 = arith.constant 0 : index
    %c0_2 = arith.constant 0 : index
    %1 = vector.load %arg2[%c0_1, %c0_2] : memref<128x512xf32, #tpu.memory_space<vmem>>, vector<128x512xf32>
    %cst = arith.constant dense<0.000000e+00> : vector<128x512xf32>
    %2 = tpu.matmul %0, %1, %cst {dimension_numbers = #tpu.dot_dimension_numbers<[1], [0], [0], [1], [0, 0, 1, 1], [], []>} : vector<128x128xf32>, vector<128x512xf32>, vector<128x512xf32> -> vector<128x512xf32>
    %c0_3 = arith.constant 0 : index
    %c0_4 = arith.constant 0 : index
    %3 = vector.load %arg3[%c0_3, %c0_4] : memref<1x512xf32, #tpu.memory_space<vmem>>, vector<1x512xf32>
    %4 = vector.broadcast %3 : vector<1x512xf32> to vector<128x512xf32>
    %5 = arith.addf %2, %4 : vector<128x512xf32>
    %cst_5 = arith.constant 0.000000e+00 : f32
    %6 = vector.broadcast %cst_5 : f32 to vector<128x512xf32>
    %7 = arith.maximumf %5, %6 : vector<128x512xf32>
    %c0_6 = arith.constant 0 : index
    %c0_7 = arith.constant 0 : index
    %8 = vector.load %arg4[%c0_6, %c0_7] : memref<128x512xf32, #tpu.memory_space<vmem>>, vector<128x512xf32>
    tpu.vector_store %arg4[%c0_6, %c0_7], %7 {strides = array<i32>} : memref<128x512xf32, #tpu.memory_space<vmem>>, vector<128x512xf32>,
    return
  }
  func.func @transform_0(%arg0: i32) -> (i32, i32) {
    %c0_i32 = arith.constant 0 : i32
    %c0_i32_0 = arith.constant 0 : i32
    return %arg0, %c0_i32 : i32, i32
  }
  func.func @transform_1(%arg0: i32) -> (i32, i32) {
    %c0_i32 = arith.constant 0 : i32
    %c0_i32_0 = arith.constant 0 : i32
    %c0_i32_1 = arith.constant 0 : i32
    return %c0_i32, %c0_i32_0 : i32, i32
  }
  func.func @transform_2(%arg0: i32) -> (i32, i32) {
    %c0_i32 = arith.constant 0 : i32
    %c0_i32_0 = arith.constant 0 : i32
    %c0_i32_1 = arith.constant 0 : i32
    return %c0_i32, %c0_i32_0 : i32, i32
  }
  func.func @transform_3(%arg0: i32) -> (i32, i32) {
    %c0_i32 = arith.constant 0 : i32
    %c0_i32_0 = arith.constant 0 : i32
    return %arg0, %c0_i32 : i32, i32
  }
}

module attributes {stable_mosaic.version = 11 : i64} {
  func.func @_linear_relu_kernel(%arg0: i32, %arg1: memref<128x128xf32, #tpu.memory_space<vmem>>, %arg2: memref<128x640xf32, #tpu.memory_space<vmem>>, %arg3: memref<1x640xf32, #tpu.memory_space<vmem>>, %arg4: memref<128x640xf32, #tpu.memory_space<vmem>>) attributes {dimension_semantics = [#tpu.dimension_semantics<parallel>], iteration_bounds = array<i64: 2>, scalar_prefetch = 0 : i64, scratch_operands = 0 : i64, tpu.core_type = #tpu.core_type<tc>, window_params = [{transform_indices = @transform_0, window_bounds = array<i64: 128, 128>}, {pipeline_mode = #tpu.pipeline_mode<synchronous>, transform_indices = @transform_1, window_bounds = array<i64: 128, 640>}, {pipeline_mode = #tpu.pipeline_mode<synchronous>, transform_indices = @transform_2, window_bounds = array<i64: 1, 640>}, {transform_indices = @transform_3, window_bounds = array<i64: 128, 640>}]} {
    %c0 = arith.constant 0 : index
    %c0_0 = arith.constant 0 : index
    %0 = vector.load %arg1[%c0, %c0_0] : memref<128x128xf32, #tpu.memory_space<vmem>>, vector<128x128xf32>
    %c0_1 = arith.constant 0 : index
    %c0_2 = arith.constant 0 : index
    %1 = vector.load %arg2[%c0_1, %c0_2] : memref<128x640xf32, #tpu.memory_space<vmem>>, vector<128x640xf32>
    %cst = arith.constant dense<0.000000e+00> : vector<128x640xf32>
    %2 = tpu.matmul %0, %1, %cst {dimension_numbers = #tpu.dot_dimension_numbers<[1], [0], [0], [1], [0, 0, 1, 1], [], []>} : vector<128x128xf32>, vector<128x640xf32>, vector<128x640xf32> -> vector<128x640xf32>
    %c0_3 = arith.constant 0 : index
    %c0_4 = arith.constant 0 : index
    %3 = vector.load %arg3[%c0_3, %c0_4] : memref<1x640xf32, #tpu.memory_space<vmem>>, vector<1x640xf32>
    %4 = vector.broadcast %3 : vector<1x640xf32> to vector<128x640xf32>
    %5 = arith.addf %2, %4 : vector<128x640xf32>
    %cst_5 = arith.constant 0.000000e+00 : f32
    %6 = vector.broadcast %cst_5 : f32 to vector<128x640xf32>
    %7 = arith.maximumf %5, %6 : vector<128x640xf32>
    %c0_6 = arith.constant 0 : index
    %c0_7 = arith.constant 0 : index
    %8 = vector.load %arg4[%c0_6, %c0_7] : memref<128x640xf32, #tpu.memory_space<vmem>>, vector<128x640xf32>
    tpu.vector_store %arg4[%c0_6, %c0_7], %7 {strides = array<i32>} : memref<128x640xf32, #tpu.memory_space<vmem>>, vector<128x640xf32>,
    return
  }
  func.func @transform_0(%arg0: i32) -> (i32, i32) {
    %c0_i32 = arith.constant 0 : i32
    %c0_i32_0 = arith.constant 0 : i32
    return %arg0, %c0_i32 : i32, i32
  }
  func.func @transform_1(%arg0: i32) -> (i32, i32) {
    %c0_i32 = arith.constant 0 : i32
    %c0_i32_0 = arith.constant 0 : i32
    %c0_i32_1 = arith.constant 0 : i32
    return %c0_i32, %c0_i32_0 : i32, i32
  }
  func.func @transform_2(%arg0: i32) -> (i32, i32) {
    %c0_i32 = arith.constant 0 : i32
    %c0_i32_0 = arith.constant 0 : i32
    %c0_i32_1 = arith.constant 0 : i32
    return %c0_i32, %c0_i32_0 : i32, i32
  }
  func.func @transform_3(%arg0: i32) -> (i32, i32) {
    %c0_i32 = arith.constant 0 : i32
    %c0_i32_0 = arith.constant 0 : i32
    return %arg0, %c0_i32 : i32, i32
  }
}

module attributes {stable_mosaic.version = 11 : i64} {
  func.func @kernel(%arg0: i32, %arg1: memref<256x128xbf16, #tpu.memory_space<vmem>>, %arg2: memref<384x128xbf16, #tpu.memory_space<vmem>>, %arg3: memref<256x128xf32, #tpu.memory_space<vmem>>, %arg4: memref<384x128xf32, #tpu.memory_space<vmem>>, %arg5: memref<128x2xf32, #tpu.memory_space<vmem>>, %arg6: memref<128x128xf32, #tpu.memory_space<vmem>>, %arg7: memref<128x128xf32, #tpu.memory_space<vmem>>) attributes {dimension_semantics = [#tpu.dimension_semantics<parallel>], iteration_bounds = array<i64: 1>, scalar_prefetch = 0 : i64, scratch_operands = 0 : i64, tpu.core_type = #tpu.core_type<tc>, window_params = [{transform_indices = @transform_0, window_bounds = array<i64: 256, 128>}, {transform_indices = @transform_1, window_bounds = array<i64: 384, 128>}, {transform_indices = @transform_2, window_bounds = array<i64: 256, 128>}, {transform_indices = @transform_3, window_bounds = array<i64: 384, 128>}, {transform_indices = @transform_4, window_bounds = array<i64: 128, 2>}, {transform_indices = @transform_5, window_bounds = array<i64: 128, 128>}, {transform_indices = @transform_6, window_bounds = array<i64: 128, 128>}]} {
    %c0 = arith.constant 0 : index
    %c0_0 = arith.constant 0 : index
    %0 = vector.load %arg6[%c0, %c0_0] : memref<128x128xf32, #tpu.memory_space<vmem>>, vector<128x128xf32>
    %c0_1 = arith.constant 0 : index
    %c0_2 = arith.constant 0 : index
    %1 = vector.load %arg1[%c0_1, %c0_2] : memref<256x128xbf16, #tpu.memory_space<vmem>>, vector<256x128xbf16>
    %2 = arith.extf %1 : vector<256x128xbf16> to vector<256x128xf32>
    %c0_3 = arith.constant 0 : index
    %c0_4 = arith.constant 0 : index
    %3 = vector.load %arg3[%c0_3, %c0_4] : memref<256x128xf32, #tpu.memory_space<vmem>>, vector<256x128xf32>
    %cst = arith.constant dense<0.000000e+00> : vector<128x128xf32>
    %4 = tpu.matmul %2, %3, %cst {dimension_numbers = #tpu.dot_dimension_numbers<[0], [0], [1], [1], [0, 1, 1, 1], [], []>} : vector<256x128xf32>, vector<256x128xf32>, vector<128x128xf32> -> vector<128x128xf32>
    %c0_5 = arith.constant 0 : index
    %c0_6 = arith.constant 0 : index
    %5 = vector.load %arg5[%c0_5, %c0_6] : memref<128x2xf32, #tpu.memory_space<vmem>>, vector<128x1xf32>
    %6 = vector.broadcast %5 : vector<128x1xf32> to vector<128x128xf32>
    %7 = arith.mulf %4, %6 : vector<128x128xf32>
    %8 = arith.addf %0, %7 : vector<128x128xf32>
    %c0_7 = arith.constant 0 : index
    %c0_8 = arith.constant 0 : index
    %9 = vector.load %arg2[%c0_7, %c0_8] : memref<384x128xbf16, #tpu.memory_space<vmem>>, vector<384x128xbf16>
    %10 = arith.extf %9 : vector<384x128xbf16> to vector<384x128xf32>
    %c0_9 = arith.constant 0 : index
    %c0_10 = arith.constant 0 : index
    %11 = vector.load %arg4[%c0_9, %c0_10] : memref<384x128xf32, #tpu.memory_space<vmem>>, vector<384x128xf32>
    %cst_11 = arith.constant dense<0.000000e+00> : vector<128x128xf32>
    %12 = tpu.matmul %10, %11, %cst_11 {dimension_numbers = #tpu.dot_dimension_numbers<[0], [0], [1], [1], [0, 1, 1, 1], [], []>} : vector<384x128xf32>, vector<384x128xf32>, vector<128x128xf32> -> vector<128x128xf32>
    %c0_12 = arith.constant 0 : index
    %c1 = arith.constant 1 : index
    %13 = vector.load %arg5[%c0_12, %c1] : memref<128x2xf32, #tpu.memory_space<vmem>>, vector<128x1xf32>
    %14 = vector.broadcast %13 : vector<128x1xf32> to vector<128x128xf32>
    %15 = arith.mulf %12, %14 : vector<128x128xf32>
    %16 = arith.addf %8, %15 : vector<128x128xf32>
    %cst_13 = arith.constant 0.333333343 : f32
    %17 = vector.broadcast %cst_13 : f32 to vector<128x128xf32>
    %18 = arith.mulf %16, %17 : vector<128x128xf32>
    %c0_14 = arith.constant 0 : index
    %c0_15 = arith.constant 0 : index
    %19 = vector.load %arg7[%c0_14, %c0_15] : memref<128x128xf32, #tpu.memory_space<vmem>>, vector<128x128xf32>
    tpu.vector_store %arg7[%c0_14, %c0_15], %18 {strides = array<i32>} : memref<128x128xf32, #tpu.memory_space<vmem>>, vector<128x128xf32>,
    return
  }
  func.func @transform_0(%arg0: i32) -> (i32, i32) {
    %c0_i32 = arith.constant 0 : i32
    %c0_i32_0 = arith.constant 0 : i32
    return %c0_i32, %arg0 : i32, i32
  }
  func.func @transform_1(%arg0: i32) -> (i32, i32) {
    %c0_i32 = arith.constant 0 : i32
    %c0_i32_0 = arith.constant 0 : i32
    return %c0_i32, %arg0 : i32, i32
  }
  func.func @transform_2(%arg0: i32) -> (i32, i32) {
    %c0_i32 = arith.constant 0 : i32
    %c3_i32 = arith.constant 3 : i32
    %c0_i32_0 = arith.constant 0 : i32
    return %c0_i32, %c3_i32 : i32, i32
  }
  func.func @transform_3(%arg0: i32) -> (i32, i32) {
    %c0_i32 = arith.constant 0 : i32
    %c3_i32 = arith.constant 3 : i32
    %c0_i32_0 = arith.constant 0 : i32
    return %c0_i32, %c3_i32 : i32, i32
  }
  func.func @transform_4(%arg0: i32) -> (i32, i32) {
    %c0_i32 = arith.constant 0 : i32
    %c0_i32_0 = arith.constant 0 : i32
    return %arg0, %c0_i32 : i32, i32
  }
  func.func @transform_5(%arg0: i32) -> (i32, i32) {
    %c0_i32 = arith.constant 0 : i32
    %c0_i32_0 = arith.constant 0 : i32
    return %arg0, %c0_i32 : i32, i32
  }
  func.func @transform_6(%arg0: i32) -> (i32, i32) {
    %c0_i32 = arith.constant 0 : i32
    %c0_i32_0 = arith.constant 0 : i32
    return %arg0, %c0_i32 : i32, i32
  }
}

module attributes {stable_mosaic.version = 11 : i64} {
  func.func @_linear_relu_kernel(%arg0: i32, %arg1: memref<128x128xf32, #tpu.memory_space<vmem>>, %arg2: memref<128x256xf32, #tpu.memory_space<vmem>>, %arg3: memref<1x256xf32, #tpu.memory_space<vmem>>, %arg4: memref<128x256xf32, #tpu.memory_space<vmem>>) attributes {dimension_semantics = [#tpu.dimension_semantics<parallel>], iteration_bounds = array<i64: 1>, scalar_prefetch = 0 : i64, scratch_operands = 0 : i64, tpu.core_type = #tpu.core_type<tc>, window_params = [{transform_indices = @transform_0, window_bounds = array<i64: 128, 128>}, {pipeline_mode = #tpu.pipeline_mode<synchronous>, transform_indices = @transform_1, window_bounds = array<i64: 128, 256>}, {pipeline_mode = #tpu.pipeline_mode<synchronous>, transform_indices = @transform_2, window_bounds = array<i64: 1, 256>}, {transform_indices = @transform_3, window_bounds = array<i64: 128, 256>}]} {
    %c0 = arith.constant 0 : index
    %c0_0 = arith.constant 0 : index
    %0 = vector.load %arg1[%c0, %c0_0] : memref<128x128xf32, #tpu.memory_space<vmem>>, vector<128x128xf32>
    %c0_1 = arith.constant 0 : index
    %c0_2 = arith.constant 0 : index
    %1 = vector.load %arg2[%c0_1, %c0_2] : memref<128x256xf32, #tpu.memory_space<vmem>>, vector<128x256xf32>
    %cst = arith.constant dense<0.000000e+00> : vector<128x256xf32>
    %2 = tpu.matmul %0, %1, %cst {dimension_numbers = #tpu.dot_dimension_numbers<[1], [0], [0], [1], [0, 0, 1, 1], [], []>} : vector<128x128xf32>, vector<128x256xf32>, vector<128x256xf32> -> vector<128x256xf32>
    %c0_3 = arith.constant 0 : index
    %c0_4 = arith.constant 0 : index
    %3 = vector.load %arg3[%c0_3, %c0_4] : memref<1x256xf32, #tpu.memory_space<vmem>>, vector<1x256xf32>
    %4 = vector.broadcast %3 : vector<1x256xf32> to vector<128x256xf32>
    %5 = arith.addf %2, %4 : vector<128x256xf32>
    %cst_5 = arith.constant 0.000000e+00 : f32
    %6 = vector.broadcast %cst_5 : f32 to vector<128x256xf32>
    %7 = arith.maximumf %5, %6 : vector<128x256xf32>
    %c0_6 = arith.constant 0 : index
    %c0_7 = arith.constant 0 : index
    %8 = vector.load %arg4[%c0_6, %c0_7] : memref<128x256xf32, #tpu.memory_space<vmem>>, vector<128x256xf32>
    tpu.vector_store %arg4[%c0_6, %c0_7], %7 {strides = array<i32>} : memref<128x256xf32, #tpu.memory_space<vmem>>, vector<128x256xf32>,
    return
  }
  func.func @transform_0(%arg0: i32) -> (i32, i32) {
    %c0_i32 = arith.constant 0 : i32
    %c0_i32_0 = arith.constant 0 : i32
    return %arg0, %c0_i32 : i32, i32
  }
  func.func @transform_1(%arg0: i32) -> (i32, i32) {
    %c0_i32 = arith.constant 0 : i32
    %c0_i32_0 = arith.constant 0 : i32
    %c0_i32_1 = arith.constant 0 : i32
    return %c0_i32, %c0_i32_0 : i32, i32
  }
  func.func @transform_2(%arg0: i32) -> (i32, i32) {
    %c0_i32 = arith.constant 0 : i32
    %c0_i32_0 = arith.constant 0 : i32
    %c0_i32_1 = arith.constant 0 : i32
    return %c0_i32, %c0_i32_0 : i32, i32
  }
  func.func @transform_3(%arg0: i32) -> (i32, i32) {
    %c0_i32 = arith.constant 0 : i32
    %c0_i32_0 = arith.constant 0 : i32
    return %arg0, %c0_i32 : i32, i32
  }
}

module attributes {stable_mosaic.version = 11 : i64} {
  func.func @kernel(%arg0: i32, %arg1: memref<128x256xbf16, #tpu.memory_space<vmem>>, %arg2: memref<128x256xf32, #tpu.memory_space<vmem>>, %arg3: memref<128x128xbf16, #tpu.memory_space<vmem>>, %arg4: memref<128x128xbf16, #tpu.memory_space<vmem>>, %arg5: memref<128x384xbf16, #tpu.memory_space<vmem>>, %arg6: memref<256x128xf32, #tpu.memory_space<vmem>>, %arg7: memref<256x128xf32, #tpu.memory_space<vmem>>, %arg8: memref<128x128xf32, #tpu.memory_space<vmem>>, %arg9: memref<128x128xf32, #tpu.memory_space<vmem>>, %arg10: memref<384x128xf32, #tpu.memory_space<vmem>>, %arg11: memref<128x5xf32, #tpu.memory_space<vmem>>, %arg12: memref<128x128xf32, #tpu.memory_space<vmem>>, %arg13: memref<128x128xf32, #tpu.memory_space<vmem>>) attributes {dimension_semantics = [#tpu.dimension_semantics<parallel>], iteration_bounds = array<i64: 2>, scalar_prefetch = 0 : i64, scratch_operands = 0 : i64, tpu.core_type = #tpu.core_type<tc>, window_params = [{transform_indices = @transform_0, window_bounds = array<i64: 128, 256>}, {transform_indices = @transform_1, window_bounds = array<i64: 128, 256>}, {transform_indices = @transform_2, window_bounds = array<i64: 128, 128>}, {transform_indices = @transform_3, window_bounds = array<i64: 128, 128>}, {transform_indices = @transform_4, window_bounds = array<i64: 128, 384>}, {transform_indices = @transform_5, window_bounds = array<i64: 256, 128>}, {transform_indices = @transform_6, window_bounds = array<i64: 256, 128>}, {transform_indices = @transform_7, window_bounds = array<i64: 128, 128>}, {pipeline_mode = #tpu.pipeline_mode<synchronous>, transform_indices = @transform_8, window_bounds = array<i64: 128, 128>}, {transform_indices = @transform_9, window_bounds = array<i64: 384, 128>}, {transform_indices = @transform_10, window_bounds = array<i64: 128, 5>}, {transform_indices = @transform_11, window_bounds = array<i64: 128, 128>}, {transform_indices = @transform_12, window_bounds = array<i64: 128, 128>}]} {
    %c0 = arith.constant 0 : index
    %c0_0 = arith.constant 0 : index
    %0 = vector.load %arg12[%c0, %c0_0] : memref<128x128xf32, #tpu.memory_space<vmem>>, vector<128x128xf32>
    %c0_1 = arith.constant 0 : index
    %c0_2 = arith.constant 0 : index
    %1 = vector.load %arg1[%c0_1, %c0_2] : memref<128x256xbf16, #tpu.memory_space<vmem>>, vector<128x256xbf16>
    %2 = arith.extf %1 : vector<128x256xbf16> to vector<128x256xf32>
    %c0_3 = arith.constant 0 : index
    %c0_4 = arith.constant 0 : index
    %3 = vector.load %arg6[%c0_3, %c0_4] : memref<256x128xf32, #tpu.memory_space<vmem>>, vector<256x128xf32>
    %cst = arith.constant dense<0.000000e+00> : vector<128x128xf32>
    %4 = tpu.matmul %2, %3, %cst {dimension_numbers = #tpu.dot_dimension_numbers<[1], [0], [0], [1], [0, 0, 1, 1], [], []>} : vector<128x256xf32>, vector<256x128xf32>, vector<128x128xf32> -> vector<128x128xf32>
    %c0_5 = arith.constant 0 : index
    %c0_6 = arith.constant 0 : index
    %5 = vector.load %arg11[%c0_5, %c0_6] : memref<128x5xf32, #tpu.memory_space<vmem>>, vector<128x1xf32>
    %6 = vector.broadcast %5 : vector<128x1xf32> to vector<128x128xf32>
    %7 = arith.mulf %4, %6 : vector<128x128xf32>
    %8 = arith.addf %0, %7 : vector<128x128xf32>
    %c0_7 = arith.constant 0 : index
    %c0_8 = arith.constant 0 : index
    %9 = vector.load %arg2[%c0_7, %c0_8] : memref<128x256xf32, #tpu.memory_space<vmem>>, vector<128x256xf32>
    %c0_9 = arith.constant 0 : index
    %c0_10 = arith.constant 0 : index
    %10 = vector.load %arg7[%c0_9, %c0_10] : memref<256x128xf32, #tpu.memory_space<vmem>>, vector<256x128xf32>
    %cst_11 = arith.constant dense<0.000000e+00> : vector<128x128xf32>
    %11 = tpu.matmul %9, %10, %cst_11 {dimension_numbers = #tpu.dot_dimension_numbers<[1], [0], [0], [1], [0, 0, 1, 1], [], []>} : vector<128x256xf32>, vector<256x128xf32>, vector<128x128xf32> -> vector<128x128xf32>
    %c0_12 = arith.constant 0 : index
    %c1 = arith.constant 1 : index
    %12 = vector.load %arg11[%c0_12, %c1] : memref<128x5xf32, #tpu.memory_space<vmem>>, vector<128x1xf32>
    %13 = vector.broadcast %12 : vector<128x1xf32> to vector<128x128xf32>
    %14 = arith.mulf %11, %13 : vector<128x128xf32>
    %15 = arith.addf %8, %14 : vector<128x128xf32>
    %c0_13 = arith.constant 0 : index
    %c0_14 = arith.constant 0 : index
    %16 = vector.load %arg3[%c0_13, %c0_14] : memref<128x128xbf16, #tpu.memory_space<vmem>>, vector<128x128xbf16>
    %17 = arith.extf %16 : vector<128x128xbf16> to vector<128x128xf32>
    %c0_15 = arith.constant 0 : index
    %c0_16 = arith.constant 0 : index
    %18 = vector.load %arg8[%c0_15, %c0_16] : memref<128x128xf32, #tpu.memory_space<vmem>>, vector<128x128xf32>
    %cst_17 = arith.constant dense<0.000000e+00> : vector<128x128xf32>
    %19 = tpu.matmul %17, %18, %cst_17 {dimension_numbers = #tpu.dot_dimension_numbers<[1], [0], [0], [1], [0, 0, 1, 1], [], []>} : vector<128x128xf32>, vector<128x128xf32>, vector<128x128xf32> -> vector<128x128xf32>
    %c0_18 = arith.constant 0 : index
    %c2 = arith.constant 2 : index
    %20 = vector.load %arg11[%c0_18, %c2] : memref<128x5xf32, #tpu.memory_space<vmem>>, vector<128x1xf32>
    %21 = vector.broadcast %20 : vector<128x1xf32> to vector<128x128xf32>
    %22 = arith.mulf %19, %21 : vector<128x128xf32>
    %23 = arith.addf %15, %22 : vector<128x128xf32>
    %c0_19 = arith.constant 0 : index
    %c0_20 = arith.constant 0 : index
    %24 = vector.load %arg4[%c0_19, %c0_20] : memref<128x128xbf16, #tpu.memory_space<vmem>>, vector<128x128xbf16>
    %25 = arith.extf %24 : vector<128x128xbf16> to vector<128x128xf32>
    %c0_21 = arith.constant 0 : index
    %c0_22 = arith.constant 0 : index
    %26 = vector.load %arg9[%c0_21, %c0_22] : memref<128x128xf32, #tpu.memory_space<vmem>>, vector<128x128xf32>
    %cst_23 = arith.constant dense<0.000000e+00> : vector<128x128xf32>
    %27 = tpu.matmul %25, %26, %cst_23 {dimension_numbers = #tpu.dot_dimension_numbers<[1], [0], [0], [1], [0, 0, 1, 1], [], []>} : vector<128x128xf32>, vector<128x128xf32>, vector<128x128xf32> -> vector<128x128xf32>
    %c0_24 = arith.constant 0 : index
    %c3 = arith.constant 3 : index
    %28 = vector.load %arg11[%c0_24, %c3] : memref<128x5xf32, #tpu.memory_space<vmem>>, vector<128x1xf32>
    %29 = vector.broadcast %28 : vector<128x1xf32> to vector<128x128xf32>
    %30 = arith.mulf %27, %29 : vector<128x128xf32>
    %31 = arith.addf %23, %30 : vector<128x128xf32>
    %c0_25 = arith.constant 0 : index
    %c0_26 = arith.constant 0 : index
    %32 = vector.load %arg5[%c0_25, %c0_26] : memref<128x384xbf16, #tpu.memory_space<vmem>>, vector<128x384xbf16>
    %33 = arith.extf %32 : vector<128x384xbf16> to vector<128x384xf32>
    %c0_27 = arith.constant 0 : index
    %c0_28 = arith.constant 0 : index
    %34 = vector.load %arg10[%c0_27, %c0_28] : memref<384x128xf32, #tpu.memory_space<vmem>>, vector<384x128xf32>
    %cst_29 = arith.constant dense<0.000000e+00> : vector<128x128xf32>
    %35 = tpu.matmul %33, %34, %cst_29 {dimension_numbers = #tpu.dot_dimension_numbers<[1], [0], [0], [1], [0, 0, 1, 1], [], []>} : vector<128x384xf32>, vector<384x128xf32>, vector<128x128xf32> -> vector<128x128xf32>
    %c0_30 = arith.constant 0 : index
    %c4 = arith.constant 4 : index
    %36 = vector.load %arg11[%c0_30, %c4] : memref<128x5xf32, #tpu.memory_space<vmem>>, vector<128x1xf32>
    %37 = vector.broadcast %36 : vector<128x1xf32> to vector<128x128xf32>
    %38 = arith.mulf %35, %37 : vector<128x128xf32>
    %39 = arith.addf %31, %38 : vector<128x128xf32>
    %cst_31 = arith.constant 0.166666672 : f32
    %40 = vector.broadcast %cst_31 : f32 to vector<128x128xf32>
    %41 = arith.mulf %39, %40 : vector<128x128xf32>
    %c0_32 = arith.constant 0 : index
    %c0_33 = arith.constant 0 : index
    %42 = vector.load %arg13[%c0_32, %c0_33] : memref<128x128xf32, #tpu.memory_space<vmem>>, vector<128x128xf32>
    tpu.vector_store %arg13[%c0_32, %c0_33], %41 {strides = array<i32>} : memref<128x128xf32, #tpu.memory_space<vmem>>, vector<128x128xf32>,
    return
  }
  func.func @transform_0(%arg0: i32) -> (i32, i32) {
    %c0_i32 = arith.constant 0 : i32
    %c0_i32_0 = arith.constant 0 : i32
    return %arg0, %c0_i32 : i32, i32
  }
  func.func @transform_1(%arg0: i32) -> (i32, i32) {
    %c0_i32 = arith.constant 0 : i32
    %c0_i32_0 = arith.constant 0 : i32
    return %arg0, %c0_i32 : i32, i32
  }
  func.func @transform_2(%arg0: i32) -> (i32, i32) {
    %c0_i32 = arith.constant 0 : i32
    %c0_i32_0 = arith.constant 0 : i32
    return %arg0, %c0_i32 : i32, i32
  }
  func.func @transform_3(%arg0: i32) -> (i32, i32) {
    %c0_i32 = arith.constant 0 : i32
    %c0_i32_0 = arith.constant 0 : i32
    return %arg0, %c0_i32 : i32, i32
  }
  func.func @transform_4(%arg0: i32) -> (i32, i32) {
    %c0_i32 = arith.constant 0 : i32
    %c0_i32_0 = arith.constant 0 : i32
    return %arg0, %c0_i32 : i32, i32
  }
  func.func @transform_5(%arg0: i32) -> (i32, i32) {
    %c0_i32 = arith.constant 0 : i32
    %c0_i32_0 = arith.constant 0 : i32
    %c0_i32_1 = arith.constant 0 : i32
    return %c0_i32, %c0_i32_0 : i32, i32
  }
  func.func @transform_6(%arg0: i32) -> (i32, i32) {
    %c0_i32 = arith.constant 0 : i32
    %c1_i32 = arith.constant 1 : i32
    %c0_i32_0 = arith.constant 0 : i32
    return %c0_i32, %c1_i32 : i32, i32
  }
  func.func @transform_7(%arg0: i32) -> (i32, i32) {
    %c0_i32 = arith.constant 0 : i32
    %c0_i32_0 = arith.constant 0 : i32
    %c0_i32_1 = arith.constant 0 : i32
    return %c0_i32, %c0_i32_0 : i32, i32
  }
  func.func @transform_8(%arg0: i32) -> (i32, i32) {
    %c0_i32 = arith.constant 0 : i32
    %c0_i32_0 = arith.constant 0 : i32
    %c0_i32_1 = arith.constant 0 : i32
    return %c0_i32, %c0_i32_0 : i32, i32
  }
  func.func @transform_9(%arg0: i32) -> (i32, i32) {
    %c0_i32 = arith.constant 0 : i32
    %c0_i32_0 = arith.constant 0 : i32
    %c0_i32_1 = arith.constant 0 : i32
    return %c0_i32, %c0_i32_0 : i32, i32
  }
  func.func @transform_10(%arg0: i32) -> (i32, i32) {
    %c0_i32 = arith.constant 0 : i32
    %c0_i32_0 = arith.constant 0 : i32
    return %arg0, %c0_i32 : i32, i32
  }
  func.func @transform_11(%arg0: i32) -> (i32, i32) {
    %c0_i32 = arith.constant 0 : i32
    %c0_i32_0 = arith.constant 0 : i32
    return %arg0, %c0_i32 : i32, i32
  }
  func.func @transform_12(%arg0: i32) -> (i32, i32) {
    %c0_i32 = arith.constant 0 : i32
    %c0_i32_0 = arith.constant 0 : i32
    return %arg0, %c0_i32 : i32, i32
  }
}

module attributes {stable_mosaic.version = 11 : i64} {
  func.func @_linear_relu_kernel(%arg0: i32, %arg1: memref<128x128xf32, #tpu.memory_space<vmem>>, %arg2: memref<128x128xf32, #tpu.memory_space<vmem>>, %arg3: memref<1x128xf32, #tpu.memory_space<vmem>>, %arg4: memref<128x128xf32, #tpu.memory_space<vmem>>) attributes {dimension_semantics = [#tpu.dimension_semantics<parallel>], iteration_bounds = array<i64: 1>, scalar_prefetch = 0 : i64, scratch_operands = 0 : i64, tpu.core_type = #tpu.core_type<tc>, window_params = [{transform_indices = @transform_0, window_bounds = array<i64: 128, 128>}, {pipeline_mode = #tpu.pipeline_mode<synchronous>, transform_indices = @transform_1, window_bounds = array<i64: 128, 128>}, {pipeline_mode = #tpu.pipeline_mode<synchronous>, transform_indices = @transform_2, window_bounds = array<i64: 1, 128>}, {transform_indices = @transform_3, window_bounds = array<i64: 128, 128>}]} {
    %c0 = arith.constant 0 : index
    %c0_0 = arith.constant 0 : index
    %0 = vector.load %arg1[%c0, %c0_0] : memref<128x128xf32, #tpu.memory_space<vmem>>, vector<128x128xf32>
    %c0_1 = arith.constant 0 : index
    %c0_2 = arith.constant 0 : index
    %1 = vector.load %arg2[%c0_1, %c0_2] : memref<128x128xf32, #tpu.memory_space<vmem>>, vector<128x128xf32>
    %cst = arith.constant dense<0.000000e+00> : vector<128x128xf32>
    %2 = tpu.matmul %0, %1, %cst {dimension_numbers = #tpu.dot_dimension_numbers<[1], [0], [0], [1], [0, 0, 1, 1], [], []>} : vector<128x128xf32>, vector<128x128xf32>, vector<128x128xf32> -> vector<128x128xf32>
    %c0_3 = arith.constant 0 : index
    %c0_4 = arith.constant 0 : index
    %3 = vector.load %arg3[%c0_3, %c0_4] : memref<1x128xf32, #tpu.memory_space<vmem>>, vector<1x128xf32>
    %4 = vector.broadcast %3 : vector<1x128xf32> to vector<128x128xf32>
    %5 = arith.addf %2, %4 : vector<128x128xf32>
    %cst_5 = arith.constant 0.000000e+00 : f32
    %6 = vector.broadcast %cst_5 : f32 to vector<128x128xf32>
    %7 = arith.maximumf %5, %6 : vector<128x128xf32>
    %c0_6 = arith.constant 0 : index
    %c0_7 = arith.constant 0 : index
    %8 = vector.load %arg4[%c0_6, %c0_7] : memref<128x128xf32, #tpu.memory_space<vmem>>, vector<128x128xf32>
    tpu.vector_store %arg4[%c0_6, %c0_7], %7 {strides = array<i32>} : memref<128x128xf32, #tpu.memory_space<vmem>>, vector<128x128xf32>,
    return
  }
  func.func @transform_0(%arg0: i32) -> (i32, i32) {
    %c0_i32 = arith.constant 0 : i32
    %c0_i32_0 = arith.constant 0 : i32
    return %arg0, %c0_i32 : i32, i32
  }
  func.func @transform_1(%arg0: i32) -> (i32, i32) {
    %c0_i32 = arith.constant 0 : i32
    %c0_i32_0 = arith.constant 0 : i32
    %c0_i32_1 = arith.constant 0 : i32
    return %c0_i32, %c0_i32_0 : i32, i32
  }
  func.func @transform_2(%arg0: i32) -> (i32, i32) {
    %c0_i32 = arith.constant 0 : i32
    %c0_i32_0 = arith.constant 0 : i32
    %c0_i32_1 = arith.constant 0 : i32
    return %c0_i32, %c0_i32_0 : i32, i32
  }
  func.func @transform_3(%arg0: i32) -> (i32, i32) {
    %c0_i32 = arith.constant 0 : i32
    %c0_i32_0 = arith.constant 0 : i32
    return %arg0, %c0_i32 : i32, i32
  }
}

module attributes {stable_mosaic.version = 11 : i64} {
  func.func @kernel(%arg0: i32, %arg1: memref<128x384xbf16, #tpu.memory_space<vmem>>, %arg2: memref<128x384xf32, #tpu.memory_space<vmem>>, %arg3: memref<128x128xbf16, #tpu.memory_space<vmem>>, %arg4: memref<256x128xbf16, #tpu.memory_space<vmem>>, %arg5: memref<384x128xf32, #tpu.memory_space<vmem>>, %arg6: memref<384x128xf32, #tpu.memory_space<vmem>>, %arg7: memref<128x128xf32, #tpu.memory_space<vmem>>, %arg8: memref<256x128xf32, #tpu.memory_space<vmem>>, %arg9: memref<128x4xf32, #tpu.memory_space<vmem>>, %arg10: memref<128x128xf32, #tpu.memory_space<vmem>>, %arg11: memref<128x128xf32, #tpu.memory_space<vmem>>) attributes {dimension_semantics = [#tpu.dimension_semantics<parallel>], iteration_bounds = array<i64: 3>, scalar_prefetch = 0 : i64, scratch_operands = 0 : i64, tpu.core_type = #tpu.core_type<tc>, window_params = [{transform_indices = @transform_0, window_bounds = array<i64: 128, 384>}, {transform_indices = @transform_1, window_bounds = array<i64: 128, 384>}, {transform_indices = @transform_2, window_bounds = array<i64: 128, 128>}, {transform_indices = @transform_3, window_bounds = array<i64: 256, 128>}, {transform_indices = @transform_4, window_bounds = array<i64: 384, 128>}, {transform_indices = @transform_5, window_bounds = array<i64: 384, 128>}, {transform_indices = @transform_6, window_bounds = array<i64: 128, 128>}, {transform_indices = @transform_7, window_bounds = array<i64: 256, 128>}, {transform_indices = @transform_8, window_bounds = array<i64: 128, 4>}, {transform_indices = @transform_9, window_bounds = array<i64: 128, 128>}, {transform_indices = @transform_10, window_bounds = array<i64: 128, 128>}]} {
    %c0 = arith.constant 0 : index
    %c0_0 = arith.constant 0 : index
    %0 = vector.load %arg10[%c0, %c0_0] : memref<128x128xf32, #tpu.memory_space<vmem>>, vector<128x128xf32>
    %c0_1 = arith.constant 0 : index
    %c0_2 = arith.constant 0 : index
    %1 = vector.load %arg1[%c0_1, %c0_2] : memref<128x384xbf16, #tpu.memory_space<vmem>>, vector<128x384xbf16>
    %2 = arith.extf %1 : vector<128x384xbf16> to vector<128x384xf32>
    %c0_3 = arith.constant 0 : index
    %c0_4 = arith.constant 0 : index
    %3 = vector.load %arg5[%c0_3, %c0_4] : memref<384x128xf32, #tpu.memory_space<vmem>>, vector<384x128xf32>
    %cst = arith.constant dense<0.000000e+00> : vector<128x128xf32>
    %4 = tpu.matmul %2, %3, %cst {dimension_numbers = #tpu.dot_dimension_numbers<[1], [0], [0], [1], [0, 0, 1, 1], [], []>} : vector<128x384xf32>, vector<384x128xf32>, vector<128x128xf32> -> vector<128x128xf32>
    %c0_5 = arith.constant 0 : index
    %c0_6 = arith.constant 0 : index
    %5 = vector.load %arg9[%c0_5, %c0_6] : memref<128x4xf32, #tpu.memory_space<vmem>>, vector<128x1xf32>
    %6 = vector.broadcast %5 : vector<128x1xf32> to vector<128x128xf32>
    %7 = arith.mulf %4, %6 : vector<128x128xf32>
    %8 = arith.addf %0, %7 : vector<128x128xf32>
    %c0_7 = arith.constant 0 : index
    %c0_8 = arith.constant 0 : index
    %9 = vector.load %arg2[%c0_7, %c0_8] : memref<128x384xf32, #tpu.memory_space<vmem>>, vector<128x384xf32>
    %c0_9 = arith.constant 0 : index
    %c0_10 = arith.constant 0 : index
    %10 = vector.load %arg6[%c0_9, %c0_10] : memref<384x128xf32, #tpu.memory_space<vmem>>, vector<384x128xf32>
    %cst_11 = arith.constant dense<0.000000e+00> : vector<128x128xf32>
    %11 = tpu.matmul %9, %10, %cst_11 {dimension_numbers = #tpu.dot_dimension_numbers<[1], [0], [0], [1], [0, 0, 1, 1], [], []>} : vector<128x384xf32>, vector<384x128xf32>, vector<128x128xf32> -> vector<128x128xf32>
    %c0_12 = arith.constant 0 : index
    %c1 = arith.constant 1 : index
    %12 = vector.load %arg9[%c0_12, %c1] : memref<128x4xf32, #tpu.memory_space<vmem>>, vector<128x1xf32>
    %13 = vector.broadcast %12 : vector<128x1xf32> to vector<128x128xf32>
    %14 = arith.mulf %11, %13 : vector<128x128xf32>
    %15 = arith.addf %8, %14 : vector<128x128xf32>
    %c0_13 = arith.constant 0 : index
    %c0_14 = arith.constant 0 : index
    %16 = vector.load %arg3[%c0_13, %c0_14] : memref<128x128xbf16, #tpu.memory_space<vmem>>, vector<128x128xbf16>
    %17 = arith.extf %16 : vector<128x128xbf16> to vector<128x128xf32>
    %c0_15 = arith.constant 0 : index
    %c0_16 = arith.constant 0 : index
    %18 = vector.load %arg7[%c0_15, %c0_16] : memref<128x128xf32, #tpu.memory_space<vmem>>, vector<128x128xf32>
    %cst_17 = arith.constant dense<0.000000e+00> : vector<128x128xf32>
    %19 = tpu.matmul %17, %18, %cst_17 {dimension_numbers = #tpu.dot_dimension_numbers<[1], [0], [0], [1], [0, 0, 1, 1], [], []>} : vector<128x128xf32>, vector<128x128xf32>, vector<128x128xf32> -> vector<128x128xf32>
    %c0_18 = arith.constant 0 : index
    %c2 = arith.constant 2 : index
    %20 = vector.load %arg9[%c0_18, %c2] : memref<128x4xf32, #tpu.memory_space<vmem>>, vector<128x1xf32>
    %21 = vector.broadcast %20 : vector<128x1xf32> to vector<128x128xf32>
    %22 = arith.mulf %19, %21 : vector<128x128xf32>
    %23 = arith.addf %15, %22 : vector<128x128xf32>
    %c0_19 = arith.constant 0 : index
    %c0_20 = arith.constant 0 : index
    %24 = vector.load %arg4[%c0_19, %c0_20] : memref<256x128xbf16, #tpu.memory_space<vmem>>, vector<256x128xbf16>
    %25 = arith.extf %24 : vector<256x128xbf16> to vector<256x128xf32>
    %c0_21 = arith.constant 0 : index
    %c0_22 = arith.constant 0 : index
    %26 = vector.load %arg8[%c0_21, %c0_22] : memref<256x128xf32, #tpu.memory_space<vmem>>, vector<256x128xf32>
    %cst_23 = arith.constant dense<0.000000e+00> : vector<128x128xf32>
    %27 = tpu.matmul %25, %26, %cst_23 {dimension_numbers = #tpu.dot_dimension_numbers<[0], [0], [1], [1], [0, 1, 1, 1], [], []>} : vector<256x128xf32>, vector<256x128xf32>, vector<128x128xf32> -> vector<128x128xf32>
    %c0_24 = arith.constant 0 : index
    %c3 = arith.constant 3 : index
    %28 = vector.load %arg9[%c0_24, %c3] : memref<128x4xf32, #tpu.memory_space<vmem>>, vector<128x1xf32>
    %29 = vector.broadcast %28 : vector<128x1xf32> to vector<128x128xf32>
    %30 = arith.mulf %27, %29 : vector<128x128xf32>
    %31 = arith.addf %23, %30 : vector<128x128xf32>
    %cst_25 = arith.constant 2.000000e-01 : f32
    %32 = vector.broadcast %cst_25 : f32 to vector<128x128xf32>
    %33 = arith.mulf %31, %32 : vector<128x128xf32>
    %c0_26 = arith.constant 0 : index
    %c0_27 = arith.constant 0 : index
    %34 = vector.load %arg11[%c0_26, %c0_27] : memref<128x128xf32, #tpu.memory_space<vmem>>, vector<128x128xf32>
    tpu.vector_store %arg11[%c0_26, %c0_27], %33 {strides = array<i32>} : memref<128x128xf32, #tpu.memory_space<vmem>>, vector<128x128xf32>,
    return
  }
  func.func @transform_0(%arg0: i32) -> (i32, i32) {
    %c0_i32 = arith.constant 0 : i32
    %c0_i32_0 = arith.constant 0 : i32
    return %arg0, %c0_i32 : i32, i32
  }
  func.func @transform_1(%arg0: i32) -> (i32, i32) {
    %c0_i32 = arith.constant 0 : i32
    %c0_i32_0 = arith.constant 0 : i32
    return %arg0, %c0_i32 : i32, i32
  }
  func.func @transform_2(%arg0: i32) -> (i32, i32) {
    %c0_i32 = arith.constant 0 : i32
    %c0_i32_0 = arith.constant 0 : i32
    return %arg0, %c0_i32 : i32, i32
  }
  func.func @transform_3(%arg0: i32) -> (i32, i32) {
    %c0_i32 = arith.constant 0 : i32
    %c0_i32_0 = arith.constant 0 : i32
    return %c0_i32, %arg0 : i32, i32
  }
  func.func @transform_4(%arg0: i32) -> (i32, i32) {
    %c0_i32 = arith.constant 0 : i32
    %c1_i32 = arith.constant 1 : i32
    %c0_i32_0 = arith.constant 0 : i32
    return %c0_i32, %c1_i32 : i32, i32
  }
  func.func @transform_5(%arg0: i32) -> (i32, i32) {
    %c0_i32 = arith.constant 0 : i32
    %c2_i32 = arith.constant 2 : i32
    %c0_i32_0 = arith.constant 0 : i32
    return %c0_i32, %c2_i32 : i32, i32
  }
  func.func @transform_6(%arg0: i32) -> (i32, i32) {
    %c0_i32 = arith.constant 0 : i32
    %c1_i32 = arith.constant 1 : i32
    %c0_i32_0 = arith.constant 0 : i32
    return %c0_i32, %c1_i32 : i32, i32
  }
  func.func @transform_7(%arg0: i32) -> (i32, i32) {
    %c0_i32 = arith.constant 0 : i32
    %c2_i32 = arith.constant 2 : i32
    %c0_i32_0 = arith.constant 0 : i32
    return %c0_i32, %c2_i32 : i32, i32
  }
  func.func @transform_8(%arg0: i32) -> (i32, i32) {
    %c0_i32 = arith.constant 0 : i32
    %c0_i32_0 = arith.constant 0 : i32
    return %arg0, %c0_i32 : i32, i32
  }
  func.func @transform_9(%arg0: i32) -> (i32, i32) {
    %c0_i32 = arith.constant 0 : i32
    %c0_i32_0 = arith.constant 0 : i32
    return %arg0, %c0_i32 : i32, i32
  }
  func.func @transform_10(%arg0: i32) -> (i32, i32) {
    %c0_i32 = arith.constant 0 : i32
    %c0_i32_0 = arith.constant 0 : i32
    return %arg0, %c0_i32 : i32, i32
  }
}

module attributes {stable_mosaic.version = 11 : i64} {
  func.func @kernel(%arg0: i32, %arg1: memref<256x128xbf16, #tpu.memory_space<vmem>>, %arg2: memref<256x128xf32, #tpu.memory_space<vmem>>, %arg3: memref<128x1xf32, #tpu.memory_space<vmem>>, %arg4: memref<128x128xf32, #tpu.memory_space<vmem>>, %arg5: memref<128x128xf32, #tpu.memory_space<vmem>>) attributes {dimension_semantics = [#tpu.dimension_semantics<parallel>], iteration_bounds = array<i64: 1>, scalar_prefetch = 0 : i64, scratch_operands = 0 : i64, tpu.core_type = #tpu.core_type<tc>, window_params = [{transform_indices = @transform_0, window_bounds = array<i64: 256, 128>}, {transform_indices = @transform_1, window_bounds = array<i64: 256, 128>}, {transform_indices = @transform_2, window_bounds = array<i64: 128, 1>}, {transform_indices = @transform_3, window_bounds = array<i64: 128, 128>}, {transform_indices = @transform_4, window_bounds = array<i64: 128, 128>}]} {
    %c0 = arith.constant 0 : index
    %c0_0 = arith.constant 0 : index
    %0 = vector.load %arg4[%c0, %c0_0] : memref<128x128xf32, #tpu.memory_space<vmem>>, vector<128x128xf32>
    %c0_1 = arith.constant 0 : index
    %c0_2 = arith.constant 0 : index
    %1 = vector.load %arg1[%c0_1, %c0_2] : memref<256x128xbf16, #tpu.memory_space<vmem>>, vector<256x128xbf16>
    %2 = arith.extf %1 : vector<256x128xbf16> to vector<256x128xf32>
    %c0_3 = arith.constant 0 : index
    %c0_4 = arith.constant 0 : index
    %3 = vector.load %arg2[%c0_3, %c0_4] : memref<256x128xf32, #tpu.memory_space<vmem>>, vector<256x128xf32>
    %cst = arith.constant dense<0.000000e+00> : vector<128x128xf32>
    %4 = tpu.matmul %2, %3, %cst {dimension_numbers = #tpu.dot_dimension_numbers<[0], [0], [1], [1], [0, 1, 1, 1], [], []>} : vector<256x128xf32>, vector<256x128xf32>, vector<128x128xf32> -> vector<128x128xf32>
    %c0_5 = arith.constant 0 : index
    %c0_6 = arith.constant 0 : index
    %5 = vector.load %arg3[%c0_5, %c0_6] : memref<128x1xf32, #tpu.memory_space<vmem>>, vector<128x1xf32>
    %6 = vector.broadcast %5 : vector<128x1xf32> to vector<128x128xf32>
    %7 = arith.mulf %4, %6 : vector<128x128xf32>
    %8 = arith.addf %0, %7 : vector<128x128xf32>
    %cst_7 = arith.constant 5.000000e-01 : f32
    %9 = vector.broadcast %cst_7 : f32 to vector<128x128xf32>
    %10 = arith.mulf %8, %9 : vector<128x128xf32>
    %c0_8 = arith.constant 0 : index
    %c0_9 = arith.constant 0 : index
    %11 = vector.load %arg5[%c0_8, %c0_9] : memref<128x128xf32, #tpu.memory_space<vmem>>, vector<128x128xf32>
    tpu.vector_store %arg5[%c0_8, %c0_9], %10 {strides = array<i32>} : memref<128x128xf32, #tpu.memory_space<vmem>>, vector<128x128xf32>,
    return
  }
  func.func @transform_0(%arg0: i32) -> (i32, i32) {
    %c0_i32 = arith.constant 0 : i32
    %c0_i32_0 = arith.constant 0 : i32
    return %c0_i32, %arg0 : i32, i32
  }
  func.func @transform_1(%arg0: i32) -> (i32, i32) {
    %c0_i32 = arith.constant 0 : i32
    %c4_i32 = arith.constant 4 : i32
    %c0_i32_0 = arith.constant 0 : i32
    return %c0_i32, %c4_i32 : i32, i32
  }
  func.func @transform_2(%arg0: i32) -> (i32, i32) {
    %c0_i32 = arith.constant 0 : i32
    %c0_i32_0 = arith.constant 0 : i32
    return %arg0, %c0_i32 : i32, i32
  }
  func.func @transform_3(%arg0: i32) -> (i32, i32) {
    %c0_i32 = arith.constant 0 : i32
    %c0_i32_0 = arith.constant 0 : i32
    return %arg0, %c0_i32 : i32, i32
  }
  func.func @transform_4(%arg0: i32) -> (i32, i32) {
    %c0_i32 = arith.constant 0 : i32
    %c0_i32_0 = arith.constant 0 : i32
    return %arg0, %c0_i32 : i32, i32
  }
}

</mosaic_0001>

<bundles_post_ra>
// kernel: custom-call
= control target key start
LH: loop header
LB: loop body
LE: loop exit
PB: predicated region body
PF: predicated region fallthrough
CT: control target
= control target key end

     0   :  { %s6_s0 = inlined_call_operand.vmem [shape: f32[640], index: 0, kind: output, shape index: {}]  }

// kernel: nv_encoder_forward.9
= control target key start
LH: loop header
LB: loop body
LE: loop exit
PB: predicated region body
PF: predicated region fallthrough
CT: control target
= control target key end

     0   :  { %s837_s12 = smov 0   ;;  %s1249_s0 = inlined_call_operand.vmem [shape: f32[384,128], index: 0, kind: input, shape index: {}]   ;;  %s1250_s1 = inlined_call_operand.vmem [shape: f32[128,512], index: 1, kind: input, shape index: {}]   ;;  %s1251_s2 = inlined_call_operand.vmem [shape: f32[1,512], index: 2, kind: input, shape index: {}]   ;;  %s1252_s3 = inlined_call_operand.vmem [shape: f32[384,512], index: 3, kind: output, shape index: {}]  }
   0x1 LB: > { %s786_s13 = sadd.s32 4294967295, %s814_s12   ;;  %p790_p0 = scmp.ge.s32.totalorder %s814_s12, 1  ;;  %s814_s12 = sphi %s837_s12, %s13_s12  }
   0x2   : > { %p138_p1 = scmp.lt.s32.totalorder %s814_s12, 4 }
   0x4   : > { %p139_p2 = pnand %p790_p0, %p138_p1 }
   0x5   : > { %s949_s5 = sshll.u32 (!%p139_p2), %s786_s13, 4 }
   0x6   : > { %142 = sbr.rel (%p139_p2) target bundleno = 305 (0x131), region = 32  ;;  %p164_p3 = scmp.lt.s32.totalorder (!%p139_p2), %s949_s5, 47 }
   0xb   : > { %v253_v0 = vld [vmem:[%s1250_s1 + $0x1e8] sm:$0xff]  ;;  %v255_v1 = vld [vmem:[%s1250_s1 + $0x1f8] sm:$0xff]  ;;  %v252_v2 = vld [vmem:[%s1250_s1 + $0x1e0] sm:$0xff]  ;;  %s1254_s5 = smov (!%p164_p3, %s949_s5), 47 }
   0xc   : > { %278 = vmatprep.subr.mxu0 %v253_v0  ;;  %439 = vmatprep.subr.mxu1 %v255_v1  ;;  %v254_v3 = vld [vmem:[%s1250_s1 + $0x1f0] sm:$0xff]  ;;  %v249_v4 = vld [vmem:[%s1250_s1 + $0x1c8] sm:$0xff]  ;;  %v251_v5 = vld [vmem:[%s1250_s1 + $0x1d8] sm:$0xff]  ;;  %s792_s26 = sshll.u32 %s1254_s5, 3  ;;  %v816_v1 = vmov 0.0   ;;  %s798_s23 = sshll.u32 %s1254_s5, 5 }
   0xd   : > { %279 = vmatpush1.msra.mxu0 %v252_v2  ;;  %440 = vmatpush1.msra.mxu1 %v254_v3  ;;  %v248_v6 = vld [vmem:[%s1250_s1 + $0x1c0] sm:$0xff]  ;;  %v250_v7 = vld [vmem:[%s1250_s1 + $0x1d0] sm:$0xff]  ;;  %v245_v8 = vld [vmem:[%s1250_s1 + $0x1a8] sm:$0xff]  ;;  %s1045_s16 = scalar_lea.vmem %s1249_s0, %s792_s26  ;;  %s1118_s26 = scalar_lea.vmem %s1252_s3, %s798_s23 }
   0xe   : > { %280 = vmatprep.subr.mxu0 %v249_v4  ;;  %441 = vmatprep.subr.mxu1 %v251_v5  ;;  %v247_v9 = vld [vmem:[%s1250_s1 + $0x1b8] sm:$0xff]  ;;  %v244_v10 = vld [vmem:[%s1250_s1 + $0x1a0] sm:$0xff]  ;;  %v246_v11 = vld [vmem:[%s1250_s1 + $0x1b0] sm:$0xff] }
   0xf   : > { %281 = vmatpush1.msra.mxu0 %v248_v6  ;;  %442 = vmatpush1.msra.mxu1 %v250_v7  ;;  %v241_v12 = vld [vmem:[%s1250_s1 + $0x188] sm:$0xff]  ;;  %v243_v13 = vld [vmem:[%s1250_s1 + $0x198] sm:$0xff]  ;;  %v240_v14 = vld [vmem:[%s1250_s1 + $0x180] sm:$0xff] }
  0x10   : > { %282 = vmatprep.subr.mxu0 %v245_v8  ;;  %443 = vmatprep.subr.mxu1 %v247_v9  ;;  %v242_v15 = vld [vmem:[%s1250_s1 + $0x190] sm:$0xff]  ;;  %v237_v16 = vld [vmem:[%s1250_s1 + $0x168] sm:$0xff]  ;;  %v239_v17 = vld [vmem:[%s1250_s1 + $0x178] sm:$0xff] }
  0x11   : > { %283 = vmatpush1.msra.mxu0 %v244_v10  ;;  %444 = vmatpush1.msra.mxu1 %v246_v11  ;;  %v236_v18 = vld [vmem:[%s1250_s1 + $0x160] sm:$0xff]  ;;  %v238_v19 = vld [vmem:[%s1250_s1 + $0x170] sm:$0xff]  ;;  %v233_v20 = vld [vmem:[%s1250_s1 + $0x148] sm:$0xff] }
  0x12   : > { %284 = vmatprep.subr.mxu0 %v241_v12  ;;  %445 = vmatprep.subr.mxu1 %v243_v13  ;;  %v235_v21 = vld [vmem:[%s1250_s1 + $0x158] sm:$0xff]  ;;  %v232_v22 = vld [vmem:[%s1250_s1 + $0x140] sm:$0xff]  ;;  %v234_v23 = vld [vmem:[%s1250_s1 + $0x150] sm:$0xff] }
  0x13   : > { %285 = vmatpush1.msra.mxu0 %v240_v14  ;;  %446 = vmatpush1.msra.mxu1 %v242_v15  ;;  %v229_v24 = vld [vmem:[%s1250_s1 + $0x128] sm:$0xff]  ;;  %v231_v25 = vld [vmem:[%s1250_s1 + $0x138] sm:$0xff]  ;;  %v228_v26 = vld [vmem:[%s1250_s1 + $0x120] sm:$0xff] }
  0x14   : > { %286 = vmatprep.subr.mxu0 %v237_v16  ;;  %447 = vmatprep.subr.mxu1 %v239_v17  ;;  %v230_v27 = vld [vmem:[%s1250_s1 + $0x130] sm:$0xff]  ;;  %v225_v28 = vld [vmem:[%s1250_s1 + $0x108] sm:$0xff]  ;;  %v227_v29 = vld [vmem:[%s1250_s1 + $0x118] sm:$0xff]  ;;  %v258_v17 = vlaneseq }
  0x15   : > { %287 = vmatpush1.msra.mxu0 %v236_v18  ;;  %448 = vmatpush1.msra.mxu1 %v238_v19  ;;  %v224_v30 = vld [vmem:[%s1250_s1 + $0x100] sm:$0xff]  ;;  %v226_v31 = vld [vmem:[%s1250_s1 + $0x110] sm:$0xff]  ;;  %v221_v32 = vld [vmem:[%s1250_s1 + $0xe8] sm:$0xff] }
  0x16   : > { %288 = vmatprep.subr.mxu0 %v233_v20  ;;  %449 = vmatprep.subr.mxu1 %v235_v21  ;;  %v223_v33 = vld [vmem:[%s1250_s1 + $0xf8] sm:$0xff]  ;;  %v220_v34 = vld [vmem:[%s1250_s1 + $0xe0] sm:$0xff]  ;;  %v222_v35 = vld [vmem:[%s1250_s1 + $0xf0] sm:$0xff]  ;;  %v259_v18 = vshrl.u32 %v258_v17, 7 }
  0x17   : > { %289 = vmatpush1.msra.mxu0 %v232_v22  ;;  %450 = vmatpush1.msra.mxu1 %v234_v23  ;;  %v217_v36 = vld [vmem:[%s1250_s1 + $0xc8] sm:$0xff]  ;;  %v219_v37 = vld [vmem:[%s1250_s1 + $0xd8] sm:$0xff]  ;;  %v216_v38 = vld [vmem:[%s1250_s1 + $0xc0] sm:$0xff] }
  0x18   : > { %290 = vmatprep.subr.mxu0 %v229_v24  ;;  %451 = vmatprep.subr.mxu1 %v231_v25  ;;  %v218_v39 = vld [vmem:[%s1250_s1 + $0xd0] sm:$0xff]  ;;  %v213_v40 = vld [vmem:[%s1250_s1 + $0xa8] sm:$0xff]  ;;  %v215_v41 = vld [vmem:[%s1250_s1 + $0xb8] sm:$0xff]  ;;  %v260_v19 = vsub.s32 0, %v259_v18  ;;  %v268_v20 = vsub.s32 2, %v259_v18  ;;  %v264_v22 = vsub.s32 1, %v259_v18 }
  0x19   : > { %291 = vmatpush1.msra.mxu0 %v228_v26  ;;  %452 = vmatpush1.msra.mxu1 %v230_v27  ;;  %v212_v42 = vld [vmem:[%s1250_s1 + $0xa0] sm:$0xff]  ;;  %v214_v43 = vld [vmem:[%s1250_s1 + $0xb0] sm:$0xff]  ;;  %v209_v44 = vld [vmem:[%s1250_s1 + $0x88] sm:$0xff]  ;;  %v272_v23 = vsub.s32 3, %v259_v18 }
  0x1a   : > { %292 = vmatprep.subr.mxu0 %v225_v28  ;;  %453 = vmatprep.subr.mxu1 %v227_v29  ;;  %v211_v45 = vld [vmem:[%s1250_s1 + $0x98] sm:$0xff]  ;;  %v208_v46 = vld [vmem:[%s1250_s1 + $0x80] sm:$0xff]  ;;  %v210_v47 = vld [vmem:[%s1250_s1 + $0x90] sm:$0xff] }
  0x1b   : > { %293 = vmatpush1.msra.mxu0 %v224_v30  ;;  %454 = vmatpush1.msra.mxu1 %v226_v31  ;;  %v205_v48 = vld [vmem:[%s1250_s1 + $0x68] sm:$0xff]  ;;  %v207_v49 = vld [vmem:[%s1250_s1 + $0x78] sm:$0xff]  ;;  %v204_v50 = vld [vmem:[%s1250_s1 + $0x60] sm:$0xff] }
  0x1c   : > { %294 = vmatprep.subr.mxu0 %v221_v32  ;;  %455 = vmatprep.subr.mxu1 %v223_v33  ;;  %v206_v51 = vld [vmem:[%s1250_s1 + $0x70] sm:$0xff]  ;;  %v201_v52 = vld [vmem:[%s1250_s1 + $0x48] sm:$0xff]  ;;  %v203_v53 = vld [vmem:[%s1250_s1 + $0x58] sm:$0xff] }
  0x1d   : > { %295 = vmatpush1.msra.mxu0 %v220_v34  ;;  %456 = vmatpush1.msra.mxu1 %v222_v35  ;;  %v200_v54 = vld [vmem:[%s1250_s1 + $0x40] sm:$0xff]  ;;  %v202_v55 = vld [vmem:[%s1250_s1 + $0x50] sm:$0xff]  ;;  %v197_v56 = vld [vmem:[%s1250_s1 + $0x28] sm:$0xff] }
  0x1e   : > { %296 = vmatprep.subr.mxu0 %v217_v36  ;;  %457 = vmatprep.subr.mxu1 %v219_v37  ;;  %v199_v57 = vld [vmem:[%s1250_s1 + $0x38] sm:$0xff]  ;;  %v196_v58 = vld [vmem:[%s1250_s1 + $0x20] sm:$0xff]  ;;  %v198_v59 = vld [vmem:[%s1250_s1 + $0x30] sm:$0xff] }
  0x1f   : > { %297 = vmatpush1.msra.mxu0 %v216_v38  ;;  %458 = vmatpush1.msra.mxu1 %v218_v39  ;;  %v193_v60 = vld [vmem:[%s1250_s1 + $0x8] sm:$0xff]  ;;  %v195_v61 = vld [vmem:[%s1250_s1 + $0x18] sm:$0xff]  ;;  %v192_v62 = vld [vmem:[%s1250_s1] sm:$0xff] }
  0x20   : > { %298 = vmatprep.subr.mxu0 %v213_v40  ;;  %459 = vmatprep.subr.mxu1 %v215_v41  ;;  %v194_v63 = vld [vmem:[%s1250_s1 + $0x10] sm:$0xff]  ;;  %v176_v0 = vld [vmem:[%s1045_s16] sm:$0xff]  ;;  %v177_v2 = vld [vmem:[%s1045_s16 + $0x8] sm:$0xff] }
  0x21   : > { %299 = vmatpush1.msra.mxu0 %v212_v42  ;;  %460 = vmatpush1.msra.mxu1 %v214_v43  ;;  %v178_v3 = vld [vmem:[%s1045_s16 + $0x10] sm:$0xff]  ;;  %v179_v4 = vld [vmem:[%s1045_s16 + $0x18] sm:$0xff]  ;;  %v180_v5 = vld [vmem:[%s1045_s16 + $0x20] sm:$0xff] }
  0x22   : > { %300 = vmatprep.subr.mxu0 %v209_v44  ;;  %461 = vmatprep.subr.mxu1 %v211_v45  ;;  %v181_v6 = vld [vmem:[%s1045_s16 + $0x28] sm:$0xff]  ;;  %v182_v7 = vld [vmem:[%s1045_s16 + $0x30] sm:$0xff]  ;;  %v183_v8 = vld [vmem:[%s1045_s16 + $0x38] sm:$0xff] }
  0x23   : > { %301 = vmatpush1.msra.mxu0 %v208_v46  ;;  %462 = vmatpush1.msra.mxu1 %v210_v47  ;;  %v184_v9 = vld [vmem:[%s1045_s16 + $0x40] sm:$0xff]  ;;  %v185_v10 = vld [vmem:[%s1045_s16 + $0x48] sm:$0xff]  ;;  %v186_v11 = vld [vmem:[%s1045_s16 + $0x50] sm:$0xff] }
  0x24   : > { %302 = vmatprep.subr.mxu0 %v205_v48  ;;  %463 = vmatprep.subr.mxu1 %v207_v49  ;;  %v187_v12 = vld [vmem:[%s1045_s16 + $0x58] sm:$0xff]  ;;  %v188_v13 = vld [vmem:[%s1045_s16 + $0x60] sm:$0xff]  ;;  %v189_v14 = vld [vmem:[%s1045_s16 + $0x68] sm:$0xff] }
  0x25   : > { %303 = vmatpush1.msra.mxu0 %v204_v50  ;;  %464 = vmatpush1.msra.mxu1 %v206_v51  ;;  %v190_v15 = vld [vmem:[%s1045_s16 + $0x70] sm:$0xff]  ;;  %v191_v16 = vld [vmem:[%s1045_s16 + $0x78] sm:$0xff]  ;;  %v256_v21 = vld [vmem:[%s1251_s2] sm:$0xf] }
  0x26   : > { %304 = vmatprep.subr.mxu0 %v201_v52  ;;  %465 = vmatprep.subr.mxu1 %v203_v53  ;;  %v1104_v24 = vrot.slane %v256_v21, %v260_v19  ;;  %v1106_v25 = vrot.slane %v256_v21, %v268_v20  ;;  %v1109_v26 = vrot.slane %v256_v21, %v264_v22 }
  0x27   : > { %305 = vmatpush1.msra.mxu0 %v200_v54  ;;  %466 = vmatpush1.msra.mxu1 %v202_v55  ;;  %v1111_v27 = vrot.slane %v256_v21, %v272_v23 }
  0x28   : > { %306 = vmatprep.subr.mxu0 %v197_v56  ;;  %467 = vmatprep.subr.mxu1 %v199_v57 }
  0x29   : > { %307 = vmatpush1.msra.mxu0 %v196_v58  ;;  %468 = vmatpush1.msra.mxu1 %v198_v59 }
  0x2a   : > { %308 = vmatprep.subr.mxu0 %v193_v60  ;;  %469 = vmatprep.subr.mxu1 %v195_v61 }
  0x2b   : > { %309 = vmatpush1.msra.mxu0 %v192_v62  ;;  %342 = vmatprep.mubr.f32.mxu0 %v816_v1 }
  0x2c   : > { %470 = vmatpush1.msra.mxu1 %v194_v63  ;;  %503 = vmatprep.mubr.f32.mxu1 %v816_v1 }
  0x2d   : > { %343 = vmatmul.mubr.f32.vlgmr.msra.gmra.mxu0 %v176_v0  ;;  %504 = vmatmul.mubr.f32.vlgmr.msra.gmra.mxu1 %v176_v0 }
  0x2e   : > { %348 = vmatprep.mubr.f32.mxu0 %v816_v1  ;;  %509 = vmatprep.mubr.f32.mxu1 %v816_v1 }
  0x31   : > { %349 = vmatmul.mubr.f32.gmra.mxu0 %v177_v2  ;;  %510 = vmatmul.mubr.f32.gmra.mxu1 %v177_v2 }
  0x32   : > { %354 = vmatprep.mubr.f32.mxu0 %v816_v1  ;;  %515 = vmatprep.mubr.f32.mxu1 %v816_v1 }
  0x35   : > { %355 = vmatmul.mubr.f32.gmra.mxu0 %v178_v3  ;;  %516 = vmatmul.mubr.f32.gmra.mxu1 %v178_v3 }
  0x36   : > { %360 = vmatprep.mubr.f32.mxu0 %v816_v1  ;;  %521 = vmatprep.mubr.f32.mxu1 %v816_v1 }
  0x39   : > { %361 = vmatmul.mubr.f32.gmra.mxu0 %v179_v4  ;;  %522 = vmatmul.mubr.f32.gmra.mxu1 %v179_v4 }
  0x3a   : > { %366 = vmatprep.mubr.f32.mxu0 %v816_v1  ;;  %527 = vmatprep.mubr.f32.mxu1 %v816_v1 }
  0x3d   : > { %367 = vmatmul.mubr.f32.gmra.mxu0 %v180_v5  ;;  %528 = vmatmul.mubr.f32.gmra.mxu1 %v180_v5 }
  0x3e   : > { %372 = vmatprep.mubr.f32.mxu0 %v816_v1  ;;  %533 = vmatprep.mubr.f32.mxu1 %v816_v1 }
  0x41   : > { %373 = vmatmul.mubr.f32.gmra.mxu0 %v181_v6  ;;  %534 = vmatmul.mubr.f32.gmra.mxu1 %v181_v6 }
  0x42   : > { %378 = vmatprep.mubr.f32.mxu0 %v816_v1  ;;  %539 = vmatprep.mubr.f32.mxu1 %v816_v1 }
  0x45   : > { %379 = vmatmul.mubr.f32.gmra.mxu0 %v182_v7  ;;  %540 = vmatmul.mubr.f32.gmra.mxu1 %v182_v7 }
  0x46   : > { %384 = vmatprep.mubr.f32.mxu0 %v816_v1  ;;  %545 = vmatprep.mubr.f32.mxu1 %v816_v1 }
  0x49   : > { %385 = vmatmul.mubr.f32.gmra.mxu0 %v183_v8  ;;  %546 = vmatmul.mubr.f32.gmra.mxu1 %v183_v8 }
  0x4a   : > { %390 = vmatprep.mubr.f32.mxu0 %v816_v1  ;;  %551 = vmatprep.mubr.f32.mxu1 %v816_v1 }
  0x4d   : > { %391 = vmatmul.mubr.f32.gmra.mxu0 %v184_v9  ;;  %552 = vmatmul.mubr.f32.gmra.mxu1 %v184_v9 }
  0x4e   : > { %396 = vmatprep.mubr.f32.mxu0 %v816_v1  ;;  %557 = vmatprep.mubr.f32.mxu1 %v816_v1 }
  0x51   : > { %397 = vmatmul.mubr.f32.gmra.mxu0 %v185_v10  ;;  %558 = vmatmul.mubr.f32.gmra.mxu1 %v185_v10 }
  0x52   : > { %402 = vmatprep.mubr.f32.mxu0 %v816_v1  ;;  %563 = vmatprep.mubr.f32.mxu1 %v816_v1 }
  0x55   : > { %403 = vmatmul.mubr.f32.gmra.mxu0 %v186_v11  ;;  %564 = vmatmul.mubr.f32.gmra.mxu1 %v186_v11 }
  0x56   : > { %408 = vmatprep.mubr.f32.mxu0 %v816_v1  ;;  %569 = vmatprep.mubr.f32.mxu1 %v816_v1 }
  0x59   : > { %409 = vmatmul.mubr.f32.gmra.mxu0 %v187_v12  ;;  %570 = vmatmul.mubr.f32.gmra.mxu1 %v187_v12 }
  0x5a   : > { %414 = vmatprep.mubr.f32.mxu0 %v816_v1  ;;  %575 = vmatprep.mubr.f32.mxu1 %v816_v1 }
  0x5d   : > { %415 = vmatmul.mubr.f32.gmra.mxu0 %v188_v13  ;;  %576 = vmatmul.mubr.f32.gmra.mxu1 %v188_v13 }
  0x5e   : > { %420 = vmatprep.mubr.f32.mxu0 %v816_v1  ;;  %581 = vmatprep.mubr.f32.mxu1 %v816_v1 }
  0x61   : > { %421 = vmatmul.mubr.f32.gmra.mxu0 %v189_v14  ;;  %582 = vmatmul.mubr.f32.gmra.mxu1 %v189_v14 }
  0x62   : > { %426 = vmatprep.mubr.f32.mxu0 %v816_v1  ;;  %587 = vmatprep.mubr.f32.mxu1 %v816_v1 }
  0x65   : > { %427 = vmatmul.mubr.f32.gmra.mxu0 %v190_v15  ;;  %588 = vmatmul.mubr.f32.gmra.mxu1 %v190_v15 }
  0x66   : > { %432 = vmatprep.mubr.f32.mxu0 %v816_v1  ;;  %593 = vmatprep.mubr.f32.mxu1 %v816_v1 }
  0x69   : > { %433 = vmatmul.mubr.f32.gmra.mxu0 %v191_v16  ;;  %594 = vmatmul.mubr.f32.gmra.mxu1 %v191_v16 }
  0xed   : > { %v344_v28 = vpop.f32.mrf.mxu0  ;;  %v505_v29 = vpop.f32.mrf.mxu1 }
  0xee   : > { %v345_v30 = vadd.f32 %v344_v28, %v1104_v24  ;;  %v506_v31 = vadd.f32 %v505_v29, %v1106_v25 }
  0xef   : > { %v346_v32 = vpop.f32.mrf.mxu0  ;;  %v507_v33 = vpop.f32.mrf.mxu1 }
  0xf0   : > { %v600_v34 = vmax.f32 %v345_v30, 0.0  ;;  %v602_v35 = vmax.f32 %v506_v31, 0.0  ;;  %v347_v36 = vadd.f32 %v346_v32, %v1109_v26  ;;  %v508_v37 = vadd.f32 %v507_v33, %v1111_v27 }
  0xf1   : > { %v350_v38 = vpop.f32.mrf.mxu0  ;;  %v511_v39 = vpop.f32.mrf.mxu1 }
  0xf2   : > { %664 = vst [vmem:[%s1118_s26] sm:$0xff] %v600_v34  ;;  %666 = vst [vmem:[%s1118_s26 + $0x10] sm:$0xff] %v602_v35  ;;  %v601_v40 = vmax.f32 %v347_v36, 0.0  ;;  %v603_v41 = vmax.f32 %v508_v37, 0.0  ;;  %v351_v42 = vadd.f32 %v350_v38, %v1104_v24  ;;  %v512_v43 = vadd.f32 %v511_v39, %v1106_v25 }
  0xf3   : > { %v352_v44 = vpop.f32.mrf.mxu0  ;;  %v513_v45 = vpop.f32.mrf.mxu1 }
  0xf4   : > { %665 = vst [vmem:[%s1118_s26 + $0x8] sm:$0xff] %v601_v40  ;;  %667 = vst [vmem:[%s1118_s26 + $0x18] sm:$0xff] %v603_v41  ;;  %v604_v46 = vmax.f32 %v351_v42, 0.0  ;;  %v606_v47 = vmax.f32 %v512_v43, 0.0  ;;  %v353_v48 = vadd.f32 %v352_v44, %v1109_v26  ;;  %v514_v49 = vadd.f32 %v513_v45, %v1111_v27 }
  0xf5   : > { %v356_v50 = vpop.f32.mrf.mxu0  ;;  %v517_v51 = vpop.f32.mrf.mxu1 }
  0xf6   : > { %668 = vst [vmem:[%s1118_s26 + $0x20] sm:$0xff] %v604_v46  ;;  %670 = vst [vmem:[%s1118_s26 + $0x30] sm:$0xff] %v606_v47  ;;  %v605_v52 = vmax.f32 %v353_v48, 0.0  ;;  %v607_v53 = vmax.f32 %v514_v49, 0.0  ;;  %v357_v54 = vadd.f32 %v356_v50, %v1104_v24  ;;  %v518_v55 = vadd.f32 %v517_v51, %v1106_v25 }
  0xf7   : > { %v358_v56 = vpop.f32.mrf.mxu0  ;;  %v519_v57 = vpop.f32.mrf.mxu1 }
  0xf8   : > { %669 = vst [vmem:[%s1118_s26 + $0x28] sm:$0xff] %v605_v52  ;;  %671 = vst [vmem:[%s1118_s26 + $0x38] sm:$0xff] %v607_v53  ;;  %v608_v58 = vmax.f32 %v357_v54, 0.0  ;;  %v610_v59 = vmax.f32 %v518_v55, 0.0  ;;  %v359_v60 = vadd.f32 %v358_v56, %v1109_v26  ;;  %v520_v61 = vadd.f32 %v519_v57, %v1111_v27 }
  0xf9   : > { %v362_v62 = vpop.f32.mrf.mxu0  ;;  %v523_v63 = vpop.f32.mrf.mxu1 }
  0xfa   : > { %672 = vst [vmem:[%s1118_s26 + $0x40] sm:$0xff] %v608_v58  ;;  %674 = vst [vmem:[%s1118_s26 + $0x50] sm:$0xff] %v610_v59  ;;  %v609_v0 = vmax.f32 %v359_v60, 0.0  ;;  %v611_v1 = vmax.f32 %v520_v61, 0.0  ;;  %v363_v2 = vadd.f32 %v362_v62, %v1104_v24  ;;  %v524_v3 = vadd.f32 %v523_v63, %v1106_v25 }
  0xfb   : > { %v364_v4 = vpop.f32.mrf.mxu0  ;;  %v525_v5 = vpop.f32.mrf.mxu1 }
  0xfc   : > { %673 = vst [vmem:[%s1118_s26 + $0x48] sm:$0xff] %v609_v0  ;;  %675 = vst [vmem:[%s1118_s26 + $0x58] sm:$0xff] %v611_v1  ;;  %v612_v6 = vmax.f32 %v363_v2, 0.0  ;;  %v614_v7 = vmax.f32 %v524_v3, 0.0  ;;  %v365_v8 = vadd.f32 %v364_v4, %v1109_v26  ;;  %v526_v9 = vadd.f32 %v525_v5, %v1111_v27 }
  0xfd   : > { %v368_v10 = vpop.f32.mrf.mxu0  ;;  %v529_v11 = vpop.f32.mrf.mxu1 }
  0xfe   : > { %676 = vst [vmem:[%s1118_s26 + $0x60] sm:$0xff] %v612_v6  ;;  %678 = vst [vmem:[%s1118_s26 + $0x70] sm:$0xff] %v614_v7  ;;  %v613_v12 = vmax.f32 %v365_v8, 0.0  ;;  %v615_v13 = vmax.f32 %v526_v9, 0.0  ;;  %v369_v14 = vadd.f32 %v368_v10, %v1104_v24  ;;  %v530_v15 = vadd.f32 %v529_v11, %v1106_v25 }
  0xff   : > { %v370_v16 = vpop.f32.mrf.mxu0  ;;  %v531_v17 = vpop.f32.mrf.mxu1 }
 0x100   : > { %677 = vst [vmem:[%s1118_s26 + $0x68] sm:$0xff] %v613_v12  ;;  %679 = vst [vmem:[%s1118_s26 + $0x78] sm:$0xff] %v615_v13  ;;  %v616_v18 = vmax.f32 %v369_v14, 0.0  ;;  %v618_v19 = vmax.f32 %v530_v15, 0.0  ;;  %v371_v20 = vadd.f32 %v370_v16, %v1109_v26  ;;  %v532_v21 = vadd.f32 %v531_v17, %v1111_v27 }
 0x101   : > { %v374_v22 = vpop.f32.mrf.mxu0  ;;  %v535_v23 = vpop.f32.mrf.mxu1 }
 0x102   : > { %680 = vst [vmem:[%s1118_s26 + $0x80] sm:$0xff] %v616_v18  ;;  %682 = vst [vmem:[%s1118_s26 + $0x90] sm:$0xff] %v618_v19  ;;  %v617_v28 = vmax.f32 %v371_v20, 0.0  ;;  %v619_v29 = vmax.f32 %v532_v21, 0.0  ;;  %v375_v30 = vadd.f32 %v374_v22, %v1104_v24  ;;  %v536_v31 = vadd.f32 %v535_v23, %v1106_v25 }
 0x103   : > { %v376_v32 = vpop.f32.mrf.mxu0  ;;  %v537_v33 = vpop.f32.mrf.mxu1 }
 0x104   : > { %681 = vst [vmem:[%s1118_s26 + $0x88] sm:$0xff] %v617_v28  ;;  %683 = vst [vmem:[%s1118_s26 + $0x98] sm:$0xff] %v619_v29  ;;  %v620_v34 = vmax.f32 %v375_v30, 0.0  ;;  %v622_v35 = vmax.f32 %v536_v31, 0.0  ;;  %v377_v36 = vadd.f32 %v376_v32, %v1109_v26  ;;  %v538_v37 = vadd.f32 %v537_v33, %v1111_v27 }
 0x105   : > { %v380_v38 = vpop.f32.mrf.mxu0  ;;  %v541_v39 = vpop.f32.mrf.mxu1 }
 0x106   : > { %684 = vst [vmem:[%s1118_s26 + $0xa0] sm:$0xff] %v620_v34  ;;  %686 = vst [vmem:[%s1118_s26 + $0xb0] sm:$0xff] %v622_v35  ;;  %v621_v40 = vmax.f32 %v377_v36, 0.0  ;;  %v623_v41 = vmax.f32 %v538_v37, 0.0  ;;  %v381_v42 = vadd.f32 %v380_v38, %v1104_v24  ;;  %v542_v43 = vadd.f32 %v541_v39, %v1106_v25 }
 0x107   : > { %v382_v44 = vpop.f32.mrf.mxu0  ;;  %v543_v45 = vpop.f32.mrf.mxu1 }
 0x108   : > { %685 = vst [vmem:[%s1118_s26 + $0xa8] sm:$0xff] %v621_v40  ;;  %687 = vst [vmem:[%s1118_s26 + $0xb8] sm:$0xff] %v623_v41  ;;  %v624_v46 = vmax.f32 %v381_v42, 0.0  ;;  %v626_v47 = vmax.f32 %v542_v43, 0.0  ;;  %v383_v48 = vadd.f32 %v382_v44, %v1109_v26  ;;  %v544_v49 = vadd.f32 %v543_v45, %v1111_v27 }
 0x109   : > { %v386_v50 = vpop.f32.mrf.mxu0  ;;  %v547_v51 = vpop.f32.mrf.mxu1 }
 0x10a   : > { %688 = vst [vmem:[%s1118_s26 + $0xc0] sm:$0xff] %v624_v46  ;;  %690 = vst [vmem:[%s1118_s26 + $0xd0] sm:$0xff] %v626_v47  ;;  %v625_v52 = vmax.f32 %v383_v48, 0.0  ;;  %v627_v53 = vmax.f32 %v544_v49, 0.0  ;;  %v387_v54 = vadd.f32 %v386_v50, %v1104_v24  ;;  %v548_v55 = vadd.f32 %v547_v51, %v1106_v25 }
 0x10b   : > { %v388_v56 = vpop.f32.mrf.mxu0  ;;  %v549_v57 = vpop.f32.mrf.mxu1 }
 0x10c   : > { %689 = vst [vmem:[%s1118_s26 + $0xc8] sm:$0xff] %v625_v52  ;;  %691 = vst [vmem:[%s1118_s26 + $0xd8] sm:$0xff] %v627_v53  ;;  %v628_v58 = vmax.f32 %v387_v54, 0.0  ;;  %v630_v59 = vmax.f32 %v548_v55, 0.0  ;;  %v389_v60 = vadd.f32 %v388_v56, %v1109_v26  ;;  %v550_v61 = vadd.f32 %v549_v57, %v1111_v27 }
 0x10d   : > { %v392_v62 = vpop.f32.mrf.mxu0  ;;  %v553_v63 = vpop.f32.mrf.mxu1 }
 0x10e   : > { %692 = vst [vmem:[%s1118_s26 + $0xe0] sm:$0xff] %v628_v58  ;;  %694 = vst [vmem:[%s1118_s26 + $0xf0] sm:$0xff] %v630_v59  ;;  %v629_v0 = vmax.f32 %v389_v60, 0.0  ;;  %v631_v1 = vmax.f32 %v550_v61, 0.0  ;;  %v393_v2 = vadd.f32 %v392_v62, %v1104_v24  ;;  %v554_v3 = vadd.f32 %v553_v63, %v1106_v25 }
 0x10f   : > { %v394_v4 = vpop.f32.mrf.mxu0  ;;  %v555_v5 = vpop.f32.mrf.mxu1 }
 0x110   : > { %693 = vst [vmem:[%s1118_s26 + $0xe8] sm:$0xff] %v629_v0  ;;  %695 = vst [vmem:[%s1118_s26 + $0xf8] sm:$0xff] %v631_v1  ;;  %v632_v6 = vmax.f32 %v393_v2, 0.0  ;;  %v634_v7 = vmax.f32 %v554_v3, 0.0  ;;  %v395_v8 = vadd.f32 %v394_v4, %v1109_v26  ;;  %v556_v9 = vadd.f32 %v555_v5, %v1111_v27 }
 0x111   : > { %v398_v10 = vpop.f32.mrf.mxu0  ;;  %v559_v11 = vpop.f32.mrf.mxu1 }
 0x112   : > { %696 = vst [vmem:[%s1118_s26 + $0x100] sm:$0xff] %v632_v6  ;;  %698 = vst [vmem:[%s1118_s26 + $0x110] sm:$0xff] %v634_v7  ;;  %v633_v12 = vmax.f32 %v395_v8, 0.0  ;;  %v635_v13 = vmax.f32 %v556_v9, 0.0  ;;  %v399_v14 = vadd.f32 %v398_v10, %v1104_v24  ;;  %v560_v15 = vadd.f32 %v559_v11, %v1106_v25 }
 0x113   : > { %v400_v16 = vpop.f32.mrf.mxu0  ;;  %v561_v17 = vpop.f32.mrf.mxu1 }
 0x114   : > { %697 = vst [vmem:[%s1118_s26 + $0x108] sm:$0xff] %v633_v12  ;;  %699 = vst [vmem:[%s1118_s26 + $0x118] sm:$0xff] %v635_v13  ;;  %v636_v18 = vmax.f32 %v399_v14, 0.0  ;;  %v638_v19 = vmax.f32 %v560_v15, 0.0  ;;  %v401_v20 = vadd.f32 %v400_v16, %v1109_v26  ;;  %v562_v21 = vadd.f32 %v561_v17, %v1111_v27 }
 0x115   : > { %v404_v22 = vpop.f32.mrf.mxu0  ;;  %v565_v23 = vpop.f32.mrf.mxu1 }
 0x116   : > { %700 = vst [vmem:[%s1118_s26 + $0x120] sm:$0xff] %v636_v18  ;;  %702 = vst [vmem:[%s1118_s26 + $0x130] sm:$0xff] %v638_v19  ;;  %v637_v28 = vmax.f32 %v401_v20, 0.0  ;;  %v639_v29 = vmax.f32 %v562_v21, 0.0  ;;  %v405_v30 = vadd.f32 %v404_v22, %v1104_v24  ;;  %v566_v31 = vadd.f32 %v565_v23, %v1106_v25 }
 0x117   : > { %v406_v32 = vpop.f32.mrf.mxu0  ;;  %v567_v33 = vpop.f32.mrf.mxu1 }
 0x118   : > { %701 = vst [vmem:[%s1118_s26 + $0x128] sm:$0xff] %v637_v28  ;;  %703 = vst [vmem:[%s1118_s26 + $0x138] sm:$0xff] %v639_v29  ;;  %v640_v34 = vmax.f32 %v405_v30, 0.0  ;;  %v642_v35 = vmax.f32 %v566_v31, 0.0  ;;  %v407_v36 = vadd.f32 %v406_v32, %v1109_v26  ;;  %v568_v37 = vadd.f32 %v567_v33, %v1111_v27 }
 0x119   : > { %v410_v38 = vpop.f32.mrf.mxu0  ;;  %v571_v39 = vpop.f32.mrf.mxu1 }
 0x11a   : > { %704 = vst [vmem:[%s1118_s26 + $0x140] sm:$0xff] %v640_v34  ;;  %706 = vst [vmem:[%s1118_s26 + $0x150] sm:$0xff] %v642_v35  ;;  %v641_v40 = vmax.f32 %v407_v36, 0.0  ;;  %v643_v41 = vmax.f32 %v568_v37, 0.0  ;;  %v411_v42 = vadd.f32 %v410_v38, %v1104_v24  ;;  %v572_v43 = vadd.f32 %v571_v39, %v1106_v25 }
 0x11b   : > { %v412_v44 = vpop.f32.mrf.mxu0  ;;  %v573_v45 = vpop.f32.mrf.mxu1 }
 0x11c   : > { %705 = vst [vmem:[%s1118_s26 + $0x148] sm:$0xff] %v641_v40  ;;  %707 = vst [vmem:[%s1118_s26 + $0x158] sm:$0xff] %v643_v41  ;;  %v644_v46 = vmax.f32 %v411_v42, 0.0  ;;  %v646_v47 = vmax.f32 %v572_v43, 0.0  ;;  %v413_v48 = vadd.f32 %v412_v44, %v1109_v26  ;;  %v574_v49 = vadd.f32 %v573_v45, %v1111_v27 }
 0x11d   : > { %v416_v50 = vpop.f32.mrf.mxu0  ;;  %v577_v51 = vpop.f32.mrf.mxu1 }
 0x11e   : > { %708 = vst [vmem:[%s1118_s26 + $0x160] sm:$0xff] %v644_v46  ;;  %710 = vst [vmem:[%s1118_s26 + $0x170] sm:$0xff] %v646_v47  ;;  %v645_v52 = vmax.f32 %v413_v48, 0.0  ;;  %v647_v53 = vmax.f32 %v574_v49, 0.0  ;;  %v417_v54 = vadd.f32 %v416_v50, %v1104_v24  ;;  %v578_v55 = vadd.f32 %v577_v51, %v1106_v25 }
 0x11f   : > { %v418_v56 = vpop.f32.mrf.mxu0  ;;  %v579_v57 = vpop.f32.mrf.mxu1 }
 0x120   : > { %709 = vst [vmem:[%s1118_s26 + $0x168] sm:$0xff] %v645_v52  ;;  %711 = vst [vmem:[%s1118_s26 + $0x178] sm:$0xff] %v647_v53  ;;  %v648_v58 = vmax.f32 %v417_v54, 0.0  ;;  %v650_v59 = vmax.f32 %v578_v55, 0.0  ;;  %v419_v60 = vadd.f32 %v418_v56, %v1109_v26  ;;  %v580_v61 = vadd.f32 %v579_v57, %v1111_v27 }
 0x121   : > { %v422_v62 = vpop.f32.mrf.mxu0  ;;  %v583_v63 = vpop.f32.mrf.mxu1 }
 0x122   : > { %712 = vst [vmem:[%s1118_s26 + $0x180] sm:$0xff] %v648_v58  ;;  %714 = vst [vmem:[%s1118_s26 + $0x190] sm:$0xff] %v650_v59  ;;  %v649_v0 = vmax.f32 %v419_v60, 0.0  ;;  %v651_v1 = vmax.f32 %v580_v61, 0.0  ;;  %v423_v2 = vadd.f32 %v422_v62, %v1104_v24  ;;  %v584_v3 = vadd.f32 %v583_v63, %v1106_v25 }
 0x123   : > { %v424_v4 = vpop.f32.mrf.mxu0  ;;  %v585_v5 = vpop.f32.mrf.mxu1 }
 0x124   : > { %713 = vst [vmem:[%s1118_s26 + $0x188] sm:$0xff] %v649_v0  ;;  %715 = vst [vmem:[%s1118_s26 + $0x198] sm:$0xff] %v651_v1  ;;  %v652_v6 = vmax.f32 %v423_v2, 0.0  ;;  %v654_v7 = vmax.f32 %v584_v3, 0.0  ;;  %v425_v8 = vadd.f32 %v424_v4, %v1109_v26  ;;  %v586_v9 = vadd.f32 %v585_v5, %v1111_v27 }
 0x125   : > { %v428_v10 = vpop.f32.mrf.mxu0  ;;  %v589_v11 = vpop.f32.mrf.mxu1 }
 0x126   : > { %716 = vst [vmem:[%s1118_s26 + $0x1a0] sm:$0xff] %v652_v6  ;;  %718 = vst [vmem:[%s1118_s26 + $0x1b0] sm:$0xff] %v654_v7  ;;  %v653_v12 = vmax.f32 %v425_v8, 0.0  ;;  %v655_v13 = vmax.f32 %v586_v9, 0.0  ;;  %v429_v14 = vadd.f32 %v428_v10, %v1104_v24  ;;  %v590_v15 = vadd.f32 %v589_v11, %v1106_v25 }
 0x127   : > { %v430_v16 = vpop.f32.mrf.mxu0  ;;  %v591_v17 = vpop.f32.mrf.mxu1 }
 0x128   : > { %717 = vst [vmem:[%s1118_s26 + $0x1a8] sm:$0xff] %v653_v12  ;;  %719 = vst [vmem:[%s1118_s26 + $0x1b8] sm:$0xff] %v655_v13  ;;  %v656_v18 = vmax.f32 %v429_v14, 0.0  ;;  %v658_v19 = vmax.f32 %v590_v15, 0.0  ;;  %v431_v20 = vadd.f32 %v430_v16, %v1109_v26  ;;  %v592_v21 = vadd.f32 %v591_v17, %v1111_v27 }
 0x129   : > { %v434_v22 = vpop.f32.mrf.mxu0  ;;  %v595_v23 = vpop.f32.mrf.mxu1 }
 0x12a   : > { %720 = vst [vmem:[%s1118_s26 + $0x1c0] sm:$0xff] %v656_v18  ;;  %722 = vst [vmem:[%s1118_s26 + $0x1d0] sm:$0xff] %v658_v19  ;;  %v657_v28 = vmax.f32 %v431_v20, 0.0  ;;  %v659_v29 = vmax.f32 %v592_v21, 0.0  ;;  %v435_v30 = vadd.f32 %v434_v22, %v1104_v24  ;;  %v596_v31 = vadd.f32 %v595_v23, %v1106_v25 }
 0x12b   : > { %v436_v32 = vpop.f32.mrf.mxu0  ;;  %v597_v33 = vpop.f32.mrf.mxu1 }
 0x12c   : > { %721 = vst [vmem:[%s1118_s26 + $0x1c8] sm:$0xff] %v657_v28  ;;  %723 = vst [vmem:[%s1118_s26 + $0x1d8] sm:$0xff] %v659_v29  ;;  %v660_v34 = vmax.f32 %v435_v30, 0.0  ;;  %v662_v35 = vmax.f32 %v596_v31, 0.0  ;;  %v437_v36 = vadd.f32 %v436_v32, %v1109_v26  ;;  %v598_v37 = vadd.f32 %v597_v33, %v1111_v27 }
 0x12e   : > { %724 = vst [vmem:[%s1118_s26 + $0x1e0] sm:$0xff] %v660_v34  ;;  %726 = vst [vmem:[%s1118_s26 + $0x1f0] sm:$0xff] %v662_v35  ;;  %v661_v38 = vmax.f32 %v437_v36, 0.0  ;;  %v663_v39 = vmax.f32 %v598_v37, 0.0 }
 0x130   : > { %725 = vst [vmem:[%s1118_s26 + $0x1e8] sm:$0xff] %v661_v38  ;;  %727 = vst [vmem:[%s1118_s26 + $0x1f8] sm:$0xff] %v663_v39 }
 0x131 PF: > { %s13_s12 = sadd.s32 1, %s814_s12  }
 0x132   : > { %p10_p4 = scmp.ge.s32.totalorder %s13_s12, 5  }
 0x134   :  { %12 = sbr.rel (!%p10_p4) target bundleno = 1 (0x1), region = 62 }

// kernel: nv_encoder_forward.8
= control target key start
LH: loop header
LB: loop body
LE: loop exit
PB: predicated region body
PF: predicated region fallthrough
CT: control target
= control target key end

     0   :  { %s1154_s12 = smov 0   ;;  %s1703_s0 = inlined_call_operand.vmem [shape: f32[256,128], index: 0, kind: input, shape index: {}]   ;;  %s1704_s1 = inlined_call_operand.vmem [shape: f32[128,640], index: 1, kind: input, shape index: {}]   ;;  %s1705_s2 = inlined_call_operand.vmem [shape: f32[1,640], index: 2, kind: input, shape index: {}]   ;;  %s1706_s3 = inlined_call_operand.vmem [shape: f32[256,640], index: 3, kind: output, shape index: {}]  }
   0x1 LB: > { %s984_s13 = sadd.s32 4294967295, %s1131_s12   ;;  %p988_p0 = scmp.ge.s32.totalorder %s1131_s12, 1  ;;  %s1131_s12 = sphi %s1154_s12, %s13_s12  }
   0x2   : > { %p138_p1 = scmp.lt.s32.totalorder %s1131_s12, 3 }
   0x4   : > { %p139_p2 = pnand %p988_p0, %p138_p1 }
   0x5   : > { %s1266_s5 = sshll.u32 (!%p139_p2), %s984_s13, 4 }
   0x6   : > { %142 = sbr.rel (%p139_p2) target bundleno = 321 (0x141), region = 32  ;;  %p164_p3 = scmp.lt.s32.totalorder (!%p139_p2), %s1266_s5, 31 }
   0xb   : > { %v268_v0 = vld [vmem:[%s1704_s1 + $0x260] sm:$0xff]  ;;  %v270_v1 = vld [vmem:[%s1704_s1 + $0x270] sm:$0xff]  ;;  %v267_v2 = vld [vmem:[%s1704_s1 + $0x258] sm:$0xff]  ;;  %s1708_s5 = smov (!%p164_p3, %s1266_s5), 31 }
   0xc   : > { %299 = vmatprep.subr.mxu0 %v268_v0  ;;  %460 = vmatprep.subr.mxu1 %v270_v1  ;;  %v269_v3 = vld [vmem:[%s1704_s1 + $0x268] sm:$0xff]  ;;  %v263_v4 = vld [vmem:[%s1704_s1 + $0x238] sm:$0xff]  ;;  %v262_v6 = vld [vmem:[%s1704_s1 + $0x230] sm:$0xff]  ;;  %s990_s26 = sshll.u32 %s1708_s5, 3  ;;  %v1133_v1 = vmov 0.0   ;;  %s1115_s30 = smul.u32 40, %s1708_s5 }
   0xd   : > { %v265_v5 = vld [vmem:[%s1704_s1 + $0x248] sm:$0xff]  ;;  %300 = vmatpush1.msra.mxu0 %v267_v2  ;;  %461 = vmatpush1.msra.mxu1 %v269_v3  ;;  %v264_v7 = vld [vmem:[%s1704_s1 + $0x240] sm:$0xff]  ;;  %v258_v8 = vld [vmem:[%s1704_s1 + $0x210] sm:$0xff]  ;;  %s1362_s16 = scalar_lea.vmem %s1703_s0, %s990_s26 }
   0xe   : > { %301 = vmatprep.subr.mxu0 %v263_v4  ;;  %462 = vmatprep.subr.mxu1 %v265_v5  ;;  %v260_v9 = vld [vmem:[%s1704_s1 + $0x220] sm:$0xff]  ;;  %v257_v10 = vld [vmem:[%s1704_s1 + $0x208] sm:$0xff]  ;;  %v259_v11 = vld [vmem:[%s1704_s1 + $0x218] sm:$0xff]  ;;  %s1540_s7 = scalar_lea.vmem %s1706_s3, %s1115_s30 }
   0xf   : > { %302 = vmatpush1.msra.mxu0 %v262_v6  ;;  %463 = vmatpush1.msra.mxu1 %v264_v7  ;;  %v253_v12 = vld [vmem:[%s1704_s1 + $0x1e8] sm:$0xff]  ;;  %v255_v13 = vld [vmem:[%s1704_s1 + $0x1f8] sm:$0xff]  ;;  %v252_v14 = vld [vmem:[%s1704_s1 + $0x1e0] sm:$0xff] }
  0x10   : > { %303 = vmatprep.subr.mxu0 %v258_v8  ;;  %464 = vmatprep.subr.mxu1 %v260_v9  ;;  %v254_v15 = vld [vmem:[%s1704_s1 + $0x1f0] sm:$0xff]  ;;  %v248_v16 = vld [vmem:[%s1704_s1 + $0x1c0] sm:$0xff]  ;;  %v247_v18 = vld [vmem:[%s1704_s1 + $0x1b8] sm:$0xff] }
  0x11   : > { %304 = vmatpush1.msra.mxu0 %v257_v10  ;;  %465 = vmatpush1.msra.mxu1 %v259_v11  ;;  %v250_v17 = vld [vmem:[%s1704_s1 + $0x1d0] sm:$0xff]  ;;  %v249_v19 = vld [vmem:[%s1704_s1 + $0x1c8] sm:$0xff]  ;;  %v243_v20 = vld [vmem:[%s1704_s1 + $0x198] sm:$0xff] }
  0x12   : > { %305 = vmatprep.subr.mxu0 %v253_v12  ;;  %466 = vmatprep.subr.mxu1 %v255_v13  ;;  %v245_v21 = vld [vmem:[%s1704_s1 + $0x1a8] sm:$0xff]  ;;  %v242_v22 = vld [vmem:[%s1704_s1 + $0x190] sm:$0xff]  ;;  %v244_v23 = vld [vmem:[%s1704_s1 + $0x1a0] sm:$0xff] }
  0x13   : > { %306 = vmatpush1.msra.mxu0 %v252_v14  ;;  %467 = vmatpush1.msra.mxu1 %v254_v15  ;;  %v238_v24 = vld [vmem:[%s1704_s1 + $0x170] sm:$0xff]  ;;  %v240_v25 = vld [vmem:[%s1704_s1 + $0x180] sm:$0xff]  ;;  %v237_v26 = vld [vmem:[%s1704_s1 + $0x168] sm:$0xff] }
  0x14   : > { %307 = vmatprep.subr.mxu0 %v248_v16  ;;  %468 = vmatprep.subr.mxu1 %v250_v17  ;;  %v239_v27 = vld [vmem:[%s1704_s1 + $0x178] sm:$0xff]  ;;  %v233_v28 = vld [vmem:[%s1704_s1 + $0x148] sm:$0xff]  ;;  %v232_v30 = vld [vmem:[%s1704_s1 + $0x140] sm:$0xff] }
  0x15   : > { %308 = vmatpush1.msra.mxu0 %v247_v18  ;;  %469 = vmatpush1.msra.mxu1 %v249_v19  ;;  %v235_v29 = vld [vmem:[%s1704_s1 + $0x158] sm:$0xff]  ;;  %v234_v31 = vld [vmem:[%s1704_s1 + $0x150] sm:$0xff]  ;;  %v228_v32 = vld [vmem:[%s1704_s1 + $0x120] sm:$0xff] }
  0x16   : > { %309 = vmatprep.subr.mxu0 %v243_v20  ;;  %470 = vmatprep.subr.mxu1 %v245_v21  ;;  %v230_v33 = vld [vmem:[%s1704_s1 + $0x130] sm:$0xff]  ;;  %v227_v34 = vld [vmem:[%s1704_s1 + $0x118] sm:$0xff]  ;;  %v229_v35 = vld [vmem:[%s1704_s1 + $0x128] sm:$0xff] }
  0x17   : > { %310 = vmatpush1.msra.mxu0 %v242_v22  ;;  %471 = vmatpush1.msra.mxu1 %v244_v23  ;;  %v223_v36 = vld [vmem:[%s1704_s1 + $0xf8] sm:$0xff]  ;;  %v225_v37 = vld [vmem:[%s1704_s1 + $0x108] sm:$0xff]  ;;  %v222_v38 = vld [vmem:[%s1704_s1 + $0xf0] sm:$0xff] }
  0x18   : > { %311 = vmatprep.subr.mxu0 %v238_v24  ;;  %472 = vmatprep.subr.mxu1 %v240_v25  ;;  %v224_v39 = vld [vmem:[%s1704_s1 + $0x100] sm:$0xff]  ;;  %v218_v40 = vld [vmem:[%s1704_s1 + $0xd0] sm:$0xff]  ;;  %v217_v42 = vld [vmem:[%s1704_s1 + $0xc8] sm:$0xff] }
  0x19   : > { %312 = vmatpush1.msra.mxu0 %v237_v26  ;;  %473 = vmatpush1.msra.mxu1 %v239_v27  ;;  %v220_v41 = vld [vmem:[%s1704_s1 + $0xe0] sm:$0xff]  ;;  %v219_v43 = vld [vmem:[%s1704_s1 + $0xd8] sm:$0xff]  ;;  %v213_v44 = vld [vmem:[%s1704_s1 + $0xa8] sm:$0xff] }
  0x1a   : > { %313 = vmatprep.subr.mxu0 %v233_v28  ;;  %474 = vmatprep.subr.mxu1 %v235_v29  ;;  %v215_v45 = vld [vmem:[%s1704_s1 + $0xb8] sm:$0xff]  ;;  %v212_v46 = vld [vmem:[%s1704_s1 + $0xa0] sm:$0xff]  ;;  %v214_v47 = vld [vmem:[%s1704_s1 + $0xb0] sm:$0xff] }
  0x1b   : > { %314 = vmatpush1.msra.mxu0 %v232_v30  ;;  %475 = vmatpush1.msra.mxu1 %v234_v31  ;;  %v208_v48 = vld [vmem:[%s1704_s1 + $0x80] sm:$0xff]  ;;  %v210_v49 = vld [vmem:[%s1704_s1 + $0x90] sm:$0xff]  ;;  %v207_v50 = vld [vmem:[%s1704_s1 + $0x78] sm:$0xff] }
  0x1c   : > { %315 = vmatprep.subr.mxu0 %v228_v32  ;;  %476 = vmatprep.subr.mxu1 %v230_v33  ;;  %v209_v51 = vld [vmem:[%s1704_s1 + $0x88] sm:$0xff]  ;;  %v203_v52 = vld [vmem:[%s1704_s1 + $0x58] sm:$0xff]  ;;  %v202_v54 = vld [vmem:[%s1704_s1 + $0x50] sm:$0xff]  ;;  %v274_v33 = vlaneseq }
  0x1d   : > { %316 = vmatpush1.msra.mxu0 %v227_v34  ;;  %477 = vmatpush1.msra.mxu1 %v229_v35  ;;  %v205_v53 = vld [vmem:[%s1704_s1 + $0x68] sm:$0xff]  ;;  %v204_v55 = vld [vmem:[%s1704_s1 + $0x60] sm:$0xff]  ;;  %v198_v56 = vld [vmem:[%s1704_s1 + $0x30] sm:$0xff] }
  0x1e   : > { %317 = vmatprep.subr.mxu0 %v223_v36  ;;  %478 = vmatprep.subr.mxu1 %v225_v37  ;;  %v200_v57 = vld [vmem:[%s1704_s1 + $0x40] sm:$0xff]  ;;  %v197_v58 = vld [vmem:[%s1704_s1 + $0x28] sm:$0xff]  ;;  %v199_v59 = vld [vmem:[%s1704_s1 + $0x38] sm:$0xff]  ;;  %v275_v34 = vshrl.u32 %v274_v33, 7 }
  0x1f   : > { %318 = vmatpush1.msra.mxu0 %v222_v38  ;;  %479 = vmatpush1.msra.mxu1 %v224_v39  ;;  %v193_v60 = vld [vmem:[%s1704_s1 + $0x8] sm:$0xff]  ;;  %v195_v61 = vld [vmem:[%s1704_s1 + $0x18] sm:$0xff]  ;;  %v192_v62 = vld [vmem:[%s1704_s1] sm:$0xff] }
  0x20   : > { %319 = vmatprep.subr.mxu0 %v218_v40  ;;  %480 = vmatprep.subr.mxu1 %v220_v41  ;;  %v194_v63 = vld [vmem:[%s1704_s1 + $0x10] sm:$0xff]  ;;  %v1371_v0 = vld [vmem:[%s1362_s16] sm:$0xff]  ;;  %v271_v2 = vld [vmem:[%s1704_s1 + $0x278] sm:$0xff]  ;;  %v292_v35 = vsub.s32 4, %v275_v34  ;;  %v276_v38 = vsub.s32 0, %v275_v34  ;;  %v284_v39 = vsub.s32 2, %v275_v34 }
  0x21   : > { %320 = vmatpush1.msra.mxu0 %v217_v42  ;;  %481 = vmatpush1.msra.mxu1 %v219_v43  ;;  %v1381_v3 = vld [vmem:[%s1362_s16 + $0x8] sm:$0xff]  ;;  %v266_v4 = vld [vmem:[%s1704_s1 + $0x250] sm:$0xff]  ;;  %v1401_v7 = vld [vmem:[%s1362_s16 + $0x18] sm:$0xff]  ;;  %v280_v40 = vsub.s32 1, %v275_v34  ;;  %v288_v41 = vsub.s32 3, %v275_v34 }
  0x22   : > { %321 = vmatprep.subr.mxu0 %v213_v44  ;;  %482 = vmatprep.subr.mxu1 %v215_v45  ;;  %v1391_v5 = vld [vmem:[%s1362_s16 + $0x10] sm:$0xff]  ;;  %v261_v6 = vld [vmem:[%s1704_s1 + $0x228] sm:$0xff]  ;;  %v256_v8 = vld [vmem:[%s1704_s1 + $0x200] sm:$0xff] }
  0x23   : > { %322 = vmatpush1.msra.mxu0 %v212_v46  ;;  %483 = vmatpush1.msra.mxu1 %v214_v47  ;;  %v1411_v9 = vld [vmem:[%s1362_s16 + $0x20] sm:$0xff]  ;;  %v251_v10 = vld [vmem:[%s1704_s1 + $0x1d8] sm:$0xff]  ;;  %v1421_v11 = vld [vmem:[%s1362_s16 + $0x28] sm:$0xff] }
  0x24   : > { %323 = vmatprep.subr.mxu0 %v208_v48  ;;  %484 = vmatprep.subr.mxu1 %v210_v49  ;;  %v246_v12 = vld [vmem:[%s1704_s1 + $0x1b0] sm:$0xff]  ;;  %v241_v14 = vld [vmem:[%s1704_s1 + $0x188] sm:$0xff]  ;;  %v1441_v15 = vld [vmem:[%s1362_s16 + $0x38] sm:$0xff] }
  0x25   : > { %324 = vmatpush1.msra.mxu0 %v207_v50  ;;  %485 = vmatpush1.msra.mxu1 %v209_v51  ;;  %v1431_v13 = vld [vmem:[%s1362_s16 + $0x30] sm:$0xff]  ;;  %v236_v16 = vld [vmem:[%s1704_s1 + $0x160] sm:$0xff]  ;;  %v231_v18 = vld [vmem:[%s1704_s1 + $0x138] sm:$0xff] }
  0x26   : > { %325 = vmatprep.subr.mxu0 %v203_v52  ;;  %486 = vmatprep.subr.mxu1 %v205_v53  ;;  %v1451_v17 = vld [vmem:[%s1362_s16 + $0x40] sm:$0xff]  ;;  %v1461_v19 = vld [vmem:[%s1362_s16 + $0x48] sm:$0xff]  ;;  %v226_v20 = vld [vmem:[%s1704_s1 + $0x110] sm:$0xff] }
  0x27   : > { %326 = vmatpush1.msra.mxu0 %v202_v54  ;;  %487 = vmatpush1.msra.mxu1 %v204_v55  ;;  %v1471_v21 = vld [vmem:[%s1362_s16 + $0x50] sm:$0xff]  ;;  %v221_v22 = vld [vmem:[%s1704_s1 + $0xe8] sm:$0xff]  ;;  %v187_v23 = vld [vmem:[%s1362_s16 + $0x58] sm:$0xff] }
  0x28   : > { %327 = vmatprep.subr.mxu0 %v198_v56  ;;  %488 = vmatprep.subr.mxu1 %v200_v57  ;;  %v216_v24 = vld [vmem:[%s1704_s1 + $0xc0] sm:$0xff]  ;;  %v211_v26 = vld [vmem:[%s1704_s1 + $0x98] sm:$0xff]  ;;  %v189_v27 = vld [vmem:[%s1362_s16 + $0x68] sm:$0xff] }
  0x29   : > { %328 = vmatpush1.msra.mxu0 %v197_v58  ;;  %489 = vmatpush1.msra.mxu1 %v199_v59  ;;  %v188_v25 = vld [vmem:[%s1362_s16 + $0x60] sm:$0xff]  ;;  %v206_v28 = vld [vmem:[%s1704_s1 + $0x70] sm:$0xff]  ;;  %v201_v30 = vld [vmem:[%s1704_s1 + $0x48] sm:$0xff] }
  0x2a   : > { %329 = vmatprep.subr.mxu0 %v193_v60  ;;  %490 = vmatprep.subr.mxu1 %v195_v61  ;;  %v190_v29 = vld [vmem:[%s1362_s16 + $0x70] sm:$0xff]  ;;  %v191_v31 = vld [vmem:[%s1362_s16 + $0x78] sm:$0xff]  ;;  %v196_v32 = vld [vmem:[%s1704_s1 + $0x20] sm:$0xff] }
  0x2b   : > { %330 = vmatpush1.msra.mxu0 %v192_v62  ;;  %363 = vmatprep.mubr.f32.mxu0 %v1133_v1  ;;  %v272_v36 = vld [vmem:[%s1705_s2] sm:$0x1f] }
  0x2c   : > { %491 = vmatpush1.msra.mxu1 %v194_v63  ;;  %524 = vmatprep.mubr.f32.mxu1 %v1133_v1  ;;  %v1524_v37 = vrot.slane %v272_v36, %v292_v35  ;;  %v1526_v42 = vrot.slane %v272_v36, %v276_v38  ;;  %v1528_v43 = vrot.slane %v272_v36, %v284_v39 }
  0x2d   : > { %364 = vmatmul.mubr.f32.vlgmr.msra.gmra.mxu0 %v1371_v0  ;;  %525 = vmatmul.mubr.f32.vlgmr.msra.gmra.mxu1 %v1371_v0  ;;  %v1531_v44 = vrot.slane %v272_v36, %v280_v40  ;;  %v1533_v45 = vrot.slane %v272_v36, %v288_v41 }
  0x2e   : > { %1027 = vmatprep.subr.mxu0 %v271_v2  ;;  %1083 = vmatprep.subr.mxu1 %v271_v2 }
  0x2f   : > { %1028 = vmatpush3.msra.mxu0 %v271_v2  ;;  %1099 = vmatpush3.msra.mxu1 %v271_v2 }
  0x30   : > { %369 = vmatprep.mubr.f32.mxu0 %v1133_v1  ;;  %530 = vmatprep.mubr.f32.mxu1 %v1133_v1 }
  0x31   : > { %370 = vmatmul.mubr.f32.gmra.mxu0 %v1381_v3  ;;  %531 = vmatmul.mubr.f32.gmra.mxu1 %v1381_v3 }
  0x32   : > { %1029 = vmatprep.subr.mxu0 %v266_v4  ;;  %1084 = vmatprep.subr.mxu1 %v266_v4 }
  0x33   : > { %1030 = vmatpush3.msra.mxu0 %v266_v4  ;;  %1100 = vmatpush3.msra.mxu1 %v266_v4 }
  0x34   : > { %375 = vmatprep.mubr.f32.mxu0 %v1133_v1  ;;  %536 = vmatprep.mubr.f32.mxu1 %v1133_v1 }
  0x35   : > { %376 = vmatmul.mubr.f32.gmra.mxu0 %v1391_v5  ;;  %537 = vmatmul.mubr.f32.gmra.mxu1 %v1391_v5 }
  0x36   : > { %1031 = vmatprep.subr.mxu0 %v261_v6  ;;  %1085 = vmatprep.subr.mxu1 %v261_v6 }
  0x37   : > { %1032 = vmatpush3.msra.mxu0 %v261_v6  ;;  %1101 = vmatpush3.msra.mxu1 %v261_v6 }
  0x38   : > { %381 = vmatprep.mubr.f32.mxu0 %v1133_v1  ;;  %542 = vmatprep.mubr.f32.mxu1 %v1133_v1 }
  0x39   : > { %382 = vmatmul.mubr.f32.gmra.mxu0 %v1401_v7  ;;  %543 = vmatmul.mubr.f32.gmra.mxu1 %v1401_v7 }
  0x3a   : > { %1033 = vmatprep.subr.mxu0 %v256_v8  ;;  %1086 = vmatprep.subr.mxu1 %v256_v8 }
  0x3b   : > { %1034 = vmatpush3.msra.mxu0 %v256_v8  ;;  %1102 = vmatpush3.msra.mxu1 %v256_v8 }
  0x3c   : > { %387 = vmatprep.mubr.f32.mxu0 %v1133_v1  ;;  %548 = vmatprep.mubr.f32.mxu1 %v1133_v1 }
  0x3d   : > { %388 = vmatmul.mubr.f32.gmra.mxu0 %v1411_v9  ;;  %549 = vmatmul.mubr.f32.gmra.mxu1 %v1411_v9 }
  0x3e   : > { %1035 = vmatprep.subr.mxu0 %v251_v10  ;;  %1087 = vmatprep.subr.mxu1 %v251_v10 }
  0x3f   : > { %1036 = vmatpush3.msra.mxu0 %v251_v10  ;;  %1103 = vmatpush3.msra.mxu1 %v251_v10 }
  0x40   : > { %393 = vmatprep.mubr.f32.mxu0 %v1133_v1  ;;  %554 = vmatprep.mubr.f32.mxu1 %v1133_v1 }
  0x41   : > { %394 = vmatmul.mubr.f32.gmra.mxu0 %v1421_v11  ;;  %555 = vmatmul.mubr.f32.gmra.mxu1 %v1421_v11 }
  0x42   : > { %1037 = vmatprep.subr.mxu0 %v246_v12  ;;  %1088 = vmatprep.subr.mxu1 %v246_v12 }
  0x43   : > { %1038 = vmatpush3.msra.mxu0 %v246_v12  ;;  %1104 = vmatpush3.msra.mxu1 %v246_v12 }
  0x44   : > { %399 = vmatprep.mubr.f32.mxu0 %v1133_v1  ;;  %560 = vmatprep.mubr.f32.mxu1 %v1133_v1 }
  0x45   : > { %400 = vmatmul.mubr.f32.gmra.mxu0 %v1431_v13  ;;  %561 = vmatmul.mubr.f32.gmra.mxu1 %v1431_v13 }
  0x46   : > { %1039 = vmatprep.subr.mxu0 %v241_v14  ;;  %1089 = vmatprep.subr.mxu1 %v241_v14 }
  0x47   : > { %1040 = vmatpush3.msra.mxu0 %v241_v14  ;;  %1105 = vmatpush3.msra.mxu1 %v241_v14 }
  0x48   : > { %405 = vmatprep.mubr.f32.mxu0 %v1133_v1  ;;  %566 = vmatprep.mubr.f32.mxu1 %v1133_v1 }
  0x49   : > { %406 = vmatmul.mubr.f32.gmra.mxu0 %v1441_v15  ;;  %567 = vmatmul.mubr.f32.gmra.mxu1 %v1441_v15 }
  0x4a   : > { %1041 = vmatprep.subr.mxu0 %v236_v16  ;;  %1090 = vmatprep.subr.mxu1 %v236_v16 }
  0x4b   : > { %1042 = vmatpush3.msra.mxu0 %v236_v16  ;;  %1106 = vmatpush3.msra.mxu1 %v236_v16 }
  0x4c   : > { %411 = vmatprep.mubr.f32.mxu0 %v1133_v1  ;;  %572 = vmatprep.mubr.f32.mxu1 %v1133_v1 }
  0x4d   : > { %412 = vmatmul.mubr.f32.gmra.mxu0 %v1451_v17  ;;  %573 = vmatmul.mubr.f32.gmra.mxu1 %v1451_v17 }
  0x4e   : > { %1043 = vmatprep.subr.mxu0 %v231_v18  ;;  %1091 = vmatprep.subr.mxu1 %v231_v18 }
  0x4f   : > { %1044 = vmatpush3.msra.mxu0 %v231_v18  ;;  %1107 = vmatpush3.msra.mxu1 %v231_v18 }
  0x50   : > { %417 = vmatprep.mubr.f32.mxu0 %v1133_v1  ;;  %578 = vmatprep.mubr.f32.mxu1 %v1133_v1 }
  0x51   : > { %418 = vmatmul.mubr.f32.gmra.mxu0 %v1461_v19  ;;  %579 = vmatmul.mubr.f32.gmra.mxu1 %v1461_v19 }
  0x52   : > { %1045 = vmatprep.subr.mxu0 %v226_v20  ;;  %1092 = vmatprep.subr.mxu1 %v226_v20 }
  0x53   : > { %1046 = vmatpush3.msra.mxu0 %v226_v20  ;;  %1108 = vmatpush3.msra.mxu1 %v226_v20 }
  0x54   : > { %423 = vmatprep.mubr.f32.mxu0 %v1133_v1  ;;  %584 = vmatprep.mubr.f32.mxu1 %v1133_v1 }
  0x55   : > { %424 = vmatmul.mubr.f32.gmra.mxu0 %v1471_v21  ;;  %585 = vmatmul.mubr.f32.gmra.mxu1 %v1471_v21 }
  0x56   : > { %1047 = vmatprep.subr.mxu0 %v221_v22  ;;  %1093 = vmatprep.subr.mxu1 %v221_v22 }
  0x57   : > { %1048 = vmatpush3.msra.mxu0 %v221_v22  ;;  %1109 = vmatpush3.msra.mxu1 %v221_v22 }
  0x58   : > { %429 = vmatprep.mubr.f32.mxu0 %v1133_v1  ;;  %590 = vmatprep.mubr.f32.mxu1 %v1133_v1 }
  0x59   : > { %430 = vmatmul.mubr.f32.gmra.mxu0 %v187_v23  ;;  %591 = vmatmul.mubr.f32.gmra.mxu1 %v187_v23 }
  0x5a   : > { %1049 = vmatprep.subr.mxu0 %v216_v24  ;;  %1094 = vmatprep.subr.mxu1 %v216_v24 }
  0x5b   : > { %1050 = vmatpush3.msra.mxu0 %v216_v24  ;;  %1110 = vmatpush3.msra.mxu1 %v216_v24 }
  0x5c   : > { %435 = vmatprep.mubr.f32.mxu0 %v1133_v1  ;;  %596 = vmatprep.mubr.f32.mxu1 %v1133_v1 }
  0x5d   : > { %436 = vmatmul.mubr.f32.gmra.mxu0 %v188_v25  ;;  %597 = vmatmul.mubr.f32.gmra.mxu1 %v188_v25 }
  0x5e   : > { %1051 = vmatprep.subr.mxu0 %v211_v26  ;;  %1095 = vmatprep.subr.mxu1 %v211_v26 }
  0x5f   : > { %1052 = vmatpush3.msra.mxu0 %v211_v26  ;;  %1111 = vmatpush3.msra.mxu1 %v211_v26 }
  0x60   : > { %441 = vmatprep.mubr.f32.mxu0 %v1133_v1  ;;  %602 = vmatprep.mubr.f32.mxu1 %v1133_v1 }
  0x61   : > { %442 = vmatmul.mubr.f32.gmra.mxu0 %v189_v27  ;;  %603 = vmatmul.mubr.f32.gmra.mxu1 %v189_v27 }
  0x62   : > { %1053 = vmatprep.subr.mxu0 %v206_v28  ;;  %1096 = vmatprep.subr.mxu1 %v206_v28 }
  0x63   : > { %1054 = vmatpush3.msra.mxu0 %v206_v28  ;;  %1112 = vmatpush3.msra.mxu1 %v206_v28 }
  0x64   : > { %447 = vmatprep.mubr.f32.mxu0 %v1133_v1  ;;  %608 = vmatprep.mubr.f32.mxu1 %v1133_v1 }
  0x65   : > { %448 = vmatmul.mubr.f32.gmra.mxu0 %v190_v29  ;;  %609 = vmatmul.mubr.f32.gmra.mxu1 %v190_v29 }
  0x66   : > { %1055 = vmatprep.subr.mxu0 %v201_v30  ;;  %1097 = vmatprep.subr.mxu1 %v201_v30 }
  0x67   : > { %1056 = vmatpush3.msra.mxu0 %v201_v30  ;;  %1113 = vmatpush3.msra.mxu1 %v201_v30 }
  0x68   : > { %453 = vmatprep.mubr.f32.mxu0 %v1133_v1  ;;  %614 = vmatprep.mubr.f32.mxu1 %v1133_v1 }
  0x69   : > { %454 = vmatmul.mubr.f32.gmra.mxu0 %v191_v31  ;;  %615 = vmatmul.mubr.f32.gmra.mxu1 %v191_v31 }
  0x6a   : > { %1057 = vmatprep.subr.mxu0 %v196_v32  ;;  %1098 = vmatprep.subr.mxu1 %v196_v32 }
  0x6b   : > { %1058 = vmatpush3.msra.mxu0 %v196_v32  ;;  %1114 = vmatpush3.msra.mxu1 %v196_v32 }
  0x6c   : > { %1059 = vmatprep.mubr.f32.mxu0 %v1371_v0  ;;  %1071 = vmatprep.mubr.f32.mxu1 %v1451_v17 }
  0x6d   : > { %1060 = vmatmul.mubr.f32.vlgmr.msra.gmra.mxu0 %v1381_v3  ;;  %1072 = vmatmul.mubr.f32.vlgmr.msra.gmra.mxu1 %v1461_v19 }
  0x6e   : > { %1062 = vmatprep.mubr.f32.mxu0 %v1391_v5  ;;  %1074 = vmatprep.mubr.f32.mxu1 %v1471_v21 }
  0x71   : > { %1063 = vmatmul.mubr.f32.gmra.mxu0 %v1401_v7  ;;  %1075 = vmatmul.mubr.f32.gmra.mxu1 %v187_v23 }
  0x72   : > { %1065 = vmatprep.mubr.f32.mxu0 %v1411_v9  ;;  %1077 = vmatprep.mubr.f32.mxu1 %v188_v25 }
  0x75   : > { %1066 = vmatmul.mubr.f32.gmra.mxu0 %v1421_v11  ;;  %1078 = vmatmul.mubr.f32.gmra.mxu1 %v189_v27 }
  0x76   : > { %1068 = vmatprep.mubr.f32.mxu0 %v1431_v13  ;;  %1080 = vmatprep.mubr.f32.mxu1 %v190_v29 }
  0x79   : > { %1069 = vmatmul.mubr.f32.gmra.mxu0 %v1441_v15  ;;  %1081 = vmatmul.mubr.f32.gmra.mxu1 %v191_v31 }
  0xed   : > { %v365_v46 = vpop.f32.mrf.mxu0  ;;  %v526_v47 = vpop.f32.mrf.mxu1 }
  0xee   : > { %v366_v48 = vadd.f32 %v365_v46, %v1526_v42  ;;  %v527_v49 = vadd.f32 %v526_v47, %v1528_v43 }
  0xef   : > { %v367_v50 = vpop.f32.mrf.mxu0  ;;  %v528_v51 = vpop.f32.mrf.mxu1 }
  0xf0   : > { %v766_v52 = vmax.f32 %v366_v48, 0.0  ;;  %v768_v53 = vmax.f32 %v527_v49, 0.0  ;;  %v368_v54 = vadd.f32 %v367_v50, %v1531_v44  ;;  %v529_v55 = vadd.f32 %v528_v51, %v1533_v45 }
  0xf1   : > { %v371_v56 = vpop.f32.mrf.mxu0  ;;  %v532_v57 = vpop.f32.mrf.mxu1 }
  0xf2   : > { %846 = vst [vmem:[%s1540_s7] sm:$0xff] %v766_v52  ;;  %848 = vst [vmem:[%s1540_s7 + $0x10] sm:$0xff] %v768_v53  ;;  %v767_v58 = vmax.f32 %v368_v54, 0.0  ;;  %v769_v59 = vmax.f32 %v529_v55, 0.0  ;;  %v372_v60 = vadd.f32 %v371_v56, %v1526_v42  ;;  %v533_v61 = vadd.f32 %v532_v57, %v1528_v43 }
  0xf3   : > { %v373_v62 = vpop.f32.mrf.mxu0  ;;  %v534_v63 = vpop.f32.mrf.mxu1 }
  0xf4   : > { %847 = vst [vmem:[%s1540_s7 + $0x8] sm:$0xff] %v767_v58  ;;  %849 = vst [vmem:[%s1540_s7 + $0x18] sm:$0xff] %v769_v59  ;;  %v771_v0 = vmax.f32 %v372_v60, 0.0  ;;  %v773_v1 = vmax.f32 %v533_v61, 0.0  ;;  %v374_v2 = vadd.f32 %v373_v62, %v1531_v44  ;;  %v535_v3 = vadd.f32 %v534_v63, %v1533_v45 }
  0xf5   : > { %v377_v4 = vpop.f32.mrf.mxu0  ;;  %v538_v5 = vpop.f32.mrf.mxu1 }
  0xf6   : > { %851 = vst [vmem:[%s1540_s7 + $0x28] sm:$0xff] %v771_v0  ;;  %853 = vst [vmem:[%s1540_s7 + $0x38] sm:$0xff] %v773_v1  ;;  %v772_v6 = vmax.f32 %v374_v2, 0.0  ;;  %v774_v7 = vmax.f32 %v535_v3, 0.0  ;;  %v378_v8 = vadd.f32 %v377_v4, %v1526_v42  ;;  %v539_v9 = vadd.f32 %v538_v5, %v1528_v43 }
  0xf7   : > { %v379_v10 = vpop.f32.mrf.mxu0  ;;  %v540_v11 = vpop.f32.mrf.mxu1 }
  0xf8   : > { %852 = vst [vmem:[%s1540_s7 + $0x30] sm:$0xff] %v772_v6  ;;  %854 = vst [vmem:[%s1540_s7 + $0x40] sm:$0xff] %v774_v7  ;;  %v776_v12 = vmax.f32 %v378_v8, 0.0  ;;  %v778_v13 = vmax.f32 %v539_v9, 0.0  ;;  %v380_v14 = vadd.f32 %v379_v10, %v1531_v44  ;;  %v541_v15 = vadd.f32 %v540_v11, %v1533_v45 }
  0xf9   : > { %v383_v16 = vpop.f32.mrf.mxu0  ;;  %v544_v17 = vpop.f32.mrf.mxu1 }
  0xfa   : > { %856 = vst [vmem:[%s1540_s7 + $0x50] sm:$0xff] %v776_v12  ;;  %858 = vst [vmem:[%s1540_s7 + $0x60] sm:$0xff] %v778_v13  ;;  %v777_v18 = vmax.f32 %v380_v14, 0.0  ;;  %v779_v19 = vmax.f32 %v541_v15, 0.0  ;;  %v384_v20 = vadd.f32 %v383_v16, %v1526_v42  ;;  %v545_v21 = vadd.f32 %v544_v17, %v1528_v43 }
  0xfb   : > { %v385_v22 = vpop.f32.mrf.mxu0  ;;  %v546_v23 = vpop.f32.mrf.mxu1 }
  0xfc   : > { %857 = vst [vmem:[%s1540_s7 + $0x58] sm:$0xff] %v777_v18  ;;  %859 = vst [vmem:[%s1540_s7 + $0x68] sm:$0xff] %v779_v19  ;;  %v781_v24 = vmax.f32 %v384_v20, 0.0  ;;  %v783_v25 = vmax.f32 %v545_v21, 0.0  ;;  %v386_v26 = vadd.f32 %v385_v22, %v1531_v44  ;;  %v547_v27 = vadd.f32 %v546_v23, %v1533_v45 }
  0xfd   : > { %v389_v28 = vpop.f32.mrf.mxu0  ;;  %v550_v29 = vpop.f32.mrf.mxu1 }
  0xfe   : > { %861 = vst [vmem:[%s1540_s7 + $0x78] sm:$0xff] %v781_v24  ;;  %863 = vst [vmem:[%s1540_s7 + $0x88] sm:$0xff] %v783_v25  ;;  %v782_v30 = vmax.f32 %v386_v26, 0.0  ;;  %v784_v31 = vmax.f32 %v547_v27, 0.0  ;;  %v390_v32 = vadd.f32 %v389_v28, %v1526_v42  ;;  %v551_v33 = vadd.f32 %v550_v29, %v1528_v43 }
  0xff   : > { %v391_v34 = vpop.f32.mrf.mxu0  ;;  %v552_v35 = vpop.f32.mrf.mxu1 }
 0x100   : > { %862 = vst [vmem:[%s1540_s7 + $0x80] sm:$0xff] %v782_v30  ;;  %864 = vst [vmem:[%s1540_s7 + $0x90] sm:$0xff] %v784_v31  ;;  %v786_v36 = vmax.f32 %v390_v32, 0.0  ;;  %v788_v38 = vmax.f32 %v551_v33, 0.0  ;;  %v392_v39 = vadd.f32 %v391_v34, %v1531_v44  ;;  %v553_v40 = vadd.f32 %v552_v35, %v1533_v45 }
 0x101   : > { %v395_v41 = vpop.f32.mrf.mxu0  ;;  %v556_v46 = vpop.f32.mrf.mxu1 }
 0x102   : > { %866 = vst [vmem:[%s1540_s7 + $0xa0] sm:$0xff] %v786_v36  ;;  %868 = vst [vmem:[%s1540_s7 + $0xb0] sm:$0xff] %v788_v38  ;;  %v787_v47 = vmax.f32 %v392_v39, 0.0  ;;  %v789_v48 = vmax.f32 %v553_v40, 0.0  ;;  %v396_v49 = vadd.f32 %v395_v41, %v1526_v42  ;;  %v557_v50 = vadd.f32 %v556_v46, %v1528_v43 }
 0x103   : > { %v397_v51 = vpop.f32.mrf.mxu0  ;;  %v558_v52 = vpop.f32.mrf.mxu1 }
 0x104   : > { %867 = vst [vmem:[%s1540_s7 + $0xa8] sm:$0xff] %v787_v47  ;;  %869 = vst [vmem:[%s1540_s7 + $0xb8] sm:$0xff] %v789_v48  ;;  %v791_v53 = vmax.f32 %v396_v49, 0.0  ;;  %v793_v54 = vmax.f32 %v557_v50, 0.0  ;;  %v398_v55 = vadd.f32 %v397_v51, %v1531_v44  ;;  %v559_v56 = vadd.f32 %v558_v52, %v1533_v45 }
 0x105   : > { %v401_v57 = vpop.f32.mrf.mxu0  ;;  %v562_v58 = vpop.f32.mrf.mxu1 }
 0x106   : > { %871 = vst [vmem:[%s1540_s7 + $0xc8] sm:$0xff] %v791_v53  ;;  %873 = vst [vmem:[%s1540_s7 + $0xd8] sm:$0xff] %v793_v54  ;;  %v792_v59 = vmax.f32 %v398_v55, 0.0  ;;  %v794_v60 = vmax.f32 %v559_v56, 0.0  ;;  %v402_v61 = vadd.f32 %v401_v57, %v1526_v42  ;;  %v563_v62 = vadd.f32 %v562_v58, %v1528_v43 }
 0x107   : > { %v403_v63 = vpop.f32.mrf.mxu0  ;;  %v564_v0 = vpop.f32.mrf.mxu1 }
 0x108   : > { %872 = vst [vmem:[%s1540_s7 + $0xd0] sm:$0xff] %v792_v59  ;;  %874 = vst [vmem:[%s1540_s7 + $0xe0] sm:$0xff] %v794_v60  ;;  %v796_v1 = vmax.f32 %v402_v61, 0.0  ;;  %v798_v2 = vmax.f32 %v563_v62, 0.0  ;;  %v404_v3 = vadd.f32 %v403_v63, %v1531_v44  ;;  %v565_v4 = vadd.f32 %v564_v0, %v1533_v45 }
 0x109   : > { %v407_v5 = vpop.f32.mrf.mxu0  ;;  %v568_v6 = vpop.f32.mrf.mxu1 }
 0x10a   : > { %876 = vst [vmem:[%s1540_s7 + $0xf0] sm:$0xff] %v796_v1  ;;  %878 = vst [vmem:[%s1540_s7 + $0x100] sm:$0xff] %v798_v2  ;;  %v797_v7 = vmax.f32 %v404_v3, 0.0  ;;  %v799_v8 = vmax.f32 %v565_v4, 0.0  ;;  %v408_v9 = vadd.f32 %v407_v5, %v1526_v42  ;;  %v569_v10 = vadd.f32 %v568_v6, %v1528_v43 }
 0x10b   : > { %v409_v11 = vpop.f32.mrf.mxu0  ;;  %v570_v12 = vpop.f32.mrf.mxu1 }
 0x10c   : > { %877 = vst [vmem:[%s1540_s7 + $0xf8] sm:$0xff] %v797_v7  ;;  %879 = vst [vmem:[%s1540_s7 + $0x108] sm:$0xff] %v799_v8  ;;  %v801_v13 = vmax.f32 %v408_v9, 0.0  ;;  %v803_v14 = vmax.f32 %v569_v10, 0.0  ;;  %v410_v15 = vadd.f32 %v409_v11, %v1531_v44  ;;  %v571_v16 = vadd.f32 %v570_v12, %v1533_v45 }
 0x10d   : > { %v413_v17 = vpop.f32.mrf.mxu0  ;;  %v574_v18 = vpop.f32.mrf.mxu1 }
 0x10e   : > { %881 = vst [vmem:[%s1540_s7 + $0x118] sm:$0xff] %v801_v13  ;;  %883 = vst [vmem:[%s1540_s7 + $0x128] sm:$0xff] %v803_v14  ;;  %v802_v19 = vmax.f32 %v410_v15, 0.0  ;;  %v804_v20 = vmax.f32 %v571_v16, 0.0  ;;  %v414_v21 = vadd.f32 %v413_v17, %v1526_v42  ;;  %v575_v22 = vadd.f32 %v574_v18, %v1528_v43 }
 0x10f   : > { %v415_v23 = vpop.f32.mrf.mxu0  ;;  %v576_v24 = vpop.f32.mrf.mxu1 }
 0x110   : > { %882 = vst [vmem:[%s1540_s7 + $0x120] sm:$0xff] %v802_v19  ;;  %884 = vst [vmem:[%s1540_s7 + $0x130] sm:$0xff] %v804_v20  ;;  %v806_v25 = vmax.f32 %v414_v21, 0.0  ;;  %v808_v26 = vmax.f32 %v575_v22, 0.0  ;;  %v416_v27 = vadd.f32 %v415_v23, %v1531_v44  ;;  %v577_v28 = vadd.f32 %v576_v24, %v1533_v45 }
 0x111   : > { %v419_v29 = vpop.f32.mrf.mxu0  ;;  %v580_v30 = vpop.f32.mrf.mxu1 }
 0x112   : > { %886 = vst [vmem:[%s1540_s7 + $0x140] sm:$0xff] %v806_v25  ;;  %888 = vst [vmem:[%s1540_s7 + $0x150] sm:$0xff] %v808_v26  ;;  %v807_v31 = vmax.f32 %v416_v27, 0.0  ;;  %v809_v32 = vmax.f32 %v577_v28, 0.0  ;;  %v420_v33 = vadd.f32 %v419_v29, %v1526_v42  ;;  %v581_v34 = vadd.f32 %v580_v30, %v1528_v43 }
 0x113   : > { %v421_v35 = vpop.f32.mrf.mxu0  ;;  %v582_v36 = vpop.f32.mrf.mxu1 }
 0x114   : > { %887 = vst [vmem:[%s1540_s7 + $0x148] sm:$0xff] %v807_v31  ;;  %889 = vst [vmem:[%s1540_s7 + $0x158] sm:$0xff] %v809_v32  ;;  %v811_v38 = vmax.f32 %v420_v33, 0.0  ;;  %v813_v39 = vmax.f32 %v581_v34, 0.0  ;;  %v422_v40 = vadd.f32 %v421_v35, %v1531_v44  ;;  %v583_v41 = vadd.f32 %v582_v36, %v1533_v45 }
 0x115   : > { %v425_v46 = vpop.f32.mrf.mxu0  ;;  %v586_v47 = vpop.f32.mrf.mxu1 }
 0x116   : > { %891 = vst [vmem:[%s1540_s7 + $0x168] sm:$0xff] %v811_v38  ;;  %893 = vst [vmem:[%s1540_s7 + $0x178] sm:$0xff] %v813_v39  ;;  %v812_v48 = vmax.f32 %v422_v40, 0.0  ;;  %v814_v49 = vmax.f32 %v583_v41, 0.0  ;;  %v426_v50 = vadd.f32 %v425_v46, %v1526_v42  ;;  %v587_v51 = vadd.f32 %v586_v47, %v1528_v43 }
 0x117   : > { %v427_v52 = vpop.f32.mrf.mxu0  ;;  %v588_v53 = vpop.f32.mrf.mxu1 }
 0x118   : > { %892 = vst [vmem:[%s1540_s7 + $0x170] sm:$0xff] %v812_v48  ;;  %894 = vst [vmem:[%s1540_s7 + $0x180] sm:$0xff] %v814_v49  ;;  %v816_v54 = vmax.f32 %v426_v50, 0.0  ;;  %v818_v55 = vmax.f32 %v587_v51, 0.0  ;;  %v428_v56 = vadd.f32 %v427_v52, %v1531_v44  ;;  %v589_v57 = vadd.f32 %v588_v53, %v1533_v45 }
 0x119   : > { %v431_v58 = vpop.f32.mrf.mxu0  ;;  %v592_v59 = vpop.f32.mrf.mxu1 }
 0x11a   : > { %896 = vst [vmem:[%s1540_s7 + $0x190] sm:$0xff] %v816_v54  ;;  %898 = vst [vmem:[%s1540_s7 + $0x1a0] sm:$0xff] %v818_v55  ;;  %v817_v60 = vmax.f32 %v428_v56, 0.0  ;;  %v819_v61 = vmax.f32 %v589_v57, 0.0  ;;  %v432_v62 = vadd.f32 %v431_v58, %v1526_v42  ;;  %v593_v63 = vadd.f32 %v592_v59, %v1528_v43 }
 0x11b   : > { %v433_v0 = vpop.f32.mrf.mxu0  ;;  %v594_v1 = vpop.f32.mrf.mxu1 }
 0x11c   : > { %897 = vst [vmem:[%s1540_s7 + $0x198] sm:$0xff] %v817_v60  ;;  %899 = vst [vmem:[%s1540_s7 + $0x1a8] sm:$0xff] %v819_v61  ;;  %v821_v2 = vmax.f32 %v432_v62, 0.0  ;;  %v823_v3 = vmax.f32 %v593_v63, 0.0  ;;  %v434_v4 = vadd.f32 %v433_v0, %v1531_v44  ;;  %v595_v5 = vadd.f32 %v594_v1, %v1533_v45 }
 0x11d   : > { %v437_v6 = vpop.f32.mrf.mxu0  ;;  %v598_v7 = vpop.f32.mrf.mxu1 }
 0x11e   : > { %901 = vst [vmem:[%s1540_s7 + $0x1b8] sm:$0xff] %v821_v2  ;;  %903 = vst [vmem:[%s1540_s7 + $0x1c8] sm:$0xff] %v823_v3  ;;  %v822_v8 = vmax.f32 %v434_v4, 0.0  ;;  %v824_v9 = vmax.f32 %v595_v5, 0.0  ;;  %v438_v10 = vadd.f32 %v437_v6, %v1526_v42  ;;  %v599_v11 = vadd.f32 %v598_v7, %v1528_v43 }
 0x11f   : > { %v439_v12 = vpop.f32.mrf.mxu0  ;;  %v600_v13 = vpop.f32.mrf.mxu1 }
 0x120   : > { %902 = vst [vmem:[%s1540_s7 + $0x1c0] sm:$0xff] %v822_v8  ;;  %904 = vst [vmem:[%s1540_s7 + $0x1d0] sm:$0xff] %v824_v9  ;;  %v826_v14 = vmax.f32 %v438_v10, 0.0  ;;  %v828_v15 = vmax.f32 %v599_v11, 0.0  ;;  %v440_v16 = vadd.f32 %v439_v12, %v1531_v44  ;;  %v601_v17 = vadd.f32 %v600_v13, %v1533_v45 }
 0x121   : > { %v443_v18 = vpop.f32.mrf.mxu0  ;;  %v604_v19 = vpop.f32.mrf.mxu1 }
 0x122   : > { %906 = vst [vmem:[%s1540_s7 + $0x1e0] sm:$0xff] %v826_v14  ;;  %908 = vst [vmem:[%s1540_s7 + $0x1f0] sm:$0xff] %v828_v15  ;;  %v827_v20 = vmax.f32 %v440_v16, 0.0  ;;  %v829_v21 = vmax.f32 %v601_v17, 0.0  ;;  %v444_v22 = vadd.f32 %v443_v18, %v1526_v42  ;;  %v605_v23 = vadd.f32 %v604_v19, %v1528_v43 }
 0x123   : > { %v445_v24 = vpop.f32.mrf.mxu0  ;;  %v606_v25 = vpop.f32.mrf.mxu1 }
 0x124   : > { %907 = vst [vmem:[%s1540_s7 + $0x1e8] sm:$0xff] %v827_v20  ;;  %909 = vst [vmem:[%s1540_s7 + $0x1f8] sm:$0xff] %v829_v21  ;;  %v831_v26 = vmax.f32 %v444_v22, 0.0  ;;  %v833_v27 = vmax.f32 %v605_v23, 0.0  ;;  %v446_v28 = vadd.f32 %v445_v24, %v1531_v44  ;;  %v607_v29 = vadd.f32 %v606_v25, %v1533_v45 }
 0x125   : > { %v449_v30 = vpop.f32.mrf.mxu0  ;;  %v610_v31 = vpop.f32.mrf.mxu1 }
 0x126   : > { %911 = vst [vmem:[%s1540_s7 + $0x208] sm:$0xff] %v831_v26  ;;  %913 = vst [vmem:[%s1540_s7 + $0x218] sm:$0xff] %v833_v27  ;;  %v832_v32 = vmax.f32 %v446_v28, 0.0  ;;  %v834_v33 = vmax.f32 %v607_v29, 0.0  ;;  %v450_v34 = vadd.f32 %v449_v30, %v1526_v42  ;;  %v611_v35 = vadd.f32 %v610_v31, %v1528_v43 }
 0x127   : > { %v451_v36 = vpop.f32.mrf.mxu0  ;;  %v612_v38 = vpop.f32.mrf.mxu1 }
 0x128   : > { %912 = vst [vmem:[%s1540_s7 + $0x210] sm:$0xff] %v832_v32  ;;  %914 = vst [vmem:[%s1540_s7 + $0x220] sm:$0xff] %v834_v33  ;;  %v836_v39 = vmax.f32 %v450_v34, 0.0  ;;  %v838_v40 = vmax.f32 %v611_v35, 0.0  ;;  %v452_v41 = vadd.f32 %v451_v36, %v1531_v44  ;;  %v613_v46 = vadd.f32 %v612_v38, %v1533_v45 }
 0x129   : > { %v455_v47 = vpop.f32.mrf.mxu0  ;;  %v616_v48 = vpop.f32.mrf.mxu1 }
 0x12a   : > { %916 = vst [vmem:[%s1540_s7 + $0x230] sm:$0xff] %v836_v39  ;;  %918 = vst [vmem:[%s1540_s7 + $0x240] sm:$0xff] %v838_v40  ;;  %v837_v49 = vmax.f32 %v452_v41, 0.0  ;;  %v839_v50 = vmax.f32 %v613_v46, 0.0  ;;  %v456_v51 = vadd.f32 %v455_v47, %v1526_v42  ;;  %v617_v52 = vadd.f32 %v616_v48, %v1528_v43 }
 0x12b   : > { %v457_v53 = vpop.f32.mrf.mxu0  ;;  %v618_v54 = vpop.f32.mrf.mxu1 }
 0x12c   : > { %917 = vst [vmem:[%s1540_s7 + $0x238] sm:$0xff] %v837_v49  ;;  %919 = vst [vmem:[%s1540_s7 + $0x248] sm:$0xff] %v839_v50  ;;  %v841_v55 = vmax.f32 %v456_v51, 0.0  ;;  %v843_v56 = vmax.f32 %v617_v52, 0.0  ;;  %v458_v57 = vadd.f32 %v457_v53, %v1531_v44  ;;  %v619_v58 = vadd.f32 %v618_v54, %v1533_v45 }
 0x12d   : > { %v1061_v59 = vpop.f32.mrf.mxu0  ;;  %v1073_v60 = vpop.f32.mrf.mxu1 }
 0x12e   : > { %921 = vst [vmem:[%s1540_s7 + $0x258] sm:$0xff] %v841_v55  ;;  %923 = vst [vmem:[%s1540_s7 + $0x268] sm:$0xff] %v843_v56  ;;  %v842_v42 = vmax.f32 %v458_v57, 0.0  ;;  %v844_v43 = vmax.f32 %v619_v58, 0.0  ;;  %v693_v61 = vadd.f32 %v1061_v59, %v1524_v37  ;;  %v733_v62 = vadd.f32 %v1073_v60, %v1524_v37 }
 0x12f   : > { %v687_v63 = vpop.f32.mrf.mxu0  ;;  %v727_v0 = vpop.f32.mrf.mxu1 }
 0x130   : > { %922 = vst [vmem:[%s1540_s7 + $0x260] sm:$0xff] %v842_v42  ;;  %924 = vst [vmem:[%s1540_s7 + $0x270] sm:$0xff] %v844_v43  ;;  %v775_v44 = vmax.f32 %v693_v61, 0.0  ;;  %v815_v45 = vmax.f32 %v733_v62, 0.0  ;;  %v688_v1 = vadd.f32 %v687_v63, %v1524_v37  ;;  %v728_v2 = vadd.f32 %v727_v0, %v1524_v37 }
 0x131   : > { %v1064_v3 = vpop.f32.mrf.mxu0  ;;  %v1076_v4 = vpop.f32.mrf.mxu1 }
 0x132   : > { %855 = vst [vmem:[%s1540_s7 + $0x48] sm:$0xff] %v775_v44  ;;  %895 = vst [vmem:[%s1540_s7 + $0x188] sm:$0xff] %v815_v45  ;;  %v770_v5 = vmax.f32 %v688_v1, 0.0  ;;  %v810_v6 = vmax.f32 %v728_v2, 0.0  ;;  %v703_v7 = vadd.f32 %v1064_v3, %v1524_v37  ;;  %v743_v8 = vadd.f32 %v1076_v4, %v1524_v37 }
 0x133   : > { %v697_v9 = vpop.f32.mrf.mxu0  ;;  %v737_v10 = vpop.f32.mrf.mxu1 }
 0x134   : > { %850 = vst [vmem:[%s1540_s7 + $0x20] sm:$0xff] %v770_v5  ;;  %890 = vst [vmem:[%s1540_s7 + $0x160] sm:$0xff] %v810_v6  ;;  %v785_v11 = vmax.f32 %v703_v7, 0.0  ;;  %v825_v12 = vmax.f32 %v743_v8, 0.0  ;;  %v698_v13 = vadd.f32 %v697_v9, %v1524_v37  ;;  %v738_v14 = vadd.f32 %v737_v10, %v1524_v37 }
 0x135   : > { %v1067_v15 = vpop.f32.mrf.mxu0  ;;  %v1079_v16 = vpop.f32.mrf.mxu1 }
 0x136   : > { %865 = vst [vmem:[%s1540_s7 + $0x98] sm:$0xff] %v785_v11  ;;  %905 = vst [vmem:[%s1540_s7 + $0x1d8] sm:$0xff] %v825_v12  ;;  %v780_v17 = vmax.f32 %v698_v13, 0.0  ;;  %v820_v18 = vmax.f32 %v738_v14, 0.0  ;;  %v713_v19 = vadd.f32 %v1067_v15, %v1524_v37  ;;  %v753_v20 = vadd.f32 %v1079_v16, %v1524_v37 }
 0x137   : > { %v707_v21 = vpop.f32.mrf.mxu0  ;;  %v747_v22 = vpop.f32.mrf.mxu1 }
 0x138   : > { %860 = vst [vmem:[%s1540_s7 + $0x70] sm:$0xff] %v780_v17  ;;  %900 = vst [vmem:[%s1540_s7 + $0x1b0] sm:$0xff] %v820_v18  ;;  %v795_v23 = vmax.f32 %v713_v19, 0.0  ;;  %v835_v24 = vmax.f32 %v753_v20, 0.0  ;;  %v708_v25 = vadd.f32 %v707_v21, %v1524_v37  ;;  %v748_v26 = vadd.f32 %v747_v22, %v1524_v37 }
 0x139   : > { %v1070_v27 = vpop.f32.mrf.mxu0  ;;  %v1082_v28 = vpop.f32.mrf.mxu1 }
 0x13a   : > { %875 = vst [vmem:[%s1540_s7 + $0xe8] sm:$0xff] %v795_v23  ;;  %915 = vst [vmem:[%s1540_s7 + $0x228] sm:$0xff] %v835_v24  ;;  %v790_v29 = vmax.f32 %v708_v25, 0.0  ;;  %v830_v30 = vmax.f32 %v748_v26, 0.0  ;;  %v723_v31 = vadd.f32 %v1070_v27, %v1524_v37  ;;  %v763_v32 = vadd.f32 %v1082_v28, %v1524_v37 }
 0x13b   : > { %v717_v33 = vpop.f32.mrf.mxu0  ;;  %v757_v34 = vpop.f32.mrf.mxu1 }
 0x13c   : > { %870 = vst [vmem:[%s1540_s7 + $0xc0] sm:$0xff] %v790_v29  ;;  %910 = vst [vmem:[%s1540_s7 + $0x200] sm:$0xff] %v830_v30  ;;  %v805_v35 = vmax.f32 %v723_v31, 0.0  ;;  %v845_v36 = vmax.f32 %v763_v32, 0.0  ;;  %v718_v38 = vadd.f32 %v717_v33, %v1524_v37  ;;  %v758_v39 = vadd.f32 %v757_v34, %v1524_v37 }
 0x13e   : > { %885 = vst [vmem:[%s1540_s7 + $0x138] sm:$0xff] %v805_v35  ;;  %925 = vst [vmem:[%s1540_s7 + $0x278] sm:$0xff] %v845_v36  ;;  %v800_v40 = vmax.f32 %v718_v38, 0.0  ;;  %v840_v41 = vmax.f32 %v758_v39, 0.0 }
 0x140   : > { %880 = vst [vmem:[%s1540_s7 + $0x110] sm:$0xff] %v800_v40  ;;  %920 = vst [vmem:[%s1540_s7 + $0x250] sm:$0xff] %v840_v41 }
 0x141 PF: > { %s13_s12 = sadd.s32 1, %s1131_s12  }
 0x142   : > { %p10_p4 = scmp.ge.s32.totalorder %s13_s12, 4  }
 0x144   :  { %12 = sbr.rel (!%p10_p4) target bundleno = 1 (0x1), region = 62 }

// kernel: nv_encoder_forward.14
= control target key start
LH: loop header
LB: loop body
LE: loop exit
PB: predicated region body
PF: predicated region fallthrough
CT: control target
= control target key end

     0   :  { %s3209_s0 = inlined_call_operand.vmem [shape: bf16[256,128], index: 0, kind: input, shape index: {}]   ;;  %s3210_s1 = inlined_call_operand.vmem [shape: bf16[384,128], index: 1, kind: input, shape index: {}]   ;;  %s3211_s2 = inlined_call_operand.vmem [shape: f32[256,640], index: 2, kind: input, shape index: {}]   ;;  %s3212_s3 = inlined_call_operand.vmem [shape: f32[384,512], index: 3, kind: input, shape index: {}]   ;;  %s3213_s4 = inlined_call_operand.vmem [shape: f32[128,2], index: 4, kind: input, shape index: {}]   ;;  %s3214_s5 = inlined_call_operand.vmem [shape: f32[128,128], index: 5, kind: input, shape index: {}]   ;;  %s3215_s6 = inlined_call_operand.hbm [shape: f32[128,128], index: 6, kind: output, shape index: {}]  }
   0x1   :  { %v1620_v0 = vld [vmem:[%s3209_s0] sm:$0xff]   ;;  %v1779_v6 = vld [vmem:[%s3209_s0 + $0x8] sm:$0xff]   ;;  %v1780_v24 = vld [vmem:[%s3209_s0 + $0x10] sm:$0xff]  }
   0x2   :  { %v1786_v1 = vld [vmem:[%s3209_s0 + $0x40] sm:$0xff]   ;;  %v1621_v2 = vunpack.c.l.bf16 %v1620_v0  ;;  %v1622_v4 = vunpack.c.h.bf16 %v1620_v0  ;;  %v1787_v7 = vld [vmem:[%s3209_s0 + $0x48] sm:$0xff]   ;;  %v1625_v12 = vunpack.c.l.bf16 %v1779_v6  ;;  %v1626_v22 = vunpack.c.h.bf16 %v1779_v6  ;;  %v1788_v25 = vld [vmem:[%s3209_s0 + $0x50] sm:$0xff]  }
   0x3   :  { %v1653_v3 = vunpack.c.l.bf16 %v1786_v1  ;;  %v1654_v5 = vunpack.c.h.bf16 %v1786_v1  ;;  %v1684_v9 = vld [vmem:[%s3210_s1] sm:$0xff]   ;;  %v1657_v13 = vunpack.c.l.bf16 %v1787_v7  ;;  %v1794_v17 = vld [vmem:[%s3210_s1 + $0x8] sm:$0xff]   ;;  %v1658_v23 = vunpack.c.h.bf16 %v1787_v7  ;;  %v1570_v29 = vld [vmem:[%s3211_s2 + $0x4f0] sm:$0xff] }
   0x4   :  { %v1801_v10 = vld [vmem:[%s3210_s1 + $0x40] sm:$0xff]   ;;  %v1685_v14 = vunpack.c.l.bf16 %v1684_v9  ;;  %v1686_v16 = vunpack.c.h.bf16 %v1684_v9  ;;  %v1802_v18 = vld [vmem:[%s3210_s1 + $0x48] sm:$0xff]   ;;  %v1689_v27 = vunpack.c.l.bf16 %v1794_v17  ;;  %v1554_v30 = vld [vmem:[%s3211_s2 + $0x270] sm:$0xff]  ;;  %v1629_v32 = vunpack.c.l.bf16 %v1780_v24  ;;  %1817 = vmatprep.subr.mxu0 %v1570_v29 }
   0x5   :  { %v2102_v8 = vpack.i.bf16 %v1653_v3, %v1621_v2  ;;  %v2104_v11 = vpack.i.bf16 %v1654_v5, %v1622_v4  ;;  %v1717_v15 = vunpack.c.l.bf16 %v1801_v10  ;;  %v1718_v20 = vunpack.c.h.bf16 %v1801_v10  ;;  %v1569_v34 = vld [vmem:[%s3211_s2 + $0x4c8] sm:$0xff]  ;;  %1818 = vmatpush3.msra.mxu0 %v1554_v30  ;;  %v1568_v39 = vld [vmem:[%s3211_s2 + $0x4a0] sm:$0xff]  ;;  %v1795_v40 = vld [vmem:[%s3210_s1 + $0x10] sm:$0xff]  }
   0x6   :  { %v2106_v21 = vpack.i.bf16 %v1657_v13, %v1625_v12  ;;  %v1721_v28 = vunpack.c.l.bf16 %v1802_v18  ;;  %v2108_v31 = vpack.i.bf16 %v1658_v23, %v1626_v22  ;;  %v1661_v33 = vunpack.c.l.bf16 %v1788_v25  ;;  %v1553_v35 = vld [vmem:[%s3211_s2 + $0x248] sm:$0xff]  ;;  %v1803_v41 = vld [vmem:[%s3210_s1 + $0x50] sm:$0xff]   ;;  %1819 = vmatprep.subr.mxu0 %v1569_v34  ;;  %v1552_v42 = vld [vmem:[%s3211_s2 + $0x220] sm:$0xff] }
   0x7   :  { %2103 = vxpose.xlu0.b32.start [1/16] %v2102_v8, 128  ;;  %v2214_v19 = vpack.i.bf16 %v1685_v14, %v1717_v15  ;;  %v2216_v26 = vpack.i.bf16 %v1686_v16, %v1718_v20  ;;  %v1690_v37 = vunpack.c.h.bf16 %v1794_v17  ;;  %v1722_v38 = vunpack.c.h.bf16 %v1802_v18  ;;  %1820 = vmatpush3.msra.mxu0 %v1553_v35  ;;  %v1567_v43 = vld [vmem:[%s3211_s2 + $0x478] sm:$0xff]  ;;  %v1566_v53 = vld [vmem:[%s3211_s2 + $0x450] sm:$0xff]  ;;  %v1565_v55 = vld [vmem:[%s3211_s2 + $0x428] sm:$0xff] }
   0x8   :  { %v2218_v36 = vpack.i.bf16 %v1689_v27, %v1721_v28  ;;  %v2110_v44 = vpack.i.bf16 %v1661_v33, %v1629_v32  ;;  %v1630_v45 = vunpack.c.h.bf16 %v1780_v24  ;;  %v1662_v46 = vunpack.c.h.bf16 %v1788_v25  ;;  %1821 = vmatprep.subr.mxu0 %v1568_v39  ;;  %v1551_v47 = vld [vmem:[%s3211_s2 + $0x1f8] sm:$0xff]  ;;  %v1550_v54 = vld [vmem:[%s3211_s2 + $0x1d0] sm:$0xff]  ;;  %v1549_v59 = vld [vmem:[%s3211_s2 + $0x1a8] sm:$0xff] }
   0x9   :  { %2215 = vxpose.xlu1.b32.start [1/16] %v2214_v19, 128  ;;  %v1781_v48 = vld [vmem:[%s3209_s0 + $0x18] sm:$0xff]   ;;  %v2220_v50 = vpack.i.bf16 %v1690_v37, %v1722_v38  ;;  %v1693_v51 = vunpack.c.l.bf16 %v1795_v40  ;;  %v1725_v52 = vunpack.c.l.bf16 %v1803_v41  ;;  %1822 = vmatpush3.msra.mxu0 %v1552_v42  ;;  %v1694_v61 = vunpack.c.h.bf16 %v1795_v40  ;;  %v1564_v63 = vld [vmem:[%s3211_s2 + $0x400] sm:$0xff]  ;;  %v1562_v15 = vld [vmem:[%s3211_s2 + $0x3b0] sm:$0xff] }
   0xa   :  { %v1789_v49 = vld [vmem:[%s3209_s0 + $0x58] sm:$0xff]   ;;  %1823 = vmatprep.subr.mxu0 %v1567_v43  ;;  %v2112_v56 = vpack.i.bf16 %v1662_v46, %v1630_v45  ;;  %v1633_v57 = vunpack.c.l.bf16 %v1781_v48  ;;  %v1726_v62 = vunpack.c.h.bf16 %v1803_v41  ;;  %v1548_v2 = vld [vmem:[%s3211_s2 + $0x180] sm:$0xff]  ;;  %v1634_v6 = vunpack.c.h.bf16 %v1781_v48  ;;  %v1546_v16 = vld [vmem:[%s3211_s2 + $0x130] sm:$0xff] }
   0xb   :  { %2105 = vxpose.xlu0.b32.cont [2/16] %v2104_v11, 128  ;;  %1824 = vmatpush3.msra.mxu0 %v1551_v47  ;;  %v1665_v58 = vunpack.c.l.bf16 %v1789_v49  ;;  %v2222_v60 = vpack.i.bf16 %v1693_v51, %v1725_v52  ;;  %v1796_v0 = vld [vmem:[%s3210_s1 + $0x18] sm:$0xff]   ;;  %v1666_v7 = vunpack.c.h.bf16 %v1789_v49  ;;  %v1782_v10 = vld [vmem:[%s3209_s0 + $0x20] sm:$0xff]   ;;  %v1561_v17 = vld [vmem:[%s3211_s2 + $0x388] sm:$0xff] }
   0xc   :  { %1825 = vmatprep.subr.mxu0 %v1566_v53  ;;  %v1804_v1 = vld [vmem:[%s3210_s1 + $0x58] sm:$0xff]   ;;  %v1790_v11 = vld [vmem:[%s3209_s0 + $0x60] sm:$0xff]   ;;  %v2224_v12 = vpack.i.bf16 %v1694_v61, %v1726_v62  ;;  %v1697_v13 = vunpack.c.l.bf16 %v1796_v0  ;;  %v1637_v20 = vunpack.c.l.bf16 %v1782_v10  ;;  %v1545_v22 = vld [vmem:[%s3211_s2 + $0x108] sm:$0xff]  ;;  %v1698_v25 = vunpack.c.h.bf16 %v1796_v0 }
   0xd   :  { %2217 = vxpose.xlu1.b32.cont [2/16] %v2216_v26, 128  ;;  %1826 = vmatpush3.msra.mxu0 %v1550_v54  ;;  %v1563_v3 = vld [vmem:[%s3211_s2 + $0x3d8] sm:$0xff]  ;;  %v2114_v5 = vpack.i.bf16 %v1665_v58, %v1633_v57  ;;  %v1729_v14 = vunpack.c.l.bf16 %v1804_v1  ;;  %v2116_v19 = vpack.i.bf16 %v1666_v7, %v1634_v6  ;;  %v1730_v26 = vunpack.c.h.bf16 %v1804_v1  ;;  %v1560_v27 = vld [vmem:[%s3211_s2 + $0x360] sm:$0xff]  ;;  %v1791_v39 = vld [vmem:[%s3209_s0 + $0x68] sm:$0xff]  }
   0xe   :  { %1827 = vmatprep.subr.mxu0 %v1565_v55  ;;  %v1602_v4 = vld [vmem:[%s3212_s3 + $0x3f8] sm:$0xff]  ;;  %v2524_v28 = vld [vmem:[%s3210_s1 + $0x20] sm:$0xff]   ;;  %v1638_v34 = vunpack.c.h.bf16 %v1782_v10  ;;  %v1670_v35 = vunpack.c.h.bf16 %v1790_v11  ;;  %v1558_v43 = vld [vmem:[%s3211_s2 + $0x310] sm:$0xff] }
   0xf   :  { %2107 = vxpose.xlu0.b32.cont [3/16] %v2106_v21, 128  ;;  %1828 = vmatpush3.msra.mxu0 %v1549_v59  ;;  %v1547_v8 = vld [vmem:[%s3211_s2 + $0x158] sm:$0xff]  ;;  %v1669_v21 = vunpack.c.l.bf16 %v1790_v11  ;;  %v2226_v24 = vpack.i.bf16 %v1697_v13, %v1729_v14  ;;  %v2529_v29 = vld [vmem:[%s3210_s1 + $0x60] sm:$0xff]   ;;  %v2228_v40 = vpack.i.bf16 %v1698_v25, %v1730_v26  ;;  %v1701_v41 = vunpack.c.l.bf16 %v2524_v28 }
  0x10   :  { %1829 = vmatprep.subr.mxu0 %v1564_v63  ;;  %v1586_v9 = vld [vmem:[%s3212_s3 + $0x1f8] sm:$0xff]  ;;  %1897 = vmatprep.subr.mxu1 %v1602_v4  ;;  %v1544_v30 = vld [vmem:[%s3211_s2 + $0xe0] sm:$0xff]  ;;  %v1733_v42 = vunpack.c.l.bf16 %v2529_v29 }
  0x11   :  { %2219 = vxpose.xlu1.b32.cont [3/16] %v2218_v36, 128  ;;  %1830 = vmatpush3.msra.mxu0 %v1548_v2  ;;  %v1601_v18 = vld [vmem:[%s3212_s3 + $0x3d8] sm:$0xff]  ;;  %v2118_v33 = vpack.i.bf16 %v1669_v21, %v1637_v20  ;;  %v2543_v36 = vld [vmem:[%s3209_s0 + $0x28] sm:$0xff]  }
  0x12   :  { %1831 = vmatprep.subr.mxu0 %v1563_v3  ;;  %1898 = vmatpush3.msra.mxu1 %v1586_v9  ;;  %v1585_v23 = vld [vmem:[%s3212_s3 + $0x1d8] sm:$0xff] }
  0x13   :  { %2109 = vxpose.xlu0.b32.cont [4/16] %v2108_v31, 128  ;;  %1832 = vmatpush3.msra.mxu0 %v1547_v8  ;;  %v1559_v31 = vld [vmem:[%s3211_s2 + $0x338] sm:$0xff] }
  0x14   :  { %1833 = vmatprep.subr.mxu0 %v1562_v15  ;;  %1899 = vmatprep.subr.mxu1 %v1601_v18  ;;  %v1600_v32 = vld [vmem:[%s3212_s3 + $0x3b8] sm:$0xff] }
  0x15   :  { %2221 = vxpose.xlu1.b32.cont [4/16] %v2220_v50, 128  ;;  %1834 = vmatpush3.msra.mxu0 %v1546_v16  ;;  %v1543_v37 = vld [vmem:[%s3211_s2 + $0xb8] sm:$0xff] }
  0x16   :  { %1835 = vmatprep.subr.mxu0 %v1561_v17  ;;  %1900 = vmatpush3.msra.mxu1 %v1585_v23  ;;  %v1584_v38 = vld [vmem:[%s3212_s3 + $0x1b8] sm:$0xff] }
  0x17   :  { %2111 = vxpose.xlu0.b32.cont [5/16] %v2110_v44, 128  ;;  %1836 = vmatpush3.msra.mxu0 %v1545_v22 }
  0x18   :  { %1837 = vmatprep.subr.mxu0 %v1560_v27 }
  0x19   :  { %2223 = vxpose.xlu1.b32.cont [5/16] %v2222_v60, 128  ;;  %1838 = vmatpush3.msra.mxu0 %v1544_v30 }
  0x1b   :  { %2113 = vxpose.xlu0.b32.cont [6/16] %v2112_v56, 128 }
  0x1d   :  { %2225 = vxpose.xlu1.b32.cont [6/16] %v2224_v12, 128 }
  0x1f   :  { %2115 = vxpose.xlu0.b32.cont [7/16] %v2114_v5, 128 }
  0x21   :  { %2227 = vxpose.xlu1.b32.cont [7/16] %v2226_v24, 128 }
  0x23   :  { %2117 = vxpose.xlu0.b32.cont [8/16] %v2116_v19, 128 }
  0x24   :  { %11 = vsyncpa [#allocation5], 0  ;;  %1839 = vmatprep.subr.mxu0 %v1559_v31  ;;  %v1542_v44 = vld [vmem:[%s3211_s2 + $0x90] sm:$0xff]  ;;  %1901 = vmatprep.subr.mxu1 %v1600_v32  ;;  %v1557_v45 = vld [vmem:[%s3211_s2 + $0x2e8] sm:$0xff]  ;;  %v2120_v47 = vpack.i.bf16 %v1670_v35, %v1638_v34  ;;  %v1641_v48 = vunpack.c.l.bf16 %v2543_v36  ;;  %v1673_v49 = vunpack.c.l.bf16 %v1791_v39  ;;  %v2230_v52 = vpack.i.bf16 %v1701_v41, %v1733_v42  ;;  %s2354_s18 = smov [#allocation4]  }
  0x25   :  { %1840 = vmatpush3.msra.mxu0 %v1543_v37  ;;  %1902 = vmatpush3.msra.mxu1 %v1584_v38  ;;  %v1599_v46 = vld [vmem:[%s3212_s3 + $0x398] sm:$0xff]  ;;  %v1541_v50 = vld [vmem:[%s3211_s2 + $0x68] sm:$0xff]  ;;  %v1702_v53 = vunpack.c.h.bf16 %v2524_v28  ;;  %v1734_v54 = vunpack.c.h.bf16 %v2529_v29  ;;  %v1556_v55 = vld [vmem:[%s3211_s2 + $0x2c0] sm:$0xff]  ;;  %v1642_v62 = vunpack.c.h.bf16 %v2543_v36  ;;  %v1674_v63 = vunpack.c.h.bf16 %v1791_v39 }
  0x26   :  { %1841 = vmatprep.subr.mxu0 %v1558_v43  ;;  %v1583_v51 = vld [vmem:[%s3212_s3 + $0x198] sm:$0xff]  ;;  %2229 = vxpose.xlu1.b32.cont [8/16] %v2228_v40, 128  ;;  %v1798_v56 = vld [vmem:[%s3210_s1 + $0x28] sm:$0xff]   ;;  %v1540_v58 = vld [vmem:[%s3211_s2 + $0x40] sm:$0xff]  ;;  %v2122_v61 = vpack.i.bf16 %v1673_v49, %v1641_v48 }
  0x27   :  { %2119 = vxpose.xlu0.b32.cont [9/16] %v2118_v33, 128  ;;  %1842 = vmatpush3.msra.mxu0 %v1542_v44  ;;  %v1806_v57 = vld [vmem:[%s3210_s1 + $0x68] sm:$0xff]   ;;  %v1555_v59 = vld [vmem:[%s3211_s2 + $0x298] sm:$0xff]  ;;  %v1784_v2 = vld [vmem:[%s3209_s0 + $0x30] sm:$0xff]   ;;  %v2232_v4 = vpack.i.bf16 %v1702_v53, %v1734_v54  ;;  %v1705_v5 = vunpack.c.l.bf16 %v1798_v56  ;;  %v2124_v11 = vpack.i.bf16 %v1674_v63, %v1642_v62  ;;  %v1706_v16 = vunpack.c.h.bf16 %v1798_v56 }
  0x28   :  { %1843 = vmatprep.subr.mxu0 %v1557_v45  ;;  %1903 = vmatprep.subr.mxu1 %v1599_v46  ;;  %v1598_v60 = vld [vmem:[%s3212_s3 + $0x378] sm:$0xff]  ;;  %v1792_v3 = vld [vmem:[%s3209_s0 + $0x70] sm:$0xff]   ;;  %v1737_v6 = vunpack.c.l.bf16 %v1806_v57  ;;  %v1645_v12 = vunpack.c.l.bf16 %v1784_v2  ;;  %v1738_v17 = vunpack.c.h.bf16 %v1806_v57  ;;  %v1646_v24 = vunpack.c.h.bf16 %v1784_v2 }
  0x29   :  { %1844 = vmatpush3.msra.mxu0 %v1541_v50  ;;  %1904 = vmatpush3.msra.mxu1 %v1583_v51  ;;  %v1539_v0 = vld [vmem:[%s3211_s2 + $0x18] sm:$0xff]  ;;  %v1677_v13 = vunpack.c.l.bf16 %v1792_v3  ;;  %v1799_v19 = vld [vmem:[%s3210_s1 + $0x30] sm:$0xff]   ;;  %v1678_v25 = vunpack.c.h.bf16 %v1792_v3 }
  0x2a   :  { %1845 = vmatprep.subr.mxu0 %v1556_v55  ;;  %v1582_v1 = vld [vmem:[%s3212_s3 + $0x178] sm:$0xff]  ;;  %2231 = vxpose.xlu1.b32.cont [9/16] %v2230_v52, 128  ;;  %v2234_v15 = vpack.i.bf16 %v1705_v5, %v1737_v6  ;;  %v1807_v20 = vld [vmem:[%s3210_s1 + $0x70] sm:$0xff]   ;;  %v2236_v29 = vpack.i.bf16 %v1706_v16, %v1738_v17  ;;  %v1709_v30 = vunpack.c.l.bf16 %v1799_v19  ;;  %v1710_v40 = vunpack.c.h.bf16 %v1799_v19  ;;  %v2717_v16 = vld [vmem:[%s3213_s4] sm:$0xff] }
  0x2b   :  { %2121 = vxpose.xlu0.b32.cont [10/16] %v2120_v47, 128  ;;  %1846 = vmatpush3.msra.mxu0 %v1540_v58  ;;  %v1597_v7 = vld [vmem:[%s3212_s3 + $0x358] sm:$0xff]  ;;  %v2126_v23 = vpack.i.bf16 %v1677_v13, %v1645_v12  ;;  %v1741_v31 = vunpack.c.l.bf16 %v1807_v20  ;;  %v2128_v35 = vpack.i.bf16 %v1678_v25, %v1646_v24  ;;  %v1742_v41 = vunpack.c.h.bf16 %v1807_v20  ;;  %v1814_v19 = vld [vmem:[%s3210_s1 + $0xa8] sm:$0xff]   ;;  %v1815_v24 = vld [vmem:[%s3210_s1 + $0xb0] sm:$0xff]  }
  0x2c   :  { %1847 = vmatprep.subr.mxu0 %v1555_v59  ;;  %1905 = vmatprep.subr.mxu1 %v1598_v60  ;;  %v1581_v8 = vld [vmem:[%s3212_s3 + $0x158] sm:$0xff]  ;;  %v1809_v59 = vld [vmem:[%s3210_s1 + $0x80] sm:$0xff]   ;;  %v2352_v17 = vmov 0   ;;  %v2727_v20 = vld [vmem:[%s3213_s4 + $0x8] sm:$0xff] }
  0x2d   :  { %1848 = vmatpush3.msra.mxu0 %v1539_v0  ;;  %1906 = vmatpush3.msra.mxu1 %v1582_v1  ;;  %v1596_v9 = vld [vmem:[%s3212_s3 + $0x338] sm:$0xff]  ;;  %v2238_v39 = vpack.i.bf16 %v1709_v30, %v1741_v31  ;;  %v2240_v51 = vpack.i.bf16 %v1710_v40, %v1742_v41  ;;  %v1749_v1 = vunpack.c.l.bf16 %v1809_v59  ;;  %v1750_v3 = vunpack.c.h.bf16 %v1809_v59  ;;  %v2757_v30 = vld [vmem:[%s3213_s4 + $0x28] sm:$0xff] }
  0x2e   :  { %v2620_v10 = vld [vmem:[%s3212_s3 + $0x5f8] sm:$0xff]  ;;  %1907 = vmatprep.subr.mxu1 %v1597_v7  ;;  %2233 = vxpose.xlu1.b32.cont [10/16] %v2232_v4, 128  ;;  %v1810_v4 = vld [vmem:[%s3210_s1 + $0x88] sm:$0xff]   ;;  %v1811_v7 = vld [vmem:[%s3210_s1 + $0x90] sm:$0xff]  }
  0x2f   :  { %2123 = vxpose.xlu0.b32.cont [11/16] %v2122_v61, 128  ;;  %v1580_v14 = vld [vmem:[%s3212_s3 + $0x138] sm:$0xff]  ;;  %1908 = vmatpush3.msra.mxu1 %v1581_v8  ;;  %v1753_v5 = vunpack.c.l.bf16 %v1810_v4  ;;  %v1754_v6 = vunpack.c.h.bf16 %v1810_v4  ;;  %v1757_v8 = vunpack.c.l.bf16 %v1811_v7 }
  0x30   :  { %v1595_v18 = vld [vmem:[%s3212_s3 + $0x318] sm:$0xff]  ;;  %1909 = vmatprep.subr.mxu1 %v1596_v9  ;;  %2009 = vmatprep.subr.mxu0 %v2620_v10  ;;  %v1758_v9 = vunpack.c.h.bf16 %v1811_v7 }
  0x31   :  { %v1579_v21 = vld [vmem:[%s3212_s3 + $0x118] sm:$0xff]  ;;  %1910 = vmatpush3.msra.mxu1 %v1580_v14  ;;  %v1813_v14 = vld [vmem:[%s3210_s1 + $0xa0] sm:$0xff]  }
  0x32   :  { %v1594_v22 = vld [vmem:[%s3212_s3 + $0x2f8] sm:$0xff]  ;;  %1911 = vmatprep.subr.mxu1 %v1595_v18  ;;  %2235 = vxpose.xlu1.b32.cont [11/16] %v2234_v15, 128  ;;  %v1765_v15 = vunpack.c.l.bf16 %v1813_v14  ;;  %v1766_v18 = vunpack.c.h.bf16 %v1813_v14 }
  0x33   :  { %2125 = vxpose.xlu0.b32.cont [12/16] %v2124_v11, 128  ;;  %v1578_v26 = vld [vmem:[%s3212_s3 + $0xf8] sm:$0xff]  ;;  %1912 = vmatpush3.msra.mxu1 %v1579_v21  ;;  %v1769_v21 = vunpack.c.l.bf16 %v1814_v19 }
  0x34   :  { %v1785_v27 = vld [vmem:[%s3209_s0 + $0x38] sm:$0xff]   ;;  %1913 = vmatprep.subr.mxu1 %v1594_v22  ;;  %v2733_v22 = vld [vmem:[%s3213_s4 + $0x10] sm:$0xff] }
  0x35   :  { %v1793_v28 = vld [vmem:[%s3209_s0 + $0x78] sm:$0xff]   ;;  %1914 = vmatpush3.msra.mxu1 %v1578_v26  ;;  %v1649_v36 = vunpack.c.l.bf16 %v1785_v27  ;;  %v1650_v48 = vunpack.c.h.bf16 %v1785_v27  ;;  %v1773_v26 = vunpack.c.l.bf16 %v1815_v24  ;;  %v2748_v27 = vld [vmem:[%s3213_s4 + $0x20] sm:$0xff]  ;;  %s1520_s0 = sshll.u32 %s2354_s18, 4  ;;  %s1521_s0 = int_to_ptr.vmem [resolvable:$true] %s1520_s0 }
  0x36   :  { %v1593_v32 = vld [vmem:[%s3212_s3 + $0x2d8] sm:$0xff]  ;;  %v1681_v37 = vunpack.c.l.bf16 %v1793_v28  ;;  %2237 = vxpose.xlu1.b32.cont [12/16] %v2236_v29, 128  ;;  %v1682_v49 = vunpack.c.h.bf16 %v1793_v28  ;;  %v1774_v28 = vunpack.c.h.bf16 %v1815_v24  ;;  %p2335_p1 = scmp.lt.s32.totalorder %s1521_s0, %s1521_s0 }
  0x37   :  { %v1577_v33 = vld [vmem:[%s3212_s3 + $0xd8] sm:$0xff]  ;;  %2127 = vxpose.xlu0.b32.cont [13/16] %v2126_v23, 128  ;;  %1915 = vmatprep.subr.mxu1 %v1593_v32  ;;  %v1770_v23 = vunpack.c.h.bf16 %v1814_v19  ;;  %v2763_v32 = vld [vmem:[%s3213_s4 + $0x30] sm:$0xff] }
  0x38   :  { %v1592_v34 = vld [vmem:[%s3212_s3 + $0x2b8] sm:$0xff]  ;;  %1916 = vmatpush3.msra.mxu1 %v1577_v33  ;;  %v2130_v47 = vpack.i.bf16 %v1681_v37, %v1649_v36  ;;  %v2132_v57 = vpack.i.bf16 %v1682_v49, %v1650_v48 }
  0x39   :  { %v1576_v38 = vld [vmem:[%s3212_s3 + $0xb8] sm:$0xff]  ;;  %1917 = vmatprep.subr.mxu1 %v1592_v34 }
  0x3a   :  { %v1591_v42 = vld [vmem:[%s3212_s3 + $0x298] sm:$0xff]  ;;  %1918 = vmatpush3.msra.mxu1 %v1576_v38  ;;  %2239 = vxpose.xlu1.b32.cont [13/16] %v2238_v39, 128  ;;  %v2775_v38 = vld [vmem:[%s3213_s4 + $0x40] sm:$0xff] }
  0x3b   :  { %v1800_v43 = vld [vmem:[%s3210_s1 + $0x38] sm:$0xff]   ;;  %2129 = vxpose.xlu0.b32.cont [14/16] %v2128_v35, 128  ;;  %1919 = vmatprep.subr.mxu1 %v1591_v42 }
  0x3c   :  { %v1808_v44 = vld [vmem:[%s3210_s1 + $0x78] sm:$0xff]   ;;  %v1713_v52 = vunpack.c.l.bf16 %v1800_v43  ;;  %v1714_v61 = vunpack.c.h.bf16 %v1800_v43 }
  0x3d   :  { %v1575_v45 = vld [vmem:[%s3212_s3 + $0x98] sm:$0xff]  ;;  %v1745_v53 = vunpack.c.l.bf16 %v1808_v44  ;;  %v1746_v62 = vunpack.c.h.bf16 %v1808_v44 }
  0x3e   :  { %v1590_v46 = vld [vmem:[%s3212_s3 + $0x278] sm:$0xff]  ;;  %1920 = vmatpush3.msra.mxu1 %v1575_v45  ;;  %2241 = vxpose.xlu1.b32.cont [14/16] %v2240_v51, 128 }
  0x3f   :  { %v1574_v50 = vld [vmem:[%s3212_s3 + $0x78] sm:$0xff]  ;;  %1921 = vmatprep.subr.mxu1 %v1590_v46  ;;  %2131 = vxpose.xlu0.b32.cont [15/16] %v2130_v47, 128  ;;  %v2242_v60 = vpack.i.bf16 %v1713_v52, %v1745_v53  ;;  %v2244_v2 = vpack.i.bf16 %v1714_v61, %v1746_v62 }
  0x40   :  { %v1589_v54 = vld [vmem:[%s3212_s3 + $0x258] sm:$0xff]  ;;  %1922 = vmatpush3.msra.mxu1 %v1574_v50 }
  0x41   :  { %v1573_v55 = vld [vmem:[%s3212_s3 + $0x58] sm:$0xff]  ;;  %1923 = vmatprep.subr.mxu1 %v1589_v54 }
  0x42   :  { %v1588_v56 = vld [vmem:[%s3212_s3 + $0x238] sm:$0xff]  ;;  %1924 = vmatpush3.msra.mxu1 %v1573_v55  ;;  %2243 = vxpose.xlu1.b32.cont [15/16] %v2242_v60, 128 }
  0x43   :  { %v1572_v58 = vld [vmem:[%s3212_s3 + $0x38] sm:$0xff]  ;;  %1925 = vmatprep.subr.mxu1 %v1588_v56  ;;  %2133 = vxpose.xlu0.b32.end [16/16] %v2132_v57, 128 }
  0x44   :  { %v1587_v63 = vld [vmem:[%s3212_s3 + $0x218] sm:$0xff]  ;;  %1926 = vmatpush3.msra.mxu1 %v1572_v58 }
  0x45   :  { %v1571_v0 = vld [vmem:[%s3212_s3 + $0x18] sm:$0xff]  ;;  %1927 = vmatprep.subr.mxu1 %v1587_v63 }
  0x46   :  { %1928 = vmatpush3.msra.mxu1 %v1571_v0  ;;  %2245 = vxpose.xlu1.b32.end [16/16] %v2244_v2, 128  ;;  %v1812_v11 = vld [vmem:[%s3210_s1 + $0x98] sm:$0xff]  }
  0x47   :  { %2065 = vmatprep.subr.mxu1 %v2620_v10  ;;  %1065 = vxpose.xlu0.b32.start [1/16] %v1749_v1, 128  ;;  %v1761_v12 = vunpack.c.l.bf16 %v1812_v11  ;;  %v1762_v13 = vunpack.c.h.bf16 %v1812_v11  ;;  %v2742_v25 = vld [vmem:[%s3213_s4 + $0x18] sm:$0xff] }
  0x48   :  { %v1816_v29 = vld [vmem:[%s3210_s1 + $0xb8] sm:$0xff]  }
  0x49   :  { %v1777_v31 = vunpack.c.l.bf16 %v1816_v29  ;;  %v1778_v33 = vunpack.c.h.bf16 %v1816_v29  ;;  %v2769_v34 = vld [vmem:[%s3213_s4 + $0x38] sm:$0xff] }
  0x4a   :  { %v1617_v39 = vld [vmem:[%s3212_s3 + $0x5d8] sm:$0xff] }
  0x4b   :  { %1066 = vxpose.xlu0.b32.cont [2/16] %v1750_v3, 128  ;;  %v2785_v46 = vld [vmem:[%s3212_s3 + $0x5b8] sm:$0xff] }
  0x4c   :  { %v2790_v48 = vld [vmem:[%s3212_s3 + $0x598] sm:$0xff] }
  0x4d   :  { %v2799_v54 = vld [vmem:[%s3212_s3 + $0x578] sm:$0xff] }
  0x4e   :  { %v2812_v62 = vld [vmem:[%s3212_s3 + $0x538] sm:$0xff] }
  0x4f   :  { %1067 = vxpose.xlu0.b32.cont [3/16] %v1753_v5, 128  ;;  %v2820_v4 = vld [vmem:[%s3212_s3 + $0x518] sm:$0xff] }
  0x50   :  { %v2834_v14 = vld [vmem:[%s3212_s3 + $0x4d8] sm:$0xff] }
  0x51   :  { %v2843_v24 = vld [vmem:[%s3212_s3 + $0x4b8] sm:$0xff] }
  0x53   :  { %1068 = vxpose.xlu0.b32.cont [4/16] %v1754_v6, 128 }
  0x57   :  { %1069 = vxpose.xlu0.b32.cont [5/16] %v1757_v8, 128 }
  0x5b   :  { %1070 = vxpose.xlu0.b32.cont [6/16] %v1758_v9, 128 }
  0x5f   :  { %1071 = vxpose.xlu0.b32.cont [7/16] %v1761_v12, 128  ;;  %v2827_v12 = vld [vmem:[%s3212_s3 + $0x4f8] sm:$0xff] }
  0x63   :  { %1072 = vxpose.xlu0.b32.cont [8/16] %v1762_v13, 128 }
  0x64   :  { %2326 = vset.pattern.permute.xlu1 %v2352_v17 }
  0x65   :  { %747 = vperm.xlu1 %2326, %v2717_v16  }
  0x67   :  { %1073 = vxpose.xlu0.b32.cont [9/16] %v1765_v15, 128 }
  0x69   :  { %752 = vperm.xlu1 %2326, %v2727_v20  }
  0x6b   :  { %1074 = vxpose.xlu0.b32.cont [10/16] %v1766_v18, 128 }
  0x6d   :  { %757 = vperm.xlu1 %2326, %v2733_v22  }
  0x6f   :  { %1075 = vxpose.xlu0.b32.cont [11/16] %v1769_v21, 128 }
  0x71   :  { %762 = vperm.xlu1 %2326, %v2742_v25  }
  0x73   :  { %1076 = vxpose.xlu0.b32.cont [12/16] %v1770_v23, 128 }
  0x75   :  { %767 = vperm.xlu1 %2326, %v2748_v27  }
  0x77   :  { %1077 = vxpose.xlu0.b32.cont [13/16] %v1773_v26, 128 }
  0x79   :  { %772 = vperm.xlu1 %2326, %v2757_v30  }
  0x7b   :  { %1078 = vxpose.xlu0.b32.cont [14/16] %v1774_v28, 128 }
  0x7d   :  { %777 = vperm.xlu1 %2326, %v2763_v32  }
  0x7f   :  { %1079 = vxpose.xlu0.b32.cont [15/16] %v1777_v31, 128 }
  0x81   :  { %782 = vperm.xlu1 %2326, %v2769_v34  }
  0x83   :  { %1080 = vxpose.xlu0.b32.end [16/16] %v1778_v33, 128  ;;  %v2134_v35 = vpop.trf.xlu0 }
  0x84   :  { %v2138_v36 = vunpack.i.h.bf16 %v2134_v35  ;;  %v2135_v37 = vunpack.i.l.bf16 %v2134_v35  ;;  %v2850_v35 = vld [vmem:[%s3212_s3 + $0x498] sm:$0xff] }
  0x85   :  { %787 = vperm.xlu1 %2326, %v2775_v38  }
  0x86   :  { %648 = vmatprep.mubr.f32.mxu0 %v2138_v36  ;;  %v2246_v43 = vpop.trf.xlu1 }
  0x87   :  { %v2139_v40 = vpop.trf.xlu0  ;;  %649 = vmatmul.mubr.f32.vlgmr.msra.gmra.mxu0 %v2135_v37  ;;  %v2247_v44 = vunpack.i.l.bf16 %v2246_v43  ;;  %v2250_v45 = vunpack.i.h.bf16 %v2246_v43 }
  0x88   :  { %v2143_v41 = vunpack.i.h.bf16 %v2139_v40  ;;  %v2140_v42 = vunpack.i.l.bf16 %v2139_v40  ;;  %2010 = vmatpush3.msra.mxu0 %v2620_v10 }
  0x89   :  { %2011 = vmatprep.subr.mxu0 %v1617_v39  ;;  %1161 = vmatprep.mubr.f32.mxu1 %v2247_v44 }
  0x8a   :  { %653 = vmatprep.mubr.f32.mxu0 %v2143_v41  ;;  %2012 = vmatpush3.msra.mxu0 %v1617_v39  ;;  %v2251_v51 = vpop.trf.xlu1 }
  0x8b   :  { %v2144_v47 = vpop.trf.xlu0  ;;  %654 = vmatmul.mubr.f32.gmra.mxu0 %v2140_v42  ;;  %1162 = vmatmul.mubr.f32.vlgmr.msra.gmra.mxu1 %v2250_v45  ;;  %v2252_v52 = vunpack.i.l.bf16 %v2251_v51  ;;  %v2255_v53 = vunpack.i.h.bf16 %v2251_v51  ;;  %v2866_v45 = vld [vmem:[%s3212_s3 + $0x458] sm:$0xff] }
  0x8c   :  { %v2148_v49 = vunpack.i.h.bf16 %v2144_v47  ;;  %v2145_v50 = vunpack.i.l.bf16 %v2144_v47  ;;  %2013 = vmatprep.subr.mxu0 %v2785_v46  ;;  %2081 = vmatpush3.msra.mxu1 %v2620_v10  ;;  %v2806_v10 = vld [vmem:[%s3212_s3 + $0x558] sm:$0xff] }
  0x8d   :  { %2014 = vmatpush3.msra.mxu0 %v2785_v46  ;;  %1166 = vmatprep.mubr.f32.mxu1 %v2252_v52 }
  0x8e   :  { %658 = vmatprep.mubr.f32.mxu0 %v2148_v49  ;;  %2015 = vmatprep.subr.mxu0 %v2790_v48  ;;  %v2256_v58 = vpop.trf.xlu1 }
  0x8f   :  { %v2149_v55 = vpop.trf.xlu0  ;;  %659 = vmatmul.mubr.f32.gmra.mxu0 %v2145_v50  ;;  %1167 = vmatmul.mubr.f32.gmra.mxu1 %v2255_v53  ;;  %v2257_v59 = vunpack.i.l.bf16 %v2256_v58  ;;  %v2260_v60 = vunpack.i.h.bf16 %v2256_v58 }
  0x90   :  { %v2153_v56 = vunpack.i.h.bf16 %v2149_v55  ;;  %v2150_v57 = vunpack.i.l.bf16 %v2149_v55  ;;  %2016 = vmatpush3.msra.mxu0 %v2790_v48  ;;  %2066 = vmatprep.subr.mxu1 %v1617_v39  ;;  %v2881_v55 = vld [vmem:[%s3212_s3 + $0x418] sm:$0xff] }
  0x91   :  { %2017 = vmatprep.subr.mxu0 %v2799_v54  ;;  %1171 = vmatprep.mubr.f32.mxu1 %v2257_v59 }
  0x92   :  { %663 = vmatprep.mubr.f32.mxu0 %v2153_v56  ;;  %2018 = vmatpush3.msra.mxu0 %v2799_v54  ;;  %v2261_v1 = vpop.trf.xlu1 }
  0x93   :  { %v2154_v61 = vpop.trf.xlu0  ;;  %664 = vmatmul.mubr.f32.gmra.mxu0 %v2150_v57  ;;  %1172 = vmatmul.mubr.f32.gmra.mxu1 %v2260_v60  ;;  %v2262_v2 = vunpack.i.l.bf16 %v2261_v1  ;;  %v2265_v3 = vunpack.i.h.bf16 %v2261_v1 }
  0x94   :  { %v2158_v63 = vunpack.i.h.bf16 %v2154_v61  ;;  %v2155_v0 = vunpack.i.l.bf16 %v2154_v61  ;;  %2019 = vmatprep.subr.mxu0 %v2806_v10  ;;  %2082 = vmatpush3.msra.mxu1 %v1617_v39  ;;  %v2857_v39 = vld [vmem:[%s3212_s3 + $0x478] sm:$0xff] }
  0x95   :  { %2020 = vmatpush3.msra.mxu0 %v2806_v10  ;;  %1176 = vmatprep.mubr.f32.mxu1 %v2262_v2 }
  0x96   :  { %668 = vmatprep.mubr.f32.mxu0 %v2158_v63  ;;  %2021 = vmatprep.subr.mxu0 %v2812_v62  ;;  %v2266_v8 = vpop.trf.xlu1 }
  0x97   :  { %v2159_v5 = vpop.trf.xlu0  ;;  %669 = vmatmul.mubr.f32.gmra.mxu0 %v2155_v0  ;;  %1177 = vmatmul.mubr.f32.gmra.mxu1 %v2265_v3  ;;  %v2267_v9 = vunpack.i.l.bf16 %v2266_v8  ;;  %v2270_v11 = vunpack.i.h.bf16 %v2266_v8  ;;  %v2893_v3 = vld [vmem:[%s3213_s4 + $0x48] sm:$0xff] }
  0x98   :  { %v2163_v6 = vunpack.i.h.bf16 %v2159_v5  ;;  %v2160_v7 = vunpack.i.l.bf16 %v2159_v5  ;;  %2022 = vmatpush3.msra.mxu0 %v2812_v62  ;;  %2067 = vmatprep.subr.mxu1 %v2785_v46 }
  0x99   :  { %2023 = vmatprep.subr.mxu0 %v2820_v4  ;;  %1181 = vmatprep.mubr.f32.mxu1 %v2267_v9 }
  0x9a   :  { %673 = vmatprep.mubr.f32.mxu0 %v2163_v6  ;;  %2024 = vmatpush3.msra.mxu0 %v2820_v4  ;;  %v2271_v19 = vpop.trf.xlu1 }
  0x9b   :  { %v2164_v13 = vpop.trf.xlu0  ;;  %674 = vmatmul.mubr.f32.gmra.mxu0 %v2160_v7  ;;  %1182 = vmatmul.mubr.f32.gmra.mxu1 %v2270_v11  ;;  %v2272_v21 = vunpack.i.l.bf16 %v2271_v19  ;;  %v2275_v23 = vunpack.i.h.bf16 %v2271_v19  ;;  %v2902_v11 = vld [vmem:[%s3213_s4 + $0x58] sm:$0xff]  ;;  %v2911_v19 = vld [vmem:[%s3213_s4 + $0x50] sm:$0xff] }
  0x9c   :  { %v2168_v15 = vunpack.i.h.bf16 %v2164_v13  ;;  %v2165_v18 = vunpack.i.l.bf16 %v2164_v13  ;;  %2025 = vmatprep.subr.mxu0 %v2827_v12  ;;  %2083 = vmatpush3.msra.mxu1 %v2785_v46 }
  0x9d   :  { %2026 = vmatpush3.msra.mxu0 %v2827_v12  ;;  %1186 = vmatprep.mubr.f32.mxu1 %v2272_v21 }
  0x9e   :  { %678 = vmatprep.mubr.f32.mxu0 %v2168_v15  ;;  %2027 = vmatprep.subr.mxu0 %v2834_v14  ;;  %v2276_v31 = vpop.trf.xlu1 }
  0x9f   :  { %v2169_v26 = vpop.trf.xlu0  ;;  %679 = vmatmul.mubr.f32.gmra.mxu0 %v2165_v18  ;;  %1187 = vmatmul.mubr.f32.gmra.mxu1 %v2275_v23  ;;  %v2277_v33 = vunpack.i.l.bf16 %v2276_v31  ;;  %v2280_v36 = vunpack.i.h.bf16 %v2276_v31  ;;  %v2916_v23 = vld [vmem:[%s3213_s4 + $0x60] sm:$0xff] }
  0xa0   :  { %v2173_v28 = vunpack.i.h.bf16 %v2169_v26  ;;  %v2170_v29 = vunpack.i.l.bf16 %v2169_v26  ;;  %2028 = vmatpush3.msra.mxu0 %v2834_v14  ;;  %2068 = vmatprep.subr.mxu1 %v2790_v48 }
  0xa1   :  { %2029 = vmatprep.subr.mxu0 %v2843_v24  ;;  %1191 = vmatprep.mubr.f32.mxu1 %v2277_v33  ;;  %v2925_v33 = vld [vmem:[%s3213_s4 + $0x68] sm:$0xff] }
  0xa2   :  { %683 = vmatprep.mubr.f32.mxu0 %v2173_v28  ;;  %2030 = vmatpush3.msra.mxu0 %v2843_v24  ;;  %v2281_v42 = vpop.trf.xlu1 }
  0xa3   :  { %v2174_v37 = vpop.trf.xlu0  ;;  %684 = vmatmul.mubr.f32.gmra.mxu0 %v2170_v29  ;;  %2031 = vmatprep.subr.mxu0 %v2850_v35  ;;  %v2282_v43 = vunpack.i.l.bf16 %v2281_v42  ;;  %v2285_v44 = vunpack.i.h.bf16 %v2281_v42  ;;  %v2353_v42 = vmov 1  }
  0xa4   :  { %v2178_v40 = vunpack.i.h.bf16 %v2174_v37  ;;  %v2175_v41 = vunpack.i.l.bf16 %v2174_v37  ;;  %1192 = vmatmul.mubr.f32.gmra.mxu1 %v2280_v36  ;;  %2032 = vmatpush3.msra.mxu0 %v2850_v35 }
  0xa5   :  { %2084 = vmatpush3.msra.mxu1 %v2790_v48  ;;  %2033 = vmatprep.subr.mxu0 %v2857_v39  ;;  %v2874_v48 = vld [vmem:[%s3212_s3 + $0x438] sm:$0xff] }
  0xa6   :  { %688 = vmatprep.mubr.f32.mxu0 %v2178_v40  ;;  %1196 = vmatprep.mubr.f32.mxu1 %v2282_v43  ;;  %v2286_v50 = vpop.trf.xlu1 }
  0xa7   :  { %v2179_v46 = vpop.trf.xlu0  ;;  %689 = vmatmul.mubr.f32.gmra.mxu0 %v2175_v41  ;;  %2069 = vmatprep.subr.mxu1 %v2799_v54  ;;  %v2287_v51 = vunpack.i.l.bf16 %v2286_v50  ;;  %v2290_v52 = vunpack.i.h.bf16 %v2286_v50  ;;  %v744_v50 = vld [vmem:[%s3213_s4 + $0x78] sm:$0xff] }
  0xa8   :  { %v2183_v47 = vunpack.i.h.bf16 %v2179_v46  ;;  %v2180_v49 = vunpack.i.l.bf16 %v2179_v46  ;;  %2034 = vmatpush3.msra.mxu0 %v2857_v39  ;;  %1197 = vmatmul.mubr.f32.gmra.mxu1 %v2285_v44  ;;  %v743_v44 = vld [vmem:[%s3213_s4 + $0x70] sm:$0xff] }
  0xa9   :  { %2035 = vmatprep.subr.mxu0 %v2866_v45  ;;  %2085 = vmatpush3.msra.mxu1 %v2799_v54 }
  0xaa   :  { %693 = vmatprep.mubr.f32.mxu0 %v2183_v47  ;;  %2036 = vmatpush3.msra.mxu0 %v2866_v45  ;;  %v2291_v58 = vpop.trf.xlu1 }
  0xab   :  { %v2184_v53 = vpop.trf.xlu0  ;;  %694 = vmatmul.mubr.f32.gmra.mxu0 %v2180_v49  ;;  %2037 = vmatprep.subr.mxu0 %v2874_v48  ;;  %v2292_v59 = vunpack.i.l.bf16 %v2291_v58  ;;  %v2295_v60 = vunpack.i.h.bf16 %v2291_v58 }
  0xac   :  { %v2188_v56 = vunpack.i.h.bf16 %v2184_v53  ;;  %v2185_v57 = vunpack.i.l.bf16 %v2184_v53  ;;  %1201 = vmatprep.mubr.f32.mxu1 %v2287_v51  ;;  %2038 = vmatpush3.msra.mxu0 %v2874_v48 }
  0xad   :  { %1202 = vmatmul.mubr.f32.gmra.mxu1 %v2290_v52  ;;  %2039 = vmatprep.subr.mxu0 %v2881_v55 }
  0xae   :  { %698 = vmatprep.mubr.f32.mxu0 %v2188_v56  ;;  %2070 = vmatprep.subr.mxu1 %v2806_v10  ;;  %v2296_v0 = vpop.trf.xlu1 }
  0xaf   :  { %v2189_v54 = vpop.trf.xlu0  ;;  %699 = vmatmul.mubr.f32.gmra.mxu0 %v2185_v57  ;;  %2086 = vmatpush3.msra.mxu1 %v2806_v10  ;;  %v2297_v1 = vunpack.i.l.bf16 %v2296_v0  ;;  %v2300_v2 = vunpack.i.h.bf16 %v2296_v0 }
  0xb0   :  { %v2193_v61 = vunpack.i.h.bf16 %v2189_v54  ;;  %v2190_v63 = vunpack.i.l.bf16 %v2189_v54  ;;  %2040 = vmatpush3.msra.mxu0 %v2881_v55  ;;  %1206 = vmatprep.mubr.f32.mxu1 %v2292_v59 }
  0xb1   :  { %2071 = vmatprep.subr.mxu1 %v2812_v62  ;;  %1207 = vmatmul.mubr.f32.gmra.mxu1 %v2295_v60 }
  0xb2   :  { %703 = vmatprep.mubr.f32.mxu0 %v2193_v61  ;;  %2087 = vmatpush3.msra.mxu1 %v2812_v62  ;;  %v2301_v10 = vpop.trf.xlu1 }
  0xb3   :  { %v2194_v5 = vpop.trf.xlu0  ;;  %704 = vmatmul.mubr.f32.gmra.mxu0 %v2190_v63  ;;  %1211 = vmatprep.mubr.f32.mxu1 %v2297_v1  ;;  %v2302_v8 = vunpack.i.l.bf16 %v2301_v10  ;;  %v2305_v9 = vunpack.i.h.bf16 %v2301_v10 }
  0xb4   :  { %v2198_v6 = vunpack.i.h.bf16 %v2194_v5  ;;  %v2195_v7 = vunpack.i.l.bf16 %v2194_v5  ;;  %2072 = vmatprep.subr.mxu1 %v2820_v4  ;;  %792 = vperm.xlu1 %2326, %v2893_v3  }
  0xb5   :  { %2088 = vmatpush3.msra.mxu1 %v2820_v4  ;;  %2327 = vset.pattern.permute.xlu0 %v2352_v17 }
  0xb6   :  { %708 = vmatprep.mubr.f32.mxu0 %v2198_v6  ;;  %1212 = vmatmul.mubr.f32.gmra.mxu1 %v2300_v2  ;;  %v2306_v18 = vpop.trf.xlu1 }
  0xb7   :  { %v2199_v62 = vpop.trf.xlu0  ;;  %709 = vmatmul.mubr.f32.gmra.mxu0 %v2195_v7  ;;  %1216 = vmatprep.mubr.f32.mxu1 %v2302_v8  ;;  %v2307_v4 = vunpack.i.l.bf16 %v2306_v18  ;;  %v2310_v21 = vunpack.i.h.bf16 %v2306_v18 }
  0xb8   :  { %v2203_v13 = vunpack.i.h.bf16 %v2199_v62  ;;  %v2200_v15 = vunpack.i.l.bf16 %v2199_v62  ;;  %2073 = vmatprep.subr.mxu1 %v2827_v12  ;;  %802 = vperm.xlu1 %2326, %v2902_v11  }
  0xb9   :  { %2089 = vmatpush3.msra.mxu1 %v2827_v12  ;;  %797 = vperm.xlu0 %2327, %v2911_v19  }
  0xba   :  { %713 = vmatprep.mubr.f32.mxu0 %v2203_v13  ;;  %1217 = vmatmul.mubr.f32.gmra.mxu1 %v2305_v9  ;;  %v2311_v12 = vpop.trf.xlu1 }
  0xbb   :  { %v2204_v26 = vpop.trf.xlu0  ;;  %714 = vmatmul.mubr.f32.gmra.mxu0 %v2200_v15  ;;  %1221 = vmatprep.mubr.f32.mxu1 %v2307_v4  ;;  %v2312_v29 = vunpack.i.l.bf16 %v2311_v12  ;;  %v2315_v31 = vunpack.i.h.bf16 %v2311_v12 }
  0xbc   :  { %v2208_v17 = vunpack.i.h.bf16 %v2204_v26  ;;  %v2205_v28 = vunpack.i.l.bf16 %v2204_v26  ;;  %2074 = vmatprep.subr.mxu1 %v2834_v14  ;;  %807 = vperm.xlu1 %2326, %v2916_v23  }
  0xbd   :  { %2090 = vmatpush3.msra.mxu1 %v2834_v14  ;;  %2329 = vset.pattern.permute.xlu0 %v2353_v42 }
  0xbe   :  { %718 = vmatprep.mubr.f32.mxu0 %v2208_v17  ;;  %1222 = vmatmul.mubr.f32.gmra.mxu1 %v2310_v21  ;;  %v2316_v41 = vpop.trf.xlu1 }
  0xbf   :  { %v2209_v36 = vpop.trf.xlu0  ;;  %719 = vmatmul.mubr.f32.gmra.mxu0 %v2205_v28  ;;  %1226 = vmatprep.mubr.f32.mxu1 %v2312_v29  ;;  %v2317_v14 = vunpack.i.l.bf16 %v2316_v41  ;;  %v2320_v43 = vunpack.i.h.bf16 %v2316_v41 }
  0xc0   :  { %v2213_v37 = vunpack.i.h.bf16 %v2209_v36  ;;  %v2210_v40 = vunpack.i.l.bf16 %v2209_v36  ;;  %2075 = vmatprep.subr.mxu1 %v2843_v24  ;;  %812 = vperm.xlu1 %2326, %v2925_v33  }
  0xc1   :  { %2091 = vmatpush3.msra.mxu1 %v2843_v24  ;;  %1408 = vperm.xlu0 %2329, %v2757_v30  }
  0xc2   :  { %723 = vmatprep.mubr.f32.mxu0 %v2213_v37  ;;  %1227 = vmatmul.mubr.f32.gmra.mxu1 %v2315_v31  ;;  %v2321_v47 = vpop.trf.xlu1 }
  0xc3   :  { %v1081_v46 = vpop.trf.xlu0  ;;  %724 = vmatmul.mubr.f32.gmra.mxu0 %v2210_v40  ;;  %1231 = vmatprep.mubr.f32.mxu1 %v2317_v14  ;;  %v2322_v49 = vunpack.i.l.bf16 %v2321_v47  ;;  %v2325_v24 = vunpack.i.h.bf16 %v2321_v47 }
  0xc4   :  { %2041 = vmatprep.mubr.f32.mxu0 %v1081_v46  ;;  %2076 = vmatprep.subr.mxu1 %v2850_v35 }
  0xc5   :  { %2092 = vmatpush3.msra.mxu1 %v2850_v35  ;;  %817 = vperm.xlu1 %2326, %v743_v44  }
  0xc6   :  { %1232 = vmatmul.mubr.f32.gmra.mxu1 %v2320_v43  ;;  %2077 = vmatprep.subr.mxu1 %v2857_v39 }
  0xc7   :  { %v1082_v51 = vpop.trf.xlu0  ;;  %2093 = vmatpush3.msra.mxu1 %v2857_v39  ;;  %1236 = vmatprep.mubr.f32.mxu1 %v2322_v49 }
  0xc8   :  { %2042 = vmatmul.mubr.f32.vlgmr.msra.gmra.mxu0 %v1082_v51  ;;  %2078 = vmatprep.subr.mxu1 %v2866_v45 }
  0xc9   :  { %2094 = vmatpush3.msra.mxu1 %v2866_v45  ;;  %822 = vperm.xlu1 %2326, %v744_v50  }
  0xca   :  { %1237 = vmatmul.mubr.f32.gmra.mxu1 %v2325_v24  ;;  %2079 = vmatprep.subr.mxu1 %v2874_v48 }
  0xcb   :  { %v1083_v35 = vpop.trf.xlu0  ;;  %2095 = vmatpush3.msra.mxu1 %v2874_v48  ;;  %1420 = vperm.xlu0 %2329, %v2775_v38  }
  0xcc   :  { %2044 = vmatprep.mubr.f32.mxu0 %v1083_v35  ;;  %2080 = vmatprep.subr.mxu1 %v2881_v55 }
  0xcd   :  { %2096 = vmatpush3.msra.mxu1 %v2881_v55  ;;  %2328 = vset.pattern.permute.xlu1 %v2353_v42 }
  0xce   :  { %1388 = vperm.xlu1 %2328, %v2717_v16  }
  0xcf   :  { %v1084_v39 = vpop.trf.xlu0  ;;  %1428 = vperm.xlu0 %2329, %v2911_v19  }
  0xd0   :  { %2045 = vmatmul.mubr.f32.gmra.mxu0 %v1084_v39 }
  0xd2   :  { %1392 = vperm.xlu1 %2328, %v2727_v20  }
  0xd3   :  { %v1085_v45 = vpop.trf.xlu0  ;;  %1436 = vperm.xlu0 %2329, %v2916_v23  }
  0xd4   :  { %2047 = vmatprep.mubr.f32.mxu0 %v1085_v45 }
  0xd6   :  { %1396 = vperm.xlu1 %2328, %v2733_v22  }
  0xd7   :  { %v1086_v30 = vpop.trf.xlu0  ;;  %1444 = vperm.xlu0 %2329, %v743_v44  }
  0xd8   :  { %2048 = vmatmul.mubr.f32.gmra.mxu0 %v1086_v30 }
  0xda   :  { %1400 = vperm.xlu1 %2328, %v2742_v25  }
  0xdb   :  { %v1087_v48 = vpop.trf.xlu0 }
  0xdc   :  { %2050 = vmatprep.mubr.f32.mxu0 %v1087_v48 }
  0xde   :  { %1404 = vperm.xlu1 %2328, %v2748_v27  }
  0xdf   :  { %v1088_v16 = vpop.trf.xlu0 }
  0xe0   :  { %2051 = vmatmul.mubr.f32.gmra.mxu0 %v1088_v16  ;;  %v748_v53 = vpop.permute.xlu1 %747 }
  0xe2   :  { %1412 = vperm.xlu1 %2328, %v2763_v32  }
  0xe3   :  { %v1089_v20 = vpop.trf.xlu0 }
  0xe4   :  { %2053 = vmatprep.mubr.f32.mxu1 %v1089_v20  ;;  %v2960_v55 = vpop.permute.xlu1 %752 }
  0xe6   :  { %1416 = vperm.xlu1 %2328, %v2769_v34  }
  0xe7   :  { %v1090_v22 = vpop.trf.xlu0 }
  0xe8   :  { %2054 = vmatmul.mubr.f32.vlgmr.msra.gmra.mxu1 %v1090_v22  ;;  %v758_v56 = vpop.permute.xlu1 %757 }
  0xea   :  { %1424 = vperm.xlu1 %2328, %v2893_v3  }
  0xeb   :  { %v1091_v38 = vpop.trf.xlu0 }
  0xec   :  { %2056 = vmatprep.mubr.f32.mxu1 %v1091_v38  ;;  %v2962_v57 = vpop.permute.xlu1 %762 }
  0xee   :  { %1432 = vperm.xlu1 %2328, %v2902_v11  }
  0xef   :  { %v1092_v25 = vpop.trf.xlu0 }
  0xf0   :  { %2057 = vmatmul.mubr.f32.gmra.mxu1 %v1092_v25  ;;  %v768_v58 = vpop.permute.xlu1 %767 }
  0xf2   :  { %1440 = vperm.xlu1 %2328, %v2925_v33  }
  0xf3   :  { %v1093_v27 = vpop.trf.xlu0 }
  0xf4   :  { %2059 = vmatprep.mubr.f32.mxu1 %v1093_v27  ;;  %v2964_v59 = vpop.permute.xlu1 %772 }
  0xf6   :  { %1448 = vperm.xlu1 %2328, %v744_v50  }
  0xf7   :  { %v1094_v32 = vpop.trf.xlu0 }
  0xf8   :  { %2060 = vmatmul.mubr.f32.gmra.mxu1 %v1094_v32  ;;  %v778_v54 = vpop.permute.xlu1 %777 }
  0xfb   :  { %v1095_v52 = vpop.trf.xlu0 }
  0xfc   :  { %2062 = vmatprep.mubr.f32.mxu1 %v1095_v52  ;;  %v2974_v5 = vpop.permute.xlu1 %782 }
  0xff   :  { %v1096_v34 = vpop.trf.xlu0 }
 0x100   :  { %2063 = vmatmul.mubr.f32.gmra.mxu1 %v1096_v34  ;;  %v788_v13 = vpop.permute.xlu1 %787 }
 0x12f   :  { %v2994_v17 = vpop.permute.xlu1 %792 }
 0x133   :  { %v3008_v41 = vpop.permute.xlu1 %802 }
 0x137   :  { %v808_v50 = vpop.permute.xlu1 %807 }
 0x13b   :  { %v3030_v20 = vpop.permute.xlu1 %812 }
 0x13c   :  { %3216 = vst [vmem:[#allocation7_spill] sm:$0xff] %v3030_v20 }
 0x147   :  { %v1849_v60 = vpop.f32.mrf.mxu0 }
 0x149   :  { %v1850_v61 = vpop.f32.mrf.mxu0 }
 0x14a   :  { %v1851_v63 = vadd.f32 %v1850_v61, %v1849_v60 }
 0x14b   :  { %v2966_v0 = vpop.f32.mrf.mxu0  ;;  %v2970_v2 = vpop.f32.mrf.mxu1 }
 0x14c   :  { %v2968_v1 = vmul.f32 %v1851_v63, %v748_v53  ;;  %v818_v53 = vpop.permute.xlu1 %817 }
 0x14d   :  { %v2972_v3 = vpop.f32.mrf.mxu0  ;;  %v2976_v6 = vpop.f32.mrf.mxu1 }
 0x14f   :  { %v1855_v7 = vpop.f32.mrf.mxu0  ;;  %v2978_v10 = vpop.f32.mrf.mxu1 }
 0x150   :  { %v3054_v63 = vpop.permute.xlu1 %822 }
 0x151   :  { %v1856_v8 = vpop.f32.mrf.mxu0  ;;  %v2980_v11 = vpop.f32.mrf.mxu1  ;;  %3217 = vst [vmem:[#allocation8_spill] sm:$0xff] %v3054_v63 }
 0x152   :  { %v1857_v9 = vadd.f32 %v1856_v8, %v1855_v7 }
 0x153   :  { %v2982_v62 = vpop.f32.mrf.mxu0  ;;  %v2986_v18 = vpop.f32.mrf.mxu1 }
 0x154   :  { %v2984_v15 = vmul.f32 %v1857_v9, %v758_v56 }
 0x155   :  { %v2988_v4 = vpop.f32.mrf.mxu0  ;;  %v2990_v19 = vpop.f32.mrf.mxu1 }
 0x157   :  { %v1861_v21 = vpop.f32.mrf.mxu0  ;;  %v2992_v23 = vpop.f32.mrf.mxu1 }
 0x159   :  { %v1862_v26 = vpop.f32.mrf.mxu0  ;;  %v2996_v12 = vpop.f32.mrf.mxu1 }
 0x15a   :  { %v1863_v28 = vadd.f32 %v1862_v26, %v1861_v21  ;;  %v1389_v26 = vpop.permute.xlu1 %1388 }
 0x15b   :  { %v2998_v29 = vpop.f32.mrf.mxu0  ;;  %v3002_v33 = vpop.f32.mrf.mxu1 }
 0x15c   :  { %v3000_v31 = vmul.f32 %v1863_v28, %v768_v58 }
 0x15d   :  { %v3004_v36 = vpop.f32.mrf.mxu0  ;;  %v3006_v37 = vpop.f32.mrf.mxu1 }
 0x15f   :  { %v1867_v40 = vpop.f32.mrf.mxu0  ;;  %v3010_v42 = vpop.f32.mrf.mxu1 }
 0x161   :  { %v1868_v14 = vpop.f32.mrf.mxu0  ;;  %v3012_v44 = vpop.f32.mrf.mxu1 }
 0x162   :  { %v1869_v43 = vadd.f32 %v1868_v14, %v1867_v40 }
 0x163   :  { %v3014_v46 = vpop.f32.mrf.mxu0 }
 0x164   :  { %v3016_v47 = vmul.f32 %v1869_v43, %v778_v54  ;;  %v3018_v49 = vpop.f32.mrf.mxu1 }
 0x165   :  { %v3020_v24 = vpop.f32.mrf.mxu0 }
 0x166   :  { %v3022_v51 = vpop.f32.mrf.mxu1 }
 0x167   :  { %v1873_v35 = vpop.f32.mrf.mxu0 }
 0x168   :  { %v3024_v39 = vpop.f32.mrf.mxu1 }
 0x169   :  { %v1874_v45 = vpop.f32.mrf.mxu0 }
 0x16a   :  { %v1875_v30 = vadd.f32 %v1874_v45, %v1873_v35  ;;  %v3026_v48 = vpop.f32.mrf.mxu1  ;;  %v1854_v45 = vadd.f32 %v2972_v3, %v2966_v0  ;;  %v1931_v3 = vadd.f32 %v2976_v6, %v2970_v2  ;;  %v1940_v6 = vadd.f32 %v2996_v12, %v2992_v23 }
 0x16b   :  { %v3028_v16 = vpop.f32.mrf.mxu0 }
 0x16c   :  { %v3032_v22 = vmul.f32 %v1875_v30, %v788_v13  ;;  %v1393_v30 = vpop.permute.xlu1 %1392 }
 0x16d   :  { %v3034_v38 = vpop.f32.mrf.mxu0  ;;  %v3036_v25 = vpop.f32.mrf.mxu1 }
 0x16f   :  { %v3038_v27 = vpop.f32.mrf.mxu0  ;;  %v3040_v32 = vpop.f32.mrf.mxu1 }
 0x171   :  { %v3042_v52 = vpop.f32.mrf.mxu0  ;;  %v3044_v34 = vpop.f32.mrf.mxu1 }
 0x173   :  { %v3046_v56 = vpop.f32.mrf.mxu0  ;;  %v3048_v58 = vpop.f32.mrf.mxu1 }
 0x175   :  { %v3050_v60 = vpop.f32.mrf.mxu0 }
 0x176   :  { %v3052_v61 = vpop.f32.mrf.mxu1 }
 0x177   :  { %v1885_v54 = vpop.f32.mrf.mxu0 }
 0x178   :  { %v3060_v21 = vpop.f32.mrf.mxu1 }
 0x179   :  { %v1886_v7 = vpop.f32.mrf.mxu0 }
 0x17a   :  { %v1887_v8 = vadd.f32 %v1886_v7, %v1885_v54  ;;  %v3064_v14 = vpop.f32.mrf.mxu1 }
 0x17b   :  { %v3056_v9 = vpop.f32.mrf.mxu0 }
 0x17c   :  { %3218 = vst [vmem:[#allocation9_spill] sm:$0xff] %v3056_v9  ;;  %v3058_v13 = vmul.f32 %v1887_v8, %v808_v50  ;;  %v3072_v50 = vpop.f32.mrf.mxu1  ;;  %v826_v8 = vmul.f32 %v1854_v45, %v2960_v55 }
 0x17d   :  { %v3062_v28 = vpop.f32.mrf.mxu0 }
 0x17e   :  { %3219 = vst [vmem:[#allocation10_spill] sm:$0xff] %v3058_v13  ;;  %3220 = vst [vmem:[#allocation11_spill] sm:$0xff] %v3062_v28  ;;  %v1934_v13 = vadd.f32 %v2980_v11, %v2978_v10  ;;  %v3082_v0 = vpop.f32.mrf.mxu1  ;;  %v1860_v10 = vadd.f32 %v2988_v4, %v2982_v62  ;;  %v411_v62 = vld [vmem:[%s3214_s5 + $0x18] sm:$0xff] }
 0x17f   :  { %v1891_v40 = vpop.f32.mrf.mxu0  ;;  %3224 = vst [vmem:[#allocation15_spill] sm:$0xff] %v3082_v0 }
 0x180   :  { %v828_v2 = vmul.f32 %v1860_v10, %v2962_v57  ;;  %v410_v57 = vld [vmem:[%s3214_s5 + $0x10] sm:$0xff]  ;;  %v413_v10 = vld [vmem:[%s3214_s5 + $0x28] sm:$0xff] }
 0x181   :  { %v1892_v43 = vpop.f32.mrf.mxu0 }
 0x182   :  { %v1893_v35 = vadd.f32 %v1892_v43, %v1891_v40  ;;  %v409_v40 = vld [vmem:[%s3214_s5 + $0x8] sm:$0xff]  ;;  %v844_v12 = vadd.f32 %v828_v2, %v411_v62 }
 0x183   :  { %v3068_v63 = vpop.f32.mrf.mxu0  ;;  %v842_v45 = vadd.f32 %v826_v8, %v409_v40 }
 0x184   :  { %3221 = vst [vmem:[#allocation12_spill] sm:$0xff] %v3068_v63  ;;  %v3070_v54 = vmul.f32 %v1893_v35, %v818_v53  ;;  %v1397_v53 = vpop.permute.xlu1 %1396  ;;  %v3091_v63 = vpop.f32.mrf.mxu1 }
 0x185   :  { %v3074_v7 = vpop.f32.mrf.mxu0 }
 0x186   :  { %3222 = vst [vmem:[#allocation13_spill] sm:$0xff] %v3070_v54  ;;  %3223 = vst [vmem:[#allocation14_spill] sm:$0xff] %v3074_v7  ;;  %v408_v54 = vld [vmem:[%s3214_s5] sm:$0xff] }
 0x187   :  { %v841_v0 = vadd.f32 %v2968_v1, %v408_v54  ;;  %v1937_v1 = vadd.f32 %v2990_v19, %v2986_v18  ;;  %v843_v18 = vadd.f32 %v2984_v15, %v410_v57  ;;  %v1943_v15 = vadd.f32 %v3006_v37, %v3002_v33 }
 0x188   :  { %v2043_v43 = vpop.f32.mrf.mxu0 }
 0x189   :  { %v1314_v35 = vadd.f32 %v2043_v43, %v1934_v13  ;;  %v1401_v13 = vpop.permute.xlu1 %1400 }
 0x18a   :  { %v1308_v55 = vpop.f32.mrf.mxu0 }
 0x18b   :  { %v1452_v11 = vmul.f32 %v1393_v30, %v1314_v35  ;;  %v1309_v7 = vadd.f32 %v1931_v3, %v1308_v55  ;;  %v3100_v30 = vpop.f32.mrf.mxu1  ;;  %v1946_v35 = vadd.f32 %v3012_v44, %v3010_v42  ;;  %v1872_v44 = vadd.f32 %v3020_v24, %v3014_v46  ;;  %v415_v46 = vld [vmem:[%s3214_s5 + $0x38] sm:$0xff] }
 0x18d   :  { %v1468_v20 = vadd.f32 %v1452_v11, %v842_v45  ;;  %v1451_v28 = vmul.f32 %v1389_v26, %v1309_v7  ;;  %v3111_v40 = vpop.f32.mrf.mxu1 }
 0x18f   :  { %v1484_v43 = vmul.f32 0.33333334, %v1468_v20  ;;  %v1467_v9 = vadd.f32 %v1451_v28, %v841_v0  ;;  %v1866_v20 = vadd.f32 %v3004_v36, %v2998_v29  ;;  %v3109_v28 = vpop.permute.xlu0 %797  ;;  %v1405_v0 = vpop.permute.xlu1 %1404 }
 0x190   :  { %v2046_v4 = vpop.f32.mrf.mxu0  ;;  %v3120_v11 = vpop.f32.mrf.mxu1 }
 0x191   :  { %1500 = vst [vmem:[#allocation4 + $0x8] sm:$0xff] %v1484_v43  ;;  %v1483_v26 = vmul.f32 0.33333334, %v1467_v9  ;;  %v1324_v54 = vadd.f32 %v2046_v4, %v1940_v6  ;;  %v830_v3 = vmul.f32 %v1866_v20, %v2964_v59  ;;  %v412_v59 = vld [vmem:[%s3214_s5 + $0x20] sm:$0xff]  ;;  %v1949_v20 = vadd.f32 %v3022_v51, %v3018_v49 }
 0x192   :  { %v1318_v23 = vpop.f32.mrf.mxu0  ;;  %v3129_v4 = vpop.f32.mrf.mxu1  ;;  %v845_v33 = vadd.f32 %v3000_v31, %v412_v59 }
 0x193   :  { %1499 = vst [vmem:[#allocation4] sm:$0xff] %v1483_v26  ;;  %v1454_v7 = vmul.f32 %v1401_v13, %v1324_v54  ;;  %v1319_v8 = vadd.f32 %v1937_v1, %v1318_v23  ;;  %v1409_v29 = vpop.permute.xlu0 %1408  ;;  %v846_v6 = vadd.f32 %v830_v3, %v413_v10  ;;  %v1413_v62 = vpop.permute.xlu1 %1412  ;;  %v832_v26 = vmul.f32 %v1872_v44, %v2974_v5  ;;  %v414_v5 = vld [vmem:[%s3214_s5 + $0x30] sm:$0xff] }
 0x194   :  { %v1952_v54 = vadd.f32 %v3026_v48, %v3024_v39  ;;  %v847_v49 = vadd.f32 %v3016_v47, %v414_v5 }
 0x195   :  { %v1470_v19 = vadd.f32 %v1454_v7, %v844_v12  ;;  %v1453_v9 = vmul.f32 %v1397_v53, %v1319_v8  ;;  %v3138_v12 = vpop.f32.mrf.mxu1  ;;  %v848_v8 = vadd.f32 %v832_v26, %v415_v46  ;;  %v3225_v26 = vld [vmem:[#allocation9_spill] sm:$0xff] }
 0x197   :  { %v1486_v55 = vmul.f32 0.33333334, %v1470_v19  ;;  %v1469_v45 = vadd.f32 %v1453_v9, %v843_v18  ;;  %v1417_v39 = vpop.permute.xlu1 %1416  ;;  %v1878_v18 = vadd.f32 %v3034_v38, %v3028_v16  ;;  %v417_v16 = vld [vmem:[%s3214_s5 + $0x48] sm:$0xff] }
 0x198   :  { %v2049_v36 = vpop.f32.mrf.mxu0 }
 0x199   :  { %1502 = vst [vmem:[#allocation4 + $0x18] sm:$0xff] %v1486_v55  ;;  %v1485_v53 = vmul.f32 0.33333334, %v1469_v45  ;;  %v1334_v2 = vadd.f32 %v2049_v36, %v1946_v35  ;;  %v834_v35 = vmul.f32 %v1878_v18, %v2994_v17  ;;  %v1958_v55 = vadd.f32 %v3048_v58, %v3044_v34  ;;  %v416_v17 = vld [vmem:[%s3214_s5 + $0x40] sm:$0xff] }
 0x19a   :  { %v1328_v42 = vpop.f32.mrf.mxu0  ;;  %v1955_v36 = vadd.f32 %v3040_v32, %v3036_v25  ;;  %v1884_v58 = vadd.f32 %v3050_v60, %v3046_v56  ;;  %v849_v44 = vadd.f32 %v3032_v22, %v416_v17  ;;  %v1881_v25 = vadd.f32 %v3042_v52, %v3038_v27  ;;  %v419_v56 = vld [vmem:[%s3214_s5 + $0x58] sm:$0xff]  ;;  %v3228_v18 = vld [vmem:[#allocation15_spill] sm:$0xff]  ;;  %v3232_v17 = vld [vmem:[#allocation8_spill] sm:$0xff] }
 0x19b   :  { %1501 = vst [vmem:[#allocation4 + $0x10] sm:$0xff] %v1485_v53  ;;  %v1456_v13 = vmul.f32 %v1409_v29, %v1334_v2  ;;  %v1329_v43 = vadd.f32 %v1943_v15, %v1328_v42  ;;  %v1425_v15 = vpop.permute.xlu1 %1424  ;;  %v850_v34 = vadd.f32 %v834_v35, %v417_v16  ;;  %v1421_v42 = vpop.permute.xlu0 %1420  ;;  %v1961_v22 = vadd.f32 %v3060_v21, %v3052_v61  ;;  %v3227_v21 = vld [vmem:[#allocation7_spill] sm:$0xff] }
 0x19d   :  { %v1472_v37 = vadd.f32 %v1456_v13, %v846_v6  ;;  %v1455_v1 = vmul.f32 %v1405_v0, %v1329_v43  ;;  %v3147_v0 = vpop.f32.mrf.mxu1  ;;  %v836_v13 = vmul.f32 %v1884_v58, %v3008_v41  ;;  %v1964_v43 = vadd.f32 %v3072_v50, %v3064_v14  ;;  %v418_v41 = vld [vmem:[%s3214_s5 + $0x50] sm:$0xff] }
 0x19f   :  { %v1488_v57 = vmul.f32 0.33333334, %v1472_v37  ;;  %v1471_v23 = vadd.f32 %v1455_v1, %v845_v33  ;;  %v835_v37 = vmul.f32 %v1881_v25, %v3109_v28  ;;  %v1433_v14 = vpop.permute.xlu1 %1432  ;;  %v852_v1 = vadd.f32 %v836_v13, %v419_v56  ;;  %v1429_v28 = vpop.permute.xlu0 %1428 }
 0x1a0   :  { %v2052_v24 = vpop.f32.mrf.mxu0 }
 0x1a1   :  { %1504 = vst [vmem:[#allocation4 + $0x28] sm:$0xff] %v1488_v57  ;;  %v1487_v31 = vmul.f32 0.33333334, %v1471_v23  ;;  %v1344_v7 = vadd.f32 %v2052_v24, %v1952_v54  ;;  %v3226_v54 = vld [vmem:[#allocation11_spill] sm:$0xff]  ;;  %v851_v24 = vadd.f32 %v835_v37, %v418_v41 }
 0x1a2   :  { %v1338_v48 = vpop.f32.mrf.mxu0  ;;  %v1890_v57 = vadd.f32 %v3226_v54, %v3225_v26 }
 0x1a3   :  { %1503 = vst [vmem:[#allocation4 + $0x20] sm:$0xff] %v1487_v31  ;;  %v1458_v19 = vmul.f32 %v1417_v39, %v1344_v7  ;;  %v1339_v9 = vadd.f32 %v1949_v20, %v1338_v48  ;;  %v1970_v7 = vadd.f32 %v3111_v40, %v3100_v30  ;;  %v421_v48 = vld [vmem:[%s3214_s5 + $0x68] sm:$0xff] }
 0x1a4   :  { %v838_v31 = vmul.f32 %v1890_v57, %v3227_v21  ;;  %v3229_v40 = vld [vmem:[#allocation12_spill] sm:$0xff] }
 0x1a5   :  { %v1474_v51 = vadd.f32 %v1458_v19, %v848_v8  ;;  %v1457_v3 = vmul.f32 %v1413_v62, %v1339_v9  ;;  %v1967_v19 = vadd.f32 %v3091_v63, %v3228_v18 }
 0x1a6   :  { %v854_v30 = vadd.f32 %v838_v31, %v421_v48 }
 0x1a7   :  { %v1490_v45 = vmul.f32 0.33333334, %v1474_v51  ;;  %v1473_v29 = vadd.f32 %v1457_v3, %v847_v49  ;;  %v420_v51 = vld [vmem:[%s3214_s5 + $0x60] sm:$0xff]  ;;  %v1441_v3 = vpop.permute.xlu1 %1440 }
 0x1a8   :  { %v2055_v38 = vpop.f32.mrf.mxu1 }
 0x1a9   :  { %1506 = vst [vmem:[#allocation4 + $0x38] sm:$0xff] %v1490_v45  ;;  %v1489_v10 = vmul.f32 0.33333334, %v1473_v29  ;;  %v1354_v47 = vadd.f32 %v2055_v38, %v1958_v55  ;;  %v3230_v55 = vld [vmem:[#allocation14_spill] sm:$0xff]  ;;  %v1437_v38 = vpop.permute.xlu0 %1436 }
 0x1aa   :  { %v1348_v53 = vpop.f32.mrf.mxu1  ;;  %v1896_v45 = vadd.f32 %v3230_v55, %v3229_v40 }
 0x1ab   :  { %1505 = vst [vmem:[#allocation4 + $0x30] sm:$0xff] %v1489_v10  ;;  %v1460_v2 = vmul.f32 %v1425_v15, %v1354_v47  ;;  %v1349_v59 = vadd.f32 %v1955_v36, %v1348_v53  ;;  %v3231_v36 = vld [vmem:[#allocation10_spill] sm:$0xff]  ;;  %v1976_v53 = vadd.f32 %v3147_v0, %v3138_v12 }
 0x1ac   :  { %v853_v10 = vadd.f32 %v3231_v36, %v420_v51  ;;  %v840_v15 = vmul.f32 %v1896_v45, %v3232_v17 }
 0x1ad   :  { %v1476_v32 = vadd.f32 %v1460_v2, %v850_v34  ;;  %v1459_v6 = vmul.f32 %v1421_v42, %v1349_v59  ;;  %v423_v2 = vld [vmem:[%s3214_s5 + $0x78] sm:$0xff]  ;;  %v1973_v42 = vadd.f32 %v3129_v4, %v3120_v11 }
 0x1ae   :  { %v856_v12 = vadd.f32 %v840_v15, %v423_v2 }
 0x1af   :  { %v1492_v62 = vmul.f32 0.33333334, %v1476_v32  ;;  %v1475_v33 = vadd.f32 %v1459_v6, %v849_v44  ;;  %v422_v32 = vld [vmem:[%s3214_s5 + $0x70] sm:$0xff]  ;;  %v1449_v6 = vpop.permute.xlu1 %1448  ;;  %s2330_s5 = scalar_lea.vmem %s1521_s0, 2048 }
 0x1b0   :  { %v2058_v60 = vpop.f32.mrf.mxu1  ;;  %p2331_p0 = scmp.ne.s32.totalorder %s1521_s0, %s2330_s5  ;;  %p2336_p2 = scmp.lt.s32.totalorder %s2330_s5, %s2330_s5 }
 0x1b1   :  { %1508 = vst [vmem:[#allocation4 + $0x48] sm:$0xff] %v1492_v62  ;;  %v1491_v27 = vmul.f32 0.33333334, %v1475_v33  ;;  %v1364_v52 = vadd.f32 %v2058_v60, %v1964_v43  ;;  %v1445_v62 = vpop.permute.xlu0 %1444  ;;  %v3233_v33 = vld [vmem:[#allocation13_spill] sm:$0xff] }
 0x1b2   :  { %v1358_v50 = vpop.f32.mrf.mxu1  ;;  %v855_v56 = vadd.f32 %v3233_v33, %v422_v32  ;;  %p2337_p3 = por %p2336_p2, %p2335_p1 }
 0x1b3   :  { %1507 = vst [vmem:[#allocation4 + $0x40] sm:$0xff] %v1491_v27  ;;  %v1462_v23 = vmul.f32 %v1433_v14, %v1364_v52  ;;  %v1359_v46 = vadd.f32 %v1961_v22, %v1358_v50 }
 0x1b4   :  { %p2338_p4 = pnand %p2337_p3, %p2331_p0 }
 0x1b5   :  { %v1478_v20 = vadd.f32 %v1462_v23, %v852_v1  ;;  %v1461_v61 = vmul.f32 %v1429_v28, %v1359_v46 }
 0x1b7   :  { %v1494_v5 = vmul.f32 0.33333334, %v1478_v20  ;;  %v1477_v39 = vadd.f32 %v1461_v61, %v851_v24 }
 0x1b8   :  { %v2061_v8 = vpop.f32.mrf.mxu1 }
 0x1b9   :  { %1510 = vst [vmem:[#allocation4 + $0x58] sm:$0xff] %v1494_v5  ;;  %v1493_v9 = vmul.f32 0.33333334, %v1477_v39  ;;  %v1374_v49 = vadd.f32 %v2061_v8, %v1970_v7 }
 0x1ba   :  { %v1368_v35 = vpop.f32.mrf.mxu1 }
 0x1bb   :  { %1509 = vst [vmem:[#allocation4 + $0x50] sm:$0xff] %v1493_v9  ;;  %v1464_v29 = vmul.f32 %v1441_v3, %v1374_v49  ;;  %v1369_v16 = vadd.f32 %v1967_v19, %v1368_v35 }
 0x1bd   :  { %v1480_v63 = vadd.f32 %v1464_v29, %v854_v30  ;;  %v1463_v47 = vmul.f32 %v1437_v38, %v1369_v16 }
 0x1bf   :  { %v1496_v34 = vmul.f32 0.33333334, %v1480_v63  ;;  %v1479_v58 = vadd.f32 %v1463_v47, %v853_v10 }
 0x1c0   :  { %v2064_v59 = vpop.f32.mrf.mxu1 }
 0x1c1   :  { %1512 = vst [vmem:[#allocation4 + $0x68] sm:$0xff] %v1496_v34  ;;  %v1495_v44 = vmul.f32 0.33333334, %v1479_v58  ;;  %v1384_v25 = vadd.f32 %v2064_v59, %v1976_v53 }
 0x1c2   :  { %v1378_v13 = vpop.f32.mrf.mxu1 }
 0x1c3   :  { %1511 = vst [vmem:[#allocation4 + $0x60] sm:$0xff] %v1495_v44  ;;  %v1466_v0 = vmul.f32 %v1449_v6, %v1384_v25  ;;  %v1379_v43 = vadd.f32 %v1973_v42, %v1378_v13 }
 0x1c5   :  { %v1482_v60 = vadd.f32 %v1466_v0, %v856_v12  ;;  %v1465_v37 = vmul.f32 %v1445_v62, %v1379_v43 }
 0x1c7   :  { %v1498_v11 = vmul.f32 0.33333334, %v1482_v60  ;;  %v1481_v4 = vadd.f32 %v1465_v37, %v855_v56 }
 0x1c9   :  { %1514 = vst [vmem:[#allocation4 + $0x78] sm:$0xff] %v1498_v11  ;;  %v1497_v22 = vmul.f32 0.33333334, %v1481_v4 }
 0x1cb   :  { %1513 = vst [vmem:[#allocation4 + $0x70] sm:$0xff] %v1497_v22 }
 0x1cc   :  { %2341 = shalt.err (!%p2338_p4)
}
 0x1cd   :  { %s2355_s19 = smov 128   ;;  %s2356_s20 = smov 8  }
 0x1ce   :  { %1526 = dma.vmem_to_hbm [thread:$0]  %s1521_s0, 2048, %s3215_s6, [#allocation5], %s2355_s19, %s2355_s19, %s2356_s20  }
 0x1cf   :  { %2350 = dma.done.wait [#allocation5], 2048  }
 0x1d0   :  { %2351 = vsyncadd [#allocation5], 4294965248 }
 0x1d1   :  { %1530 = vsyncpa [#allocation5], 1 }

// kernel: nv_encoder_forward.10
= control target key start
LH: loop header
LB: loop body
LE: loop exit
PB: predicated region body
PF: predicated region fallthrough
CT: control target
= control target key end

     0   :  { %v336_v3 = vmov 0.0   ;;  %v64_v49 = vlaneseq  ;;  %s652_s1 = inlined_call_operand.vmem [shape: f32[128,256], index: 1, kind: input, shape index: {}]   ;;  %s653_s0 = inlined_call_operand.vmem [shape: f32[128,128], index: 0, kind: input, shape index: {}]   ;;  %s654_s2 = inlined_call_operand.vmem [shape: f32[1,256], index: 2, kind: input, shape index: {}]   ;;  %s655_s3 = inlined_call_operand.vmem [shape: f32[128,256], index: 3, kind: output, shape index: {}]  }
   0x1   :  { %v61_v0 = vld [vmem:[%s652_s1 + $0xf8] sm:$0xff]  ;;  %v60_v1 = vld [vmem:[%s652_s1 + $0xf0] sm:$0xff]  ;;  %v59_v2 = vld [vmem:[%s652_s1 + $0xe8] sm:$0xff]  ;;  %138 = vmatprep.mubr.f32.mxu0 %v336_v3  ;;  %186 = vmatprep.mubr.f32.mxu1 %v336_v3 }
   0x2   :  { %74 = vmatprep.subr.mxu0 %v61_v0  ;;  %303 = vmatprep.subr.mxu1 %v61_v0  ;;  %v58_v4 = vld [vmem:[%s652_s1 + $0xe0] sm:$0xff]  ;;  %v57_v5 = vld [vmem:[%s652_s1 + $0xd8] sm:$0xff]  ;;  %v56_v6 = vld [vmem:[%s652_s1 + $0xd0] sm:$0xff]  ;;  %v65_v50 = vshrl.u32 %v64_v49, 7 }
   0x3   :  { %75 = vmatpush1.msra.mxu0 %v60_v1  ;;  %319 = vmatpush1.msra.mxu1 %v60_v1  ;;  %v55_v7 = vld [vmem:[%s652_s1 + $0xc8] sm:$0xff]  ;;  %v54_v8 = vld [vmem:[%s652_s1 + $0xc0] sm:$0xff]  ;;  %v53_v9 = vld [vmem:[%s652_s1 + $0xb8] sm:$0xff] }
   0x4   :  { %76 = vmatprep.subr.mxu0 %v59_v2  ;;  %304 = vmatprep.subr.mxu1 %v59_v2  ;;  %v52_v10 = vld [vmem:[%s652_s1 + $0xb0] sm:$0xff]  ;;  %v51_v11 = vld [vmem:[%s652_s1 + $0xa8] sm:$0xff]  ;;  %v50_v12 = vld [vmem:[%s652_s1 + $0xa0] sm:$0xff]  ;;  %v66_v51 = vsub.s32 0, %v65_v50  ;;  %v70_v53 = vsub.s32 1, %v65_v50 }
   0x5   :  { %77 = vmatpush1.msra.mxu0 %v58_v4  ;;  %320 = vmatpush1.msra.mxu1 %v58_v4  ;;  %v49_v13 = vld [vmem:[%s652_s1 + $0x98] sm:$0xff]  ;;  %v48_v14 = vld [vmem:[%s652_s1 + $0x90] sm:$0xff]  ;;  %v47_v15 = vld [vmem:[%s652_s1 + $0x88] sm:$0xff] }
   0x6   :  { %78 = vmatprep.subr.mxu0 %v57_v5  ;;  %305 = vmatprep.subr.mxu1 %v57_v5  ;;  %v46_v16 = vld [vmem:[%s652_s1 + $0x80] sm:$0xff]  ;;  %v45_v17 = vld [vmem:[%s652_s1 + $0x78] sm:$0xff]  ;;  %v44_v18 = vld [vmem:[%s652_s1 + $0x70] sm:$0xff] }
   0x7   :  { %79 = vmatpush1.msra.mxu0 %v56_v6  ;;  %321 = vmatpush1.msra.mxu1 %v56_v6  ;;  %v43_v19 = vld [vmem:[%s652_s1 + $0x68] sm:$0xff]  ;;  %v42_v20 = vld [vmem:[%s652_s1 + $0x60] sm:$0xff]  ;;  %v41_v21 = vld [vmem:[%s652_s1 + $0x58] sm:$0xff] }
   0x8   :  { %80 = vmatprep.subr.mxu0 %v55_v7  ;;  %306 = vmatprep.subr.mxu1 %v55_v7  ;;  %v40_v22 = vld [vmem:[%s652_s1 + $0x50] sm:$0xff]  ;;  %v39_v23 = vld [vmem:[%s652_s1 + $0x48] sm:$0xff]  ;;  %v38_v24 = vld [vmem:[%s652_s1 + $0x40] sm:$0xff] }
   0x9   :  { %81 = vmatpush1.msra.mxu0 %v54_v8  ;;  %322 = vmatpush1.msra.mxu1 %v54_v8  ;;  %v37_v25 = vld [vmem:[%s652_s1 + $0x38] sm:$0xff]  ;;  %v36_v26 = vld [vmem:[%s652_s1 + $0x30] sm:$0xff]  ;;  %v35_v27 = vld [vmem:[%s652_s1 + $0x28] sm:$0xff] }
   0xa   :  { %82 = vmatprep.subr.mxu0 %v53_v9  ;;  %307 = vmatprep.subr.mxu1 %v53_v9  ;;  %v34_v28 = vld [vmem:[%s652_s1 + $0x20] sm:$0xff]  ;;  %v33_v29 = vld [vmem:[%s652_s1 + $0x18] sm:$0xff]  ;;  %v32_v30 = vld [vmem:[%s652_s1 + $0x10] sm:$0xff] }
   0xb   :  { %83 = vmatpush1.msra.mxu0 %v52_v10  ;;  %323 = vmatpush1.msra.mxu1 %v52_v10  ;;  %v31_v31 = vld [vmem:[%s652_s1 + $0x8] sm:$0xff]  ;;  %v30_v32 = vld [vmem:[%s652_s1] sm:$0xff]  ;;  %v16_v37 = vld [vmem:[%s653_s0 + $0x10] sm:$0xff] }
   0xc   :  { %84 = vmatprep.subr.mxu0 %v51_v11  ;;  %308 = vmatprep.subr.mxu1 %v51_v11  ;;  %v14_v33 = vld [vmem:[%s653_s0] sm:$0xff]  ;;  %v15_v35 = vld [vmem:[%s653_s0 + $0x8] sm:$0xff]  ;;  %v24_v38 = vld [vmem:[%s653_s0 + $0x50] sm:$0xff] }
   0xd   :  { %85 = vmatpush1.msra.mxu0 %v50_v12  ;;  %324 = vmatpush1.msra.mxu1 %v50_v12  ;;  %v22_v34 = vld [vmem:[%s653_s0 + $0x40] sm:$0xff]  ;;  %v23_v36 = vld [vmem:[%s653_s0 + $0x48] sm:$0xff]  ;;  %v17_v39 = vld [vmem:[%s653_s0 + $0x18] sm:$0xff] }
   0xe   :  { %86 = vmatprep.subr.mxu0 %v49_v13  ;;  %309 = vmatprep.subr.mxu1 %v49_v13  ;;  %v25_v40 = vld [vmem:[%s653_s0 + $0x58] sm:$0xff]  ;;  %v18_v41 = vld [vmem:[%s653_s0 + $0x20] sm:$0xff]  ;;  %v19_v43 = vld [vmem:[%s653_s0 + $0x28] sm:$0xff] }
   0xf   :  { %87 = vmatpush1.msra.mxu0 %v48_v14  ;;  %325 = vmatpush1.msra.mxu1 %v48_v14  ;;  %v26_v42 = vld [vmem:[%s653_s0 + $0x60] sm:$0xff]  ;;  %v27_v44 = vld [vmem:[%s653_s0 + $0x68] sm:$0xff]  ;;  %v20_v45 = vld [vmem:[%s653_s0 + $0x30] sm:$0xff] }
  0x10   :  { %88 = vmatprep.subr.mxu0 %v47_v15  ;;  %310 = vmatprep.subr.mxu1 %v47_v15  ;;  %v28_v46 = vld [vmem:[%s653_s0 + $0x70] sm:$0xff]  ;;  %v21_v47 = vld [vmem:[%s653_s0 + $0x38] sm:$0xff]  ;;  %v62_v52 = vld [vmem:[%s654_s2] sm:$0x3] }
  0x11   :  { %89 = vmatpush1.msra.mxu0 %v46_v16  ;;  %326 = vmatpush1.msra.mxu1 %v46_v16  ;;  %v29_v48 = vld [vmem:[%s653_s0 + $0x78] sm:$0xff]  ;;  %v520_v54 = vrot.slane %v62_v52, %v66_v51  ;;  %v522_v55 = vrot.slane %v62_v52, %v70_v53 }
  0x12   :  { %90 = vmatprep.subr.mxu0 %v45_v17  ;;  %311 = vmatprep.subr.mxu1 %v45_v17 }
  0x13   :  { %91 = vmatpush1.msra.mxu0 %v44_v18  ;;  %327 = vmatpush1.msra.mxu1 %v44_v18 }
  0x14   :  { %92 = vmatprep.subr.mxu0 %v43_v19  ;;  %312 = vmatprep.subr.mxu1 %v43_v19 }
  0x15   :  { %93 = vmatpush1.msra.mxu0 %v42_v20  ;;  %328 = vmatpush1.msra.mxu1 %v42_v20 }
  0x16   :  { %94 = vmatprep.subr.mxu0 %v41_v21  ;;  %313 = vmatprep.subr.mxu1 %v41_v21 }
  0x17   :  { %95 = vmatpush1.msra.mxu0 %v40_v22  ;;  %329 = vmatpush1.msra.mxu1 %v40_v22 }
  0x18   :  { %96 = vmatprep.subr.mxu0 %v39_v23  ;;  %314 = vmatprep.subr.mxu1 %v39_v23 }
  0x19   :  { %97 = vmatpush1.msra.mxu0 %v38_v24  ;;  %330 = vmatpush1.msra.mxu1 %v38_v24 }
  0x1a   :  { %98 = vmatprep.subr.mxu0 %v37_v25  ;;  %315 = vmatprep.subr.mxu1 %v37_v25 }
  0x1b   :  { %99 = vmatpush1.msra.mxu0 %v36_v26  ;;  %331 = vmatpush1.msra.mxu1 %v36_v26 }
  0x1c   :  { %100 = vmatprep.subr.mxu0 %v35_v27  ;;  %316 = vmatprep.subr.mxu1 %v35_v27 }
  0x1d   :  { %101 = vmatpush1.msra.mxu0 %v34_v28  ;;  %332 = vmatpush1.msra.mxu1 %v34_v28 }
  0x1e   :  { %102 = vmatprep.subr.mxu0 %v33_v29  ;;  %317 = vmatprep.subr.mxu1 %v33_v29 }
  0x1f   :  { %103 = vmatpush1.msra.mxu0 %v32_v30  ;;  %333 = vmatpush1.msra.mxu1 %v32_v30 }
  0x20   :  { %104 = vmatprep.subr.mxu0 %v31_v31  ;;  %318 = vmatprep.subr.mxu1 %v31_v31 }
  0x21   :  { %105 = vmatpush1.msra.mxu0 %v30_v32  ;;  %334 = vmatpush1.msra.mxu1 %v30_v32 }
  0x22   :  { %139 = vmatmul.mubr.f32.vlgmr.msra.gmra.mxu0 %v14_v33  ;;  %187 = vmatmul.mubr.f32.vlgmr.msra.gmra.mxu1 %v22_v34 }
  0x23   :  { %144 = vmatprep.mubr.f32.mxu0 %v336_v3  ;;  %192 = vmatprep.mubr.f32.mxu1 %v336_v3 }
  0x26   :  { %145 = vmatmul.mubr.f32.gmra.mxu0 %v15_v35  ;;  %193 = vmatmul.mubr.f32.gmra.mxu1 %v23_v36 }
  0x27   :  { %150 = vmatprep.mubr.f32.mxu0 %v336_v3  ;;  %198 = vmatprep.mubr.f32.mxu1 %v336_v3 }
  0x2a   :  { %151 = vmatmul.mubr.f32.gmra.mxu0 %v16_v37  ;;  %199 = vmatmul.mubr.f32.gmra.mxu1 %v24_v38 }
  0x2b   :  { %156 = vmatprep.mubr.f32.mxu0 %v336_v3  ;;  %204 = vmatprep.mubr.f32.mxu1 %v336_v3 }
  0x2e   :  { %157 = vmatmul.mubr.f32.gmra.mxu0 %v17_v39  ;;  %205 = vmatmul.mubr.f32.gmra.mxu1 %v25_v40 }
  0x2f   :  { %162 = vmatprep.mubr.f32.mxu0 %v336_v3  ;;  %210 = vmatprep.mubr.f32.mxu1 %v336_v3 }
  0x32   :  { %163 = vmatmul.mubr.f32.gmra.mxu0 %v18_v41  ;;  %211 = vmatmul.mubr.f32.gmra.mxu1 %v26_v42 }
  0x33   :  { %168 = vmatprep.mubr.f32.mxu0 %v336_v3  ;;  %216 = vmatprep.mubr.f32.mxu1 %v336_v3 }
  0x36   :  { %169 = vmatmul.mubr.f32.gmra.mxu0 %v19_v43  ;;  %217 = vmatmul.mubr.f32.gmra.mxu1 %v27_v44 }
  0x37   :  { %174 = vmatprep.mubr.f32.mxu0 %v336_v3  ;;  %222 = vmatprep.mubr.f32.mxu1 %v336_v3 }
  0x3a   :  { %175 = vmatmul.mubr.f32.gmra.mxu0 %v20_v45  ;;  %223 = vmatmul.mubr.f32.gmra.mxu1 %v28_v46 }
  0x3b   :  { %180 = vmatprep.mubr.f32.mxu0 %v336_v3  ;;  %228 = vmatprep.mubr.f32.mxu1 %v336_v3 }
  0x3e   :  { %181 = vmatmul.mubr.f32.gmra.mxu0 %v21_v47  ;;  %229 = vmatmul.mubr.f32.gmra.mxu1 %v29_v48 }
  0xe2   :  { %v140_v56 = vpop.f32.mrf.mxu0  ;;  %v188_v57 = vpop.f32.mrf.mxu1 }
  0xe3   :  { %v141_v58 = vadd.f32 %v140_v56, %v520_v54  ;;  %v189_v59 = vadd.f32 %v188_v57, %v520_v54 }
  0xe4   :  { %v142_v60 = vpop.f32.mrf.mxu0  ;;  %v190_v61 = vpop.f32.mrf.mxu1 }
  0xe5   :  { %v235_v62 = vmax.f32 %v141_v58, 0.0  ;;  %v251_v63 = vmax.f32 %v189_v59, 0.0  ;;  %v143_v0 = vadd.f32 %v142_v60, %v522_v55  ;;  %v191_v1 = vadd.f32 %v190_v61, %v522_v55 }
  0xe6   :  { %v146_v2 = vpop.f32.mrf.mxu0  ;;  %v194_v3 = vpop.f32.mrf.mxu1 }
  0xe7   :  { %267 = vst [vmem:[%s655_s3] sm:$0xff] %v235_v62  ;;  %283 = vst [vmem:[%s655_s3 + $0x80] sm:$0xff] %v251_v63  ;;  %v236_v4 = vmax.f32 %v143_v0, 0.0  ;;  %v252_v5 = vmax.f32 %v191_v1, 0.0  ;;  %v147_v6 = vadd.f32 %v146_v2, %v520_v54  ;;  %v195_v7 = vadd.f32 %v194_v3, %v520_v54 }
  0xe8   :  { %v148_v8 = vpop.f32.mrf.mxu0  ;;  %v196_v9 = vpop.f32.mrf.mxu1 }
  0xe9   :  { %268 = vst [vmem:[%s655_s3 + $0x8] sm:$0xff] %v236_v4  ;;  %284 = vst [vmem:[%s655_s3 + $0x88] sm:$0xff] %v252_v5  ;;  %v237_v10 = vmax.f32 %v147_v6, 0.0  ;;  %v253_v11 = vmax.f32 %v195_v7, 0.0  ;;  %v149_v12 = vadd.f32 %v148_v8, %v522_v55  ;;  %v197_v13 = vadd.f32 %v196_v9, %v522_v55 }
  0xea   :  { %v152_v14 = vpop.f32.mrf.mxu0  ;;  %v200_v15 = vpop.f32.mrf.mxu1 }
  0xeb   :  { %269 = vst [vmem:[%s655_s3 + $0x10] sm:$0xff] %v237_v10  ;;  %285 = vst [vmem:[%s655_s3 + $0x90] sm:$0xff] %v253_v11  ;;  %v238_v16 = vmax.f32 %v149_v12, 0.0  ;;  %v254_v17 = vmax.f32 %v197_v13, 0.0  ;;  %v153_v18 = vadd.f32 %v152_v14, %v520_v54  ;;  %v201_v19 = vadd.f32 %v200_v15, %v520_v54 }
  0xec   :  { %v154_v20 = vpop.f32.mrf.mxu0  ;;  %v202_v21 = vpop.f32.mrf.mxu1 }
  0xed   :  { %270 = vst [vmem:[%s655_s3 + $0x18] sm:$0xff] %v238_v16  ;;  %286 = vst [vmem:[%s655_s3 + $0x98] sm:$0xff] %v254_v17  ;;  %v239_v22 = vmax.f32 %v153_v18, 0.0  ;;  %v255_v23 = vmax.f32 %v201_v19, 0.0  ;;  %v155_v24 = vadd.f32 %v154_v20, %v522_v55  ;;  %v203_v25 = vadd.f32 %v202_v21, %v522_v55 }
  0xee   :  { %v158_v26 = vpop.f32.mrf.mxu0  ;;  %v206_v27 = vpop.f32.mrf.mxu1 }
  0xef   :  { %271 = vst [vmem:[%s655_s3 + $0x20] sm:$0xff] %v239_v22  ;;  %287 = vst [vmem:[%s655_s3 + $0xa0] sm:$0xff] %v255_v23  ;;  %v240_v28 = vmax.f32 %v155_v24, 0.0  ;;  %v256_v29 = vmax.f32 %v203_v25, 0.0  ;;  %v159_v30 = vadd.f32 %v158_v26, %v520_v54  ;;  %v207_v31 = vadd.f32 %v206_v27, %v520_v54 }
  0xf0   :  { %v160_v32 = vpop.f32.mrf.mxu0  ;;  %v208_v33 = vpop.f32.mrf.mxu1 }
  0xf1   :  { %272 = vst [vmem:[%s655_s3 + $0x28] sm:$0xff] %v240_v28  ;;  %288 = vst [vmem:[%s655_s3 + $0xa8] sm:$0xff] %v256_v29  ;;  %v241_v34 = vmax.f32 %v159_v30, 0.0  ;;  %v257_v35 = vmax.f32 %v207_v31, 0.0  ;;  %v161_v36 = vadd.f32 %v160_v32, %v522_v55  ;;  %v209_v37 = vadd.f32 %v208_v33, %v522_v55 }
  0xf2   :  { %v164_v38 = vpop.f32.mrf.mxu0  ;;  %v212_v39 = vpop.f32.mrf.mxu1 }
  0xf3   :  { %273 = vst [vmem:[%s655_s3 + $0x30] sm:$0xff] %v241_v34  ;;  %289 = vst [vmem:[%s655_s3 + $0xb0] sm:$0xff] %v257_v35  ;;  %v242_v40 = vmax.f32 %v161_v36, 0.0  ;;  %v258_v41 = vmax.f32 %v209_v37, 0.0  ;;  %v165_v42 = vadd.f32 %v164_v38, %v520_v54  ;;  %v213_v43 = vadd.f32 %v212_v39, %v520_v54 }
  0xf4   :  { %v166_v44 = vpop.f32.mrf.mxu0  ;;  %v214_v45 = vpop.f32.mrf.mxu1 }
  0xf5   :  { %274 = vst [vmem:[%s655_s3 + $0x38] sm:$0xff] %v242_v40  ;;  %290 = vst [vmem:[%s655_s3 + $0xb8] sm:$0xff] %v258_v41  ;;  %v243_v46 = vmax.f32 %v165_v42, 0.0  ;;  %v259_v47 = vmax.f32 %v213_v43, 0.0  ;;  %v167_v48 = vadd.f32 %v166_v44, %v522_v55  ;;  %v215_v49 = vadd.f32 %v214_v45, %v522_v55 }
  0xf6   :  { %v170_v50 = vpop.f32.mrf.mxu0  ;;  %v218_v51 = vpop.f32.mrf.mxu1 }
  0xf7   :  { %275 = vst [vmem:[%s655_s3 + $0x40] sm:$0xff] %v243_v46  ;;  %291 = vst [vmem:[%s655_s3 + $0xc0] sm:$0xff] %v259_v47  ;;  %v244_v52 = vmax.f32 %v167_v48, 0.0  ;;  %v260_v53 = vmax.f32 %v215_v49, 0.0  ;;  %v171_v56 = vadd.f32 %v170_v50, %v520_v54  ;;  %v219_v57 = vadd.f32 %v218_v51, %v520_v54 }
  0xf8   :  { %v172_v58 = vpop.f32.mrf.mxu0  ;;  %v220_v59 = vpop.f32.mrf.mxu1 }
  0xf9   :  { %276 = vst [vmem:[%s655_s3 + $0x48] sm:$0xff] %v244_v52  ;;  %292 = vst [vmem:[%s655_s3 + $0xc8] sm:$0xff] %v260_v53  ;;  %v245_v60 = vmax.f32 %v171_v56, 0.0  ;;  %v261_v61 = vmax.f32 %v219_v57, 0.0  ;;  %v173_v62 = vadd.f32 %v172_v58, %v522_v55  ;;  %v221_v63 = vadd.f32 %v220_v59, %v522_v55 }
  0xfa   :  { %v176_v0 = vpop.f32.mrf.mxu0  ;;  %v224_v1 = vpop.f32.mrf.mxu1 }
  0xfb   :  { %277 = vst [vmem:[%s655_s3 + $0x50] sm:$0xff] %v245_v60  ;;  %293 = vst [vmem:[%s655_s3 + $0xd0] sm:$0xff] %v261_v61  ;;  %v246_v2 = vmax.f32 %v173_v62, 0.0  ;;  %v262_v3 = vmax.f32 %v221_v63, 0.0  ;;  %v177_v4 = vadd.f32 %v176_v0, %v520_v54  ;;  %v225_v5 = vadd.f32 %v224_v1, %v520_v54 }
  0xfc   :  { %v178_v6 = vpop.f32.mrf.mxu0  ;;  %v226_v7 = vpop.f32.mrf.mxu1 }
  0xfd   :  { %278 = vst [vmem:[%s655_s3 + $0x58] sm:$0xff] %v246_v2  ;;  %294 = vst [vmem:[%s655_s3 + $0xd8] sm:$0xff] %v262_v3  ;;  %v247_v8 = vmax.f32 %v177_v4, 0.0  ;;  %v263_v9 = vmax.f32 %v225_v5, 0.0  ;;  %v179_v10 = vadd.f32 %v178_v6, %v522_v55  ;;  %v227_v11 = vadd.f32 %v226_v7, %v522_v55 }
  0xfe   :  { %v182_v12 = vpop.f32.mrf.mxu0  ;;  %v230_v13 = vpop.f32.mrf.mxu1 }
  0xff   :  { %279 = vst [vmem:[%s655_s3 + $0x60] sm:$0xff] %v247_v8  ;;  %295 = vst [vmem:[%s655_s3 + $0xe0] sm:$0xff] %v263_v9  ;;  %v248_v14 = vmax.f32 %v179_v10, 0.0  ;;  %v264_v15 = vmax.f32 %v227_v11, 0.0  ;;  %v183_v16 = vadd.f32 %v182_v12, %v520_v54  ;;  %v231_v17 = vadd.f32 %v230_v13, %v520_v54 }
 0x100   :  { %v184_v18 = vpop.f32.mrf.mxu0  ;;  %v232_v19 = vpop.f32.mrf.mxu1 }
 0x101   :  { %280 = vst [vmem:[%s655_s3 + $0x68] sm:$0xff] %v248_v14  ;;  %296 = vst [vmem:[%s655_s3 + $0xe8] sm:$0xff] %v264_v15  ;;  %v249_v20 = vmax.f32 %v183_v16, 0.0  ;;  %v265_v21 = vmax.f32 %v231_v17, 0.0  ;;  %v185_v22 = vadd.f32 %v184_v18, %v522_v55  ;;  %v233_v23 = vadd.f32 %v232_v19, %v522_v55 }
 0x103   :  { %281 = vst [vmem:[%s655_s3 + $0x70] sm:$0xff] %v249_v20  ;;  %297 = vst [vmem:[%s655_s3 + $0xf0] sm:$0xff] %v265_v21  ;;  %v250_v54 = vmax.f32 %v185_v22, 0.0  ;;  %v266_v24 = vmax.f32 %v233_v23, 0.0 }
 0x105   :  { %282 = vst [vmem:[%s655_s3 + $0x78] sm:$0xff] %v250_v54  ;;  %298 = vst [vmem:[%s655_s3 + $0xf8] sm:$0xff] %v266_v24 }

// kernel: nv_encoder_forward.11
= control target key start
LH: loop header
LB: loop body
LE: loop exit
PB: predicated region body
PF: predicated region fallthrough
CT: control target
= control target key end

     0   :  { %s522_s1 = inlined_call_operand.vmem [shape: f32[128,128], index: 1, kind: input, shape index: {}]   ;;  %s523_s0 = inlined_call_operand.vmem [shape: f32[128,128], index: 0, kind: input, shape index: {}]   ;;  %s524_s2 = inlined_call_operand.vmem [shape: f32[1,128], index: 2, kind: input, shape index: {}]   ;;  %s525_s3 = inlined_call_operand.vmem [shape: f32[128,128], index: 3, kind: output, shape index: {}]  }
   0x1   :  { %v45_v0 = vld [vmem:[%s522_s1 + $0x78] sm:$0xff]  ;;  %v44_v1 = vld [vmem:[%s522_s1 + $0x70] sm:$0xff]  ;;  %v43_v2 = vld [vmem:[%s522_s1 + $0x68] sm:$0xff] }
   0x2   :  { %267 = vmatprep.subr.mxu0 %v45_v0  ;;  %323 = vmatprep.subr.mxu1 %v45_v0  ;;  %v42_v3 = vld [vmem:[%s522_s1 + $0x60] sm:$0xff]  ;;  %v41_v4 = vld [vmem:[%s522_s1 + $0x58] sm:$0xff]  ;;  %v40_v5 = vld [vmem:[%s522_s1 + $0x50] sm:$0xff] }
   0x3   :  { %268 = vmatpush3.msra.mxu0 %v45_v0  ;;  %339 = vmatpush3.msra.mxu1 %v45_v0  ;;  %v39_v6 = vld [vmem:[%s522_s1 + $0x48] sm:$0xff]  ;;  %v38_v7 = vld [vmem:[%s522_s1 + $0x40] sm:$0xff]  ;;  %v37_v8 = vld [vmem:[%s522_s1 + $0x38] sm:$0xff] }
   0x4   :  { %269 = vmatprep.subr.mxu0 %v44_v1  ;;  %324 = vmatprep.subr.mxu1 %v44_v1  ;;  %v36_v9 = vld [vmem:[%s522_s1 + $0x30] sm:$0xff]  ;;  %v35_v10 = vld [vmem:[%s522_s1 + $0x28] sm:$0xff]  ;;  %v34_v11 = vld [vmem:[%s522_s1 + $0x20] sm:$0xff] }
   0x5   :  { %270 = vmatpush3.msra.mxu0 %v44_v1  ;;  %340 = vmatpush3.msra.mxu1 %v44_v1  ;;  %v33_v12 = vld [vmem:[%s522_s1 + $0x18] sm:$0xff]  ;;  %v32_v13 = vld [vmem:[%s522_s1 + $0x10] sm:$0xff]  ;;  %v31_v14 = vld [vmem:[%s522_s1 + $0x8] sm:$0xff] }
   0x6   :  { %271 = vmatprep.subr.mxu0 %v43_v2  ;;  %325 = vmatprep.subr.mxu1 %v43_v2  ;;  %v30_v15 = vld [vmem:[%s522_s1] sm:$0xff]  ;;  %v15_v18 = vld [vmem:[%s523_s0 + $0x8] sm:$0xff]  ;;  %v16_v20 = vld [vmem:[%s523_s0 + $0x10] sm:$0xff] }
   0x7   :  { %272 = vmatpush3.msra.mxu0 %v43_v2  ;;  %341 = vmatpush3.msra.mxu1 %v43_v2  ;;  %v14_v16 = vld [vmem:[%s523_s0] sm:$0xff]  ;;  %v23_v19 = vld [vmem:[%s523_s0 + $0x48] sm:$0xff]  ;;  %v24_v21 = vld [vmem:[%s523_s0 + $0x50] sm:$0xff] }
   0x8   :  { %273 = vmatprep.subr.mxu0 %v42_v3  ;;  %326 = vmatprep.subr.mxu1 %v42_v3  ;;  %v22_v17 = vld [vmem:[%s523_s0 + $0x40] sm:$0xff]  ;;  %v17_v22 = vld [vmem:[%s523_s0 + $0x18] sm:$0xff]  ;;  %v19_v26 = vld [vmem:[%s523_s0 + $0x28] sm:$0xff] }
   0x9   :  { %274 = vmatpush3.msra.mxu0 %v42_v3  ;;  %342 = vmatpush3.msra.mxu1 %v42_v3  ;;  %v25_v23 = vld [vmem:[%s523_s0 + $0x58] sm:$0xff]  ;;  %v18_v24 = vld [vmem:[%s523_s0 + $0x20] sm:$0xff]  ;;  %v27_v27 = vld [vmem:[%s523_s0 + $0x68] sm:$0xff] }
   0xa   :  { %275 = vmatprep.subr.mxu0 %v41_v4  ;;  %327 = vmatprep.subr.mxu1 %v41_v4  ;;  %v26_v25 = vld [vmem:[%s523_s0 + $0x60] sm:$0xff]  ;;  %v20_v28 = vld [vmem:[%s523_s0 + $0x30] sm:$0xff]  ;;  %v21_v30 = vld [vmem:[%s523_s0 + $0x38] sm:$0xff] }
   0xb   :  { %276 = vmatpush3.msra.mxu0 %v41_v4  ;;  %343 = vmatpush3.msra.mxu1 %v41_v4  ;;  %v28_v29 = vld [vmem:[%s523_s0 + $0x70] sm:$0xff]  ;;  %v29_v31 = vld [vmem:[%s523_s0 + $0x78] sm:$0xff]  ;;  %v234_v32 = vld [vmem:[%s524_s2] ss:$0 sm:$0xff] }
   0xc   :  { %277 = vmatprep.subr.mxu0 %v40_v5  ;;  %328 = vmatprep.subr.mxu1 %v40_v5 }
   0xd   :  { %278 = vmatpush3.msra.mxu0 %v40_v5  ;;  %344 = vmatpush3.msra.mxu1 %v40_v5 }
   0xe   :  { %279 = vmatprep.subr.mxu0 %v39_v6  ;;  %329 = vmatprep.subr.mxu1 %v39_v6 }
   0xf   :  { %280 = vmatpush3.msra.mxu0 %v39_v6  ;;  %345 = vmatpush3.msra.mxu1 %v39_v6 }
  0x10   :  { %281 = vmatprep.subr.mxu0 %v38_v7  ;;  %330 = vmatprep.subr.mxu1 %v38_v7 }
  0x11   :  { %282 = vmatpush3.msra.mxu0 %v38_v7  ;;  %346 = vmatpush3.msra.mxu1 %v38_v7 }
  0x12   :  { %283 = vmatprep.subr.mxu0 %v37_v8  ;;  %331 = vmatprep.subr.mxu1 %v37_v8 }
  0x13   :  { %284 = vmatpush3.msra.mxu0 %v37_v8  ;;  %347 = vmatpush3.msra.mxu1 %v37_v8 }
  0x14   :  { %285 = vmatprep.subr.mxu0 %v36_v9  ;;  %332 = vmatprep.subr.mxu1 %v36_v9 }
  0x15   :  { %286 = vmatpush3.msra.mxu0 %v36_v9  ;;  %348 = vmatpush3.msra.mxu1 %v36_v9 }
  0x16   :  { %287 = vmatprep.subr.mxu0 %v35_v10  ;;  %333 = vmatprep.subr.mxu1 %v35_v10 }
  0x17   :  { %288 = vmatpush3.msra.mxu0 %v35_v10  ;;  %349 = vmatpush3.msra.mxu1 %v35_v10 }
  0x18   :  { %289 = vmatprep.subr.mxu0 %v34_v11  ;;  %334 = vmatprep.subr.mxu1 %v34_v11 }
  0x19   :  { %290 = vmatpush3.msra.mxu0 %v34_v11  ;;  %350 = vmatpush3.msra.mxu1 %v34_v11 }
  0x1a   :  { %291 = vmatprep.subr.mxu0 %v33_v12  ;;  %335 = vmatprep.subr.mxu1 %v33_v12 }
  0x1b   :  { %292 = vmatpush3.msra.mxu0 %v33_v12  ;;  %351 = vmatpush3.msra.mxu1 %v33_v12 }
  0x1c   :  { %293 = vmatprep.subr.mxu0 %v32_v13  ;;  %336 = vmatprep.subr.mxu1 %v32_v13 }
  0x1d   :  { %294 = vmatpush3.msra.mxu0 %v32_v13  ;;  %352 = vmatpush3.msra.mxu1 %v32_v13 }
  0x1e   :  { %295 = vmatprep.subr.mxu0 %v31_v14  ;;  %337 = vmatprep.subr.mxu1 %v31_v14 }
  0x1f   :  { %296 = vmatpush3.msra.mxu0 %v31_v14  ;;  %353 = vmatpush3.msra.mxu1 %v31_v14 }
  0x20   :  { %297 = vmatprep.subr.mxu0 %v30_v15  ;;  %338 = vmatprep.subr.mxu1 %v30_v15 }
  0x21   :  { %298 = vmatpush3.msra.mxu0 %v30_v15  ;;  %354 = vmatpush3.msra.mxu1 %v30_v15 }
  0x22   :  { %299 = vmatprep.mubr.f32.mxu0 %v14_v16  ;;  %311 = vmatprep.mubr.f32.mxu1 %v22_v17 }
  0x23   :  { %300 = vmatmul.mubr.f32.vlgmr.msra.gmra.mxu0 %v15_v18  ;;  %312 = vmatmul.mubr.f32.vlgmr.msra.gmra.mxu1 %v23_v19 }
  0x24   :  { %302 = vmatprep.mubr.f32.mxu0 %v16_v20  ;;  %314 = vmatprep.mubr.f32.mxu1 %v24_v21 }
  0x27   :  { %303 = vmatmul.mubr.f32.gmra.mxu0 %v17_v22  ;;  %315 = vmatmul.mubr.f32.gmra.mxu1 %v25_v23 }
  0x28   :  { %305 = vmatprep.mubr.f32.mxu0 %v18_v24  ;;  %317 = vmatprep.mubr.f32.mxu1 %v26_v25 }
  0x2b   :  { %306 = vmatmul.mubr.f32.gmra.mxu0 %v19_v26  ;;  %318 = vmatmul.mubr.f32.gmra.mxu1 %v27_v27 }
  0x2c   :  { %308 = vmatprep.mubr.f32.mxu0 %v20_v28  ;;  %320 = vmatprep.mubr.f32.mxu1 %v28_v29 }
  0x2f   :  { %309 = vmatmul.mubr.f32.gmra.mxu0 %v21_v30  ;;  %321 = vmatmul.mubr.f32.gmra.mxu1 %v29_v31 }
  0xe3   :  { %v301_v33 = vpop.f32.mrf.mxu0  ;;  %v313_v34 = vpop.f32.mrf.mxu1 }
  0xe4   :  { %v125_v35 = vadd.f32 %v301_v33, %v234_v32  ;;  %v165_v36 = vadd.f32 %v313_v34, %v234_v32 }
  0xe5   :  { %v119_v37 = vpop.f32.mrf.mxu0  ;;  %v159_v38 = vpop.f32.mrf.mxu1 }
  0xe6   :  { %v199_v39 = vmax.f32 %v125_v35, 0.0  ;;  %v207_v40 = vmax.f32 %v165_v36, 0.0  ;;  %v120_v41 = vadd.f32 %v234_v32, %v119_v37  ;;  %v160_v42 = vadd.f32 %v234_v32, %v159_v38 }
  0xe7   :  { %v304_v43 = vpop.f32.mrf.mxu0  ;;  %v316_v44 = vpop.f32.mrf.mxu1 }
  0xe8   :  { %215 = vst [vmem:[%s525_s3 + $0x8] sm:$0xff] %v199_v39  ;;  %223 = vst [vmem:[%s525_s3 + $0x48] sm:$0xff] %v207_v40  ;;  %v198_v45 = vmax.f32 %v120_v41, 0.0  ;;  %v206_v46 = vmax.f32 %v160_v42, 0.0  ;;  %v135_v47 = vadd.f32 %v304_v43, %v234_v32  ;;  %v175_v48 = vadd.f32 %v316_v44, %v234_v32 }
  0xe9   :  { %v129_v49 = vpop.f32.mrf.mxu0  ;;  %v169_v50 = vpop.f32.mrf.mxu1 }
  0xea   :  { %214 = vst [vmem:[%s525_s3] sm:$0xff] %v198_v45  ;;  %222 = vst [vmem:[%s525_s3 + $0x40] sm:$0xff] %v206_v46  ;;  %v201_v51 = vmax.f32 %v135_v47, 0.0  ;;  %v209_v52 = vmax.f32 %v175_v48, 0.0  ;;  %v130_v53 = vadd.f32 %v234_v32, %v129_v49  ;;  %v170_v54 = vadd.f32 %v234_v32, %v169_v50 }
  0xeb   :  { %v307_v55 = vpop.f32.mrf.mxu0  ;;  %v319_v56 = vpop.f32.mrf.mxu1 }
  0xec   :  { %217 = vst [vmem:[%s525_s3 + $0x18] sm:$0xff] %v201_v51  ;;  %225 = vst [vmem:[%s525_s3 + $0x58] sm:$0xff] %v209_v52  ;;  %v200_v57 = vmax.f32 %v130_v53, 0.0  ;;  %v208_v58 = vmax.f32 %v170_v54, 0.0  ;;  %v145_v59 = vadd.f32 %v307_v55, %v234_v32  ;;  %v185_v60 = vadd.f32 %v319_v56, %v234_v32 }
  0xed   :  { %v139_v61 = vpop.f32.mrf.mxu0  ;;  %v179_v62 = vpop.f32.mrf.mxu1 }
  0xee   :  { %216 = vst [vmem:[%s525_s3 + $0x10] sm:$0xff] %v200_v57  ;;  %224 = vst [vmem:[%s525_s3 + $0x50] sm:$0xff] %v208_v58  ;;  %v203_v63 = vmax.f32 %v145_v59, 0.0  ;;  %v211_v0 = vmax.f32 %v185_v60, 0.0  ;;  %v140_v1 = vadd.f32 %v234_v32, %v139_v61  ;;  %v180_v2 = vadd.f32 %v234_v32, %v179_v62 }
  0xef   :  { %v310_v3 = vpop.f32.mrf.mxu0  ;;  %v322_v4 = vpop.f32.mrf.mxu1 }
  0xf0   :  { %219 = vst [vmem:[%s525_s3 + $0x28] sm:$0xff] %v203_v63  ;;  %227 = vst [vmem:[%s525_s3 + $0x68] sm:$0xff] %v211_v0  ;;  %v202_v5 = vmax.f32 %v140_v1, 0.0  ;;  %v210_v6 = vmax.f32 %v180_v2, 0.0  ;;  %v155_v7 = vadd.f32 %v310_v3, %v234_v32  ;;  %v195_v8 = vadd.f32 %v322_v4, %v234_v32 }
  0xf1   :  { %v149_v9 = vpop.f32.mrf.mxu0  ;;  %v189_v10 = vpop.f32.mrf.mxu1 }
  0xf2   :  { %218 = vst [vmem:[%s525_s3 + $0x20] sm:$0xff] %v202_v5  ;;  %226 = vst [vmem:[%s525_s3 + $0x60] sm:$0xff] %v210_v6  ;;  %v205_v11 = vmax.f32 %v155_v7, 0.0  ;;  %v213_v12 = vmax.f32 %v195_v8, 0.0  ;;  %v150_v13 = vadd.f32 %v234_v32, %v149_v9  ;;  %v190_v14 = vadd.f32 %v234_v32, %v189_v10 }
  0xf4   :  { %221 = vst [vmem:[%s525_s3 + $0x38] sm:$0xff] %v205_v11  ;;  %229 = vst [vmem:[%s525_s3 + $0x78] sm:$0xff] %v213_v12  ;;  %v204_v15 = vmax.f32 %v150_v13, 0.0  ;;  %v212_v16 = vmax.f32 %v190_v14, 0.0 }
  0xf6   :  { %220 = vst [vmem:[%s525_s3 + $0x30] sm:$0xff] %v204_v15  ;;  %228 = vst [vmem:[%s525_s3 + $0x70] sm:$0xff] %v212_v16 }

// kernel: nv_encoder_forward.12
= control target key start
LH: loop header
LB: loop body
LE: loop exit
PB: predicated region body
PF: predicated region fallthrough
CT: control target
= control target key end

     0   :  { %17 = vsyncpa [#allocation7], 0  ;;  %s5151_s0 = inlined_call_operand.vmem [shape: bf16[256,256], index: 0, kind: input, shape index: {}]   ;;  %s5152_s1 = inlined_call_operand.vmem [shape: f32[256,256], index: 1, kind: input, shape index: {}]   ;;  %s5153_s2 = inlined_call_operand.vmem [shape: bf16[256,128], index: 2, kind: input, shape index: {}]   ;;  %s5154_s3 = inlined_call_operand.vmem [shape: bf16[256,128], index: 3, kind: input, shape index: {}]   ;;  %s5155_s4 = inlined_call_operand.vmem [shape: bf16[256,384], index: 4, kind: input, shape index: {}]   ;;  %s5156_s5 = inlined_call_operand.vmem [shape: f32[256,640], index: 5, kind: input, shape index: {}, may-alias: {5,6}]   ;;  %s5157_s6 = inlined_call_operand.vmem [shape: f32[256,640], index: 6, kind: input, shape index: {}, may-alias: {5,6}]   ;;  %s5158_s7 = inlined_call_operand.vmem [shape: f32[128,256], index: 7, kind: input, shape index: {}]   ;;  %s5159_s8 = inlined_call_operand.vmem [shape: f32[128,128], index: 8, kind: input, shape index: {}]   ;;  %s5160_s9 = inlined_call_operand.vmem [shape: f32[384,512], index: 9, kind: input, shape index: {}]   ;;  %s5161_s10 = inlined_call_operand.vmem [shape: f32[256,5], index: 10, kind: input, shape index: {}]   ;;  %s5162_s11 = inlined_call_operand.vmem [shape: f32[256,128], index: 11, kind: input, shape index: {}]   ;;  %s5163_s12 = inlined_call_operand.hbm [shape: f32[256,128], index: 12, kind: output, shape index: {}]  }
   0x1   :  { %19 = vsyncpa [#allocation7 + $0x1], 0  ;;  %s4044_s21 = smov 0   ;;  %s4046_s22 = smov 0  }
   0x2   :  { %s4048_s23 = smov 0   ;;  %s4050_s24 = smov 0  }
   0x3 LB: > { %5165 = sst [smem:[#allocation9_spill]] %s3965_s23  ;;  %s4065_s25 = sadd.s32 4294967295, %s3969_s24   ;;  %s3969_s24 = sphi %s4050_s24, %s5177_s24   ;;  %s3965_s23 = sphi %s4048_s23, %s5174_s23   ;;  %s3961_s22 = sphi %s4046_s22, %s5176_s22   ;;  %s3957_s21 = sphi %s4044_s21, %s5175_s21  }
   0x4   : > { %s3195_s26 = sadd.s32 4294967294, %s3969_s24   ;;  %s4069_s27 = sadd.s32 1, %s3969_s24  }
   0x5   : > { %s319_s28 = sadd.s32 1, %s3965_s23  ;;  %s316_s29 = ssub.s32 %s3969_s24, %s4069_s27 }
   0x6   : > { %p329_p0 = scmp.ne.s32.totalorder %s3965_s23, %s3961_s22  ;;  %p317_p1 = scmp.eq.s32.totalorder %s316_s29, 0 }
   0x7   : > { %p330_p2 = scmp.eq.s32.totalorder %s4065_s25, 1  ;;  %p335_p3 = scmp.ne.s32.totalorder %s3961_s22, %s3957_s21 }
   0x8   : > { %p336_p4 = scmp.eq.s32.totalorder %s3195_s26, 1  ;;  %p3196_p7 = scmp.ge.s32.totalorder %s3969_s24, 1 }
   0x9   : > { %s4080_s30 = scalar_select %p317_p1, %s3965_s23, %s319_s28  }
   0xa   : > { %p4082_p5 = por %p330_p2, %p329_p0  ;;  %p4086_p6 = por %p336_p4, %p335_p3 }
   0xb   : > { %5166 = sst [smem:[#allocation10_spill]] %s4080_s30  ;;  %p343_p8 = scmp.lt.s32.totalorder %s3969_s24, 3 }
   0xd   : > { %p4092_p9 = pnand %p3196_p7, %p343_p8 }
   0xe   : > { %p3197_p10 = scmp.ne.s32.totalorder (!%p4092_p9), %s4065_s25, 0 }
   0xf   : > { %347 = sbr.rel (%p4092_p9) target bundleno = 132 (0x84), region = 12 }
  0x14   : > { %351 = sbr.rel (%p3197_p10) target bundleno = 42 (0x2a), region = 16 }
  0x19   : > { %v442_v0 = vld [vmem:[%s5156_s5] sm:$0xff]  ;;  %v444_v1 = vld [vmem:[%s5156_s5 + $0x28] sm:$0xff]  ;;  %v446_v2 = vld [vmem:[%s5156_s5 + $0x50] sm:$0xff] }
  0x1a   : > { %443 = vst [vmem:[#allocation2 + $0xb0] sm:$0xff] %v442_v0  ;;  %445 = vst [vmem:[#allocation2] sm:$0xff] %v444_v1  ;;  %v448_v3 = vld [vmem:[%s5156_s5 + $0x78] sm:$0xff]  ;;  %v450_v4 = vld [vmem:[%s5156_s5 + $0xa0] sm:$0xff] }
  0x1b   : > { %447 = vst [vmem:[#allocation2 + $0xd8] sm:$0xff] %v446_v2  ;;  %v452_v5 = vld [vmem:[%s5156_s5 + $0xc8] sm:$0xff]  ;;  %449 = vst [vmem:[#allocation2 + $0x18] sm:$0xff] %v448_v3  ;;  %v454_v6 = vld [vmem:[%s5156_s5 + $0xf0] sm:$0xff] }
  0x1c   : > { %451 = vst [vmem:[#allocation2 + $0x50] sm:$0xff] %v450_v4  ;;  %453 = vst [vmem:[#allocation2 + $0x68] sm:$0xff] %v452_v5  ;;  %v456_v7 = vld [vmem:[%s5156_s5 + $0x118] sm:$0xff]  ;;  %v458_v8 = vld [vmem:[%s5156_s5 + $0x140] sm:$0xff] }
  0x1d   : > { %455 = vst [vmem:[#allocation2 + $0x30] sm:$0xff] %v454_v6  ;;  %457 = vst [vmem:[#allocation2 + $0x48] sm:$0xff] %v456_v7  ;;  %v460_v9 = vld [vmem:[%s5156_s5 + $0x168] sm:$0xff]  ;;  %v462_v10 = vld [vmem:[%s5156_s5 + $0x190] sm:$0xff] }
  0x1e   : > { %459 = vst [vmem:[#allocation2 + $0x80] sm:$0xff] %v458_v8  ;;  %v464_v11 = vld [vmem:[%s5156_s5 + $0x1b8] sm:$0xff]  ;;  %461 = vst [vmem:[#allocation2 + $0x88] sm:$0xff] %v460_v9  ;;  %v466_v12 = vld [vmem:[%s5156_s5 + $0x1e0] sm:$0xff] }
  0x1f   : > { %463 = vst [vmem:[#allocation2 + $0xe8] sm:$0xff] %v462_v10  ;;  %465 = vst [vmem:[#allocation2 + $0xb8] sm:$0xff] %v464_v11  ;;  %v468_v13 = vld [vmem:[%s5156_s5 + $0x208] sm:$0xff]  ;;  %v470_v14 = vld [vmem:[%s5156_s5 + $0x230] sm:$0xff] }
  0x20   : > { %467 = vst [vmem:[#allocation2 + $0x60] sm:$0xff] %v466_v12  ;;  %469 = vst [vmem:[#allocation2 + $0xf0] sm:$0xff] %v468_v13  ;;  %v472_v15 = vld [vmem:[%s5156_s5 + $0x258] sm:$0xff]  ;;  %v474_v16 = vld [vmem:[%s5156_s5 + $0x280] sm:$0xff] }
  0x21   : > { %471 = vst [vmem:[#allocation2 + $0x8] sm:$0xff] %v470_v14  ;;  %v476_v17 = vld [vmem:[%s5156_s5 + $0x2a8] sm:$0xff]  ;;  %473 = vst [vmem:[#allocation2 + $0x78] sm:$0xff] %v472_v15  ;;  %v478_v18 = vld [vmem:[%s5156_s5 + $0x2d0] sm:$0xff] }
  0x22   : > { %475 = vst [vmem:[#allocation2 + $0x38] sm:$0xff] %v474_v16  ;;  %477 = vst [vmem:[#allocation2 + $0x58] sm:$0xff] %v476_v17  ;;  %v480_v19 = vld [vmem:[%s5156_s5 + $0x2f8] sm:$0xff]  ;;  %v482_v20 = vld [vmem:[%s5156_s5 + $0x320] sm:$0xff] }
  0x23   : > { %479 = vst [vmem:[#allocation2 + $0x40] sm:$0xff] %v478_v18  ;;  %481 = vst [vmem:[#allocation2 + $0xc8] sm:$0xff] %v480_v19  ;;  %v484_v21 = vld [vmem:[%s5156_s5 + $0x348] sm:$0xff]  ;;  %v486_v22 = vld [vmem:[%s5156_s5 + $0x370] sm:$0xff] }
  0x24   : > { %483 = vst [vmem:[#allocation2 + $0xe0] sm:$0xff] %v482_v20  ;;  %v488_v23 = vld [vmem:[%s5156_s5 + $0x398] sm:$0xff]  ;;  %485 = vst [vmem:[#allocation2 + $0x90] sm:$0xff] %v484_v21  ;;  %v490_v24 = vld [vmem:[%s5156_s5 + $0x3c0] sm:$0xff] }
  0x25   : > { %487 = vst [vmem:[#allocation2 + $0x70] sm:$0xff] %v486_v22  ;;  %489 = vst [vmem:[#allocation2 + $0xc0] sm:$0xff] %v488_v23  ;;  %v492_v25 = vld [vmem:[%s5156_s5 + $0x3e8] sm:$0xff]  ;;  %v494_v26 = vld [vmem:[%s5156_s5 + $0x410] sm:$0xff] }
  0x26   : > { %491 = vst [vmem:[#allocation2 + $0xa8] sm:$0xff] %v490_v24  ;;  %493 = vst [vmem:[#allocation2 + $0xd0] sm:$0xff] %v492_v25  ;;  %v496_v27 = vld [vmem:[%s5156_s5 + $0x438] sm:$0xff]  ;;  %v498_v28 = vld [vmem:[%s5156_s5 + $0x460] sm:$0xff] }
  0x27   : > { %495 = vst [vmem:[#allocation2 + $0x10] sm:$0xff] %v494_v26  ;;  %v500_v29 = vld [vmem:[%s5156_s5 + $0x488] sm:$0xff]  ;;  %497 = vst [vmem:[#allocation2 + $0x28] sm:$0xff] %v496_v27  ;;  %v502_v30 = vld [vmem:[%s5156_s5 + $0x4b0] sm:$0xff] }
  0x28   : > { %499 = vst [vmem:[#allocation2 + $0xa0] sm:$0xff] %v498_v28  ;;  %501 = vst [vmem:[#allocation2 + $0xf8] sm:$0xff] %v500_v29  ;;  %v504_v31 = vld [vmem:[%s5156_s5 + $0x4d8] sm:$0xff] }
  0x29   : > { %503 = vst [vmem:[#allocation2 + $0x20] sm:$0xff] %v502_v30  ;;  %505 = vst [vmem:[#allocation2 + $0x98] sm:$0xff] %v504_v31 }
  0x2a PF: > { %511 = sbr.rel (%p3197_p10) target bundleno = 64 (0x40), region = 54 }
  0x2f   : > { %v3199_v32 = vld [vmem:[%s5157_s6 + $0x8] sm:$0xff]  ;;  %v3200_v33 = vld [vmem:[%s5157_s6 + $0x30] sm:$0xff]  ;;  %v3201_v34 = vld [vmem:[%s5157_s6 + $0x58] sm:$0xff] }
  0x30   : > { %604 = vst [vmem:[#allocation3 + $0x80] sm:$0xff] %v3199_v32  ;;  %606 = vst [vmem:[#allocation3 + $0xc8] sm:$0xff] %v3200_v33  ;;  %v3202_v35 = vld [vmem:[%s5157_s6 + $0x80] sm:$0xff]  ;;  %v3203_v36 = vld [vmem:[%s5157_s6 + $0xa8] sm:$0xff] }
  0x31   : > { %608 = vst [vmem:[#allocation3 + $0xe8] sm:$0xff] %v3201_v34  ;;  %v3204_v37 = vld [vmem:[%s5157_s6 + $0xd0] sm:$0xff]  ;;  %610 = vst [vmem:[#allocation3 + $0x78] sm:$0xff] %v3202_v35  ;;  %v3205_v38 = vld [vmem:[%s5157_s6 + $0xf8] sm:$0xff] }
  0x32   : > { %612 = vst [vmem:[#allocation3 + $0x8] sm:$0xff] %v3203_v36  ;;  %614 = vst [vmem:[#allocation3 + $0x90] sm:$0xff] %v3204_v37  ;;  %v3206_v39 = vld [vmem:[%s5157_s6 + $0x120] sm:$0xff]  ;;  %v3207_v40 = vld [vmem:[%s5157_s6 + $0x148] sm:$0xff] }
  0x33   : > { %616 = vst [vmem:[#allocation3 + $0x58] sm:$0xff] %v3205_v38  ;;  %618 = vst [vmem:[#allocation3 + $0xa8] sm:$0xff] %v3206_v39  ;;  %v3208_v41 = vld [vmem:[%s5157_s6 + $0x170] sm:$0xff]  ;;  %v3209_v42 = vld [vmem:[%s5157_s6 + $0x198] sm:$0xff] }
  0x34   : > { %620 = vst [vmem:[#allocation3 + $0xd0] sm:$0xff] %v3207_v40  ;;  %v3210_v43 = vld [vmem:[%s5157_s6 + $0x1c0] sm:$0xff]  ;;  %622 = vst [vmem:[#allocation3 + $0xb0] sm:$0xff] %v3208_v41  ;;  %v3211_v44 = vld [vmem:[%s5157_s6 + $0x1e8] sm:$0xff] }
  0x35   : > { %624 = vst [vmem:[#allocation3 + $0x38] sm:$0xff] %v3209_v42  ;;  %626 = vst [vmem:[#allocation3 + $0x40] sm:$0xff] %v3210_v43  ;;  %v3212_v45 = vld [vmem:[%s5157_s6 + $0x210] sm:$0xff]  ;;  %v3213_v46 = vld [vmem:[%s5157_s6 + $0x238] sm:$0xff] }
  0x36   : > { %628 = vst [vmem:[#allocation3 + $0xe0] sm:$0xff] %v3211_v44  ;;  %630 = vst [vmem:[#allocation3 + $0x60] sm:$0xff] %v3212_v45  ;;  %v3214_v47 = vld [vmem:[%s5157_s6 + $0x260] sm:$0xff]  ;;  %v3215_v48 = vld [vmem:[%s5157_s6 + $0x288] sm:$0xff] }
  0x37   : > { %632 = vst [vmem:[#allocation3 + $0x18] sm:$0xff] %v3213_v46  ;;  %v3216_v49 = vld [vmem:[%s5157_s6 + $0x2b0] sm:$0xff]  ;;  %634 = vst [vmem:[#allocation3 + $0x68] sm:$0xff] %v3214_v47  ;;  %v3217_v50 = vld [vmem:[%s5157_s6 + $0x2d8] sm:$0xff] }
  0x38   : > { %636 = vst [vmem:[#allocation3 + $0x10] sm:$0xff] %v3215_v48  ;;  %638 = vst [vmem:[#allocation3 + $0x70] sm:$0xff] %v3216_v49  ;;  %v3218_v51 = vld [vmem:[%s5157_s6 + $0x300] sm:$0xff]  ;;  %v3219_v52 = vld [vmem:[%s5157_s6 + $0x328] sm:$0xff] }
  0x39   : > { %640 = vst [vmem:[#allocation3 + $0x50] sm:$0xff] %v3217_v50  ;;  %642 = vst [vmem:[#allocation3 + $0xa0] sm:$0xff] %v3218_v51  ;;  %v3220_v53 = vld [vmem:[%s5157_s6 + $0x350] sm:$0xff]  ;;  %v3221_v54 = vld [vmem:[%s5157_s6 + $0x378] sm:$0xff] }
  0x3a   : > { %644 = vst [vmem:[#allocation3 + $0xd8] sm:$0xff] %v3219_v52  ;;  %v3222_v55 = vld [vmem:[%s5157_s6 + $0x3a0] sm:$0xff]  ;;  %646 = vst [vmem:[#allocation3 + $0x30] sm:$0xff] %v3220_v53  ;;  %v3223_v56 = vld [vmem:[%s5157_s6 + $0x3c8] sm:$0xff] }
  0x3b   : > { %648 = vst [vmem:[#allocation3 + $0x20] sm:$0xff] %v3221_v54  ;;  %650 = vst [vmem:[#allocation3 + $0xf0] sm:$0xff] %v3222_v55  ;;  %v3224_v57 = vld [vmem:[%s5157_s6 + $0x3f0] sm:$0xff]  ;;  %v3225_v58 = vld [vmem:[%s5157_s6 + $0x418] sm:$0xff] }
  0x3c   : > { %652 = vst [vmem:[#allocation3 + $0x88] sm:$0xff] %v3223_v56  ;;  %654 = vst [vmem:[#allocation3 + $0x48] sm:$0xff] %v3224_v57  ;;  %v3226_v59 = vld [vmem:[%s5157_s6 + $0x440] sm:$0xff]  ;;  %v3227_v60 = vld [vmem:[%s5157_s6 + $0x468] sm:$0xff] }
  0x3d   : > { %656 = vst [vmem:[#allocation3 + $0xf8] sm:$0xff] %v3225_v58  ;;  %v3228_v61 = vld [vmem:[%s5157_s6 + $0x490] sm:$0xff]  ;;  %658 = vst [vmem:[#allocation3 + $0xc0] sm:$0xff] %v3226_v59  ;;  %v3229_v62 = vld [vmem:[%s5157_s6 + $0x4b8] sm:$0xff] }
  0x3e   : > { %660 = vst [vmem:[#allocation3 + $0xb8] sm:$0xff] %v3227_v60  ;;  %662 = vst [vmem:[#allocation3] sm:$0xff] %v3228_v61  ;;  %v3230_v63 = vld [vmem:[%s5157_s6 + $0x4e0] sm:$0xff] }
  0x3f   : > { %664 = vst [vmem:[#allocation3 + $0x28] sm:$0xff] %v3229_v62  ;;  %666 = vst [vmem:[#allocation3 + $0x98] sm:$0xff] %v3230_v63 }
  0x40 PF: > { %672 = sbr.rel (%p3197_p10) target bundleno = 78 (0x4e), region = 92 }
  0x45   : > { %v731_v0 = vld [vmem:[%s5158_s7] sm:$0xff]  ;;  %v733_v1 = vld [vmem:[%s5158_s7 + $0x10] sm:$0xff] }
  0x46   : > { %v735_v2 = vld [vmem:[%s5158_s7 + $0x20] sm:$0xff]  ;;  %732 = vst [vmem:[#allocation4 + $0x30] sm:$0xff] %v731_v0  ;;  %734 = vst [vmem:[#allocation4 + $0x38] sm:$0xff] %v733_v1  ;;  %v737_v3 = vld [vmem:[%s5158_s7 + $0x30] sm:$0xff] }
  0x47   : > { %736 = vst [vmem:[#allocation4 + $0x40] sm:$0xff] %v735_v2  ;;  %v739_v4 = vld [vmem:[%s5158_s7 + $0x40] sm:$0xff]  ;;  %v741_v5 = vld [vmem:[%s5158_s7 + $0x50] sm:$0xff]  ;;  %738 = vst [vmem:[#allocation4 + $0x10] sm:$0xff] %v737_v3 }
  0x48   : > { %740 = vst [vmem:[#allocation4 + $0x28] sm:$0xff] %v739_v4  ;;  %742 = vst [vmem:[#allocation4] sm:$0xff] %v741_v5  ;;  %v743_v6 = vld [vmem:[%s5158_s7 + $0x60] sm:$0xff]  ;;  %v745_v7 = vld [vmem:[%s5158_s7 + $0x70] sm:$0xff] }
  0x49   : > { %v747_v8 = vld [vmem:[%s5158_s7 + $0x80] sm:$0xff]  ;;  %744 = vst [vmem:[#allocation4 + $0x50] sm:$0xff] %v743_v6  ;;  %746 = vst [vmem:[#allocation4 + $0x68] sm:$0xff] %v745_v7  ;;  %v749_v9 = vld [vmem:[%s5158_s7 + $0x90] sm:$0xff] }
  0x4a   : > { %748 = vst [vmem:[#allocation4 + $0x8] sm:$0xff] %v747_v8  ;;  %v751_v10 = vld [vmem:[%s5158_s7 + $0xa0] sm:$0xff]  ;;  %v753_v11 = vld [vmem:[%s5158_s7 + $0xb0] sm:$0xff]  ;;  %750 = vst [vmem:[#allocation4 + $0x60] sm:$0xff] %v749_v9 }
  0x4b   : > { %752 = vst [vmem:[#allocation4 + $0x78] sm:$0xff] %v751_v10  ;;  %754 = vst [vmem:[#allocation4 + $0x20] sm:$0xff] %v753_v11  ;;  %v755_v12 = vld [vmem:[%s5158_s7 + $0xc0] sm:$0xff]  ;;  %v757_v13 = vld [vmem:[%s5158_s7 + $0xd0] sm:$0xff] }
  0x4c   : > { %v759_v14 = vld [vmem:[%s5158_s7 + $0xe0] sm:$0xff]  ;;  %756 = vst [vmem:[#allocation4 + $0x48] sm:$0xff] %v755_v12  ;;  %758 = vst [vmem:[#allocation4 + $0x58] sm:$0xff] %v757_v13  ;;  %v761_v15 = vld [vmem:[%s5158_s7 + $0xf0] sm:$0xff] }
  0x4d   : > { %760 = vst [vmem:[#allocation4 + $0x70] sm:$0xff] %v759_v14  ;;  %762 = vst [vmem:[#allocation4 + $0x18] sm:$0xff] %v761_v15 }
  0x4e PF: > { %771 = sbr.rel (%p3197_p10) target bundleno = 132 (0x84), region = 134 }
  0x53   : > { %v894_v16 = vld [vmem:[%s5160_s9] sm:$0xff] }
  0x54   : > { %v896_v17 = vld [vmem:[%s5160_s9 + $0x20] sm:$0xff]  ;;  %895 = vst [vmem:[#allocation5 + $0x8] sm:$0xff] %v894_v16 }
  0x55   : > { %v898_v18 = vld [vmem:[%s5160_s9 + $0x40] sm:$0xff]  ;;  %897 = vst [vmem:[#allocation5 + $0x128] sm:$0xff] %v896_v17 }
  0x56   : > { %899 = vst [vmem:[#allocation5 + $0x148] sm:$0xff] %v898_v18  ;;  %v900_v19 = vld [vmem:[%s5160_s9 + $0x60] sm:$0xff] }
  0x57   : > { %v902_v20 = vld [vmem:[%s5160_s9 + $0x80] sm:$0xff]  ;;  %901 = vst [vmem:[#allocation5 + $0x70] sm:$0xff] %v900_v19 }
  0x58   : > { %v904_v21 = vld [vmem:[%s5160_s9 + $0xa0] sm:$0xff]  ;;  %903 = vst [vmem:[#allocation5 + $0x48] sm:$0xff] %v902_v20 }
  0x59   : > { %905 = vst [vmem:[#allocation5 + $0x98] sm:$0xff] %v904_v21  ;;  %v906_v22 = vld [vmem:[%s5160_s9 + $0xc0] sm:$0xff] }
  0x5a   : > { %v908_v23 = vld [vmem:[%s5160_s9 + $0xe0] sm:$0xff]  ;;  %907 = vst [vmem:[#allocation5 + $0x158] sm:$0xff] %v906_v22 }
  0x5b   : > { %v910_v24 = vld [vmem:[%s5160_s9 + $0x100] sm:$0xff]  ;;  %909 = vst [vmem:[#allocation5 + $0xb0] sm:$0xff] %v908_v23 }
  0x5c   : > { %911 = vst [vmem:[#allocation5 + $0x108] sm:$0xff] %v910_v24  ;;  %v912_v25 = vld [vmem:[%s5160_s9 + $0x120] sm:$0xff] }
  0x5d   : > { %v914_v26 = vld [vmem:[%s5160_s9 + $0x140] sm:$0xff]  ;;  %913 = vst [vmem:[#allocation5 + $0x100] sm:$0xff] %v912_v25 }
  0x5e   : > { %v916_v27 = vld [vmem:[%s5160_s9 + $0x160] sm:$0xff]  ;;  %915 = vst [vmem:[#allocation5 + $0x50] sm:$0xff] %v914_v26 }
  0x5f   : > { %917 = vst [vmem:[#allocation5 + $0xd0] sm:$0xff] %v916_v27  ;;  %v918_v28 = vld [vmem:[%s5160_s9 + $0x180] sm:$0xff] }
  0x60   : > { %v920_v29 = vld [vmem:[%s5160_s9 + $0x1a0] sm:$0xff]  ;;  %919 = vst [vmem:[#allocation5 + $0xc0] sm:$0xff] %v918_v28 }
  0x61   : > { %v922_v30 = vld [vmem:[%s5160_s9 + $0x1c0] sm:$0xff]  ;;  %921 = vst [vmem:[#allocation5 + $0x140] sm:$0xff] %v920_v29 }
  0x62   : > { %923 = vst [vmem:[#allocation5 + $0x120] sm:$0xff] %v922_v30  ;;  %v924_v31 = vld [vmem:[%s5160_s9 + $0x1e0] sm:$0xff] }
  0x63   : > { %v926_v32 = vld [vmem:[%s5160_s9 + $0x200] sm:$0xff]  ;;  %925 = vst [vmem:[#allocation5 + $0x68] sm:$0xff] %v924_v31 }
  0x64   : > { %v928_v33 = vld [vmem:[%s5160_s9 + $0x220] sm:$0xff]  ;;  %927 = vst [vmem:[#allocation5 + $0x28] sm:$0xff] %v926_v32 }
  0x65   : > { %929 = vst [vmem:[#allocation5 + $0xe8] sm:$0xff] %v928_v33  ;;  %v930_v34 = vld [vmem:[%s5160_s9 + $0x240] sm:$0xff] }
  0x66   : > { %v932_v35 = vld [vmem:[%s5160_s9 + $0x260] sm:$0xff]  ;;  %931 = vst [vmem:[#allocation5 + $0x118] sm:$0xff] %v930_v34 }
  0x67   : > { %v934_v36 = vld [vmem:[%s5160_s9 + $0x280] sm:$0xff]  ;;  %933 = vst [vmem:[#allocation5 + $0x110] sm:$0xff] %v932_v35 }
  0x68   : > { %935 = vst [vmem:[#allocation5 + $0x130] sm:$0xff] %v934_v36  ;;  %v936_v37 = vld [vmem:[%s5160_s9 + $0x2a0] sm:$0xff] }
  0x69   : > { %v938_v38 = vld [vmem:[%s5160_s9 + $0x2c0] sm:$0xff]  ;;  %937 = vst [vmem:[#allocation5 + $0x10] sm:$0xff] %v936_v37 }
  0x6a   : > { %v940_v39 = vld [vmem:[%s5160_s9 + $0x2e0] sm:$0xff]  ;;  %939 = vst [vmem:[#allocation5 + $0x38] sm:$0xff] %v938_v38 }
  0x6b   : > { %941 = vst [vmem:[#allocation5 + $0x58] sm:$0xff] %v940_v39  ;;  %v942_v40 = vld [vmem:[%s5160_s9 + $0x300] sm:$0xff] }
  0x6c   : > { %v944_v41 = vld [vmem:[%s5160_s9 + $0x320] sm:$0xff]  ;;  %943 = vst [vmem:[#allocation5 + $0xd8] sm:$0xff] %v942_v40 }
  0x6d   : > { %v946_v42 = vld [vmem:[%s5160_s9 + $0x340] sm:$0xff]  ;;  %945 = vst [vmem:[#allocation5 + $0x178] sm:$0xff] %v944_v41 }
  0x6e   : > { %947 = vst [vmem:[#allocation5 + $0x20] sm:$0xff] %v946_v42  ;;  %v948_v43 = vld [vmem:[%s5160_s9 + $0x360] sm:$0xff] }
  0x6f   : > { %v950_v44 = vld [vmem:[%s5160_s9 + $0x380] sm:$0xff]  ;;  %949 = vst [vmem:[#allocation5 + $0x150] sm:$0xff] %v948_v43 }
  0x70   : > { %v952_v45 = vld [vmem:[%s5160_s9 + $0x3a0] sm:$0xff]  ;;  %951 = vst [vmem:[#allocation5 + $0x138] sm:$0xff] %v950_v44 }
  0x71   : > { %953 = vst [vmem:[#allocation5 + $0xf8] sm:$0xff] %v952_v45  ;;  %v954_v46 = vld [vmem:[%s5160_s9 + $0x3c0] sm:$0xff] }
  0x72   : > { %v956_v47 = vld [vmem:[%s5160_s9 + $0x3e0] sm:$0xff]  ;;  %955 = vst [vmem:[#allocation5 + $0xa8] sm:$0xff] %v954_v46 }
  0x73   : > { %v958_v48 = vld [vmem:[%s5160_s9 + $0x400] sm:$0xff]  ;;  %957 = vst [vmem:[#allocation5 + $0x40] sm:$0xff] %v956_v47 }
  0x74   : > { %959 = vst [vmem:[#allocation5 + $0xa0] sm:$0xff] %v958_v48  ;;  %v960_v49 = vld [vmem:[%s5160_s9 + $0x420] sm:$0xff] }
  0x75   : > { %v962_v50 = vld [vmem:[%s5160_s9 + $0x440] sm:$0xff]  ;;  %961 = vst [vmem:[#allocation5 + $0x88] sm:$0xff] %v960_v49 }
  0x76   : > { %v964_v51 = vld [vmem:[%s5160_s9 + $0x460] sm:$0xff]  ;;  %963 = vst [vmem:[#allocation5 + $0xf0] sm:$0xff] %v962_v50 }
  0x77   : > { %965 = vst [vmem:[#allocation5 + $0x78] sm:$0xff] %v964_v51  ;;  %v966_v52 = vld [vmem:[%s5160_s9 + $0x480] sm:$0xff] }
  0x78   : > { %v968_v53 = vld [vmem:[%s5160_s9 + $0x4a0] sm:$0xff]  ;;  %967 = vst [vmem:[#allocation5 + $0x168] sm:$0xff] %v966_v52 }
  0x79   : > { %v970_v54 = vld [vmem:[%s5160_s9 + $0x4c0] sm:$0xff]  ;;  %969 = vst [vmem:[#allocation5 + $0xe0] sm:$0xff] %v968_v53 }
  0x7a   : > { %971 = vst [vmem:[#allocation5 + $0x80] sm:$0xff] %v970_v54  ;;  %v972_v55 = vld [vmem:[%s5160_s9 + $0x4e0] sm:$0xff] }
  0x7b   : > { %v974_v56 = vld [vmem:[%s5160_s9 + $0x500] sm:$0xff]  ;;  %973 = vst [vmem:[#allocation5 + $0xc8] sm:$0xff] %v972_v55 }
  0x7c   : > { %v976_v57 = vld [vmem:[%s5160_s9 + $0x520] sm:$0xff]  ;;  %975 = vst [vmem:[#allocation5 + $0x170] sm:$0xff] %v974_v56 }
  0x7d   : > { %977 = vst [vmem:[#allocation5] sm:$0xff] %v976_v57  ;;  %v978_v58 = vld [vmem:[%s5160_s9 + $0x540] sm:$0xff] }
  0x7e   : > { %v980_v59 = vld [vmem:[%s5160_s9 + $0x560] sm:$0xff]  ;;  %979 = vst [vmem:[#allocation5 + $0x60] sm:$0xff] %v978_v58 }
  0x7f   : > { %v982_v60 = vld [vmem:[%s5160_s9 + $0x580] sm:$0xff]  ;;  %981 = vst [vmem:[#allocation5 + $0x30] sm:$0xff] %v980_v59 }
  0x80   : > { %983 = vst [vmem:[#allocation5 + $0x18] sm:$0xff] %v982_v60  ;;  %v984_v61 = vld [vmem:[%s5160_s9 + $0x5a0] sm:$0xff] }
  0x81   : > { %v986_v62 = vld [vmem:[%s5160_s9 + $0x5c0] sm:$0xff]  ;;  %985 = vst [vmem:[#allocation5 + $0x160] sm:$0xff] %v984_v61 }
  0x82   : > { %v988_v63 = vld [vmem:[%s5160_s9 + $0x5e0] sm:$0xff]  ;;  %987 = vst [vmem:[#allocation5 + $0x90] sm:$0xff] %v986_v62 }
  0x83   : > { %989 = vst [vmem:[#allocation5 + $0xb8] sm:$0xff] %v988_v63 }
  0x84 PF: > { %1068 = sbr.rel (%p4092_p9) target bundleno = 580 (0x244), region = 204 }
  0x89   : > { %v1292_v0 = vld [vmem:[#allocation2 + $0x98] sm:$0xff]  ;;  %v1613_v3 = vld [vmem:[#allocation3 + $0x68] sm:$0xff]  ;;  %v1291_v4 = vld [vmem:[#allocation2 + $0x20] sm:$0xff]  ;;  %s3236_s15 = sshll.u32 %s4065_s25, 4 }
  0x8a   : > { %v1629_v1 = vld [vmem:[#allocation3 + $0x98] sm:$0xff]  ;;  %3338 = vmatprep.subr.mxu0 %v1292_v0  ;;  %v1628_v5 = vld [vmem:[#allocation3 + $0x28] sm:$0xff]  ;;  %v1627_v9 = vld [vmem:[#allocation3] sm:$0xff]  ;;  %p4496_p11 = scmp.lt.s32.totalorder %s3236_s15, 31 }
  0x8b   : > { %v1276_v2 = vld [vmem:[#allocation2 + $0x78] sm:$0xff]  ;;  %3418 = vmatprep.subr.mxu1 %v1629_v1  ;;  %v1275_v6 = vld [vmem:[#allocation2 + $0x8] sm:$0xff]  ;;  %v1274_v10 = vld [vmem:[#allocation2 + $0xf0] sm:$0xff] }
  0x8c   : > { %3339 = vmatpush3.msra.mxu0 %v1276_v2  ;;  %3419 = vmatpush3.msra.mxu1 %v1613_v3  ;;  %v1612_v7 = vld [vmem:[#allocation3 + $0x18] sm:$0xff]  ;;  %v1611_v11 = vld [vmem:[#allocation3 + $0x60] sm:$0xff]  ;;  %v1288_v16 = vld [vmem:[#allocation2 + $0x28] sm:$0xff]  ;;  %s5179_s15 = smov (!%p4496_p11, %s3236_s15), 31 }
  0x8d   : > { %v1290_v8 = vld [vmem:[#allocation2 + $0xf8] sm:$0xff]  ;;  %3340 = vmatprep.subr.mxu0 %v1291_v4  ;;  %3420 = vmatprep.subr.mxu1 %v1628_v5  ;;  %v1289_v12 = vld [vmem:[#allocation2 + $0xa0] sm:$0xff]  ;;  %v1287_v20 = vld [vmem:[#allocation2 + $0x10] sm:$0xff]  ;;  %s4507_s29 = sshll.u32 %s5179_s15, 3  ;;  %s3258_s17 = sshll.u32 %s5179_s15, 4 }
  0x8e   : > { %3341 = vmatpush3.msra.mxu0 %v1275_v6  ;;  %3421 = vmatpush3.msra.mxu1 %v1612_v7  ;;  %v1626_v13 = vld [vmem:[#allocation3 + $0xb8] sm:$0xff]  ;;  %v1273_v14 = vld [vmem:[#allocation2 + $0x60] sm:$0xff]  ;;  %v1271_v22 = vld [vmem:[#allocation2 + $0xe8] sm:$0xff]  ;;  %s4513_s16 = scalar_lea.vmem %s5151_s0, %s4507_s29  ;;  %s4520_s20 = scalar_lea.vmem %s5152_s1, %s3258_s17 }
  0x8f   : > { %3342 = vmatprep.subr.mxu0 %v1290_v8  ;;  %3422 = vmatprep.subr.mxu1 %v1627_v9  ;;  %v1610_v15 = vld [vmem:[#allocation3 + $0xe0] sm:$0xff]  ;;  %v1272_v18 = vld [vmem:[#allocation2 + $0xb8] sm:$0xff]  ;;  %v1286_v24 = vld [vmem:[#allocation2 + $0xd0] sm:$0xff]  ;;  %s4531_s23 = scalar_lea.vmem %s5161_s10, %s4507_s29  ;;  %s3243_s30 = sshll.u32 %s5179_s15, 2 }
  0x90   : > { %3343 = vmatpush3.msra.mxu0 %v1274_v10  ;;  %3423 = vmatpush3.msra.mxu1 %v1611_v11  ;;  %v1625_v17 = vld [vmem:[#allocation3 + $0xc0] sm:$0xff]  ;;  %v1624_v21 = vld [vmem:[#allocation3 + $0xf8] sm:$0xff]  ;;  %v1623_v25 = vld [vmem:[#allocation3 + $0x48] sm:$0xff]  ;;  %s4663_s18 = scalar_lea.vmem %s5153_s2, %s3243_s30  ;;  %s4687_s26 = scalar_lea.vmem %s5154_s3, %s3243_s30 }
  0x91   : > { %3344 = vmatprep.subr.mxu0 %v1289_v12  ;;  %3424 = vmatprep.subr.mxu1 %v1626_v13  ;;  %v1609_v19 = vld [vmem:[#allocation3 + $0x40] sm:$0xff]  ;;  %v1608_v23 = vld [vmem:[#allocation3 + $0x38] sm:$0xff]  ;;  %v1270_v26 = vld [vmem:[#allocation2 + $0x88] sm:$0xff]  ;;  %s3259_s17 = sshll.u32 %s4065_s25, 11 }
  0x92   : > { %3345 = vmatpush3.msra.mxu0 %v1273_v14  ;;  %3425 = vmatpush3.msra.mxu1 %v1610_v15  ;;  %v1607_v27 = vld [vmem:[#allocation3 + $0xb0] sm:$0xff]  ;;  %v1285_v28 = vld [vmem:[#allocation2 + $0xa8] sm:$0xff]  ;;  %v1269_v30 = vld [vmem:[#allocation2 + $0x80] sm:$0xff] }
  0x93   : > { %3346 = vmatprep.subr.mxu0 %v1288_v16  ;;  %3426 = vmatprep.subr.mxu1 %v1625_v17  ;;  %v1622_v29 = vld [vmem:[#allocation3 + $0x88] sm:$0xff]  ;;  %v1606_v31 = vld [vmem:[#allocation3 + $0xd0] sm:$0xff]  ;;  %v1284_v32 = vld [vmem:[#allocation2 + $0xc0] sm:$0xff]  ;;  %v3971_v17 = vmov 0  }
  0x94   : > { %3347 = vmatpush3.msra.mxu0 %v1272_v18  ;;  %3427 = vmatpush3.msra.mxu1 %v1609_v19  ;;  %v1621_v33 = vld [vmem:[#allocation3 + $0xf0] sm:$0xff]  ;;  %v1268_v34 = vld [vmem:[#allocation2 + $0x48] sm:$0xff]  ;;  %v1620_v37 = vld [vmem:[#allocation3 + $0x20] sm:$0xff] }
  0x95   : > { %3348 = vmatprep.subr.mxu0 %v1287_v20  ;;  %3428 = vmatprep.subr.mxu1 %v1624_v21  ;;  %v1605_v35 = vld [vmem:[#allocation3 + $0xa8] sm:$0xff]  ;;  %v1283_v36 = vld [vmem:[#allocation2 + $0x70] sm:$0xff]  ;;  %v1604_v39 = vld [vmem:[#allocation3 + $0x58] sm:$0xff] }
  0x96   : > { %3349 = vmatpush3.msra.mxu0 %v1271_v22  ;;  %3429 = vmatpush3.msra.mxu1 %v1608_v23  ;;  %v1267_v38 = vld [vmem:[#allocation2 + $0x30] sm:$0xff]  ;;  %v1266_v42 = vld [vmem:[#allocation2 + $0x68] sm:$0xff]  ;;  %v1281_v44 = vld [vmem:[#allocation2 + $0xe0] sm:$0xff] }
  0x97   : > { %3350 = vmatprep.subr.mxu0 %v1286_v24  ;;  %3430 = vmatprep.subr.mxu1 %v1623_v25  ;;  %v1282_v40 = vld [vmem:[#allocation2 + $0x90] sm:$0xff]  ;;  %v1618_v45 = vld [vmem:[#allocation3 + $0xd8] sm:$0xff]  ;;  %v1602_v47 = vld [vmem:[#allocation3 + $0x8] sm:$0xff] }
  0x98   : > { %3351 = vmatpush3.msra.mxu0 %v1270_v26  ;;  %3431 = vmatpush3.msra.mxu1 %v1607_v27  ;;  %v1619_v41 = vld [vmem:[#allocation3 + $0x30] sm:$0xff]  ;;  %v1280_v48 = vld [vmem:[#allocation2 + $0xc8] sm:$0xff]  ;;  %v1617_v49 = vld [vmem:[#allocation3 + $0xa0] sm:$0xff] }
  0x99   : > { %3352 = vmatprep.subr.mxu0 %v1285_v28  ;;  %3432 = vmatprep.subr.mxu1 %v1622_v29  ;;  %v1603_v43 = vld [vmem:[#allocation3 + $0x90] sm:$0xff]  ;;  %v1264_v50 = vld [vmem:[#allocation2 + $0x18] sm:$0xff]  ;;  %v1279_v52 = vld [vmem:[#allocation2 + $0x40] sm:$0xff] }
  0x9a   : > { %3353 = vmatpush3.msra.mxu0 %v1269_v30  ;;  %3433 = vmatpush3.msra.mxu1 %v1606_v31  ;;  %v1265_v46 = vld [vmem:[#allocation2 + $0x50] sm:$0xff]  ;;  %v1601_v51 = vld [vmem:[#allocation3 + $0x78] sm:$0xff]  ;;  %v1600_v55 = vld [vmem:[#allocation3 + $0xe8] sm:$0xff] }
  0x9b   : > { %3354 = vmatprep.subr.mxu0 %v1284_v32  ;;  %3434 = vmatprep.subr.mxu1 %v1621_v33  ;;  %v1616_v53 = vld [vmem:[#allocation3 + $0x50] sm:$0xff]  ;;  %v1263_v54 = vld [vmem:[#allocation2 + $0xd8] sm:$0xff]  ;;  %v1213_v56 = vld [vmem:[%s4513_s16] sm:$0xff] }
  0x9c   : > { %3355 = vmatpush3.msra.mxu0 %v1268_v34  ;;  %3435 = vmatpush3.msra.mxu1 %v1605_v35  ;;  %v1278_v57 = vld [vmem:[#allocation2 + $0x58] sm:$0xff]  ;;  %v1615_v58 = vld [vmem:[#allocation3 + $0x70] sm:$0xff]  ;;  %v1262_v59 = vld [vmem:[#allocation2] sm:$0xff]  ;;  %v1230_v63 = vunpack.c.h.bf16 %v1213_v56  ;;  %v1229_v2 = vunpack.c.l.bf16 %v1213_v56 }
  0x9d   : > { %3356 = vmatprep.subr.mxu0 %v1283_v36  ;;  %3436 = vmatprep.subr.mxu1 %v1620_v37  ;;  %v1599_v60 = vld [vmem:[#allocation3 + $0xc8] sm:$0xff]  ;;  %v1277_v61 = vld [vmem:[#allocation2 + $0x38] sm:$0xff]  ;;  %v1614_v62 = vld [vmem:[#allocation3 + $0x10] sm:$0xff] }
  0x9e   : > { %3357 = vmatpush3.msra.mxu0 %v1267_v38  ;;  %3437 = vmatpush3.msra.mxu1 %v1604_v39  ;;  %v1214_v0 = vld [vmem:[%s4513_s16 + $0x8] sm:$0xff]  ;;  %v1261_v1 = vld [vmem:[#allocation2 + $0xb0] sm:$0xff]  ;;  %v1598_v3 = vld [vmem:[#allocation3 + $0x80] sm:$0xff] }
  0x9f   : > { %3358 = vmatprep.subr.mxu0 %v1282_v40  ;;  %3438 = vmatprep.subr.mxu1 %v1619_v41  ;;  %v1567_v4 = vld [vmem:[%s4520_s20 + $0x8] sm:$0xff]  ;;  %v1566_v5 = vld [vmem:[%s4520_s20] sm:$0xff]  ;;  %v1232_v6 = vunpack.c.h.bf16 %v1214_v0  ;;  %v1918_v7 = vld [vmem:[#allocation4 + $0x18] sm:$0xff]  ;;  %v1231_v10 = vunpack.c.l.bf16 %v1214_v0 }
  0xa0   : > { %3359 = vmatpush3.msra.mxu0 %v1266_v42  ;;  %3439 = vmatpush3.msra.mxu1 %v1603_v43  ;;  %v1215_v8 = vld [vmem:[%s4513_s16 + $0x10] sm:$0xff]  ;;  %v1569_v9 = vld [vmem:[%s4520_s20 + $0x18] sm:$0xff]  ;;  %v1571_v15 = vld [vmem:[%s4520_s20 + $0x28] sm:$0xff] }
  0xa1   : > { %3360 = vmatprep.subr.mxu0 %v1281_v44  ;;  %3440 = vmatprep.subr.mxu1 %v1618_v45  ;;  %v1917_v11 = vld [vmem:[#allocation4 + $0x70] sm:$0xff]  ;;  %v1234_v13 = vunpack.c.h.bf16 %v1215_v8  ;;  %v1216_v14 = vld [vmem:[%s4513_s16 + $0x18] sm:$0xff]  ;;  %v1233_v18 = vunpack.c.l.bf16 %v1215_v8  ;;  %v1570_v20 = vld [vmem:[%s4520_s20 + $0x20] sm:$0xff] }
  0xa2   : > { %3361 = vmatpush3.msra.mxu0 %v1265_v46  ;;  %3441 = vmatpush3.msra.mxu1 %v1602_v47  ;;  %v1568_v12 = vld [vmem:[%s4520_s20 + $0x10] sm:$0xff]  ;;  %v1916_v16 = vld [vmem:[#allocation4 + $0x58] sm:$0xff]  ;;  %v1236_v21 = vunpack.c.h.bf16 %v1216_v14  ;;  %v1217_v23 = vld [vmem:[%s4513_s16 + $0x20] sm:$0xff]  ;;  %v1235_v26 = vunpack.c.l.bf16 %v1216_v14 }
  0xa3   : > { %3362 = vmatprep.subr.mxu0 %v1280_v48  ;;  %3442 = vmatprep.subr.mxu1 %v1617_v49  ;;  %v4538_v19 = vld [vmem:[%s4531_s23 + $0x10] sm:$0xff]  ;;  %v1573_v22 = vld [vmem:[%s4520_s20 + $0x38] sm:$0xff]  ;;  %v1915_v24 = vld [vmem:[#allocation4 + $0x48] sm:$0xff]  ;;  %v1238_v28 = vunpack.c.h.bf16 %v1217_v23  ;;  %v1237_v33 = vunpack.c.l.bf16 %v1217_v23 }
  0xa4   : > { %3363 = vmatpush3.msra.mxu0 %v1264_v50  ;;  %3443 = vmatpush3.msra.mxu1 %v1601_v51  ;;  %v2207_v25 = vld [vmem:[%s5159_s8 + $0x78] sm:$0xff]  ;;  %v1572_v27 = vld [vmem:[%s4520_s20 + $0x30] sm:$0xff]  ;;  %v1575_v29 = vld [vmem:[%s4520_s20 + $0x48] sm:$0xff] }
  0xa5   : > { %3364 = vmatprep.subr.mxu0 %v1279_v52  ;;  %3444 = vmatprep.subr.mxu1 %v1616_v53  ;;  %v1218_v30 = vld [vmem:[%s4513_s16 + $0x28] sm:$0xff]  ;;  %v1914_v31 = vld [vmem:[#allocation4 + $0x20] sm:$0xff]  ;;  %v2206_v32 = vld [vmem:[%s5159_s8 + $0x70] sm:$0xff] }
  0xa6   : > { %3365 = vmatpush3.msra.mxu0 %v1263_v54  ;;  %3445 = vmatpush3.msra.mxu1 %v1600_v55  ;;  %v4554_v34 = vld [vmem:[%s4531_s23 + $0x18] sm:$0xff]  ;;  %v1574_v35 = vld [vmem:[%s4520_s20 + $0x40] sm:$0xff]  ;;  %v1240_v36 = vunpack.c.h.bf16 %v1218_v30  ;;  %v1219_v38 = vld [vmem:[%s4513_s16 + $0x30] sm:$0xff]  ;;  %v1239_v40 = vunpack.c.l.bf16 %v1218_v30 }
  0xa7   : > { %3366 = vmatprep.subr.mxu0 %v1278_v57  ;;  %3446 = vmatprep.subr.mxu1 %v1615_v58  ;;  %v1577_v37 = vld [vmem:[%s4520_s20 + $0x58] sm:$0xff]  ;;  %v2205_v41 = vld [vmem:[%s5159_s8 + $0x68] sm:$0xff]  ;;  %v1576_v42 = vld [vmem:[%s4520_s20 + $0x50] sm:$0xff]  ;;  %v1242_v43 = vunpack.c.h.bf16 %v1219_v38  ;;  %v1241_v47 = vunpack.c.l.bf16 %v1219_v38 }
  0xa8   : > { %3367 = vmatpush3.msra.mxu0 %v1262_v59  ;;  %3447 = vmatpush3.msra.mxu1 %v1599_v60  ;;  %v1913_v39 = vld [vmem:[#allocation4 + $0x78] sm:$0xff]  ;;  %v1579_v44 = vld [vmem:[%s4520_s20 + $0x68] sm:$0xff]  ;;  %v1912_v46 = vld [vmem:[#allocation4 + $0x60] sm:$0xff] }
  0xa9   : > { %3368 = vmatprep.subr.mxu0 %v1277_v61  ;;  %3448 = vmatprep.subr.mxu1 %v1614_v62  ;;  %v1220_v45 = vld [vmem:[%s4513_s16 + $0x38] sm:$0xff]  ;;  %v1578_v48 = vld [vmem:[%s4520_s20 + $0x60] sm:$0xff]  ;;  %v1911_v52 = vld [vmem:[#allocation4 + $0x8] sm:$0xff] }
  0xaa   : > { %3369 = vmatpush3.msra.mxu0 %v1261_v1  ;;  %1357 = vmatprep.mubr.f32.mxu0 %v1230_v63  ;;  %v1244_v49 = vunpack.c.h.bf16 %v1220_v45  ;;  %v1581_v50 = vld [vmem:[%s4520_s20 + $0x78] sm:$0xff]  ;;  %v1221_v51 = vld [vmem:[%s4513_s16 + $0x40] sm:$0xff]  ;;  %v1243_v54 = vunpack.c.l.bf16 %v1220_v45  ;;  %v4574_v55 = vld [vmem:[%s4531_s23 + $0x28] sm:$0xff] }
  0xab   : > { %3449 = vmatpush3.msra.mxu1 %v1598_v3  ;;  %1694 = vmatprep.mubr.f32.mxu1 %v1567_v4  ;;  %v2204_v53 = vld [vmem:[%s5159_s8 + $0x60] sm:$0xff]  ;;  %v1580_v56 = vld [vmem:[%s4520_s20 + $0x70] sm:$0xff]  ;;  %v1246_v57 = vunpack.c.h.bf16 %v1221_v51  ;;  %v1583_v58 = vld [vmem:[%s4520_s20 + $0x88] sm:$0xff]  ;;  %v1245_v62 = vunpack.c.l.bf16 %v1221_v51 }
  0xac   : > { %1358 = vmatmul.mubr.f32.vlgmr.msra.gmra.mxu0 %v1229_v2  ;;  %1695 = vmatmul.mubr.f32.vlgmr.msra.gmra.mxu1 %v1566_v5  ;;  %v1222_v59 = vld [vmem:[%s4513_s16 + $0x48] sm:$0xff]  ;;  %v4581_v61 = vld [vmem:[%s4531_s23] sm:$0xff]  ;;  %v1585_v1 = vld [vmem:[%s4520_s20 + $0x98] sm:$0xff] }
  0xad   : > { %3674 = vmatprep.subr.mxu0 %v1918_v7  ;;  %1362 = vmatprep.mubr.f32.mxu0 %v1232_v6  ;;  %v1910_v60 = vld [vmem:[#allocation4 + $0x68] sm:$0xff]  ;;  %v1582_v63 = vld [vmem:[%s4520_s20 + $0x80] sm:$0xff]  ;;  %v1248_v0 = vunpack.c.h.bf16 %v1222_v59  ;;  %v1223_v2 = vld [vmem:[%s4513_s16 + $0x50] sm:$0xff]  ;;  %v1247_v5 = vunpack.c.l.bf16 %v1222_v59 }
  0xae   : > { %3675 = vmatpush3.msra.mxu0 %v1918_v7  ;;  %1699 = vmatprep.mubr.f32.mxu1 %v1569_v9  ;;  %v1909_v3 = vld [vmem:[#allocation4 + $0x50] sm:$0xff]  ;;  %v2203_v4 = vld [vmem:[%s5159_s8 + $0x58] sm:$0xff]  ;;  %v1250_v7 = vunpack.c.h.bf16 %v1223_v2  ;;  %v1587_v8 = vld [vmem:[%s4520_s20 + $0xa8] sm:$0xff] }
  0xaf   : > { %3676 = vmatprep.subr.mxu0 %v1917_v11  ;;  %3890 = vset.pattern.permute.xlu1 %v3971_v17  ;;  %v1584_v6 = vld [vmem:[%s4520_s20 + $0x90] sm:$0xff]  ;;  %v1224_v9 = vld [vmem:[%s4513_s16 + $0x58] sm:$0xff]  ;;  %v1586_v14 = vld [vmem:[%s4520_s20 + $0xa0] sm:$0xff] }
  0xb0   : > { %1363 = vmatmul.mubr.f32.gmra.mxu0 %v1231_v10  ;;  %1700 = vmatmul.mubr.f32.gmra.mxu1 %v1568_v12  ;;  %v1908_v10 = vld [vmem:[#allocation4] sm:$0xff]  ;;  %v1249_v12 = vunpack.c.l.bf16 %v1223_v2  ;;  %v2198_v38 = vld [vmem:[%s5159_s8 + $0x30] sm:$0xff]  ;;  %v2197_v45 = vld [vmem:[%s5159_s8 + $0x28] sm:$0xff] }
  0xb1   : > { %3677 = vmatpush3.msra.mxu0 %v1917_v11  ;;  %1367 = vmatprep.mubr.f32.mxu0 %v1234_v13  ;;  %v2202_v11 = vld [vmem:[%s5159_s8 + $0x50] sm:$0xff]  ;;  %v4597_v13 = vld [vmem:[%s4531_s23 + $0x38] sm:$0xff]  ;;  %v4621_v30 = vld [vmem:[%s4531_s23 + $0x20] sm:$0xff] }
  0xb2   : > { %1704 = vmatprep.mubr.f32.mxu1 %v1571_v15  ;;  %3678 = vmatprep.subr.mxu0 %v1916_v16  ;;  %v1252_v15 = vunpack.c.h.bf16 %v1224_v9  ;;  %v4656_v51 = vld [vmem:[%s4531_s23 + $0x40] sm:$0xff]  ;;  %v2194_v59 = vld [vmem:[%s5159_s8 + $0x10] sm:$0xff] }
  0xb3   : > { %3679 = vmatpush3.msra.mxu0 %v1916_v16  ;;  %1466 = vperm.xlu1 %3890, %v4538_v19   ;;  %v1589_v16 = vld [vmem:[%s4520_s20 + $0xb8] sm:$0xff] }
  0xb4   : > { %1368 = vmatmul.mubr.f32.gmra.mxu0 %v1233_v18  ;;  %1705 = vmatmul.mubr.f32.gmra.mxu1 %v1570_v20  ;;  %v4604_v18 = vld [vmem:[%s4531_s23 + $0x8] sm:$0xff] }
  0xb5   : > { %1372 = vmatprep.mubr.f32.mxu0 %v1236_v21  ;;  %1709 = vmatprep.mubr.f32.mxu1 %v1573_v22  ;;  %v1907_v20 = vld [vmem:[#allocation4 + $0x28] sm:$0xff]  ;;  %v1251_v21 = vunpack.c.l.bf16 %v1224_v9  ;;  %v1588_v22 = vld [vmem:[%s4520_s20 + $0xb0] sm:$0xff] }
  0xb6   : > { %3680 = vmatprep.subr.mxu0 %v1915_v24  ;;  %3730 = vmatprep.subr.mxu1 %v2207_v25 }
  0xb7   : > { %3681 = vmatpush3.msra.mxu0 %v1915_v24  ;;  %3731 = vmatpush3.msra.mxu1 %v2207_v25  ;;  %v2201_v24 = vld [vmem:[%s5159_s8 + $0x48] sm:$0xff] }
  0xb8   : > { %1373 = vmatmul.mubr.f32.gmra.mxu0 %v1235_v26  ;;  %1710 = vmatmul.mubr.f32.gmra.mxu1 %v1572_v27  ;;  %v1591_v25 = vld [vmem:[%s4520_s20 + $0xc8] sm:$0xff]  ;;  %v2200_v26 = vld [vmem:[%s5159_s8 + $0x40] sm:$0xff] }
  0xb9   : > { %1377 = vmatprep.mubr.f32.mxu0 %v1238_v28  ;;  %1714 = vmatprep.mubr.f32.mxu1 %v1575_v29  ;;  %v4616_v27 = vld [vmem:[%s4531_s23 + $0x48] sm:$0xff]  ;;  %v1590_v29 = vld [vmem:[%s4520_s20 + $0xc0] sm:$0xff] }
  0xba   : > { %3682 = vmatprep.subr.mxu0 %v1914_v31  ;;  %3732 = vmatprep.subr.mxu1 %v2206_v32  ;;  %v1226_v28 = vld [vmem:[%s4513_s16 + $0x68] sm:$0xff] }
  0xbb   : > { %3683 = vmatpush3.msra.mxu0 %v1914_v31  ;;  %1471 = vperm.xlu1 %3890, %v4554_v34  }
  0xbc   : > { %1378 = vmatmul.mubr.f32.gmra.mxu0 %v1237_v33  ;;  %1715 = vmatmul.mubr.f32.gmra.mxu1 %v1574_v35  ;;  %v1256_v33 = vunpack.c.h.bf16 %v1226_v28  ;;  %v2199_v35 = vld [vmem:[%s5159_s8 + $0x38] sm:$0xff] }
  0xbd   : > { %1382 = vmatprep.mubr.f32.mxu0 %v1240_v36  ;;  %1719 = vmatprep.mubr.f32.mxu1 %v1577_v37  ;;  %v1593_v36 = vld [vmem:[%s4520_s20 + $0xd8] sm:$0xff]  ;;  %v1592_v37 = vld [vmem:[%s4520_s20 + $0xd0] sm:$0xff] }
  0xbe   : > { %3684 = vmatprep.subr.mxu0 %v1913_v39  ;;  %3733 = vmatpush3.msra.mxu1 %v2206_v32  ;;  %v1906_v32 = vld [vmem:[#allocation4 + $0x10] sm:$0xff] }
  0xbf   : > { %3685 = vmatpush3.msra.mxu0 %v1913_v39  ;;  %3734 = vmatprep.subr.mxu1 %v2205_v41  ;;  %v1227_v39 = vld [vmem:[%s4513_s16 + $0x70] sm:$0xff] }
  0xc0   : > { %1383 = vmatmul.mubr.f32.gmra.mxu0 %v1239_v40  ;;  %1720 = vmatmul.mubr.f32.gmra.mxu1 %v1576_v42  ;;  %v4635_v40 = vld [vmem:[%s4531_s23 + $0x58] sm:$0xff]  ;;  %v1255_v42 = vunpack.c.l.bf16 %v1226_v28  ;;  %v3325_v28 = vld [vmem:[%s4663_s18 + $0x10] sm:$0xff]  }
  0xc1   : > { %1387 = vmatprep.mubr.f32.mxu0 %v1242_v43  ;;  %1724 = vmatprep.mubr.f32.mxu1 %v1579_v44  ;;  %v1905_v43 = vld [vmem:[#allocation4 + $0x40] sm:$0xff]  ;;  %v1258_v44 = vunpack.c.h.bf16 %v1227_v39 }
  0xc2   : > { %3686 = vmatprep.subr.mxu0 %v1912_v46  ;;  %3889 = vset.pattern.permute.xlu0 %v3971_v17  ;;  %v1225_v17 = vld [vmem:[%s4513_s16 + $0x60] sm:$0xff] }
  0xc3   : > { %3687 = vmatpush3.msra.mxu0 %v1912_v46  ;;  %3735 = vmatpush3.msra.mxu1 %v2205_v41  ;;  %v1254_v23 = vunpack.c.h.bf16 %v1225_v17  ;;  %v1253_v31 = vunpack.c.l.bf16 %v1225_v17  ;;  %v4638_v41 = vld [vmem:[%s4531_s23 + $0x30] sm:$0xff]  ;;  %v1595_v46 = vld [vmem:[%s4520_s20 + $0xe8] sm:$0xff]  ;;  %v2576_v17 = vld [vmem:[#allocation5 + $0xb8] sm:$0xff] }
  0xc4   : > { %1388 = vmatmul.mubr.f32.gmra.mxu0 %v1241_v47  ;;  %1725 = vmatmul.mubr.f32.gmra.mxu1 %v1578_v48  ;;  %v1594_v47 = vld [vmem:[%s4520_s20 + $0xe0] sm:$0xff] }
  0xc5   : > { %1392 = vmatprep.mubr.f32.mxu0 %v1244_v49  ;;  %1729 = vmatprep.mubr.f32.mxu1 %v1581_v50  ;;  %v2196_v48 = vld [vmem:[%s5159_s8 + $0x20] sm:$0xff]  ;;  %v1228_v49 = vld [vmem:[%s4513_s16 + $0x78] sm:$0xff]  ;;  %v4653_v50 = vld [vmem:[%s4531_s23 + $0x68] sm:$0xff]  ;;  %s3842_s16 = smul.u32 12, %s5179_s15 }
  0xc6   : > { %3688 = vmatprep.subr.mxu0 %v1911_v52  ;;  %3736 = vmatprep.subr.mxu1 %v2204_v53 }
  0xc7   : > { %3689 = vmatpush3.msra.mxu0 %v1911_v52  ;;  %1481 = vperm.xlu1 %3890, %v4574_v55   ;;  %v1257_v52 = vunpack.c.l.bf16 %v1227_v39  ;;  %v3271_v39 = vunpack.c.h.bf16 %v3325_v28  ;;  %s4734_s28 = scalar_lea.vmem %s5155_s4, %s3842_s16 }
  0xc8   : > { %1393 = vmatmul.mubr.f32.gmra.mxu0 %v1243_v54  ;;  %1730 = vmatmul.mubr.f32.gmra.mxu1 %v1580_v56  ;;  %v1260_v54 = vunpack.c.h.bf16 %v1228_v49  ;;  %v2195_v56 = vld [vmem:[%s5159_s8 + $0x18] sm:$0xff] }
  0xc9   : > { %1397 = vmatprep.mubr.f32.mxu0 %v1246_v57  ;;  %1734 = vmatprep.mubr.f32.mxu1 %v1583_v58  ;;  %v1597_v57 = vld [vmem:[%s4520_s20 + $0xf8] sm:$0xff]  ;;  %v1596_v58 = vld [vmem:[%s4520_s20 + $0xf0] sm:$0xff] }
  0xca   : > { %3690 = vmatprep.subr.mxu0 %v1910_v60  ;;  %1456 = vperm.xlu0 %3889, %v4581_v61  }
  0xcb   : > { %3691 = vmatpush3.msra.mxu0 %v1910_v60  ;;  %3737 = vmatpush3.msra.mxu1 %v2204_v53  ;;  %v1904_v53 = vld [vmem:[#allocation4 + $0x38] sm:$0xff]  ;;  %v3261_v60 = vld [vmem:[%s4663_s18] sm:$0xff]  }
  0xcc   : > { %1735 = vmatmul.mubr.f32.gmra.mxu1 %v1582_v63  ;;  %1398 = vmatmul.mubr.f32.gmra.mxu0 %v1245_v62  ;;  %v4677_v62 = vld [vmem:[%s4531_s23 + $0x78] sm:$0xff]  ;;  %v4680_v63 = vld [vmem:[%s4531_s23 + $0x50] sm:$0xff]  ;;  %v3262_v2 = vunpack.c.l.bf16 %v3261_v60 }
  0xcd   : > { %1402 = vmatprep.mubr.f32.mxu0 %v1248_v0  ;;  %1739 = vmatprep.mubr.f32.mxu1 %v1585_v1  ;;  %v1259_v0 = vunpack.c.l.bf16 %v1228_v49  ;;  %v1903_v1 = vld [vmem:[#allocation4 + $0x30] sm:$0xff] }
  0xce   : > { %3692 = vmatprep.subr.mxu0 %v1909_v3  ;;  %3738 = vmatprep.subr.mxu1 %v2203_v4 }
  0xcf   : > { %3693 = vmatpush3.msra.mxu0 %v1909_v3  ;;  %3739 = vmatpush3.msra.mxu1 %v2203_v4  ;;  %v2193_v3 = vld [vmem:[%s5159_s8 + $0x8] sm:$0xff]  ;;  %v3293_v4 = vld [vmem:[%s4687_s26] sm:$0xff]  }
  0xd0   : > { %1740 = vmatmul.mubr.f32.gmra.mxu1 %v1584_v6  ;;  %1403 = vmatmul.mubr.f32.gmra.mxu0 %v1247_v5  ;;  %v3263_v5 = vunpack.c.h.bf16 %v3261_v60  ;;  %v2192_v6 = vld [vmem:[%s5159_s8] sm:$0xff]  ;;  %v3294_v9 = vunpack.c.l.bf16 %v3293_v4 }
  0xd1   : > { %1407 = vmatprep.mubr.f32.mxu0 %v1250_v7  ;;  %1744 = vmatprep.mubr.f32.mxu1 %v1587_v8  ;;  %v4699_v7 = vld [vmem:[%s4531_s23 + $0x60] sm:$0xff] }
  0xd2   : > { %3694 = vmatprep.subr.mxu0 %v1908_v10  ;;  %3740 = vmatprep.subr.mxu1 %v2202_v11  ;;  %v2560_v8 = vld [vmem:[#allocation5 + $0x40] sm:$0xff] }
  0xd3   : > { %3695 = vmatpush3.msra.mxu0 %v1908_v10  ;;  %1491 = vperm.xlu1 %3890, %v4597_v13   ;;  %v3324_v10 = vld [vmem:[%s4663_s18 + $0x8] sm:$0xff]  }
  0xd4   : > { %1745 = vmatmul.mubr.f32.gmra.mxu1 %v1586_v14  ;;  %1408 = vmatmul.mubr.f32.gmra.mxu0 %v1249_v12  ;;  %v3295_v12 = vunpack.c.h.bf16 %v3293_v4  ;;  %v2544_v14 = vld [vmem:[#allocation5 + $0x68] sm:$0xff]  ;;  %v3334_v4 = vld [vmem:[%s4687_s26 + $0x20] sm:$0xff]  }
  0xd5   : > { %1412 = vmatprep.mubr.f32.mxu0 %v1252_v15  ;;  %1749 = vmatprep.mubr.f32.mxu1 %v1589_v16  ;;  %v2559_v15 = vld [vmem:[#allocation5 + $0xa8] sm:$0xff]  ;;  %v3266_v16 = vunpack.c.l.bf16 %v3324_v10 }
  0xd6   : > { %1461 = vperm.xlu0 %3889, %v4604_v18   ;;  %3696 = vmatprep.subr.mxu0 %v1907_v20 }
  0xd7   : > { %3697 = vmatpush3.msra.mxu0 %v1907_v20  ;;  %3741 = vmatpush3.msra.mxu1 %v2202_v11  ;;  %v3972_v11 = vmov 1   ;;  %v3331_v20 = vld [vmem:[%s4687_s26 + $0x8] sm:$0xff]  }
  0xd8   : > { %1750 = vmatmul.mubr.f32.gmra.mxu1 %v1588_v22  ;;  %1413 = vmatmul.mubr.f32.gmra.mxu0 %v1251_v21  ;;  %v2543_v21 = vld [vmem:[#allocation5 + $0x120] sm:$0xff]  ;;  %v2575_v22 = vld [vmem:[#allocation5 + $0x90] sm:$0xff] }
  0xd9   : > { %3742 = vmatprep.subr.mxu1 %v2201_v24  ;;  %1417 = vmatprep.mubr.f32.mxu0 %v1254_v23  ;;  %v4706_v23 = vld [vmem:[%s4531_s23 + $0x70] sm:$0xff] }
  0xda   : > { %1754 = vmatprep.mubr.f32.mxu1 %v1591_v25  ;;  %3743 = vmatpush3.msra.mxu1 %v2201_v24  ;;  %v3267_v24 = vunpack.c.h.bf16 %v3324_v10  ;;  %v2558_v25 = vld [vmem:[#allocation5 + $0xf8] sm:$0xff]  ;;  %v3310_v10 = vunpack.c.l.bf16 %v3334_v4 }
  0xdb   : > { %3744 = vmatprep.subr.mxu1 %v2200_v26  ;;  %1501 = vperm.xlu1 %3890, %v4616_v27  }
  0xdc   : > { %1755 = vmatmul.mubr.f32.gmra.mxu1 %v1590_v29  ;;  %1476 = vperm.xlu0 %3889, %v4621_v30   ;;  %v2542_v29 = vld [vmem:[#allocation5 + $0x140] sm:$0xff] }
  0xdd   : > { %1418 = vmatmul.mubr.f32.gmra.mxu0 %v1253_v31  ;;  %3698 = vmatprep.subr.mxu0 %v1906_v32  ;;  %v3299_v31 = vunpack.c.h.bf16 %v3331_v20 }
  0xde   : > { %3699 = vmatpush3.msra.mxu0 %v1906_v32  ;;  %3745 = vmatpush3.msra.mxu1 %v2200_v26  ;;  %v3298_v26 = vunpack.c.l.bf16 %v3331_v20  ;;  %v2557_v32 = vld [vmem:[#allocation5 + $0x138] sm:$0xff]  ;;  %v3335_v20 = vld [vmem:[%s4687_s26 + $0x28] sm:$0xff]  }
  0xdf   : > { %3746 = vmatprep.subr.mxu1 %v2199_v35  ;;  %1422 = vmatprep.mubr.f32.mxu0 %v1256_v33  ;;  %v3270_v33 = vunpack.c.l.bf16 %v3325_v28  ;;  %v3329_v28 = vld [vmem:[%s4663_s18 + $0x30] sm:$0xff]  }
  0xe0   : > { %1759 = vmatprep.mubr.f32.mxu1 %v1593_v36  ;;  %3747 = vmatpush3.msra.mxu1 %v2199_v35  ;;  %v2574_v35 = vld [vmem:[#allocation5 + $0x160] sm:$0xff]  ;;  %v3332_v36 = vld [vmem:[%s4687_s26 + $0x10] sm:$0xff]  }
  0xe1   : > { %1760 = vmatmul.mubr.f32.gmra.mxu1 %v1592_v37  ;;  %3748 = vmatprep.subr.mxu1 %v2198_v38  ;;  %v2541_v37 = vld [vmem:[#allocation5 + $0xc0] sm:$0xff] }
  0xe2   : > { %1511 = vperm.xlu1 %3890, %v4635_v40   ;;  %1486 = vperm.xlu0 %3889, %v4638_v41  }
  0xe3   : > { %1423 = vmatmul.mubr.f32.gmra.mxu0 %v1255_v42  ;;  %3700 = vmatprep.subr.mxu0 %v1905_v43  ;;  %v2556_v42 = vld [vmem:[#allocation5 + $0x150] sm:$0xff] }
  0xe4   : > { %3701 = vmatpush3.msra.mxu0 %v1905_v43  ;;  %3749 = vmatpush3.msra.mxu1 %v2198_v38  ;;  %v2573_v38 = vld [vmem:[#allocation5 + $0x18] sm:$0xff]  ;;  %v3302_v43 = vunpack.c.l.bf16 %v3332_v36 }
  0xe5   : > { %3750 = vmatprep.subr.mxu1 %v2197_v45  ;;  %1427 = vmatprep.mubr.f32.mxu0 %v1258_v44  ;;  %v3326_v44 = vld [vmem:[%s4663_s18 + $0x18] sm:$0xff]  }
  0xe6   : > { %1764 = vmatprep.mubr.f32.mxu1 %v1595_v46  ;;  %3751 = vmatpush3.msra.mxu1 %v2197_v45  ;;  %v3303_v45 = vunpack.c.h.bf16 %v3332_v36  ;;  %v2540_v46 = vld [vmem:[#allocation5 + $0xd0] sm:$0xff]  ;;  %v3274_v49 = vunpack.c.l.bf16 %v3326_v44 }
  0xe7   : > { %1765 = vmatmul.mubr.f32.gmra.mxu1 %v1594_v47  ;;  %3752 = vmatprep.subr.mxu1 %v2196_v48  ;;  %v2555_v47 = vld [vmem:[#allocation5 + $0x20] sm:$0xff]  ;;  %v3336_v36 = vld [vmem:[%s4687_s26 + $0x30] sm:$0xff]  }
  0xe8   : > { %1521 = vperm.xlu1 %3890, %v4653_v50   ;;  %1496 = vperm.xlu0 %3889, %v4656_v51  }
  0xe9   : > { %1428 = vmatmul.mubr.f32.gmra.mxu0 %v1257_v52  ;;  %3702 = vmatprep.subr.mxu0 %v1904_v53  ;;  %v3333_v52 = vld [vmem:[%s4687_s26 + $0x18] sm:$0xff]  }
  0xea   : > { %3703 = vmatpush3.msra.mxu0 %v1904_v53  ;;  %3753 = vmatpush3.msra.mxu1 %v2196_v48  ;;  %v2572_v48 = vld [vmem:[#allocation5 + $0x30] sm:$0xff]  ;;  %v3307_v60 = vunpack.c.h.bf16 %v3333_v52 }
  0xeb   : > { %3754 = vmatprep.subr.mxu1 %v2195_v56  ;;  %1432 = vmatprep.mubr.f32.mxu0 %v1260_v54  ;;  %v2539_v53 = vld [vmem:[#allocation5 + $0x50] sm:$0xff]  ;;  %v3275_v54 = vunpack.c.h.bf16 %v3326_v44  ;;  %v3330_v44 = vld [vmem:[%s4663_s18 + $0x38] sm:$0xff]  }
  0xec   : > { %1769 = vmatprep.mubr.f32.mxu1 %v1597_v57  ;;  %3755 = vmatpush3.msra.mxu1 %v2195_v56  ;;  %v2554_v56 = vld [vmem:[#allocation5 + $0x178] sm:$0xff]  ;;  %v2571_v57 = vld [vmem:[#allocation5 + $0x60] sm:$0xff] }
  0xed   : > { %1770 = vmatmul.mubr.f32.gmra.mxu1 %v1596_v58  ;;  %3756 = vmatprep.subr.mxu1 %v2194_v59  ;;  %v3306_v58 = vunpack.c.l.bf16 %v3333_v52  ;;  %v3337_v52 = vld [vmem:[%s4687_s26 + $0x38] sm:$0xff]   ;;  %s4842_s26 = scalar_lea.vmem %s5162_s11, %s4507_s29  ;;  %s1148_s29 = sand.u32 1, %s3961_s22  }
  0xee   : > { %1531 = vperm.xlu1 %3890, %v4677_v62   ;;  %1506 = vperm.xlu0 %3889, %v4680_v63   ;;  %s5111_s15 = scalar_lea.sflag [#allocation7], %s1148_s29 }
  0xef   : > { %1433 = vmatmul.mubr.f32.gmra.mxu0 %v1259_v0  ;;  %3704 = vmatprep.subr.mxu0 %v1903_v1  ;;  %v2538_v0 = vld [vmem:[#allocation5 + $0x100] sm:$0xff] }
  0xf0   : > { %3705 = vmatpush3.msra.mxu0 %v1903_v1  ;;  %3757 = vmatpush3.msra.mxu1 %v2194_v59  ;;  %v3327_v59 = vld [vmem:[%s4663_s18 + $0x20] sm:$0xff]   ;;  %v2553_v1 = vld [vmem:[#allocation5 + $0xd8] sm:$0xff] }
  0xf1   : > { %3758 = vmatprep.subr.mxu1 %v2193_v3  ;;  %3706 = vmatprep.mubr.f32.mxu0 %v3262_v2  ;;  %v2570_v2 = vld [vmem:[#allocation5] sm:$0xff] }
  0xf2   : > { %3759 = vmatpush3.msra.mxu1 %v2193_v3  ;;  %3892 = vset.pattern.permute.xlu1 %v3972_v11  ;;  %v3278_v3 = vunpack.c.l.bf16 %v3327_v59 }
  0xf3   : > { %3760 = vmatprep.subr.mxu1 %v2192_v6  ;;  %1516 = vperm.xlu0 %3889, %v4699_v7  }
  0xf4   : > { %3707 = vmatmul.mubr.f32.vlgmr.msra.gmra.mxu0 %v3263_v5  ;;  %3562 = vmatprep.subr.mxu0 %v2560_v8  ;;  %v2537_v5 = vld [vmem:[#allocation5 + $0x108] sm:$0xff]  ;;  %v2552_v8 = vld [vmem:[#allocation5 + $0x58] sm:$0xff] }
  0xf5   : > { %3761 = vmatpush3.msra.mxu1 %v2192_v6  ;;  %3762 = vmatprep.mubr.f32.mxu1 %v3294_v9  ;;  %v3279_v6 = vunpack.c.h.bf16 %v3327_v59  ;;  %v2569_v9 = vld [vmem:[#allocation5 + $0x170] sm:$0xff]  ;;  %v2449_v59 = vld [vmem:[%s4734_s28] sm:$0xff] }
  0xf6   : > { %1780 = vperm.xlu1 %3892, %v4604_v18   ;;  %3563 = vmatpush3.msra.mxu0 %v2544_v14  ;;  %v2536_v14 = vld [vmem:[#allocation5 + $0xb0] sm:$0xff] }
  0xf7   : > { %3763 = vmatmul.mubr.f32.vlgmr.msra.gmra.mxu1 %v3295_v12  ;;  %3564 = vmatprep.subr.mxu0 %v2559_v15  ;;  %v3311_v12 = vunpack.c.h.bf16 %v3334_v4  ;;  %v2551_v15 = vld [vmem:[#allocation5 + $0x38] sm:$0xff]  ;;  %v2482_v4 = vunpack.c.h.bf16 %v2449_v59 }
  0xf8   : > { %3786 = vmatprep.subr.mxu1 %v2576_v17  ;;  %3709 = vmatprep.mubr.f32.mxu0 %v3266_v16  ;;  %v2568_v16 = vld [vmem:[#allocation5 + $0xc8] sm:$0xff] }
  0xf9   : > { %3565 = vmatpush3.msra.mxu0 %v2543_v21  ;;  %3787 = vmatpush3.msra.mxu1 %v2576_v17  ;;  %v2535_v21 = vld [vmem:[#allocation5 + $0x158] sm:$0xff] }
  0xfa   : > { %3788 = vmatprep.subr.mxu1 %v2575_v22  ;;  %1526 = vperm.xlu0 %3889, %v4706_v23  }
  0xfb   : > { %3710 = vmatmul.mubr.f32.gmra.mxu0 %v3267_v24  ;;  %3566 = vmatprep.subr.mxu0 %v2558_v25  ;;  %v2550_v24 = vld [vmem:[#allocation5 + $0x10] sm:$0xff]  ;;  %v2567_v25 = vld [vmem:[#allocation5 + $0x80] sm:$0xff] }
  0xfc   : > { %3765 = vmatprep.mubr.f32.mxu1 %v3298_v26  ;;  %3789 = vmatpush3.msra.mxu1 %v2575_v22  ;;  %v3314_v26 = vunpack.c.l.bf16 %v3335_v20 }
  0xfd   : > { %1784 = vperm.xlu1 %3892, %v4538_v19   ;;  %3567 = vmatpush3.msra.mxu0 %v2542_v29  ;;  %v3315_v29 = vunpack.c.h.bf16 %v3335_v20  ;;  %v2458_v20 = vld [vmem:[%s4734_s28 + $0x38] ss:$12 sps:$4 sm:$0xff]  }
  0xfe   : > { %3766 = vmatmul.mubr.f32.gmra.mxu1 %v3299_v31  ;;  %3568 = vmatprep.subr.mxu0 %v2557_v32  ;;  %v2534_v31 = vld [vmem:[#allocation5 + $0x98] sm:$0xff]  ;;  %v2549_v32 = vld [vmem:[#allocation5 + $0x130] sm:$0xff] }
  0xff   : > { %3790 = vmatprep.subr.mxu1 %v2574_v35  ;;  %3712 = vmatprep.mubr.f32.mxu0 %v3270_v33  ;;  %v2566_v33 = vld [vmem:[#allocation5 + $0xe0] sm:$0xff] }
 0x100   : > { %3569 = vmatpush3.msra.mxu0 %v2541_v37  ;;  %3791 = vmatpush3.msra.mxu1 %v2574_v35  ;;  %v3286_v35 = vunpack.c.l.bf16 %v3329_v28  ;;  %v2533_v37 = vld [vmem:[#allocation5 + $0x48] sm:$0xff] }
 0x101   : > { %3792 = vmatprep.subr.mxu1 %v2573_v38  ;;  %3891 = vset.pattern.permute.xlu0 %v3972_v11  ;;  %v3328_v11 = vld [vmem:[%s4663_s18 + $0x28] sm:$0xff]   ;;  %s3976_s18 = smov [#allocation6]  }
 0x102   : > { %3713 = vmatmul.mubr.f32.gmra.mxu0 %v3271_v39  ;;  %3570 = vmatprep.subr.mxu0 %v2556_v42  ;;  %v3282_v17 = vunpack.c.l.bf16 %v3328_v11  ;;  %v3283_v22 = vunpack.c.h.bf16 %v3328_v11  ;;  %v2548_v39 = vld [vmem:[#allocation5 + $0x110] sm:$0xff]  ;;  %v2565_v42 = vld [vmem:[#allocation5 + $0x168] sm:$0xff] }
 0x103   : > { %3768 = vmatprep.mubr.f32.mxu1 %v3302_v43  ;;  %3793 = vmatpush3.msra.mxu1 %v2573_v38  ;;  %v3287_v38 = vunpack.c.h.bf16 %v3329_v28  ;;  %v3318_v43 = vunpack.c.l.bf16 %v3336_v36  ;;  %v2454_v11 = vld [vmem:[%s4734_s28 + $0x20] ss:$12 sps:$4 sm:$0xff]  }
 0x104   : > { %1792 = vperm.xlu1 %3892, %v4621_v30   ;;  %1776 = vperm.xlu0 %3891, %v4581_v61  }
 0x105   : > { %3571 = vmatpush3.msra.mxu0 %v2540_v46  ;;  %3769 = vmatmul.mubr.f32.gmra.mxu1 %v3303_v45  ;;  %v3319_v45 = vunpack.c.h.bf16 %v3336_v36  ;;  %v2532_v46 = vld [vmem:[#allocation5 + $0x70] sm:$0xff] }
 0x106   : > { %3572 = vmatprep.subr.mxu0 %v2555_v47  ;;  %3794 = vmatprep.subr.mxu1 %v2572_v48  ;;  %v2547_v47 = vld [vmem:[#allocation5 + $0x118] sm:$0xff] }
 0x107   : > { %3715 = vmatprep.mubr.f32.mxu0 %v3274_v49  ;;  %3573 = vmatpush3.msra.mxu0 %v2539_v53  ;;  %v3290_v49 = vunpack.c.l.bf16 %v3330_v44  ;;  %v2531_v53 = vld [vmem:[#allocation5 + $0x148] sm:$0xff] }
 0x108   : > { %3795 = vmatpush3.msra.mxu1 %v2572_v48  ;;  %3716 = vmatmul.mubr.f32.gmra.mxu0 %v3275_v54  ;;  %v2564_v48 = vld [vmem:[#allocation5 + $0x78] sm:$0xff]  ;;  %v3291_v54 = vunpack.c.h.bf16 %v3330_v44 }
 0x109   : > { %3574 = vmatprep.subr.mxu0 %v2554_v56  ;;  %3796 = vmatprep.subr.mxu1 %v2571_v57  ;;  %v2546_v56 = vld [vmem:[#allocation5 + $0xe8] sm:$0xff] }
 0x10a   : > { %3771 = vmatprep.mubr.f32.mxu1 %v3306_v58  ;;  %3797 = vmatpush3.msra.mxu1 %v2571_v57  ;;  %v2563_v57 = vld [vmem:[#allocation5 + $0xf0] sm:$0xff]  ;;  %v3322_v58 = vunpack.c.l.bf16 %v3337_v52 }
 0x10b   : > { %1800 = vperm.xlu1 %3892, %v4638_v41   ;;  %1788 = vperm.xlu0 %3891, %v4554_v34  }
 0x10c   : > { %3575 = vmatpush3.msra.mxu0 %v2538_v0  ;;  %3772 = vmatmul.mubr.f32.gmra.mxu1 %v3307_v60  ;;  %v3323_v60 = vunpack.c.h.bf16 %v3337_v52  ;;  %v2530_v0 = vld [vmem:[#allocation5 + $0x128] sm:$0xff]  ;;  %v2474_v52 = vld [vmem:[%s4734_s28 + $0x98] ss:$12 sps:$4 sm:$0xff]  }
 0x10d   : > { %3576 = vmatprep.subr.mxu0 %v2553_v1  ;;  %3798 = vmatprep.subr.mxu1 %v2570_v2  ;;  %v2450_v1 = vld [vmem:[%s4734_s28 + $0x8] ss:$12 sps:$4 sm:$0xff]  }
 0x10e   : > { %3718 = vmatprep.mubr.f32.mxu0 %v3278_v3  ;;  %3577 = vmatpush3.msra.mxu0 %v2537_v5  ;;  %v2562_v3 = vld [vmem:[#allocation5 + $0x88] sm:$0xff] }
 0x10f   : > { %3799 = vmatpush3.msra.mxu1 %v2570_v2  ;;  %3719 = vmatmul.mubr.f32.gmra.mxu0 %v3279_v6  ;;  %v2545_v2 = vld [vmem:[#allocation5 + $0x28] sm:$0xff]  ;;  %v2481_v6 = vunpack.c.l.bf16 %v2449_v59 }
 0x110   : > { %3578 = vmatprep.subr.mxu0 %v2552_v8  ;;  %3800 = vmatprep.subr.mxu1 %v2569_v9  ;;  %v2529_v5 = vld [vmem:[#allocation5 + $0x8] sm:$0xff]  ;;  %v2483_v8 = vunpack.c.l.bf16 %v2450_v1 }
 0x111   : > { %3774 = vmatprep.mubr.f32.mxu1 %v3310_v10  ;;  %3801 = vmatpush3.msra.mxu1 %v2569_v9  ;;  %v2451_v9 = vld [vmem:[%s4734_s28 + $0xc] sm:$0xff]  ;;  %v2561_v10 = vld [vmem:[#allocation5 + $0xa0] sm:$0xff] }
 0x112   : > { %1808 = vperm.xlu1 %3892, %v4656_v51   ;;  %1796 = vperm.xlu0 %3891, %v4574_v55  }
 0x113   : > { %3579 = vmatpush3.msra.mxu0 %v2536_v14  ;;  %3775 = vmatmul.mubr.f32.gmra.mxu1 %v3311_v12  ;;  %v2486_v12 = vunpack.c.h.bf16 %v2450_v1  ;;  %v2453_v14 = vld [vmem:[%s4734_s28 + $0x18] sm:$0xff] }
 0x114   : > { %3580 = vmatprep.subr.mxu0 %v2551_v15  ;;  %3802 = vmatprep.subr.mxu1 %v2568_v16  ;;  %v2485_v15 = vunpack.c.h.bf16 %v2451_v9  ;;  %v2487_v28 = vunpack.c.l.bf16 %v2453_v14 }
 0x115   : > { %3721 = vmatprep.mubr.f32.mxu0 %v3282_v17  ;;  %3581 = vmatpush3.msra.mxu0 %v2535_v21  ;;  %v2489_v17 = vunpack.c.l.bf16 %v2454_v11  ;;  %v3973_v21 = vmov 2  }
 0x116   : > { %3803 = vmatpush3.msra.mxu1 %v2568_v16  ;;  %3722 = vmatmul.mubr.f32.gmra.mxu0 %v3283_v22  ;;  %v2484_v16 = vunpack.c.l.bf16 %v2451_v9  ;;  %v2488_v22 = vunpack.c.h.bf16 %v2453_v14 }
 0x117   : > { %3582 = vmatprep.subr.mxu0 %v2550_v24  ;;  %3804 = vmatprep.subr.mxu1 %v2567_v25  ;;  %v2492_v24 = vunpack.c.h.bf16 %v2454_v11 }
 0x118   : > { %3777 = vmatprep.mubr.f32.mxu1 %v3314_v26  ;;  %3805 = vmatpush3.msra.mxu1 %v2567_v25  ;;  %v2455_v25 = vld [vmem:[%s4734_s28 + $0x24] sm:$0xff]  ;;  %v2495_v26 = vunpack.c.l.bf16 %v2458_v20 }
 0x119   : > { %1816 = vperm.xlu1 %3892, %v4680_v63   ;;  %1804 = vperm.xlu0 %3891, %v4597_v13  }
 0x11a   : > { %3583 = vmatpush3.msra.mxu0 %v2534_v31  ;;  %3778 = vmatmul.mubr.f32.gmra.mxu1 %v3315_v29  ;;  %v2491_v29 = vunpack.c.h.bf16 %v2455_v25  ;;  %v2462_v31 = vld [vmem:[%s4734_s28 + $0x50] ss:$12 sps:$4 sm:$0xff]  }
 0x11b   : > { %3584 = vmatprep.subr.mxu0 %v2549_v32  ;;  %3806 = vmatprep.subr.mxu1 %v2566_v33  ;;  %v2457_v32 = vld [vmem:[%s4734_s28 + $0x30] sm:$0xff]  ;;  %v2501_v36 = vunpack.c.l.bf16 %v2462_v31 }
 0x11c   : > { %3724 = vmatprep.mubr.f32.mxu0 %v3286_v35  ;;  %3585 = vmatpush3.msra.mxu0 %v2533_v37  ;;  %v2490_v35 = vunpack.c.l.bf16 %v2455_v25  ;;  %v2494_v37 = vunpack.c.h.bf16 %v2457_v32 }
 0x11d   : > { %3807 = vmatpush3.msra.mxu1 %v2566_v33  ;;  %3725 = vmatmul.mubr.f32.gmra.mxu0 %v3287_v38  ;;  %v2498_v33 = vunpack.c.h.bf16 %v2458_v20  ;;  %v2466_v38 = vld [vmem:[%s4734_s28 + $0x68] ss:$12 sps:$4 sm:$0xff]  }
 0x11e   : > { %3586 = vmatprep.subr.mxu0 %v2548_v39  ;;  %3808 = vmatprep.subr.mxu1 %v2565_v42  ;;  %v2459_v39 = vld [vmem:[%s4734_s28 + $0x3c] sm:$0xff] }
 0x11f   : > { %3780 = vmatprep.mubr.f32.mxu1 %v3318_v43  ;;  %3809 = vmatpush3.msra.mxu1 %v2565_v42  ;;  %v2504_v42 = vunpack.c.h.bf16 %v2462_v31  ;;  %v2493_v43 = vunpack.c.l.bf16 %v2457_v32  ;;  %v2497_v44 = vunpack.c.h.bf16 %v2459_v39  ;;  %v4795_v31 = vld [vmem:[%s4531_s23 + $0x10] sm:$0xff]  ;;  %v4799_v32 = vld [vmem:[%s4531_s23 + $0x18] sm:$0xff] }
 0x120   : > { %1824 = vperm.xlu1 %3892, %v4699_v7   ;;  %1812 = vperm.xlu0 %3891, %v4616_v27  }
 0x121   : > { %3587 = vmatpush3.msra.mxu0 %v2532_v46  ;;  %3781 = vmatmul.mubr.f32.gmra.mxu1 %v3319_v45  ;;  %v2470_v45 = vld [vmem:[%s4734_s28 + $0x80] ss:$12 sps:$4 sm:$0xff]  }
 0x122   : > { %3588 = vmatprep.subr.mxu0 %v2547_v47  ;;  %3810 = vmatprep.subr.mxu1 %v2564_v48  ;;  %v2461_v46 = vld [vmem:[%s4734_s28 + $0x48] sm:$0xff]  ;;  %v2510_v47 = vunpack.c.h.bf16 %v2466_v38 }
 0x123   : > { %3727 = vmatprep.mubr.f32.mxu0 %v3290_v49  ;;  %3589 = vmatpush3.msra.mxu0 %v2531_v53  ;;  %v2500_v49 = vunpack.c.h.bf16 %v2461_v46  ;;  %v2463_v53 = vld [vmem:[%s4734_s28 + $0x54] sm:$0xff] }
 0x124   : > { %3811 = vmatpush3.msra.mxu1 %v2564_v48  ;;  %3728 = vmatmul.mubr.f32.gmra.mxu0 %v3291_v54  ;;  %v2513_v48 = vunpack.c.l.bf16 %v2470_v45  ;;  %v2516_v54 = vunpack.c.h.bf16 %v2470_v45  ;;  %v2502_v1 = vunpack.c.l.bf16 %v2463_v53 }
 0x125   : > { %3590 = vmatprep.subr.mxu0 %v2546_v56  ;;  %3812 = vmatprep.subr.mxu1 %v2563_v57  ;;  %v2519_v56 = vunpack.c.l.bf16 %v2474_v52 }
 0x126   : > { %3783 = vmatprep.mubr.f32.mxu1 %v3322_v58  ;;  %3813 = vmatpush3.msra.mxu1 %v2563_v57  ;;  %v2503_v57 = vunpack.c.h.bf16 %v2463_v53  ;;  %v2478_v58 = vld [vmem:[%s4734_s28 + $0xb0] ss:$12 sps:$4 sm:$0xff]  }
 0x127   : > { %1832 = vperm.xlu1 %3892, %v4706_v23   ;;  %1820 = vperm.xlu0 %3891, %v4635_v40  }
 0x128   : > { %3591 = vmatpush3.msra.mxu0 %v2530_v0  ;;  %3784 = vmatmul.mubr.f32.gmra.mxu1 %v3323_v60  ;;  %v2465_v60 = vld [vmem:[%s4734_s28 + $0x60] sm:$0xff]  ;;  %v2522_v0 = vunpack.c.h.bf16 %v2474_v52 }
 0x129   : > { %3592 = vmatprep.subr.mxu0 %v2545_v2  ;;  %3814 = vmatprep.subr.mxu1 %v2562_v3  ;;  %v2525_v2 = vunpack.c.l.bf16 %v2478_v58 }
 0x12a   : > { %3593 = vmatpush3.msra.mxu0 %v2529_v5  ;;  %2641 = vmatprep.mubr.f32.mxu0 %v2482_v4  ;;  %v2467_v4 = vld [vmem:[%s4734_s28 + $0x6c] sm:$0xff]  ;;  %v2528_v5 = vunpack.c.h.bf16 %v2478_v58 }
 0x12b   : > { %3815 = vmatpush3.msra.mxu1 %v2562_v3  ;;  %2642 = vmatmul.mubr.f32.vlgmr.msra.gmra.mxu0 %v2481_v6  ;;  %v2506_v3 = vunpack.c.h.bf16 %v2465_v60  ;;  %v2509_v9 = vunpack.c.h.bf16 %v2467_v4  ;;  %v2508_v11 = vunpack.c.l.bf16 %v2467_v4  ;;  %v3902_v4 = vld [vmem:[%s4531_s23] sm:$0xff] }
 0x12c   : > { %3816 = vmatprep.subr.mxu1 %v2561_v10  ;;  %3818 = vmatprep.mubr.f32.mxu1 %v2483_v8  ;;  %v2505_v8 = vunpack.c.l.bf16 %v2465_v60 }
 0x12d   : > { %3817 = vmatpush3.msra.mxu1 %v2561_v10  ;;  %3893 = vset.pattern.permute.xlu1 %v3973_v21  ;;  %v2469_v10 = vld [vmem:[%s4734_s28 + $0x78] sm:$0xff] }
 0x12e   : > { %1828 = vperm.xlu0 %3891, %v4653_v50   ;;  %3819 = vmatmul.mubr.f32.vlgmr.msra.gmra.mxu1 %v2486_v12  ;;  %v4766_v59 = vpop.permute.xlu1 %1466  ;;  %v2512_v12 = vunpack.c.h.bf16 %v2469_v10 }
 0x12f   : > { %2065 = vperm.xlu1 %3893, %v4581_v61   ;;  %2646 = vmatprep.mubr.f32.mxu0 %v2485_v15  ;;  %v2471_v15 = vld [vmem:[%s4734_s28 + $0x84] sm:$0xff] }
 0x130   : > { %2647 = vmatmul.mubr.f32.gmra.mxu0 %v2484_v16  ;;  %3821 = vmatprep.mubr.f32.mxu1 %v2489_v17  ;;  %v2511_v17 = vunpack.c.l.bf16 %v2469_v10  ;;  %v2515_v20 = vunpack.c.h.bf16 %v2471_v15  ;;  %v2514_v25 = vunpack.c.l.bf16 %v2471_v15 }
 0x131   : > { %2651 = vmatprep.mubr.f32.mxu0 %v2488_v22  ;;  %v2473_v22 = vld [vmem:[%s4734_s28 + $0x90] sm:$0xff] }
 0x132   : > { %1836 = vperm.xlu0 %3891, %v4677_v62   ;;  %3822 = vmatmul.mubr.f32.gmra.mxu1 %v2492_v24 }
 0x133   : > { %2073 = vperm.xlu1 %3893, %v4538_v19   ;;  %3824 = vmatprep.mubr.f32.mxu1 %v2495_v26  ;;  %v2507_v19 = vunpack.c.l.bf16 %v2466_v38 }
 0x134   : > { %2652 = vmatmul.mubr.f32.gmra.mxu0 %v2487_v28  ;;  %v2518_v28 = vunpack.c.h.bf16 %v2473_v22 }
 0x135   : > { %2656 = vmatprep.mubr.f32.mxu0 %v2491_v29  ;;  %v2475_v29 = vld [vmem:[%s4734_s28 + $0x9c] sm:$0xff] }
 0x136   : > { %3894 = vset.pattern.permute.xlu0 %v3973_v21  ;;  %3825 = vmatmul.mubr.f32.gmra.mxu1 %v2498_v33  ;;  %v4774_v6 = vpop.permute.xlu1 %1471  ;;  %v3974_v21 = vmov 3   ;;  %v2521_v33 = vunpack.c.h.bf16 %v2475_v29  ;;  %v2520_v38 = vunpack.c.l.bf16 %v2475_v29  ;;  %v1199_v29 = vld [vmem:[%s4842_s26 + $0x10] sm:$0xff] }
 0x137   : > { %2077 = vperm.xlu1 %3893, %v4554_v34   ;;  %2069 = vperm.xlu0 %3894, %v4604_v18   ;;  %v2496_v34 = vunpack.c.l.bf16 %v2459_v39 }
 0x138   : > { %2657 = vmatmul.mubr.f32.gmra.mxu0 %v2490_v35  ;;  %3827 = vmatprep.mubr.f32.mxu1 %v2501_v36  ;;  %v2477_v35 = vld [vmem:[%s4734_s28 + $0xa8] sm:$0xff] }
 0x139   : > { %2661 = vmatprep.mubr.f32.mxu0 %v2494_v37  ;;  %v4809_v37 = vld [vmem:[%s4531_s23 + $0x28] sm:$0xff]  ;;  %v2524_v39 = vunpack.c.h.bf16 %v2477_v35 }
 0x13a   : > { %3828 = vmatmul.mubr.f32.gmra.mxu1 %v2504_v42  ;;  %v2479_v42 = vld [vmem:[%s4734_s28 + $0xb4] sm:$0xff]  ;;  %s5104_s28 = scalar_lea.hbm %s5163_s12, %s3259_s17 }
 0x13b   : > { %2085 = vperm.xlu1 %3893, %v4574_v55   ;;  %2081 = vperm.xlu0 %3894, %v4621_v30   ;;  %v2499_v55 = vunpack.c.l.bf16 %v2461_v46  ;;  %v2527_v45 = vunpack.c.h.bf16 %v2479_v42  ;;  %v2526_v46 = vunpack.c.l.bf16 %v2479_v42 }
 0x13c   : > { %2662 = vmatmul.mubr.f32.gmra.mxu0 %v2493_v43  ;;  %3830 = vmatprep.mubr.f32.mxu1 %v2507_v19  ;;  %v2523_v19 = vunpack.c.l.bf16 %v2477_v35 }
 0x13d   : > { %2666 = vmatprep.mubr.f32.mxu0 %v2497_v44 }
 0x13e   : > { %3831 = vmatmul.mubr.f32.gmra.mxu1 %v2510_v47 }
 0x13f   : > { %2093 = vperm.xlu1 %3893, %v4597_v13   ;;  %2089 = vperm.xlu0 %3894, %v4638_v41  }
 0x140   : > { %2667 = vmatmul.mubr.f32.gmra.mxu0 %v2496_v34  ;;  %3833 = vmatprep.mubr.f32.mxu1 %v2513_v48 }
 0x141   : > { %2671 = vmatprep.mubr.f32.mxu0 %v2500_v49 }
 0x142   : > { %3834 = vmatmul.mubr.f32.gmra.mxu1 %v2516_v54  ;;  %v4779_v14 = vpop.permute.xlu1 %1481 }
 0x143   : > { %2101 = vperm.xlu1 %3893, %v4616_v27   ;;  %2097 = vperm.xlu0 %3894, %v4656_v51  }
 0x144   : > { %2672 = vmatmul.mubr.f32.gmra.mxu0 %v2499_v55  ;;  %3836 = vmatprep.mubr.f32.mxu1 %v2519_v56 }
 0x145   : > { %2676 = vmatprep.mubr.f32.mxu0 %v2503_v57  ;;  %v4784_v16 = vpop.permute.xlu0 %1456 }
 0x146   : > { %3837 = vmatmul.mubr.f32.gmra.mxu1 %v2522_v0 }
 0x147   : > { %2109 = vperm.xlu1 %3893, %v4635_v40   ;;  %2105 = vperm.xlu0 %3894, %v4680_v63  }
 0x148   : > { %2677 = vmatmul.mubr.f32.gmra.mxu0 %v2502_v1  ;;  %3839 = vmatprep.mubr.f32.mxu1 %v2525_v2  ;;  %v3975_v2 = vmov 4  }
 0x149   : > { %2681 = vmatprep.mubr.f32.mxu0 %v2506_v3 }
 0x14a   : > { %3840 = vmatmul.mubr.f32.gmra.mxu1 %v2528_v5  ;;  %v3903_v5 = vld [vmem:[%s4531_s23 + $0x8] sm:$0xff] }
 0x14b   : > { %2117 = vperm.xlu1 %3893, %v4653_v50   ;;  %2113 = vperm.xlu0 %3894, %v4699_v7  }
 0x14c   : > { %2682 = vmatmul.mubr.f32.gmra.mxu0 %v2505_v8 }
 0x14d   : > { %2686 = vmatprep.mubr.f32.mxu0 %v2509_v9  ;;  %v1198_v9 = vld [vmem:[%s4842_s26 + $0x8] sm:$0xff] }
 0x14e   : > { %v4787_v24 = vpop.permute.xlu1 %1491 }
 0x14f   : > { %2125 = vperm.xlu1 %3893, %v4677_v62   ;;  %2121 = vperm.xlu0 %3894, %v4706_v23  }
 0x150   : > { %2687 = vmatmul.mubr.f32.gmra.mxu0 %v2508_v11 }
 0x151   : > { %2691 = vmatprep.mubr.f32.mxu0 %v2512_v12  ;;  %v4791_v26 = vpop.permute.xlu0 %1461 }
 0x153   : > { %3896 = vset.pattern.permute.xlu1 %v3974_v21  ;;  %3895 = vset.pattern.permute.xlu0 %v3974_v21 }
 0x154   : > { %2358 = vperm.xlu1 %3896, %v4604_v18   ;;  %2354 = vperm.xlu0 %3895, %v4581_v61   ;;  %v2517_v61 = vunpack.c.l.bf16 %v2473_v22 }
 0x155   : > { %2692 = vmatmul.mubr.f32.gmra.mxu0 %v2511_v17 }
 0x156   : > { %2696 = vmatprep.mubr.f32.mxu0 %v2515_v20  ;;  %v4802_v18 = vpop.permute.xlu1 %1501 }
 0x157   : > { %v4805_v36 = vpop.permute.xlu0 %1476 }
 0x158   : > { %2362 = vperm.xlu1 %3896, %v4795_v31   ;;  %2366 = vperm.xlu0 %3895, %v4799_v32  }
 0x159   : > { %2697 = vmatmul.mubr.f32.gmra.mxu0 %v2514_v25 }
 0x15a   : > { %2701 = vmatprep.mubr.f32.mxu0 %v2518_v28 }
 0x15c   : > { %2370 = vperm.xlu1 %3896, %v4621_v30   ;;  %2374 = vperm.xlu0 %3895, %v4809_v37  }
 0x15d   : > { %2702 = vmatmul.mubr.f32.gmra.mxu0 %v2517_v61  ;;  %v4813_v43 = vpop.permute.xlu1 %1511  ;;  %v4817_v44 = vpop.permute.xlu0 %1486 }
 0x15e   : > { %2706 = vmatprep.mubr.f32.mxu0 %v2521_v33 }
 0x160   : > { %2378 = vperm.xlu1 %3896, %v4638_v41   ;;  %2382 = vperm.xlu0 %3895, %v4597_v13  }
 0x161   : > { %2707 = vmatmul.mubr.f32.gmra.mxu0 %v2520_v38  ;;  %v1197_v38 = vld [vmem:[%s4842_s26] sm:$0xff] }
 0x162   : > { %2711 = vmatprep.mubr.f32.mxu0 %v2524_v39 }
 0x163   : > { %v4821_v47 = vpop.permute.xlu1 %1521  ;;  %v4823_v34 = vpop.permute.xlu0 %1496 }
 0x164   : > { %2386 = vperm.xlu1 %3896, %v4656_v51   ;;  %2390 = vperm.xlu0 %3895, %v4616_v27  }
 0x165   : > { %2712 = vmatmul.mubr.f32.gmra.mxu0 %v2523_v19 }
 0x166   : > { %2716 = vmatprep.mubr.f32.mxu0 %v2527_v45 }
 0x168   : > { %2394 = vperm.xlu1 %3896, %v4680_v63   ;;  %2398 = vperm.xlu0 %3895, %v4635_v40  }
 0x169   : > { %2717 = vmatmul.mubr.f32.gmra.mxu0 %v2526_v46  ;;  %v4827_v13 = vpop.permute.xlu1 %1531  ;;  %v4831_v49 = vpop.permute.xlu0 %1506 }
 0x16c   : > { %2402 = vperm.xlu1 %3896, %v4699_v7   ;;  %2406 = vperm.xlu0 %3895, %v4653_v50   ;;  %v3450_v48 = vpop.f32.mrf.mxu1  ;;  %v3370_v27 = vpop.f32.mrf.mxu0 }
 0x16e   : > { %v3451_v52 = vpop.f32.mrf.mxu1  ;;  %v3371_v54 = vpop.f32.mrf.mxu0 }
 0x16f   : > { %v3452_v53 = vadd.f32 %v3451_v52, %v3450_v48  ;;  %v3372_v40 = vadd.f32 %v3371_v54, %v3370_v27  ;;  %v4836_v60 = vpop.permute.xlu0 %1516 }
 0x170   : > { %2410 = vperm.xlu1 %3896, %v4706_v23   ;;  %2414 = vperm.xlu0 %3895, %v4677_v62   ;;  %v3453_v55 = vpop.f32.mrf.mxu1  ;;  %v3373_v56 = vpop.f32.mrf.mxu0 }
 0x171   : > { %v1781_v57 = vpop.permute.xlu1 %1780  ;;  %v1534_v50 = vmul.f32 %v3372_v40, %v4784_v16 }
 0x172   : > { %v3454_v58 = vpop.f32.mrf.mxu1  ;;  %v3374_v1 = vpop.f32.mrf.mxu0 }
 0x173   : > { %v3455_v0 = vadd.f32 %v3454_v58, %v3453_v55  ;;  %v3375_v62 = vadd.f32 %v3374_v1, %v3373_v56  ;;  %v1200_v58 = vld [vmem:[%s4842_s26 + $0x18] sm:$0xff] }
 0x174   : > { %3897 = vset.pattern.permute.xlu1 %v3975_v2  ;;  %3898 = vset.pattern.permute.xlu0 %v3975_v2  ;;  %v3456_v3 = vpop.f32.mrf.mxu1  ;;  %v3376_v10 = vpop.f32.mrf.mxu0 }
 0x175   : > { %2868 = vperm.xlu1 %3897, %v3902_v4   ;;  %2872 = vperm.xlu0 %3898, %v3903_v5   ;;  %v1840_v8 = vmul.f32 %v3455_v0, %v1781_v57  ;;  %v1535_v11 = vmul.f32 %v3375_v62, %v4791_v26  ;;  %v4850_v25 = vpop.permute.xlu0 %1526  ;;  %v3904_v4 = vld [vmem:[%s4531_s23 + $0x38] sm:$0xff] }
 0x176   : > { %v3457_v12 = vpop.f32.mrf.mxu1  ;;  %v3377_v16 = vpop.f32.mrf.mxu0 }
 0x177   : > { %v3458_v15 = vadd.f32 %v3457_v12, %v3456_v3  ;;  %v1551_v20 = vadd.f32 %v1535_v11, %v1198_v9  ;;  %v3378_v21 = vadd.f32 %v3377_v16, %v3376_v10 }
 0x178   : > { %v1785_v17 = vpop.permute.xlu1 %1784  ;;  %v3459_v22 = vpop.f32.mrf.mxu1 }
 0x179   : > { %2876 = vperm.xlu1 %3897, %v4795_v31   ;;  %2884 = vperm.xlu0 %3898, %v4621_v30   ;;  %v1841_v28 = vmul.f32 %v3458_v15, %v1785_v17  ;;  %v3379_v61 = vpop.f32.mrf.mxu0  ;;  %v1536_v33 = vmul.f32 %v3378_v21, %v4766_v59  ;;  %v4854_v35 = vadd.f32 %v1840_v8, %v1551_v20  ;;  %v3905_v17 = vld [vmem:[%s4531_s23 + $0x48] sm:$0xff] }
 0x17a   : > { %v3460_v26 = vpop.f32.mrf.mxu1  ;;  %v1550_v31 = vadd.f32 %v1534_v50, %v1197_v38 }
 0x17b   : > { %v3461_v39 = vadd.f32 %v3460_v26, %v3459_v22  ;;  %v3380_v42 = vpop.f32.mrf.mxu0  ;;  %v1552_v19 = vadd.f32 %v1536_v33, %v1199_v29 }
 0x17c   : > { %v3381_v45 = vadd.f32 %v3380_v42, %v3379_v61  ;;  %v3462_v46 = vpop.f32.mrf.mxu1  ;;  %v1203_v61 = vld [vmem:[%s4842_s26 + $0x30] sm:$0xff]  ;;  %v3906_v42 = vld [vmem:[%s4531_s23 + $0x58] sm:$0xff] }
 0x17d   : > { %2880 = vperm.xlu1 %3897, %v4799_v32   ;;  %2892 = vperm.xlu0 %3898, %v4638_v41   ;;  %v3382_v30 = vpop.f32.mrf.mxu0  ;;  %v4860_v27 = vadd.f32 %v1841_v28, %v1552_v19 }
 0x17e   : > { %v1537_v48 = vmul.f32 %v3381_v45, %v4774_v6  ;;  %v3463_v59 = vpop.f32.mrf.mxu1  ;;  %v1201_v6 = vld [vmem:[%s4842_s26 + $0x20] sm:$0xff] }
 0x17f   : > { %v1793_v52 = vpop.permute.xlu1 %1792  ;;  %v1777_v54 = vpop.permute.xlu0 %1776  ;;  %v3464_v40 = vadd.f32 %v3463_v59, %v3462_v46  ;;  %v1204_v59 = vld [vmem:[%s4842_s26 + $0x38] sm:$0xff] }
 0x180   : > { %v1839_v55 = vmul.f32 %v3452_v53, %v1777_v54  ;;  %v3383_v56 = vpop.f32.mrf.mxu0  ;;  %v3465_v57 = vpop.f32.mrf.mxu1 }
 0x181   : > { %2888 = vperm.xlu1 %3897, %v4809_v37   ;;  %2900 = vperm.xlu0 %3898, %v4656_v51   ;;  %v1843_v41 = vmul.f32 %v3464_v40, %v1793_v52  ;;  %v3384_v32 = vadd.f32 %v3383_v56, %v3382_v30  ;;  %v1553_v51 = vadd.f32 %v1537_v48, %v1200_v58 }
 0x182   : > { %v4864_v50 = vadd.f32 %v1839_v55, %v1550_v31  ;;  %v3385_v0 = vpop.f32.mrf.mxu0  ;;  %v3466_v1 = vpop.f32.mrf.mxu1  ;;  %v3907_v55 = vld [vmem:[%s4531_s23 + $0x68] sm:$0xff] }
 0x183   : > { %v1538_v2 = vmul.f32 %v3384_v32, %v4805_v36  ;;  %v3467_v62 = vadd.f32 %v3466_v1, %v3465_v57  ;;  %v1205_v1 = vld [vmem:[%s4842_s26 + $0x40] sm:$0xff] }
 0x184   : > { %v3386_v3 = vpop.f32.mrf.mxu0  ;;  %v3468_v53 = vpop.f32.mrf.mxu1 }
 0x185   : > { %2896 = vperm.xlu1 %3897, %v3904_v4   ;;  %2908 = vperm.xlu0 %3898, %v4680_v63   ;;  %v1554_v37 = vadd.f32 %v1538_v2, %v1201_v6  ;;  %v3387_v5 = vadd.f32 %v3386_v3, %v3385_v0  ;;  %v1202_v63 = vld [vmem:[%s4842_s26 + $0x28] sm:$0xff]  ;;  %v3908_v2 = vld [vmem:[%s4531_s23 + $0x78] sm:$0xff]  ;;  %s3235_s23 = sshll.u32 %s1148_s29, 7 }
 0x186   : > { %v1789_v8 = vpop.permute.xlu0 %1788  ;;  %v3388_v11 = vpop.f32.mrf.mxu0  ;;  %s5046_s30 = scalar_lea.vmem [#allocation6], %s3235_s23 }
 0x187   : > { %v1842_v9 = vmul.f32 %v3461_v39, %v1789_v8  ;;  %v1539_v10 = vmul.f32 %v3387_v5, %v4779_v14  ;;  %v3469_v12 = vpop.f32.mrf.mxu1  ;;  %v4872_v36 = vadd.f32 %v1843_v41, %v1554_v37  ;;  %v1801_v15 = vpop.permute.xlu1 %1800  ;;  %s3009_s16 = sshll.u32 %s5046_s30, 4  ;;  %s5106_s16 = int_to_ptr.vmem [resolvable:$true] %s3009_s16 }
 0x188   : > { %v3470_v16 = vadd.f32 %v3469_v12, %v3468_v53  ;;  %v3389_v20 = vpop.f32.mrf.mxu0  ;;  %s3909_s25 = scalar_lea.vmem %s5106_s16, 2048 }
 0x189   : > { %2904 = vperm.xlu1 %3897, %v3905_v17   ;;  %2916 = vperm.xlu0 %3898, %v4699_v7   ;;  %v3471_v21 = vpop.f32.mrf.mxu1  ;;  %v4877_v22 = vadd.f32 %v1842_v9, %v1553_v51  ;;  %v3390_v29 = vadd.f32 %v3389_v20, %v3388_v11  ;;  %v1555_v26 = vadd.f32 %v1539_v10, %v1202_v63  ;;  %v1206_v11 = vld [vmem:[%s4842_s26 + $0x48] sm:$0xff]  ;;  %p3910_p12 = scmp.ne.s32.totalorder %s5106_s16, %s3909_s25 }
 0x18a   : > { %v1845_v28 = vmul.f32 %v3470_v16, %v1801_v15  ;;  %v3391_v14 = vpop.f32.mrf.mxu0 }
 0x18b   : > { %v3472_v33 = vpop.f32.mrf.mxu1  ;;  %v1540_v38 = vmul.f32 %v3390_v29, %v4817_v44  ;;  %p3911_p13 = pnand %p3910_p12, %p4082_p5 }
 0x18c   : > { %v3473_v39 = vadd.f32 %v3472_v33, %v3471_v21  ;;  %v3392_v46 = vpop.f32.mrf.mxu0 }
 0x18d   : > { %2912 = vperm.xlu1 %3897, %v3906_v42   ;;  %v1797_v19 = vpop.permute.xlu0 %1796  ;;  %2924 = vperm.xlu0 %3898, %v4706_v23   ;;  %v1556_v45 = vadd.f32 %v1540_v38, %v1203_v61  ;;  %v3474_v30 = vpop.f32.mrf.mxu1  ;;  %v3393_v48 = vadd.f32 %v3392_v46, %v3391_v14  ;;  %p3912_p0 = pneg %p3911_p13 }
 0x18e   : > { %v1844_v7 = vmul.f32 %v3467_v62, %v1797_v19  ;;  %v1809_v31 = vpop.permute.xlu1 %1808  ;;  %v3394_v52 = vpop.f32.mrf.mxu0 }
 0x18f   : > { %v3475_v54 = vpop.f32.mrf.mxu1  ;;  %v4886_v44 = vadd.f32 %v1845_v28, %v1556_v45  ;;  %v1541_v56 = vmul.f32 %v3393_v48, %v4787_v24  ;;  %v1208_v48 = vld [vmem:[%s4842_s26 + $0x58] sm:$0xff] }
 0x190   : > { %v4884_v40 = vadd.f32 %v1844_v7, %v1555_v26  ;;  %v3476_v23 = vadd.f32 %v3475_v54, %v3474_v30  ;;  %v3395_v57 = vpop.f32.mrf.mxu0  ;;  %v1207_v26 = vld [vmem:[%s4842_s26 + $0x50] sm:$0xff] }
 0x191   : > { %2920 = vperm.xlu1 %3897, %v3907_v55   ;;  %v3477_v41 = vpop.f32.mrf.mxu1  ;;  %v1557_v32 = vadd.f32 %v1541_v56, %v1204_v59  ;;  %v3396_v6 = vadd.f32 %v3395_v57, %v3394_v52 }
 0x192   : > { %v1847_v58 = vmul.f32 %v3476_v23, %v1809_v31  ;;  %v3397_v53 = vpop.f32.mrf.mxu0 }
 0x193   : > { %v1542_v3 = vmul.f32 %v3396_v6, %v4823_v34  ;;  %v3478_v4 = vpop.f32.mrf.mxu1 }
 0x194   : > { %v1805_v0 = vpop.permute.xlu0 %1804  ;;  %v1817_v51 = vpop.permute.xlu1 %1816  ;;  %v3479_v37 = vadd.f32 %v3478_v4, %v3477_v41 }
 0x195   : > { %2928 = vperm.xlu1 %3897, %v3908_v2   ;;  %v1846_v62 = vmul.f32 %v3473_v39, %v1805_v0  ;;  %v1558_v5 = vadd.f32 %v1542_v3, %v1205_v1  ;;  %v3398_v24 = vpop.f32.mrf.mxu0  ;;  %v3480_v8 = vpop.f32.mrf.mxu1  ;;  %v1209_v0 = vld [vmem:[%s4842_s26 + $0x60] sm:$0xff] }
 0x196   : > { %v3399_v10 = vadd.f32 %v3398_v24, %v3397_v53 }
 0x197   : > { %v4893_v9 = vadd.f32 %v1846_v62, %v1557_v32  ;;  %v3400_v12 = vpop.f32.mrf.mxu0  ;;  %v3481_v15 = vpop.f32.mrf.mxu1  ;;  %v4896_v16 = vadd.f32 %v1847_v58, %v1558_v5 }
 0x198   : > { %v1543_v17 = vmul.f32 %v3399_v10, %v4802_v18  ;;  %v3482_v63 = vadd.f32 %v3481_v15, %v3480_v8  ;;  %v1210_v10 = vld [vmem:[%s4842_s26 + $0x68] sm:$0xff] }
 0x199   : > { %v3401_v29 = vpop.f32.mrf.mxu0  ;;  %v3483_v61 = vpop.f32.mrf.mxu1 }
 0x19a   : > { %v1559_v21 = vadd.f32 %v1543_v17, %v1206_v11  ;;  %v1849_v28 = vmul.f32 %v3482_v63, %v1817_v51  ;;  %v3402_v33 = vadd.f32 %v3401_v29, %v3400_v12 }
 0x19b   : > { %v1813_v34 = vpop.permute.xlu0 %1812  ;;  %v1825_v14 = vpop.permute.xlu1 %1824 }
 0x19c   : > { %v1848_v20 = vmul.f32 %v3479_v37, %v1813_v34  ;;  %v3403_v38 = vpop.f32.mrf.mxu0  ;;  %v3484_v39 = vpop.f32.mrf.mxu1  ;;  %v1544_v19 = vmul.f32 %v3402_v33, %v4831_v49 }
 0x19d   : > { %v3485_v7 = vadd.f32 %v3484_v39, %v3483_v61 }
 0x19e   : > { %v4900_v42 = vadd.f32 %v1848_v20, %v1559_v21  ;;  %v3404_v45 = vpop.f32.mrf.mxu0  ;;  %v3486_v18 = vpop.f32.mrf.mxu1  ;;  %v1560_v46 = vadd.f32 %v1544_v19, %v1207_v26 }
 0x19f   : > { %v3405_v30 = vadd.f32 %v3404_v45, %v3403_v38 }
 0x1a0   : > { %v3406_v54 = vpop.f32.mrf.mxu0  ;;  %v3487_v55 = vpop.f32.mrf.mxu1  ;;  %v4905_v56 = vadd.f32 %v1849_v28, %v1560_v46 }
 0x1a1   : > { %v1545_v52 = vmul.f32 %v3405_v30, %v4813_v43  ;;  %v3488_v57 = vadd.f32 %v3487_v55, %v3486_v18 }
 0x1a2   : > { %v1821_v31 = vpop.permute.xlu0 %1820  ;;  %v1833_v23 = vpop.permute.xlu1 %1832 }
 0x1a3   : > { %v1850_v59 = vmul.f32 %v3485_v7, %v1821_v31  ;;  %v1561_v41 = vadd.f32 %v1545_v52, %v1208_v48  ;;  %v3407_v32 = vpop.f32.mrf.mxu0  ;;  %v3489_v49 = vpop.f32.mrf.mxu1  ;;  %v1851_v58 = vmul.f32 %v3488_v57, %v1825_v14  ;;  %v1211_v14 = vld [vmem:[%s4842_s26 + $0x70] sm:$0xff]  ;;  %v1212_v31 = vld [vmem:[%s4842_s26 + $0x78] sm:$0xff]  ;;  %s3913_s26 = sshll.u32 %s3976_s18, 4  ;;  %s3914_s26 = int_to_ptr.vmem [resolvable:$false] %s3913_s26 }
 0x1a4   : > { %v3408_v6 = vadd.f32 %v3407_v32, %v3406_v54  ;;  %s3915_s23 = scalar_lea.vmem %s3914_s26, 4096  ;;  %p3916_p1 = scmp.lt.s32.totalorder %s5106_s16, %s3914_s26 }
 0x1a5   : > { %v3409_v1 = vpop.f32.mrf.mxu0  ;;  %v3490_v2 = vpop.f32.mrf.mxu1  ;;  %v4908_v62 = vadd.f32 %v1850_v59, %v1561_v41  ;;  %p3917_p2 = scmp.lt.s32.totalorder %s3915_s23, %s3909_s25 }
 0x1a6   : > { %v1546_v3 = vmul.f32 %v3408_v6, %v4836_v60  ;;  %v3491_v43 = vadd.f32 %v3490_v2, %v3489_v49 }
 0x1a7   : > { %v3410_v4 = vpop.f32.mrf.mxu0  ;;  %v3492_v8 = vpop.f32.mrf.mxu1  ;;  %p3918_p3 = por %p3917_p2, %p3916_p1 }
 0x1a8   : > { %v1562_v37 = vadd.f32 %v1546_v3, %v1209_v0  ;;  %v3411_v24 = vadd.f32 %v3410_v4, %v3409_v1 }
 0x1a9   : > { %v1829_v53 = vpop.permute.xlu0 %1828  ;;  %v3412_v11 = vpop.f32.mrf.mxu0  ;;  %p3919_p4 = pnand %p3918_p3, %p3912_p0 }
 0x1aa   : > { %v2066_v51 = vpop.permute.xlu1 %2065  ;;  %v1852_v5 = vmul.f32 %v3491_v43, %v1829_v53  ;;  %v1547_v12 = vmul.f32 %v3411_v24, %v4821_v47  ;;  %v3493_v15 = vpop.f32.mrf.mxu1  ;;  %v4913_v17 = vadd.f32 %v1851_v58, %v1562_v37 }
 0x1ab   : > { %v3494_v34 = vadd.f32 %v3493_v15, %v3492_v8  ;;  %v3413_v20 = vpop.f32.mrf.mxu0 }
 0x1ac   : > { %v1563_v21 = vadd.f32 %v1547_v12, %v1210_v10  ;;  %v3414_v28 = vadd.f32 %v3413_v20, %v3412_v11 }
 0x1ad   : > { %v1837_v63 = vpop.permute.xlu0 %1836  ;;  %v3495_v29 = vpop.f32.mrf.mxu1  ;;  %v1853_v61 = vmul.f32 %v3494_v34, %v1833_v23 }
 0x1ae   : > { %v2074_v60 = vpop.permute.xlu1 %2073  ;;  %v1548_v26 = vmul.f32 %v3414_v28, %v4850_v25  ;;  %v4917_v39 = vadd.f32 %v1852_v5, %v1563_v21 }
 0x1af   : > { %v3415_v33 = vpop.f32.mrf.mxu0  ;;  %v3496_v38 = vpop.f32.mrf.mxu1 }
 0x1b0   : > { %v3497_v47 = vadd.f32 %v3496_v38, %v3495_v29  ;;  %v1564_v18 = vadd.f32 %v1548_v26, %v1211_v14 }
 0x1b1   : > { %v3416_v19 = vpop.f32.mrf.mxu0 }
 0x1b2   : > { %v2078_v7 = vpop.permute.xlu1 %2077  ;;  %v4919_v45 = vpop.permute.xlu0 %2069  ;;  %v3417_v46 = vadd.f32 %v3416_v19, %v3415_v33  ;;  %v1854_v30 = vmul.f32 %v3497_v47, %v1837_v63  ;;  %v4925_v52 = vadd.f32 %v1853_v61, %v1564_v18 }
 0x1b4   : > { %v1549_v48 = vmul.f32 %v3417_v46, %v4827_v13  ;;  %v4923_v59 = vpop.f32.mrf.mxu0 }
 0x1b6   : > { %v2086_v54 = vpop.permute.xlu1 %2085  ;;  %v2082_v25 = vpop.permute.xlu0 %2081  ;;  %v1565_v55 = vadd.f32 %v1549_v48, %v1212_v31 }
 0x1b7   : > { %v4927_v23 = vpop.f32.mrf.mxu1  ;;  %v1985_v57 = vpop.f32.mrf.mxu0 }
 0x1b8   : > { %v2128_v41 = vmul.f32 %v2066_v51, %v1985_v57  ;;  %v4929_v32 = vadd.f32 %v1854_v30, %v1565_v55 }
 0x1b9   : > { %v4934_v13 = vpop.f32.mrf.mxu1 }
 0x1ba   : > { %v2094_v49 = vpop.permute.xlu1 %2093  ;;  %v2090_v58 = vpop.permute.xlu0 %2089  ;;  %v4932_v6 = vadd.f32 %v2128_v41, %v4864_v50 }
 0x1bb   : > { %v3711_v0 = vpop.f32.mrf.mxu0 }
 0x1bc   : > { %v2131_v1 = vmul.f32 %v3711_v0, %v2078_v7 }
 0x1bd   : > { %v1995_v2 = vpop.f32.mrf.mxu0 }
 0x1be   : > { %v2102_v3 = vpop.permute.xlu1 %2101  ;;  %v2098_v43 = vpop.permute.xlu0 %2097  ;;  %v4937_v53 = vadd.f32 %v2131_v1, %v4877_v22  ;;  %v2130_v4 = vmul.f32 %v2074_v60, %v1995_v2 }
 0x1bf   : > { %v4939_v37 = vpop.f32.mrf.mxu1 }
 0x1c0   : > { %v4942_v51 = vadd.f32 %v2130_v4, %v4860_v27 }
 0x1c1   : > { %v4944_v5 = vpop.f32.mrf.mxu1 }
 0x1c2   : > { %v2110_v50 = vpop.permute.xlu1 %2109  ;;  %v2106_v24 = vpop.permute.xlu0 %2105 }
 0x1c3   : > { %v3714_v8 = vpop.f32.mrf.mxu0 }
 0x1c4   : > { %v2133_v10 = vmul.f32 %v3714_v8, %v2086_v54 }
 0x1c5   : > { %v4946_v11 = vpop.f32.mrf.mxu1  ;;  %v2005_v12 = vpop.f32.mrf.mxu0 }
 0x1c6   : > { %v2118_v15 = vpop.permute.xlu1 %2117  ;;  %v2114_v63 = vpop.permute.xlu0 %2113  ;;  %v4949_v22 = vadd.f32 %v2133_v10, %v4884_v40  ;;  %v2132_v34 = vmul.f32 %v2082_v25, %v2005_v12 }
 0x1c7   : > { %v4954_v60 = vpop.f32.mrf.mxu1 }
 0x1c8   : > { %v4952_v20 = vadd.f32 %v2132_v34, %v4872_v36  ;;  %v3717_v27 = vpop.f32.mrf.mxu0 }
 0x1c9   : > { %v2135_v21 = vmul.f32 %v3717_v27, %v2094_v49 }
 0x1ca   : > { %v2122_v28 = vpop.permute.xlu0 %2121  ;;  %v2126_v29 = vpop.permute.xlu1 %2125 }
 0x1cb   : > { %v4957_v61 = vadd.f32 %v2135_v21, %v4893_v9  ;;  %v2015_v14 = vpop.f32.mrf.mxu0 }
 0x1cc   : > { %v4959_v33 = vpop.f32.mrf.mxu1  ;;  %v2134_v26 = vmul.f32 %v2090_v58, %v2015_v14 }
 0x1ce   : > { %v4962_v40 = vadd.f32 %v2134_v26, %v4886_v44  ;;  %v4966_v19 = vpop.f32.mrf.mxu1 }
 0x1cf   : > { %v4964_v38 = vpop.permute.xlu1 %2358  ;;  %v2355_v36 = vpop.permute.xlu0 %2354 }
 0x1d0   : > { %v3720_v47 = vpop.f32.mrf.mxu0 }
 0x1d1   : > { %v2137_v7 = vmul.f32 %v3720_v47, %v2102_v3 }
 0x1d2   : > { %v2025_v18 = vpop.f32.mrf.mxu0 }
 0x1d3   : > { %v4968_v46 = vpop.permute.xlu0 %2366  ;;  %v4970_v30 = vpop.permute.xlu1 %2362  ;;  %v4973_v9 = vadd.f32 %v2137_v7, %v4900_v42  ;;  %v2136_v31 = vmul.f32 %v2098_v43, %v2025_v18 }
 0x1d4   : > { %v4975_v48 = vpop.f32.mrf.mxu1 }
 0x1d5   : > { %v4978_v44 = vadd.f32 %v2136_v31, %v4896_v16 }
 0x1d6   : > { %v3723_v54 = vpop.f32.mrf.mxu0  ;;  %v4980_v25 = vpop.f32.mrf.mxu1 }
 0x1d7   : > { %v4982_v55 = vpop.permute.xlu0 %2374  ;;  %v4984_v57 = vpop.permute.xlu1 %2370  ;;  %v2139_v41 = vmul.f32 %v3723_v54, %v2110_v50 }
 0x1d8   : > { %v2035_v49 = vpop.f32.mrf.mxu0 }
 0x1d9   : > { %v4987_v58 = vadd.f32 %v2139_v41, %v4908_v62  ;;  %v2138_v42 = vmul.f32 %v2106_v24, %v2035_v49 }
 0x1da   : > { %v4989_v0 = vpop.f32.mrf.mxu1 }
 0x1db   : > { %v4991_v1 = vpop.permute.xlu0 %2382  ;;  %v4993_v2 = vpop.permute.xlu1 %2378  ;;  %v4996_v16 = vadd.f32 %v2138_v42, %v4905_v56 }
 0x1dc   : > { %v4998_v43 = vpop.f32.mrf.mxu1 }
 0x1dd   : > { %v3726_v3 = vpop.f32.mrf.mxu0 }
 0x1de   : > { %v2141_v4 = vmul.f32 %v3726_v3, %v2118_v15 }
 0x1df   : > { %v5000_v8 = vpop.permute.xlu0 %2390  ;;  %v5002_v50 = vpop.permute.xlu1 %2386 }
 0x1e0   : > { %v5005_v62 = vadd.f32 %v2141_v4, %v4917_v39  ;;  %v2045_v24 = vpop.f32.mrf.mxu0 }
 0x1e1   : > { %v5007_v10 = vpop.f32.mrf.mxu1  ;;  %v2140_v12 = vmul.f32 %v2114_v63, %v2045_v24  ;;  %v2417_v24 = vmul.f32 %v2355_v36, %v4934_v13 }
 0x1e3   : > { %v5009_v34 = vpop.permute.xlu0 %2398  ;;  %v5011_v27 = vpop.permute.xlu1 %2394  ;;  %v5014_v56 = vadd.f32 %v2140_v12, %v4913_v17 }
 0x1e4   : > { %v3729_v21 = vpop.f32.mrf.mxu0  ;;  %v5016_v15 = vpop.f32.mrf.mxu1 }
 0x1e5   : > { %v2143_v14 = vmul.f32 %v3729_v21, %v2126_v29 }
 0x1e6   : > { %v2055_v26 = vpop.f32.mrf.mxu0 }
 0x1e7   : > { %v5018_v47 = vpop.permute.xlu0 %2406  ;;  %v5020_v39 = vpop.permute.xlu1 %2402  ;;  %v2159_v7 = vadd.f32 %v2143_v14, %v4929_v32  ;;  %v2142_v18 = vmul.f32 %v2122_v28, %v2055_v26  ;;  %v2129_v32 = vmul.f32 %v4923_v59, %v4919_v45 }
 0x1e8   : > { %v3785_v63 = vpop.f32.mrf.mxu1 }
 0x1e9   : > { %v5024_v31 = vadd.f32 %v2142_v18, %v4925_v52  ;;  %v2145_v18 = vadd.f32 %v2129_v32, %v4854_v35  ;;  %v2419_v35 = vmul.f32 %v4970_v30, %v4944_v5 }
 0x1ea   : > { %v5026_v54 = vpop.f32.mrf.mxu1 }
 0x1eb   : > { %v2415_v17 = vpop.permute.xlu0 %2414  ;;  %v5028_v41 = vpop.permute.xlu1 %2410 }
 0x1ec   : > { %v2432_v49 = vmul.f32 %v3785_v63, %v2415_v17  ;;  %v3594_v29 = vpop.f32.mrf.mxu0 }
 0x1ee   : > { %v5030_v42 = vadd.f32 %v2432_v49, %v2159_v7  ;;  %v3595_v3 = vpop.f32.mrf.mxu0  ;;  %v3820_v4 = vpop.f32.mrf.mxu1  ;;  %v2418_v7 = vmul.f32 %v4927_v23, %v4964_v38  ;;  %v2433_v49 = vadd.f32 %v2417_v24, %v4932_v6  ;;  %v2420_v24 = vmul.f32 %v4939_v37, %v4968_v46 }
 0x1ef   : > { %v3596_v28 = vadd.f32 %v3595_v3, %v3594_v29 }
 0x1f0   : > { %5171 = vst [vmem:[#allocation11_spill] sm:$0xff] %v5030_v42  ;;  %v3597_v52 = vpop.f32.mrf.mxu0  ;;  %v2869_v12 = vpop.permute.xlu1 %2868  ;;  %v2436_v37 = vadd.f32 %v2420_v24, %v4937_v53 }
 0x1f1   : > { %v2788_v21 = vpop.f32.mrf.mxu1  ;;  %v2873_v13 = vpop.permute.xlu0 %2872 }
 0x1f2   : > { %v2789_v14 = vadd.f32 %v3596_v28, %v2788_v21  ;;  %v3598_v26 = vpop.f32.mrf.mxu0  ;;  %v2434_v28 = vadd.f32 %v2418_v7, %v2145_v18 }
 0x1f3   : > { %v3599_v63 = vadd.f32 %v3598_v26, %v3597_v52  ;;  %v3823_v17 = vpop.f32.mrf.mxu1 }
 0x1f4   : > { %v2931_v45 = vmul.f32 %v2869_v12, %v2789_v14  ;;  %v3600_v59 = vpop.f32.mrf.mxu0  ;;  %v2877_v32 = vpop.permute.xlu1 %2876  ;;  %v2435_v14 = vadd.f32 %v2419_v35, %v4942_v51 }
 0x1f5   : > { %v2794_v36 = vadd.f32 %v3820_v4, %v3599_v63  ;;  %v2798_v42 = vpop.f32.mrf.mxu1 }
 0x1f6   : > { %v2947_v29 = vadd.f32 %v2931_v45, %v2433_v49  ;;  %v3601_v3 = vpop.f32.mrf.mxu0 }
 0x1f7   : > { %v2932_v21 = vmul.f32 %v2873_v13, %v2794_v36  ;;  %v3602_v23 = vadd.f32 %v3601_v3, %v3600_v59  ;;  %v3826_v12 = vpop.f32.mrf.mxu1  ;;  %v2421_v59 = vmul.f32 %v4984_v57, %v4954_v60  ;;  %v2885_v3 = vpop.permute.xlu0 %2884 }
 0x1f8   : > { %v2963_v38 = vmul.f32 0.16666667, %v2947_v29  ;;  %v3603_v52 = vpop.f32.mrf.mxu0  ;;  %v2881_v63 = vpop.permute.xlu1 %2880 }
 0x1f9   : > { %v2948_v26 = vadd.f32 %v2932_v21, %v2434_v28  ;;  %v2799_v6 = vadd.f32 %v3602_v23, %v2798_v42  ;;  %v2808_v45 = vpop.f32.mrf.mxu1  ;;  %v2437_v53 = vadd.f32 %v2421_v59, %v4952_v20 }
 0x1fa   : > { %2979 = vst [vmem:[%s5046_s30] sm:$0xff] %v2963_v38  ;;  %v3604_v4 = vpop.f32.mrf.mxu0 }
 0x1fb   : > { %v2964_v5 = vmul.f32 0.16666667, %v2948_v26  ;;  %v2933_v30 = vmul.f32 %v2877_v32, %v2799_v6  ;;  %v3605_v18 = vadd.f32 %v3604_v4, %v3603_v52  ;;  %v2422_v32 = vmul.f32 %v4946_v11, %v4982_v55  ;;  %v3829_v21 = vpop.f32.mrf.mxu1 }
 0x1fc   : > { %v3606_v7 = vpop.f32.mrf.mxu0  ;;  %v2889_v52 = vpop.permute.xlu1 %2888  ;;  %v2423_v11 = vmul.f32 %v4993_v2, %v4966_v19 }
 0x1fd   : > { %2980 = vst [vmem:[%s5046_s30 + $0x8] sm:$0xff] %v2964_v5  ;;  %v2949_v42 = vadd.f32 %v2933_v30, %v2435_v14  ;;  %v2804_v49 = vadd.f32 %v3823_v17, %v3605_v18  ;;  %v2438_v24 = vadd.f32 %v2422_v32, %v4949_v22  ;;  %v2818_v14 = vpop.f32.mrf.mxu1 }
 0x1fe   : > { %v3607_v46 = vpop.f32.mrf.mxu0  ;;  %v2439_v22 = vadd.f32 %v2423_v11, %v4962_v40 }
 0x1ff   : > { %v2965_v13 = vmul.f32 0.16666667, %v2949_v42  ;;  %v2934_v36 = vmul.f32 %v2881_v63, %v2804_v49  ;;  %v3608_v51 = vadd.f32 %v3607_v46, %v3606_v7  ;;  %v2893_v7 = vpop.permute.xlu0 %2892  ;;  %v2424_v42 = vmul.f32 %v4959_v33, %v4991_v1  ;;  %v3832_v49 = vpop.f32.mrf.mxu1 }
 0x200   : > { %v3609_v29 = vpop.f32.mrf.mxu0  ;;  %v2425_v33 = vmul.f32 %v5002_v50, %v4980_v25 }
 0x201   : > { %2981 = vst [vmem:[%s5046_s30 + $0x10] sm:$0xff] %v2965_v13  ;;  %v2950_v28 = vadd.f32 %v2934_v36, %v2436_v37  ;;  %v2809_v35 = vadd.f32 %v3608_v51, %v2808_v45  ;;  %v2897_v45 = vpop.permute.xlu1 %2896  ;;  %v2440_v36 = vadd.f32 %v2424_v42, %v4957_v61 }
 0x202   : > { %v3610_v17 = vpop.f32.mrf.mxu0  ;;  %v2441_v61 = vadd.f32 %v2425_v33, %v4978_v44  ;;  %v2427_v44 = vmul.f32 %v5011_v27, %v4998_v43 }
 0x203   : > { %v2966_v23 = vmul.f32 0.16666667, %v2950_v28  ;;  %v2935_v38 = vmul.f32 %v2885_v3, %v2809_v35  ;;  %v3611_v60 = vadd.f32 %v3610_v17, %v3609_v29  ;;  %v2828_v29 = vpop.f32.mrf.mxu1  ;;  %v2426_v17 = vmul.f32 %v4975_v48, %v5000_v8 }
 0x204   : > { %v3612_v57 = vpop.f32.mrf.mxu0 }
 0x205   : > { %2982 = vst [vmem:[%s5046_s30 + $0x18] sm:$0xff] %v2966_v23  ;;  %v2951_v26 = vadd.f32 %v2935_v38, %v2437_v53  ;;  %v2814_v6 = vadd.f32 %v3826_v12, %v3611_v60  ;;  %v2901_v53 = vpop.permute.xlu0 %2900  ;;  %v3835_v25 = vpop.f32.mrf.mxu1 }
 0x206   : > { %v3613_v4 = vpop.f32.mrf.mxu0 }
 0x207   : > { %v2967_v55 = vmul.f32 0.16666667, %v2951_v26  ;;  %v2936_v5 = vmul.f32 %v2889_v52, %v2814_v6  ;;  %v3614_v20 = vadd.f32 %v3613_v4, %v3612_v57  ;;  %v2905_v26 = vpop.permute.xlu1 %2904  ;;  %v2442_v6 = vadd.f32 %v2426_v17, %v4973_v9  ;;  %v2838_v48 = vpop.f32.mrf.mxu1 }
 0x208   : > { %v3615_v30 = vpop.f32.mrf.mxu0 }
 0x209   : > { %2983 = vst [vmem:[%s5046_s30 + $0x20] sm:$0xff] %v2967_v55  ;;  %v2952_v18 = vadd.f32 %v2936_v5, %v2438_v24  ;;  %v2819_v63 = vadd.f32 %v3614_v20, %v2818_v14  ;;  %v2909_v5 = vpop.permute.xlu0 %2908  ;;  %v3838_v9 = vpop.f32.mrf.mxu1 }
 0x20a   : > { %v3616_v12 = vpop.f32.mrf.mxu0 }
 0x20b   : > { %v2968_v37 = vmul.f32 0.16666667, %v2952_v18  ;;  %v2937_v46 = vmul.f32 %v2893_v7, %v2819_v63  ;;  %v3617_v19 = vadd.f32 %v3616_v12, %v3615_v30  ;;  %v2428_v30 = vmul.f32 %v4989_v0, %v5009_v34  ;;  %v2913_v43 = vpop.permute.xlu1 %2912 }
 0x20c   : > { %v3618_v2 = vpop.f32.mrf.mxu0  ;;  %v2443_v63 = vadd.f32 %v2427_v44, %v4996_v16  ;;  %v2429_v0 = vmul.f32 %v5020_v39, %v5016_v15 }
 0x20d   : > { %2984 = vst [vmem:[%s5046_s30 + $0x28] sm:$0xff] %v2968_v37  ;;  %v2953_v59 = vadd.f32 %v2937_v46, %v2439_v22  ;;  %v2824_v13 = vadd.f32 %v3829_v21, %v3617_v19  ;;  %v2444_v37 = vadd.f32 %v2428_v30, %v4987_v58  ;;  %v2848_v19 = vpop.f32.mrf.mxu1 }
 0x20e   : > { %v3619_v51 = vpop.f32.mrf.mxu0  ;;  %v2445_v58 = vadd.f32 %v2429_v0, %v5014_v56 }
 0x20f   : > { %v2969_v1 = vmul.f32 0.16666667, %v2953_v59  ;;  %v2938_v3 = vmul.f32 %v2897_v45, %v2824_v13  ;;  %v3620_v40 = vadd.f32 %v3619_v51, %v3618_v2  ;;  %v2917_v59 = vpop.permute.xlu0 %2916  ;;  %v2430_v51 = vmul.f32 %v5007_v10, %v5018_v47  ;;  %v3841_v33 = vpop.f32.mrf.mxu1 }
 0x210   : > { %v3621_v28 = vpop.f32.mrf.mxu0  ;;  %v2431_v10 = vmul.f32 %v5028_v41, %v5026_v54 }
 0x211   : > { %2985 = vst [vmem:[%s5046_s30 + $0x30] sm:$0xff] %v2969_v1  ;;  %v2954_v35 = vadd.f32 %v2938_v3, %v2440_v36  ;;  %v2829_v32 = vadd.f32 %v3620_v40, %v2828_v29  ;;  %v2921_v40 = vpop.permute.xlu1 %2920 }
 0x212   : > { %v3622_v21 = vpop.f32.mrf.mxu0 }
 0x213   : > { %v2970_v23 = vmul.f32 0.16666667, %v2954_v35  ;;  %v2939_v38 = vmul.f32 %v2901_v53, %v2829_v32  ;;  %v3623_v60 = vadd.f32 %v3622_v21, %v3621_v28  ;;  %v2446_v32 = vadd.f32 %v2430_v51, %v5005_v62  ;;  %v2858_v53 = vpop.f32.mrf.mxu1 }
 0x214   : > { %v2447_v62 = vadd.f32 %v2431_v10, %v5024_v31 }
 0x215   : > { %2986 = vst [vmem:[%s5046_s30 + $0x38] sm:$0xff] %v2970_v23  ;;  %v2955_v50 = vadd.f32 %v2939_v38, %v2441_v61  ;;  %v2834_v57 = vadd.f32 %v3832_v49, %v3623_v60  ;;  %v3624_v52 = vpop.f32.mrf.mxu0  ;;  %v2925_v60 = vpop.permute.xlu0 %2924 }
 0x217   : > { %v2971_v24 = vmul.f32 0.16666667, %v2955_v50  ;;  %v2940_v4 = vmul.f32 %v2905_v26, %v2834_v57  ;;  %v3625_v14 = vpop.f32.mrf.mxu0  ;;  %v2929_v26 = vpop.permute.xlu1 %2928 }
 0x218   : > { %v3626_v8 = vadd.f32 %v3625_v14, %v3624_v52 }
 0x219   : > { %2987 = vst [vmem:[%s5046_s30 + $0x40] sm:$0xff] %v2971_v24  ;;  %v2956_v11 = vadd.f32 %v2940_v4, %v2442_v6  ;;  %v3627_v55 = vpop.f32.mrf.mxu0  ;;  %v5172_v4 = vld [vmem:[#allocation11_spill] sm:$0xff] }
 0x21a   : > { %v2839_v20 = vadd.f32 %v3626_v8, %v2838_v48 }
 0x21b   : > { %v2972_v18 = vmul.f32 0.16666667, %v2956_v11  ;;  %v3628_v7 = vpop.f32.mrf.mxu0 }
 0x21c   : > { %v2941_v42 = vmul.f32 %v2909_v5, %v2839_v20  ;;  %v3629_v12 = vadd.f32 %v3628_v7, %v3627_v55 }
 0x21d   : > { %2988 = vst [vmem:[%s5046_s30 + $0x48] sm:$0xff] %v2972_v18  ;;  %v3630_v49 = vpop.f32.mrf.mxu0 }
 0x21e   : > { %v2957_v27 = vadd.f32 %v2941_v42, %v2443_v63  ;;  %v2844_v22 = vadd.f32 %v3835_v25, %v3629_v12 }
 0x21f   : > { %v3631_v46 = vpop.f32.mrf.mxu0 }
 0x220   : > { %v2973_v34 = vmul.f32 0.16666667, %v2957_v27  ;;  %v2942_v2 = vmul.f32 %v2913_v43, %v2844_v22  ;;  %v3632_v45 = vadd.f32 %v3631_v46, %v3630_v49 }
 0x221   : > { %v3633_v16 = vpop.f32.mrf.mxu0 }
 0x222   : > { %2989 = vst [vmem:[%s5046_s30 + $0x50] sm:$0xff] %v2973_v34  ;;  %v2958_v13 = vadd.f32 %v2942_v2, %v2444_v37  ;;  %v2849_v36 = vadd.f32 %v3632_v45, %v2848_v19 }
 0x223   : > { %v3634_v29 = vpop.f32.mrf.mxu0 }
 0x224   : > { %v2974_v1 = vmul.f32 0.16666667, %v2958_v13  ;;  %v2943_v3 = vmul.f32 %v2917_v59, %v2849_v36  ;;  %v3635_v15 = vadd.f32 %v3634_v29, %v3633_v16 }
 0x225   : > { %v3636_v39 = vpop.f32.mrf.mxu0 }
 0x226   : > { %2990 = vst [vmem:[%s5046_s30 + $0x58] sm:$0xff] %v2974_v1  ;;  %v2959_v28 = vadd.f32 %v2943_v3, %v2445_v58  ;;  %v2854_v35 = vadd.f32 %v3838_v9, %v3635_v15 }
 0x227   : > { %v3637_v17 = vpop.f32.mrf.mxu0 }
 0x228   : > { %v2975_v47 = vmul.f32 0.16666667, %v2959_v28  ;;  %v2944_v21 = vmul.f32 %v2921_v40, %v2854_v35  ;;  %v3638_v56 = vadd.f32 %v3637_v17, %v3636_v39 }
 0x229   : > { %v3639_v61 = vpop.f32.mrf.mxu0 }
 0x22a   : > { %2991 = vst [vmem:[%s5046_s30 + $0x60] sm:$0xff] %v2975_v47  ;;  %v2960_v23 = vadd.f32 %v2944_v21, %v2446_v32  ;;  %v2859_v38 = vadd.f32 %v3638_v56, %v2858_v53 }
 0x22b   : > { %v3640_v25 = vpop.f32.mrf.mxu0 }
 0x22c   : > { %v2976_v50 = vmul.f32 0.16666667, %v2960_v23  ;;  %v2945_v57 = vmul.f32 %v2925_v60, %v2859_v38  ;;  %v3641_v52 = vadd.f32 %v3640_v25, %v3639_v61 }
 0x22e   : > { %2992 = vst [vmem:[%s5046_s30 + $0x68] sm:$0xff] %v2976_v50  ;;  %v2961_v54 = vadd.f32 %v2945_v57, %v2447_v62  ;;  %v2864_v41 = vadd.f32 %v3841_v33, %v3641_v52 }
 0x230   : > { %v2977_v6 = vmul.f32 0.16666667, %v2961_v54  ;;  %v2946_v24 = vmul.f32 %v2929_v26, %v2864_v41 }
 0x232   : > { %2993 = vst [vmem:[%s5046_s30 + $0x70] sm:$0xff] %v2977_v6  ;;  %v2962_v14 = vadd.f32 %v2946_v24, %v5172_v4 }
 0x234   : > { %v2978_v31 = vmul.f32 0.16666667, %v2962_v14 }
 0x236   : > { %2994 = vst [vmem:[%s5046_s30 + $0x78] sm:$0xff] %v2978_v31 }
 0x237   : > { %3922 = shalt.err (!%p3919_p4)
}
 0x238   : > { %s3923_s29 = scalar_lea.hbm %s5104_s28, 2048  ;;  %s3927_s19 = scalar_lea.hbm %s5163_s12, 4096 }
 0x239   : > { %p3924_p7 = scmp.ne.s32.totalorder %s5104_s28, %s3923_s29  ;;  %p3928_p10 = scmp.lt.s32.totalorder %s5104_s28, %s5163_s12 }
 0x23a   : > { %p3929_p11 = scmp.lt.s32.totalorder %s3927_s19, %s3923_s29 }
 0x23b   : > { %p3925_p8 = pnand %p3924_p7, %p4082_p5 }
 0x23c   : > { %p3930_p12 = por %p3929_p11, %p3928_p10 }
 0x23d   : > { %p3926_p9 = pneg %p3925_p8 }
 0x23f   : > { %p3931_p13 = pnand %p3930_p12, %p3926_p9 }
 0x241   : > { %3934 = shalt.err (!%p3931_p13)
}
 0x242   : > { %s3977_s25 = smov 128   ;;  %s3978_s26 = smov 8  }
 0x243   : > { %3843 = dma.vmem_to_hbm [thread:$0]  (%p4082_p5), %s5106_s16, 2048, %s5104_s28, %s5111_s15, %s3977_s25, %s3977_s25, %s3978_s26  }
 0x244 PF: > { %p3849_p0 = scmp.ge.s32.totalorder %s3969_s24, 2  ;;  %s3024_s23 = sand.u32 1, %s3957_s21  }
 0x245   : > { %s3025_s29 = scalar_lea.sflag [#allocation7], %s3024_s23 }
 0x246   : > { %p3846_p1 = pnand %p3849_p0, %p4086_p6 }
 0x248   : > { %p3847_p2 = pneg %p3846_p1 }
 0x24a   : > { %3952 = dma.done.wait (%p3847_p2), %s3025_s29, 2048  }
 0x24b   : > { %3954 = vsyncadd (%p3847_p2), %s3025_s29, 4294965248  ;;  %s5173_s30 = sld [smem:[#allocation9_spill]]  ;;  %p22_p3 = scmp.ge.s32.totalorder %s4069_s27, 4  }
 0x24c   : > { %s5174_s23 = sld [smem:[#allocation10_spill]]  ;;  %s5175_s21 = smov %s3961_s22 }
 0x24d   : > { %s5177_s24 = smov %s4069_s27  ;;  %24 = sbr.rel (!%p22_p3) target bundleno = 3 (0x3), region = 290 }
 0x251   : > { %s5176_s22 = smov %s5173_s30 }
 0x252   :  { %3030 = vsyncpa [#allocation7], 1 }
 0x253   :  { %3032 = vsyncpa [#allocation7 + $0x1], 1 }

// kernel: nv_encoder_forward.15
= control target key start
LH: loop header
LB: loop body
LE: loop exit
PB: predicated region body
PF: predicated region fallthrough
CT: control target
= control target key end

     0   :  { %s1316_s0 = inlined_call_operand.vmem [shape: bf16[256,128], index: 0, kind: input, shape index: {}]   ;;  %s1317_s1 = inlined_call_operand.vmem [shape: f32[256,640], index: 1, kind: input, shape index: {}]   ;;  %s1318_s2 = inlined_call_operand.vmem [shape: f32[128,1], index: 2, kind: input, shape index: {}]   ;;  %s1319_s3 = inlined_call_operand.vmem [shape: f32[128,128], index: 3, kind: input, shape index: {}]   ;;  %s1320_s4 = inlined_call_operand.hbm [shape: f32[128,128], index: 4, kind: output, shape index: {}]  }
   0x1   :  { %v712_v0 = vld [vmem:[%s1316_s0] sm:$0xff]   ;;  %v775_v6 = vld [vmem:[%s1316_s0 + $0x8] sm:$0xff]   ;;  %v710_v12 = vld [vmem:[%s1317_s1 + $0x4f8] sm:$0xff] }
   0x2   :  { %v782_v1 = vld [vmem:[%s1316_s0 + $0x40] sm:$0xff]   ;;  %v713_v2 = vunpack.c.l.bf16 %v712_v0  ;;  %v714_v4 = vunpack.c.h.bf16 %v712_v0  ;;  %v783_v7 = vld [vmem:[%s1316_s0 + $0x48] sm:$0xff]   ;;  %v717_v10 = vunpack.c.l.bf16 %v775_v6  ;;  %v694_v13 = vld [vmem:[%s1317_s1 + $0x278] sm:$0xff]  ;;  %790 = vmatprep.subr.mxu0 %v710_v12  ;;  %870 = vmatprep.subr.mxu1 %v710_v12  ;;  %v718_v19 = vunpack.c.h.bf16 %v775_v6 }
   0x3   :  { %v745_v3 = vunpack.c.l.bf16 %v782_v1  ;;  %v746_v5 = vunpack.c.h.bf16 %v782_v1  ;;  %v749_v11 = vunpack.c.l.bf16 %v783_v7  ;;  %v709_v14 = vld [vmem:[%s1317_s1 + $0x4d0] sm:$0xff]  ;;  %791 = vmatpush3.msra.mxu0 %v694_v13  ;;  %v708_v16 = vld [vmem:[%s1317_s1 + $0x4a8] sm:$0xff]  ;;  %886 = vmatpush3.msra.mxu1 %v694_v13  ;;  %v750_v20 = vunpack.c.h.bf16 %v783_v7  ;;  %v707_v21 = vld [vmem:[%s1317_s1 + $0x480] sm:$0xff] }
   0x4   :  { %v693_v15 = vld [vmem:[%s1317_s1 + $0x250] sm:$0xff]  ;;  %792 = vmatprep.subr.mxu0 %v709_v14  ;;  %v692_v17 = vld [vmem:[%s1317_s1 + $0x228] sm:$0xff]  ;;  %871 = vmatprep.subr.mxu1 %v709_v14  ;;  %v691_v24 = vld [vmem:[%s1317_s1 + $0x200] sm:$0xff] }
   0x5   :  { %v906_v8 = vpack.i.bf16 %v713_v2, %v745_v3  ;;  %v908_v9 = vpack.i.bf16 %v714_v4, %v746_v5  ;;  %v910_v18 = vpack.i.bf16 %v717_v10, %v749_v11  ;;  %793 = vmatpush3.msra.mxu0 %v693_v15  ;;  %v776_v22 = vld [vmem:[%s1316_s0 + $0x10] sm:$0xff]   ;;  %887 = vmatpush3.msra.mxu1 %v693_v15  ;;  %v706_v25 = vld [vmem:[%s1317_s1 + $0x458] sm:$0xff]  ;;  %v704_v32 = vld [vmem:[%s1317_s1 + $0x408] sm:$0xff] }
   0x6   :  { %v784_v23 = vld [vmem:[%s1316_s0 + $0x50] sm:$0xff]   ;;  %794 = vmatprep.subr.mxu0 %v708_v16  ;;  %872 = vmatprep.subr.mxu1 %v708_v16  ;;  %v690_v26 = vld [vmem:[%s1317_s1 + $0x1d8] sm:$0xff]  ;;  %v912_v27 = vpack.i.bf16 %v718_v19, %v750_v20  ;;  %v721_v28 = vunpack.c.l.bf16 %v776_v22  ;;  %v688_v33 = vld [vmem:[%s1317_s1 + $0x188] sm:$0xff] }
   0x7   :  { %907 = vxpose.xlu0.b32.start [1/16] %v906_v8, 128  ;;  %795 = vmatpush3.msra.mxu0 %v692_v17  ;;  %v753_v29 = vunpack.c.l.bf16 %v784_v23  ;;  %v705_v30 = vld [vmem:[%s1317_s1 + $0x430] sm:$0xff] }
   0x8   :  { %796 = vmatprep.subr.mxu0 %v707_v21  ;;  %888 = vmatpush3.msra.mxu1 %v692_v17  ;;  %v689_v31 = vld [vmem:[%s1317_s1 + $0x1b0] sm:$0xff] }
   0x9   :  { %797 = vmatpush3.msra.mxu0 %v691_v24  ;;  %873 = vmatprep.subr.mxu1 %v707_v21 }
   0xa   :  { %798 = vmatprep.subr.mxu0 %v706_v25  ;;  %889 = vmatpush3.msra.mxu1 %v691_v24 }
   0xb   :  { %909 = vxpose.xlu0.b32.cont [2/16] %v908_v9, 128  ;;  %799 = vmatpush3.msra.mxu0 %v690_v26 }
   0xc   :  { %800 = vmatprep.subr.mxu0 %v705_v30  ;;  %874 = vmatprep.subr.mxu1 %v706_v25 }
   0xf   :  { %911 = vxpose.xlu0.b32.cont [3/16] %v910_v18, 128 }
  0x10   :  { %9 = vsyncpa [#allocation4], 0  ;;  %v914_v34 = vpack.i.bf16 %v721_v28, %v753_v29  ;;  %v722_v35 = vunpack.c.h.bf16 %v776_v22  ;;  %v754_v36 = vunpack.c.h.bf16 %v784_v23  ;;  %801 = vmatpush3.msra.mxu0 %v689_v31  ;;  %v703_v37 = vld [vmem:[%s1317_s1 + $0x3e0] sm:$0xff]  ;;  %v777_v38 = vld [vmem:[%s1316_s0 + $0x18] sm:$0xff]   ;;  %890 = vmatpush3.msra.mxu1 %v690_v26  ;;  %v1042_v49 = vmov 0   ;;  %s1043_s12 = smov [#allocation3]  }
  0x11   :  { %v785_v39 = vld [vmem:[%s1316_s0 + $0x58] sm:$0xff]   ;;  %802 = vmatprep.subr.mxu0 %v704_v32  ;;  %v687_v40 = vld [vmem:[%s1317_s1 + $0x160] sm:$0xff]  ;;  %875 = vmatprep.subr.mxu1 %v705_v30  ;;  %v725_v44 = vunpack.c.l.bf16 %v777_v38  ;;  %v701_v46 = vld [vmem:[%s1317_s1 + $0x390] sm:$0xff]  ;;  %v726_v53 = vunpack.c.h.bf16 %v777_v38  ;;  %s664_s13 = sshll.u32 %s1043_s12, 4  ;;  %s665_s13 = int_to_ptr.vmem [resolvable:$true] %s664_s13 }
  0x12   :  { %803 = vmatpush3.msra.mxu0 %v688_v33  ;;  %v702_v41 = vld [vmem:[%s1317_s1 + $0x3b8] sm:$0xff]  ;;  %891 = vmatpush3.msra.mxu1 %v689_v31  ;;  %v916_v43 = vpack.i.bf16 %v722_v35, %v754_v36  ;;  %v757_v45 = vunpack.c.l.bf16 %v785_v39  ;;  %v499_v47 = vld [vmem:[%s1318_s2] sm:$0xff]  ;;  %v685_v48 = vld [vmem:[%s1317_s1 + $0x110] sm:$0xff]  ;;  %v758_v54 = vunpack.c.h.bf16 %v785_v39  ;;  %s1020_s14 = scalar_lea.vmem %s665_s13, 2048  ;;  %p1025_p1 = scmp.lt.s32.totalorder %s665_s13, %s665_s13 }
  0x13   :  { %913 = vxpose.xlu0.b32.cont [4/16] %v912_v27, 128  ;;  %804 = vmatprep.subr.mxu0 %v703_v37  ;;  %v686_v42 = vld [vmem:[%s1317_s1 + $0x138] sm:$0xff]  ;;  %v700_v50 = vld [vmem:[%s1317_s1 + $0x368] sm:$0xff]  ;;  %v699_v55 = vld [vmem:[%s1317_s1 + $0x340] sm:$0xff]  ;;  %p1021_p0 = scmp.ne.s32.totalorder %s665_s13, %s1020_s14  ;;  %p1026_p2 = scmp.lt.s32.totalorder %s1020_s14, %s1020_s14 }
  0x14   :  { %805 = vmatpush3.msra.mxu0 %v687_v40  ;;  %1018 = vset.pattern.permute.xlu1 %v1042_v49  ;;  %v684_v51 = vld [vmem:[%s1317_s1 + $0xe8] sm:$0xff]  ;;  %v918_v52 = vpack.i.bf16 %v725_v44, %v757_v45  ;;  %v778_v56 = vld [vmem:[%s1316_s0 + $0x20] sm:$0xff]   ;;  %v698_v59 = vld [vmem:[%s1317_s1 + $0x318] sm:$0xff]  ;;  %v920_v62 = vpack.i.bf16 %v726_v53, %v758_v54 }
  0x15   :  { %806 = vmatprep.subr.mxu0 %v702_v41  ;;  %876 = vmatprep.subr.mxu1 %v704_v32  ;;  %v786_v57 = vld [vmem:[%s1316_s0 + $0x60] sm:$0xff]   ;;  %v682_v60 = vld [vmem:[%s1317_s1 + $0x98] sm:$0xff]  ;;  %v500_v61 = vld [vmem:[%s1318_s2 + $0x8] sm:$0xff]  ;;  %v729_v63 = vunpack.c.l.bf16 %v778_v56  ;;  %v730_v6 = vunpack.c.h.bf16 %v778_v56  ;;  %p1027_p3 = por %p1026_p2, %p1025_p1 }
  0x16   :  { %807 = vmatpush3.msra.mxu0 %v686_v42  ;;  %517 = vperm.xlu1 %1018, %v499_v47   ;;  %v683_v58 = vld [vmem:[%s1317_s1 + $0xc0] sm:$0xff]  ;;  %v761_v0 = vunpack.c.l.bf16 %v786_v57  ;;  %v697_v1 = vld [vmem:[%s1317_s1 + $0x2f0] sm:$0xff]  ;;  %v696_v3 = vld [vmem:[%s1317_s1 + $0x2c8] sm:$0xff]  ;;  %v762_v7 = vunpack.c.h.bf16 %v786_v57 }
  0x17   :  { %915 = vxpose.xlu0.b32.cont [5/16] %v914_v34, 128  ;;  %808 = vmatprep.subr.mxu0 %v701_v46  ;;  %v681_v2 = vld [vmem:[%s1317_s1 + $0x70] sm:$0xff]  ;;  %v680_v4 = vld [vmem:[%s1317_s1 + $0x48] sm:$0xff]  ;;  %v695_v8 = vld [vmem:[%s1317_s1 + $0x2a0] sm:$0xff]  ;;  %p1028_p4 = pnand %p1027_p3, %p1021_p0 }
  0x18   :  { %809 = vmatpush3.msra.mxu0 %v685_v48  ;;  %892 = vmatpush3.msra.mxu1 %v688_v33  ;;  %v922_v5 = vpack.i.bf16 %v729_v63, %v761_v0  ;;  %v779_v9 = vld [vmem:[%s1316_s0 + $0x28] sm:$0xff]   ;;  %v679_v11 = vld [vmem:[%s1317_s1 + $0x20] sm:$0xff]  ;;  %v501_v12 = vld [vmem:[%s1318_s2 + $0x10] sm:$0xff]  ;;  %v924_v13 = vpack.i.bf16 %v730_v6, %v762_v7 }
  0x19   :  { %810 = vmatprep.subr.mxu0 %v700_v50  ;;  %877 = vmatprep.subr.mxu1 %v703_v37  ;;  %v787_v10 = vld [vmem:[%s1316_s0 + $0x68] sm:$0xff]   ;;  %v733_v14 = vunpack.c.l.bf16 %v779_v9  ;;  %v502_v16 = vld [vmem:[%s1318_s2 + $0x18] sm:$0xff]  ;;  %v734_v18 = vunpack.c.h.bf16 %v779_v9  ;;  %v780_v20 = vld [vmem:[%s1316_s0 + $0x30] sm:$0xff]  }
  0x1a   :  { %811 = vmatpush3.msra.mxu0 %v684_v51  ;;  %893 = vmatpush3.msra.mxu1 %v687_v40  ;;  %v765_v15 = vunpack.c.l.bf16 %v787_v10  ;;  %v766_v19 = vunpack.c.h.bf16 %v787_v10  ;;  %v788_v21 = vld [vmem:[%s1316_s0 + $0x70] sm:$0xff]   ;;  %v503_v22 = vld [vmem:[%s1318_s2 + $0x20] sm:$0xff]  ;;  %v737_v24 = vunpack.c.l.bf16 %v780_v20  ;;  %v504_v26 = vld [vmem:[%s1318_s2 + $0x28] sm:$0xff]  ;;  %v738_v28 = vunpack.c.h.bf16 %v780_v20 }
  0x1b   :  { %917 = vxpose.xlu0.b32.cont [6/16] %v916_v43, 128  ;;  %812 = vmatprep.subr.mxu0 %v699_v55  ;;  %v769_v25 = vunpack.c.l.bf16 %v788_v21  ;;  %v770_v29 = vunpack.c.h.bf16 %v788_v21  ;;  %v781_v30 = vld [vmem:[%s1316_s0 + $0x38] sm:$0xff]   ;;  %v505_v32 = vld [vmem:[%s1318_s2 + $0x30] sm:$0xff]  ;;  %v507_v40 = vld [vmem:[%s1318_s2 + $0x40] sm:$0xff] }
  0x1c   :  { %813 = vmatpush3.msra.mxu0 %v683_v58  ;;  %878 = vmatprep.subr.mxu1 %v702_v41  ;;  %v926_v17 = vpack.i.bf16 %v733_v14, %v765_v15  ;;  %v928_v23 = vpack.i.bf16 %v734_v18, %v766_v19  ;;  %v789_v31 = vld [vmem:[%s1316_s0 + $0x78] sm:$0xff]   ;;  %v741_v34 = vunpack.c.l.bf16 %v781_v30  ;;  %v742_v38 = vunpack.c.h.bf16 %v781_v30  ;;  %v509_v43 = vld [vmem:[%s1318_s2 + $0x50] sm:$0xff]  ;;  %v511_v45 = vld [vmem:[%s1318_s2 + $0x60] sm:$0xff] }
  0x1d   :  { %814 = vmatprep.subr.mxu0 %v698_v59  ;;  %522 = vperm.xlu1 %1018, %v500_v61   ;;  %v930_v27 = vpack.i.bf16 %v737_v24, %v769_v25  ;;  %v932_v33 = vpack.i.bf16 %v738_v28, %v770_v29  ;;  %v773_v35 = vunpack.c.l.bf16 %v789_v31  ;;  %v506_v36 = vld [vmem:[%s1318_s2 + $0x38] sm:$0xff]  ;;  %v774_v39 = vunpack.c.h.bf16 %v789_v31  ;;  %v513_v47 = vld [vmem:[%s1318_s2 + $0x70] sm:$0xff] }
  0x1e   :  { %815 = vmatpush3.msra.mxu0 %v682_v60  ;;  %894 = vmatpush3.msra.mxu1 %v686_v42  ;;  %v508_v42 = vld [vmem:[%s1318_s2 + $0x48] sm:$0xff]  ;;  %v510_v44 = vld [vmem:[%s1318_s2 + $0x58] sm:$0xff] }
  0x1f   :  { %919 = vxpose.xlu0.b32.cont [7/16] %v918_v52, 128  ;;  %816 = vmatprep.subr.mxu0 %v697_v1  ;;  %v934_v37 = vpack.i.bf16 %v741_v34, %v773_v35  ;;  %v936_v41 = vpack.i.bf16 %v742_v38, %v774_v39 }
  0x20   :  { %817 = vmatpush3.msra.mxu0 %v681_v2  ;;  %879 = vmatprep.subr.mxu1 %v701_v46  ;;  %v512_v46 = vld [vmem:[%s1318_s2 + $0x68] sm:$0xff] }
  0x21   :  { %818 = vmatprep.subr.mxu0 %v696_v3  ;;  %895 = vmatpush3.msra.mxu1 %v685_v48  ;;  %v514_v48 = vld [vmem:[%s1318_s2 + $0x78] sm:$0xff] }
  0x22   :  { %819 = vmatpush3.msra.mxu0 %v680_v4  ;;  %880 = vmatprep.subr.mxu1 %v700_v50 }
  0x23   :  { %921 = vxpose.xlu0.b32.cont [8/16] %v920_v62, 128  ;;  %820 = vmatprep.subr.mxu0 %v695_v8 }
  0x24   :  { %821 = vmatpush3.msra.mxu0 %v679_v11  ;;  %527 = vperm.xlu1 %1018, %v501_v12  }
  0x25   :  { %896 = vmatpush3.msra.mxu1 %v684_v51 }
  0x26   :  { %881 = vmatprep.subr.mxu1 %v699_v55 }
  0x27   :  { %923 = vxpose.xlu0.b32.cont [9/16] %v922_v5, 128  ;;  %897 = vmatpush3.msra.mxu1 %v683_v58 }
  0x28   :  { %882 = vmatprep.subr.mxu1 %v698_v59  ;;  %532 = vperm.xlu1 %1018, %v502_v16  }
  0x29   :  { %898 = vmatpush3.msra.mxu1 %v682_v60 }
  0x2a   :  { %883 = vmatprep.subr.mxu1 %v697_v1 }
  0x2b   :  { %925 = vxpose.xlu0.b32.cont [10/16] %v924_v13, 128  ;;  %899 = vmatpush3.msra.mxu1 %v681_v2 }
  0x2c   :  { %884 = vmatprep.subr.mxu1 %v696_v3  ;;  %537 = vperm.xlu1 %1018, %v503_v22  }
  0x2d   :  { %900 = vmatpush3.msra.mxu1 %v680_v4 }
  0x2e   :  { %885 = vmatprep.subr.mxu1 %v695_v8 }
  0x2f   :  { %927 = vxpose.xlu0.b32.cont [11/16] %v926_v17, 128  ;;  %901 = vmatpush3.msra.mxu1 %v679_v11 }
  0x30   :  { %542 = vperm.xlu1 %1018, %v504_v26  }
  0x33   :  { %929 = vxpose.xlu0.b32.cont [12/16] %v928_v23, 128 }
  0x34   :  { %547 = vperm.xlu1 %1018, %v505_v32  }
  0x37   :  { %931 = vxpose.xlu0.b32.cont [13/16] %v930_v27, 128 }
  0x38   :  { %552 = vperm.xlu1 %1018, %v506_v36  }
  0x3b   :  { %933 = vxpose.xlu0.b32.cont [14/16] %v932_v33, 128 }
  0x3c   :  { %557 = vperm.xlu1 %1018, %v507_v40  }
  0x3f   :  { %935 = vxpose.xlu0.b32.cont [15/16] %v934_v37, 128 }
  0x40   :  { %562 = vperm.xlu1 %1018, %v508_v42   ;;  %v178_v42 = vld [vmem:[%s1319_s3] sm:$0xff] }
  0x43   :  { %937 = vxpose.xlu0.b32.end [16/16] %v936_v41, 128 }
  0x44   :  { %567 = vperm.xlu1 %1018, %v509_v43  }
  0x48   :  { %572 = vperm.xlu1 %1018, %v510_v44  }
  0x4c   :  { %577 = vperm.xlu1 %1018, %v511_v45  }
  0x50   :  { %582 = vperm.xlu1 %1018, %v512_v46  }
  0x54   :  { %587 = vperm.xlu1 %1018, %v513_v47  }
  0x58   :  { %592 = vperm.xlu1 %1018, %v514_v48   ;;  %v179_v48 = vld [vmem:[%s1319_s3 + $0x8] sm:$0xff] }
  0x6c   :  { %1019 = vset.pattern.permute.xlu0 %v1042_v49 }
  0x83   :  { %v938_v50 = vpop.trf.xlu0 }
  0x84   :  { %v939_v51 = vunpack.i.l.bf16 %v938_v50  ;;  %v942_v52 = vunpack.i.h.bf16 %v938_v50 }
  0x86   :  { %418 = vmatprep.mubr.f32.mxu0 %v939_v51 }
  0x87   :  { %v943_v53 = vpop.trf.xlu0  ;;  %419 = vmatmul.mubr.f32.vlgmr.msra.gmra.mxu0 %v942_v52 }
  0x88   :  { %v944_v54 = vunpack.i.l.bf16 %v943_v53  ;;  %v947_v55 = vunpack.i.h.bf16 %v943_v53 }
  0x8a   :  { %423 = vmatprep.mubr.f32.mxu0 %v944_v54 }
  0x8b   :  { %v948_v56 = vpop.trf.xlu0  ;;  %424 = vmatmul.mubr.f32.gmra.mxu0 %v947_v55 }
  0x8c   :  { %v949_v57 = vunpack.i.l.bf16 %v948_v56  ;;  %v952_v58 = vunpack.i.h.bf16 %v948_v56 }
  0x8e   :  { %428 = vmatprep.mubr.f32.mxu0 %v949_v57  ;;  %v180_v57 = vld [vmem:[%s1319_s3 + $0x10] sm:$0xff] }
  0x8f   :  { %v953_v59 = vpop.trf.xlu0  ;;  %429 = vmatmul.mubr.f32.gmra.mxu0 %v952_v58 }
  0x90   :  { %v954_v60 = vunpack.i.l.bf16 %v953_v59  ;;  %v957_v61 = vunpack.i.h.bf16 %v953_v59 }
  0x91   :  { %v518_v33 = vpop.permute.xlu1 %517 }
  0x92   :  { %433 = vmatprep.mubr.f32.mxu0 %v954_v60 }
  0x93   :  { %v958_v49 = vpop.trf.xlu0  ;;  %434 = vmatmul.mubr.f32.gmra.mxu0 %v957_v61 }
  0x94   :  { %v959_v62 = vunpack.i.l.bf16 %v958_v49  ;;  %v962_v63 = vunpack.i.h.bf16 %v958_v49 }
  0x96   :  { %438 = vmatprep.mubr.f32.mxu0 %v959_v62 }
  0x97   :  { %v963_v0 = vpop.trf.xlu0  ;;  %439 = vmatmul.mubr.f32.gmra.mxu0 %v962_v63 }
  0x98   :  { %v964_v1 = vunpack.i.l.bf16 %v963_v0  ;;  %v967_v2 = vunpack.i.h.bf16 %v963_v0  ;;  %v523_v34 = vpop.permute.xlu1 %522  ;;  %v181_v0 = vld [vmem:[%s1319_s3 + $0x18] sm:$0xff] }
  0x9a   :  { %443 = vmatprep.mubr.f32.mxu0 %v964_v1 }
  0x9b   :  { %v968_v3 = vpop.trf.xlu0  ;;  %444 = vmatmul.mubr.f32.gmra.mxu0 %v967_v2 }
  0x9c   :  { %v969_v4 = vunpack.i.l.bf16 %v968_v3  ;;  %v972_v5 = vunpack.i.h.bf16 %v968_v3 }
  0x9e   :  { %448 = vmatprep.mubr.f32.mxu0 %v969_v4 }
  0x9f   :  { %v973_v6 = vpop.trf.xlu0  ;;  %449 = vmatmul.mubr.f32.gmra.mxu0 %v972_v5  ;;  %v528_v35 = vpop.permute.xlu1 %527 }
  0xa0   :  { %v974_v7 = vunpack.i.l.bf16 %v973_v6  ;;  %v977_v8 = vunpack.i.h.bf16 %v973_v6 }
  0xa2   :  { %453 = vmatprep.mubr.f32.mxu0 %v974_v7  ;;  %v182_v7 = vld [vmem:[%s1319_s3 + $0x20] sm:$0xff] }
  0xa3   :  { %v978_v9 = vpop.trf.xlu0  ;;  %454 = vmatmul.mubr.f32.gmra.mxu0 %v977_v8  ;;  %v533_v36 = vpop.permute.xlu1 %532 }
  0xa4   :  { %v979_v10 = vunpack.i.l.bf16 %v978_v9  ;;  %v982_v11 = vunpack.i.h.bf16 %v978_v9 }
  0xa6   :  { %458 = vmatprep.mubr.f32.mxu1 %v979_v10 }
  0xa7   :  { %v983_v12 = vpop.trf.xlu0  ;;  %459 = vmatmul.mubr.f32.vlgmr.msra.gmra.mxu1 %v982_v11  ;;  %v538_v37 = vpop.permute.xlu1 %537 }
  0xa8   :  { %v984_v13 = vunpack.i.l.bf16 %v983_v12  ;;  %v987_v14 = vunpack.i.h.bf16 %v983_v12 }
  0xaa   :  { %463 = vmatprep.mubr.f32.mxu1 %v984_v13 }
  0xab   :  { %v988_v15 = vpop.trf.xlu0  ;;  %464 = vmatmul.mubr.f32.gmra.mxu1 %v987_v14  ;;  %v543_v41 = vpop.permute.xlu1 %542 }
  0xac   :  { %v989_v16 = vunpack.i.l.bf16 %v988_v15  ;;  %v992_v17 = vunpack.i.h.bf16 %v988_v15  ;;  %v183_v15 = vld [vmem:[%s1319_s3 + $0x28] sm:$0xff] }
  0xae   :  { %468 = vmatprep.mubr.f32.mxu1 %v989_v16 }
  0xaf   :  { %v993_v18 = vpop.trf.xlu0  ;;  %469 = vmatmul.mubr.f32.gmra.mxu1 %v992_v17  ;;  %v548_v53 = vpop.permute.xlu1 %547 }
  0xb0   :  { %v994_v19 = vunpack.i.l.bf16 %v993_v18  ;;  %v997_v20 = vunpack.i.h.bf16 %v993_v18 }
  0xb2   :  { %473 = vmatprep.mubr.f32.mxu1 %v994_v19 }
  0xb3   :  { %v998_v21 = vpop.trf.xlu0  ;;  %474 = vmatmul.mubr.f32.gmra.mxu1 %v997_v20  ;;  %v553_v63 = vpop.permute.xlu1 %552 }
  0xb4   :  { %v999_v22 = vunpack.i.l.bf16 %v998_v21  ;;  %v1002_v23 = vunpack.i.h.bf16 %v998_v21 }
  0xb6   :  { %478 = vmatprep.mubr.f32.mxu1 %v999_v22 }
  0xb7   :  { %v1003_v24 = vpop.trf.xlu0  ;;  %479 = vmatmul.mubr.f32.gmra.mxu1 %v1002_v23  ;;  %v558_v11 = vpop.permute.xlu1 %557  ;;  %v184_v23 = vld [vmem:[%s1319_s3 + $0x30] sm:$0xff] }
  0xb8   :  { %v1004_v25 = vunpack.i.l.bf16 %v1003_v24  ;;  %v1007_v26 = vunpack.i.h.bf16 %v1003_v24 }
  0xba   :  { %483 = vmatprep.mubr.f32.mxu1 %v1004_v25 }
  0xbb   :  { %v1008_v27 = vpop.trf.xlu0  ;;  %484 = vmatmul.mubr.f32.gmra.mxu1 %v1007_v26  ;;  %v563_v22 = vpop.permute.xlu1 %562 }
  0xbc   :  { %v1009_v28 = vunpack.i.l.bf16 %v1008_v27  ;;  %v1012_v29 = vunpack.i.h.bf16 %v1008_v27 }
  0xbe   :  { %488 = vmatprep.mubr.f32.mxu1 %v1009_v28 }
  0xbf   :  { %v1013_v30 = vpop.trf.xlu0  ;;  %489 = vmatmul.mubr.f32.gmra.mxu1 %v1012_v29 }
  0xc0   :  { %v1017_v31 = vunpack.i.h.bf16 %v1013_v30  ;;  %v1014_v32 = vunpack.i.l.bf16 %v1013_v30  ;;  %v185_v30 = vld [vmem:[%s1319_s3 + $0x38] sm:$0xff] }
  0xc2   :  { %493 = vmatprep.mubr.f32.mxu1 %v1014_v32 }
  0xc3   :  { %494 = vmatmul.mubr.f32.gmra.mxu1 %v1017_v31 }
 0x147   :  { %v822_v38 = vpop.f32.mrf.mxu0 }
 0x149   :  { %v823_v39 = vpop.f32.mrf.mxu0 }
 0x14a   :  { %v824_v40 = vadd.f32 %v823_v39, %v822_v38  ;;  %v186_v38 = vld [vmem:[%s1319_s3 + $0x40] sm:$0xff] }
 0x14b   :  { %v825_v43 = vpop.f32.mrf.mxu0 }
 0x14c   :  { %v595_v44 = vmul.f32 %v824_v40, %v518_v33 }
 0x14d   :  { %v826_v45 = vpop.f32.mrf.mxu0 }
 0x14e   :  { %v611_v46 = vadd.f32 %v595_v44, %v178_v42  ;;  %v827_v47 = vadd.f32 %v826_v45, %v825_v43 }
 0x14f   :  { %v828_v50 = vpop.f32.mrf.mxu0 }
 0x150   :  { %v627_v51 = vmul.f32 0.5, %v611_v46  ;;  %v596_v52 = vmul.f32 %v827_v47, %v523_v34  ;;  %v568_v34 = vpop.permute.xlu1 %567  ;;  %v187_v46 = vld [vmem:[%s1319_s3 + $0x48] sm:$0xff] }
 0x151   :  { %v829_v54 = vpop.f32.mrf.mxu0 }
 0x152   :  { %643 = vst [vmem:[#allocation3] sm:$0xff] %v627_v51  ;;  %v612_v55 = vadd.f32 %v596_v52, %v179_v48  ;;  %v830_v56 = vadd.f32 %v829_v54, %v828_v50  ;;  %v188_v54 = vld [vmem:[%s1319_s3 + $0x50] sm:$0xff] }
 0x153   :  { %v831_v58 = vpop.f32.mrf.mxu0 }
 0x154   :  { %v628_v59 = vmul.f32 0.5, %v612_v55  ;;  %v597_v60 = vmul.f32 %v830_v56, %v528_v35  ;;  %v573_v45 = vpop.permute.xlu1 %572 }
 0x155   :  { %v832_v61 = vpop.f32.mrf.mxu0 }
 0x156   :  { %644 = vst [vmem:[#allocation3 + $0x8] sm:$0xff] %v628_v59  ;;  %v613_v49 = vadd.f32 %v597_v60, %v180_v57  ;;  %v833_v62 = vadd.f32 %v832_v61, %v831_v58 }
 0x157   :  { %v834_v1 = vpop.f32.mrf.mxu0 }
 0x158   :  { %v629_v2 = vmul.f32 0.5, %v613_v49  ;;  %v598_v3 = vmul.f32 %v833_v62, %v533_v36  ;;  %v578_v58 = vpop.permute.xlu1 %577  ;;  %v189_v49 = vld [vmem:[%s1319_s3 + $0x58] sm:$0xff] }
 0x159   :  { %v835_v4 = vpop.f32.mrf.mxu0 }
 0x15a   :  { %645 = vst [vmem:[#allocation3 + $0x10] sm:$0xff] %v629_v2  ;;  %v614_v5 = vadd.f32 %v598_v3, %v181_v0  ;;  %v836_v6 = vadd.f32 %v835_v4, %v834_v1 }
 0x15b   :  { %v837_v8 = vpop.f32.mrf.mxu0 }
 0x15c   :  { %v630_v9 = vmul.f32 0.5, %v614_v5  ;;  %v599_v10 = vmul.f32 %v836_v6, %v538_v37  ;;  %v583_v4 = vpop.permute.xlu1 %582  ;;  %v190_v5 = vld [vmem:[%s1319_s3 + $0x60] sm:$0xff] }
 0x15d   :  { %v838_v12 = vpop.f32.mrf.mxu0 }
 0x15e   :  { %646 = vst [vmem:[#allocation3 + $0x18] sm:$0xff] %v630_v9  ;;  %v615_v13 = vadd.f32 %v599_v10, %v182_v7  ;;  %v839_v14 = vadd.f32 %v838_v12, %v837_v8  ;;  %v191_v12 = vld [vmem:[%s1319_s3 + $0x68] sm:$0xff] }
 0x15f   :  { %v840_v16 = vpop.f32.mrf.mxu0 }
 0x160   :  { %v631_v17 = vmul.f32 0.5, %v615_v13  ;;  %v600_v18 = vmul.f32 %v839_v14, %v543_v41 }
 0x161   :  { %v841_v19 = vpop.f32.mrf.mxu0 }
 0x162   :  { %647 = vst [vmem:[#allocation3 + $0x20] sm:$0xff] %v631_v17  ;;  %v616_v20 = vadd.f32 %v600_v18, %v183_v15  ;;  %v842_v21 = vadd.f32 %v841_v19, %v840_v16  ;;  %v588_v16 = vpop.permute.xlu1 %587 }
 0x163   :  { %v843_v24 = vpop.f32.mrf.mxu0 }
 0x164   :  { %v632_v25 = vmul.f32 0.5, %v616_v20  ;;  %v601_v26 = vmul.f32 %v842_v21, %v548_v53  ;;  %v192_v20 = vld [vmem:[%s1319_s3 + $0x70] sm:$0xff] }
 0x165   :  { %v844_v27 = vpop.f32.mrf.mxu0 }
 0x166   :  { %648 = vst [vmem:[#allocation3 + $0x28] sm:$0xff] %v632_v25  ;;  %v617_v28 = vadd.f32 %v601_v26, %v184_v23  ;;  %v845_v29 = vadd.f32 %v844_v27, %v843_v24  ;;  %v593_v27 = vpop.permute.xlu1 %592 }
 0x167   :  { %v846_v31 = vpop.f32.mrf.mxu1 }
 0x168   :  { %v633_v32 = vmul.f32 0.5, %v617_v28  ;;  %v602_v33 = vmul.f32 %v845_v29, %v553_v63  ;;  %v193_v28 = vld [vmem:[%s1319_s3 + $0x78] sm:$0xff] }
 0x169   :  { %v847_v35 = vpop.f32.mrf.mxu1 }
 0x16a   :  { %649 = vst [vmem:[#allocation3 + $0x30] sm:$0xff] %v633_v32  ;;  %v618_v36 = vadd.f32 %v602_v33, %v185_v30  ;;  %v848_v37 = vadd.f32 %v847_v35, %v846_v31 }
 0x16b   :  { %v849_v39 = vpop.f32.mrf.mxu1 }
 0x16c   :  { %v634_v40 = vmul.f32 0.5, %v618_v36  ;;  %v603_v41 = vmul.f32 %v848_v37, %v558_v11 }
 0x16d   :  { %v850_v42 = vpop.f32.mrf.mxu1 }
 0x16e   :  { %650 = vst [vmem:[#allocation3 + $0x38] sm:$0xff] %v634_v40  ;;  %v619_v43 = vadd.f32 %v603_v41, %v186_v38  ;;  %v851_v44 = vadd.f32 %v850_v42, %v849_v39 }
 0x16f   :  { %v852_v47 = vpop.f32.mrf.mxu1 }
 0x170   :  { %v635_v48 = vmul.f32 0.5, %v619_v43  ;;  %v604_v50 = vmul.f32 %v851_v44, %v563_v22 }
 0x171   :  { %v853_v51 = vpop.f32.mrf.mxu1 }
 0x172   :  { %651 = vst [vmem:[#allocation3 + $0x40] sm:$0xff] %v635_v48  ;;  %v620_v52 = vadd.f32 %v604_v50, %v187_v46  ;;  %v854_v53 = vadd.f32 %v853_v51, %v852_v47 }
 0x173   :  { %v855_v55 = vpop.f32.mrf.mxu1 }
 0x174   :  { %v636_v56 = vmul.f32 0.5, %v620_v52  ;;  %v605_v57 = vmul.f32 %v854_v53, %v568_v34 }
 0x175   :  { %v856_v59 = vpop.f32.mrf.mxu1 }
 0x176   :  { %652 = vst [vmem:[#allocation3 + $0x48] sm:$0xff] %v636_v56  ;;  %v621_v60 = vadd.f32 %v605_v57, %v188_v54  ;;  %v857_v61 = vadd.f32 %v856_v59, %v855_v55 }
 0x177   :  { %v858_v62 = vpop.f32.mrf.mxu1 }
 0x178   :  { %v637_v63 = vmul.f32 0.5, %v621_v60  ;;  %v606_v0 = vmul.f32 %v857_v61, %v573_v45 }
 0x179   :  { %v859_v1 = vpop.f32.mrf.mxu1 }
 0x17a   :  { %653 = vst [vmem:[#allocation3 + $0x50] sm:$0xff] %v637_v63  ;;  %v622_v2 = vadd.f32 %v606_v0, %v189_v49  ;;  %v860_v3 = vadd.f32 %v859_v1, %v858_v62 }
 0x17b   :  { %v861_v6 = vpop.f32.mrf.mxu1 }
 0x17c   :  { %v638_v7 = vmul.f32 0.5, %v622_v2  ;;  %v607_v8 = vmul.f32 %v860_v3, %v578_v58 }
 0x17d   :  { %v862_v9 = vpop.f32.mrf.mxu1 }
 0x17e   :  { %654 = vst [vmem:[#allocation3 + $0x58] sm:$0xff] %v638_v7  ;;  %v623_v10 = vadd.f32 %v607_v8, %v190_v5  ;;  %v863_v11 = vadd.f32 %v862_v9, %v861_v6 }
 0x17f   :  { %v864_v13 = vpop.f32.mrf.mxu1 }
 0x180   :  { %v639_v14 = vmul.f32 0.5, %v623_v10  ;;  %v608_v15 = vmul.f32 %v863_v11, %v583_v4 }
 0x181   :  { %v865_v17 = vpop.f32.mrf.mxu1 }
 0x182   :  { %655 = vst [vmem:[#allocation3 + $0x60] sm:$0xff] %v639_v14  ;;  %v624_v18 = vadd.f32 %v608_v15, %v191_v12  ;;  %v866_v19 = vadd.f32 %v865_v17, %v864_v13 }
 0x183   :  { %v867_v21 = vpop.f32.mrf.mxu1 }
 0x184   :  { %v640_v22 = vmul.f32 0.5, %v624_v18  ;;  %v609_v23 = vmul.f32 %v866_v19, %v588_v16 }
 0x185   :  { %v868_v24 = vpop.f32.mrf.mxu1 }
 0x186   :  { %656 = vst [vmem:[#allocation3 + $0x68] sm:$0xff] %v640_v22  ;;  %v625_v25 = vadd.f32 %v609_v23, %v192_v20  ;;  %v869_v26 = vadd.f32 %v868_v24, %v867_v21 }
 0x188   :  { %v641_v29 = vmul.f32 0.5, %v625_v25  ;;  %v610_v30 = vmul.f32 %v869_v26, %v593_v27 }
 0x18a   :  { %657 = vst [vmem:[#allocation3 + $0x70] sm:$0xff] %v641_v29  ;;  %v626_v31 = vadd.f32 %v610_v30, %v193_v28 }
 0x18c   :  { %v642_v32 = vmul.f32 0.5, %v626_v31 }
 0x18e   :  { %658 = vst [vmem:[#allocation3 + $0x78] sm:$0xff] %v642_v32 }
 0x18f   :  { %1031 = shalt.err (!%p1028_p4)
}
 0x190   :  { %s1044_s15 = smov 128   ;;  %s1045_s16 = smov 8  }
 0x191   :  { %670 = dma.vmem_to_hbm [thread:$0]  %s665_s13, 2048, %s1320_s4, [#allocation4], %s1044_s15, %s1044_s15, %s1045_s16  }
 0x192   :  { %1040 = dma.done.wait [#allocation4], 2048  }
 0x193   :  { %1041 = vsyncadd [#allocation4], 4294965248 }
 0x194   :  { %674 = vsyncpa [#allocation4], 1 }

// kernel: nv_encoder_forward.13
= control target key start
LH: loop header
LB: loop body
LE: loop exit
PB: predicated region body
PF: predicated region fallthrough
CT: control target
= control target key end

     0   :  { %15 = vsyncpa [#allocation8], 0  ;;  %s5909_s0 = inlined_call_operand.vmem [shape: bf16[384,384], index: 0, kind: input, shape index: {}]   ;;  %s5910_s1 = inlined_call_operand.vmem [shape: f32[384,384], index: 1, kind: input, shape index: {}]   ;;  %s5911_s2 = inlined_call_operand.vmem [shape: bf16[384,128], index: 2, kind: input, shape index: {}]   ;;  %s5912_s3 = inlined_call_operand.vmem [shape: bf16[256,384], index: 3, kind: input, shape index: {}]   ;;  %s5913_s4 = inlined_call_operand.vmem [shape: f32[384,512], index: 4, kind: input, shape index: {}, may-alias: {4,5}]   ;;  %s5914_s5 = inlined_call_operand.vmem [shape: f32[384,512], index: 5, kind: input, shape index: {}, may-alias: {4,5}]   ;;  %s5915_s6 = inlined_call_operand.vmem [shape: f32[128,256], index: 6, kind: input, shape index: {}]   ;;  %s5916_s7 = inlined_call_operand.vmem [shape: f32[256,640], index: 7, kind: input, shape index: {}]   ;;  %s5917_s8 = inlined_call_operand.vmem [shape: f32[384,4], index: 8, kind: input, shape index: {}]   ;;  %s5918_s9 = inlined_call_operand.vmem [shape: f32[384,128], index: 9, kind: input, shape index: {}]   ;;  %s5919_s10 = inlined_call_operand.hbm [shape: f32[384,128], index: 10, kind: output, shape index: {}]  }
   0x1   :  { %17 = vsyncpa [#allocation8 + $0x1], 0  ;;  %s4435_s13 = smov 0   ;;  %s4437_s14 = smov 0  }
   0x2   :  { %s4439_s15 = smov 0   ;;  %s4441_s16 = smov 0  }
   0x3 LB: > { %s4456_s17 = sadd.s32 4294967295, %s4371_s16   ;;  %s3310_s18 = sadd.s32 4294967294, %s4371_s16   ;;  %s4371_s16 = sphi %s4441_s16, %s6002_s16   ;;  %s4367_s15 = sphi %s4439_s15, %s6001_s15   ;;  %s4363_s14 = sphi %s4437_s14, %s6000_s14   ;;  %s4359_s13 = sphi %s4435_s13, %s5999_s13  }
   0x4   : > { %s4460_s19 = sadd.s32 1, %s4371_s16   ;;  %s108_s20 = sadd.s32 1, %s4367_s15 }
   0x5   : > { %s105_s21 = ssub.s32 %s4371_s16, %s4460_s19  ;;  %p115_p0 = scmp.ne.s32.totalorder %s4367_s15, %s4363_s14 }
   0x6   : > { %p106_p1 = scmp.eq.s32.totalorder %s105_s21, 0  ;;  %p116_p2 = scmp.eq.s32.totalorder %s4371_s16, 0 }
   0x7   : > { %p281_p3 = scmp.eq.s32.totalorder %s4456_s17, 2  ;;  %p286_p4 = scmp.ne.s32.totalorder %s4363_s14, %s4359_s13 }
   0x8   : > { %s4472_s22 = scalar_select %p106_p1, %s4367_s15, %s108_s20  }
   0x9   : > { %p4474_p5 = por %p116_p2, %p115_p0  ;;  %p4478_p6 = por %p281_p3, %p115_p0 }
   0xa   : > { %5920 = sst [smem:[#allocation10_spill]] %s4472_s22  ;;  %p287_p7 = scmp.eq.s32.totalorder %s3310_s18, 2 }
   0xb   : > { %p3311_p8 = scmp.ge.s32.totalorder %s4371_s16, 1  ;;  %p294_p9 = scmp.lt.s32.totalorder %s4371_s16, 4 }
   0xc   : > { %p4484_p10 = por %p287_p7, %p286_p4 }
   0xd   : > { %p4488_p11 = pnand %p3311_p8, %p294_p9 }
   0xe   : > { %p3312_p12 = scmp.ne.s32.totalorder (!%p4488_p11), %s4456_s17, 0 }
   0xf   : > { %298 = sbr.rel (%p4488_p11) target bundleno = 164 (0xa4), region = 12 }
  0x14   : > { %302 = sbr.rel (%p3312_p12) target bundleno = 74 (0x4a), region = 16 }
  0x19   : > { %v3313_v0 = vld [vmem:[%s5913_s4 + $0x8] sm:$0xff] }
  0x1a   : > { %v3314_v1 = vld [vmem:[%s5913_s4 + $0x28] sm:$0xff]  ;;  %427 = vst [vmem:[#allocation3 + $0xb0] sm:$0xff] %v3313_v0 }
  0x1b   : > { %v3315_v2 = vld [vmem:[%s5913_s4 + $0x48] sm:$0xff]  ;;  %429 = vst [vmem:[#allocation3 + $0xd0] sm:$0xff] %v3314_v1 }
  0x1c   : > { %431 = vst [vmem:[#allocation3 + $0x10] sm:$0xff] %v3315_v2  ;;  %v3316_v3 = vld [vmem:[%s5913_s4 + $0x68] sm:$0xff] }
  0x1d   : > { %v3317_v4 = vld [vmem:[%s5913_s4 + $0x88] sm:$0xff]  ;;  %433 = vst [vmem:[#allocation3 + $0x48] sm:$0xff] %v3316_v3 }
  0x1e   : > { %v3318_v5 = vld [vmem:[%s5913_s4 + $0xa8] sm:$0xff]  ;;  %435 = vst [vmem:[#allocation3 + $0x160] sm:$0xff] %v3317_v4 }
  0x1f   : > { %437 = vst [vmem:[#allocation3 + $0x128] sm:$0xff] %v3318_v5  ;;  %v3319_v6 = vld [vmem:[%s5913_s4 + $0xc8] sm:$0xff] }
  0x20   : > { %v3320_v7 = vld [vmem:[%s5913_s4 + $0xe8] sm:$0xff]  ;;  %439 = vst [vmem:[#allocation3 + $0x40] sm:$0xff] %v3319_v6 }
  0x21   : > { %v3321_v8 = vld [vmem:[%s5913_s4 + $0x108] sm:$0xff]  ;;  %441 = vst [vmem:[#allocation3 + $0x178] sm:$0xff] %v3320_v7 }
  0x22   : > { %443 = vst [vmem:[#allocation3 + $0x108] sm:$0xff] %v3321_v8  ;;  %v3322_v9 = vld [vmem:[%s5913_s4 + $0x128] sm:$0xff] }
  0x23   : > { %v3323_v10 = vld [vmem:[%s5913_s4 + $0x148] sm:$0xff]  ;;  %445 = vst [vmem:[#allocation3 + $0x110] sm:$0xff] %v3322_v9 }
  0x24   : > { %v3324_v11 = vld [vmem:[%s5913_s4 + $0x168] sm:$0xff]  ;;  %447 = vst [vmem:[#allocation3 + $0x90] sm:$0xff] %v3323_v10 }
  0x25   : > { %449 = vst [vmem:[#allocation3 + $0x118] sm:$0xff] %v3324_v11  ;;  %v3325_v12 = vld [vmem:[%s5913_s4 + $0x188] sm:$0xff] }
  0x26   : > { %v3326_v13 = vld [vmem:[%s5913_s4 + $0x1a8] sm:$0xff]  ;;  %451 = vst [vmem:[#allocation3 + $0x148] sm:$0xff] %v3325_v12 }
  0x27   : > { %v3327_v14 = vld [vmem:[%s5913_s4 + $0x1c8] sm:$0xff]  ;;  %453 = vst [vmem:[#allocation3 + $0x100] sm:$0xff] %v3326_v13 }
  0x28   : > { %455 = vst [vmem:[#allocation3 + $0x58] sm:$0xff] %v3327_v14  ;;  %v3328_v15 = vld [vmem:[%s5913_s4 + $0x1e8] sm:$0xff] }
  0x29   : > { %v3329_v16 = vld [vmem:[%s5913_s4 + $0x208] sm:$0xff]  ;;  %457 = vst [vmem:[#allocation3 + $0xd8] sm:$0xff] %v3328_v15 }
  0x2a   : > { %v3330_v17 = vld [vmem:[%s5913_s4 + $0x228] sm:$0xff]  ;;  %459 = vst [vmem:[#allocation3 + $0x80] sm:$0xff] %v3329_v16 }
  0x2b   : > { %461 = vst [vmem:[#allocation3 + $0x130] sm:$0xff] %v3330_v17  ;;  %v3331_v18 = vld [vmem:[%s5913_s4 + $0x248] sm:$0xff] }
  0x2c   : > { %v3332_v19 = vld [vmem:[%s5913_s4 + $0x268] sm:$0xff]  ;;  %463 = vst [vmem:[#allocation3 + $0x138] sm:$0xff] %v3331_v18 }
  0x2d   : > { %v3333_v20 = vld [vmem:[%s5913_s4 + $0x288] sm:$0xff]  ;;  %465 = vst [vmem:[#allocation3 + $0x120] sm:$0xff] %v3332_v19 }
  0x2e   : > { %467 = vst [vmem:[#allocation3 + $0xe0] sm:$0xff] %v3333_v20  ;;  %v3334_v21 = vld [vmem:[%s5913_s4 + $0x2a8] sm:$0xff] }
  0x2f   : > { %v3335_v22 = vld [vmem:[%s5913_s4 + $0x2c8] sm:$0xff]  ;;  %469 = vst [vmem:[#allocation3 + $0xa8] sm:$0xff] %v3334_v21 }
  0x30   : > { %v3336_v23 = vld [vmem:[%s5913_s4 + $0x2e8] sm:$0xff]  ;;  %471 = vst [vmem:[#allocation3 + $0xb8] sm:$0xff] %v3335_v22 }
  0x31   : > { %473 = vst [vmem:[#allocation3 + $0x168] sm:$0xff] %v3336_v23  ;;  %v3337_v24 = vld [vmem:[%s5913_s4 + $0x308] sm:$0xff] }
  0x32   : > { %v3338_v25 = vld [vmem:[%s5913_s4 + $0x328] sm:$0xff]  ;;  %475 = vst [vmem:[#allocation3 + $0xe8] sm:$0xff] %v3337_v24 }
  0x33   : > { %v3339_v26 = vld [vmem:[%s5913_s4 + $0x348] sm:$0xff]  ;;  %477 = vst [vmem:[#allocation3 + $0xf8] sm:$0xff] %v3338_v25 }
  0x34   : > { %479 = vst [vmem:[#allocation3 + $0x20] sm:$0xff] %v3339_v26  ;;  %v3340_v27 = vld [vmem:[%s5913_s4 + $0x368] sm:$0xff] }
  0x35   : > { %v3341_v28 = vld [vmem:[%s5913_s4 + $0x388] sm:$0xff]  ;;  %481 = vst [vmem:[#allocation3 + $0x88] sm:$0xff] %v3340_v27 }
  0x36   : > { %v3342_v29 = vld [vmem:[%s5913_s4 + $0x3a8] sm:$0xff]  ;;  %483 = vst [vmem:[#allocation3 + $0xa0] sm:$0xff] %v3341_v28 }
  0x37   : > { %485 = vst [vmem:[#allocation3 + $0x170] sm:$0xff] %v3342_v29  ;;  %v3343_v30 = vld [vmem:[%s5913_s4 + $0x3c8] sm:$0xff] }
  0x38   : > { %v3344_v31 = vld [vmem:[%s5913_s4 + $0x3e8] sm:$0xff]  ;;  %487 = vst [vmem:[#allocation3 + $0xf0] sm:$0xff] %v3343_v30 }
  0x39   : > { %v3345_v32 = vld [vmem:[%s5913_s4 + $0x408] sm:$0xff]  ;;  %489 = vst [vmem:[#allocation3 + $0x140] sm:$0xff] %v3344_v31 }
  0x3a   : > { %491 = vst [vmem:[#allocation3 + $0x60] sm:$0xff] %v3345_v32  ;;  %v3346_v33 = vld [vmem:[%s5913_s4 + $0x428] sm:$0xff] }
  0x3b   : > { %v3347_v34 = vld [vmem:[%s5913_s4 + $0x448] sm:$0xff]  ;;  %493 = vst [vmem:[#allocation3 + $0xc8] sm:$0xff] %v3346_v33 }
  0x3c   : > { %v3348_v35 = vld [vmem:[%s5913_s4 + $0x468] sm:$0xff]  ;;  %495 = vst [vmem:[#allocation3 + $0x28] sm:$0xff] %v3347_v34 }
  0x3d   : > { %497 = vst [vmem:[#allocation3 + $0x38] sm:$0xff] %v3348_v35  ;;  %v3349_v36 = vld [vmem:[%s5913_s4 + $0x488] sm:$0xff] }
  0x3e   : > { %v3350_v37 = vld [vmem:[%s5913_s4 + $0x4a8] sm:$0xff]  ;;  %499 = vst [vmem:[#allocation3 + $0xc0] sm:$0xff] %v3349_v36 }
  0x3f   : > { %v3351_v38 = vld [vmem:[%s5913_s4 + $0x4c8] sm:$0xff]  ;;  %501 = vst [vmem:[#allocation3 + $0x18] sm:$0xff] %v3350_v37 }
  0x40   : > { %503 = vst [vmem:[#allocation3 + $0x98] sm:$0xff] %v3351_v38  ;;  %v3352_v39 = vld [vmem:[%s5913_s4 + $0x4e8] sm:$0xff] }
  0x41   : > { %v3353_v40 = vld [vmem:[%s5913_s4 + $0x508] sm:$0xff]  ;;  %505 = vst [vmem:[#allocation3 + $0x8] sm:$0xff] %v3352_v39 }
  0x42   : > { %v3354_v41 = vld [vmem:[%s5913_s4 + $0x528] sm:$0xff]  ;;  %507 = vst [vmem:[#allocation3] sm:$0xff] %v3353_v40 }
  0x43   : > { %509 = vst [vmem:[#allocation3 + $0x78] sm:$0xff] %v3354_v41  ;;  %v3355_v42 = vld [vmem:[%s5913_s4 + $0x548] sm:$0xff] }
  0x44   : > { %v3356_v43 = vld [vmem:[%s5913_s4 + $0x568] sm:$0xff]  ;;  %511 = vst [vmem:[#allocation3 + $0x50] sm:$0xff] %v3355_v42 }
  0x45   : > { %v3357_v44 = vld [vmem:[%s5913_s4 + $0x588] sm:$0xff]  ;;  %513 = vst [vmem:[#allocation3 + $0x68] sm:$0xff] %v3356_v43 }
  0x46   : > { %515 = vst [vmem:[#allocation3 + $0x70] sm:$0xff] %v3357_v44  ;;  %v3358_v45 = vld [vmem:[%s5913_s4 + $0x5a8] sm:$0xff] }
  0x47   : > { %v3359_v46 = vld [vmem:[%s5913_s4 + $0x5c8] sm:$0xff]  ;;  %517 = vst [vmem:[#allocation3 + $0x30] sm:$0xff] %v3358_v45 }
  0x48   : > { %v3360_v47 = vld [vmem:[%s5913_s4 + $0x5e8] sm:$0xff]  ;;  %519 = vst [vmem:[#allocation3 + $0x158] sm:$0xff] %v3359_v46 }
  0x49   : > { %521 = vst [vmem:[#allocation3 + $0x150] sm:$0xff] %v3360_v47 }
  0x4a PF: > { %527 = sbr.rel (%p3312_p12) target bundleno = 128 (0x80), region = 54 }
  0x4f   : > { %v3362_v48 = vld [vmem:[%s5914_s5 + $0x10] sm:$0xff] }
  0x50   : > { %v3363_v49 = vld [vmem:[%s5914_s5 + $0x30] sm:$0xff]  ;;  %652 = vst [vmem:[#allocation4 + $0xb0] sm:$0xff] %v3362_v48 }
  0x51   : > { %v3364_v50 = vld [vmem:[%s5914_s5 + $0x50] sm:$0xff]  ;;  %654 = vst [vmem:[#allocation4 + $0xc0] sm:$0xff] %v3363_v49 }
  0x52   : > { %656 = vst [vmem:[#allocation4 + $0x88] sm:$0xff] %v3364_v50  ;;  %v3365_v51 = vld [vmem:[%s5914_s5 + $0x70] sm:$0xff] }
  0x53   : > { %v3366_v52 = vld [vmem:[%s5914_s5 + $0x90] sm:$0xff]  ;;  %658 = vst [vmem:[#allocation4 + $0x108] sm:$0xff] %v3365_v51 }
  0x54   : > { %v3367_v53 = vld [vmem:[%s5914_s5 + $0xb0] sm:$0xff]  ;;  %660 = vst [vmem:[#allocation4 + $0x28] sm:$0xff] %v3366_v52 }
  0x55   : > { %662 = vst [vmem:[#allocation4 + $0x90] sm:$0xff] %v3367_v53  ;;  %v3368_v54 = vld [vmem:[%s5914_s5 + $0xd0] sm:$0xff] }
  0x56   : > { %v3369_v55 = vld [vmem:[%s5914_s5 + $0xf0] sm:$0xff]  ;;  %664 = vst [vmem:[#allocation4 + $0x118] sm:$0xff] %v3368_v54 }
  0x57   : > { %v3370_v56 = vld [vmem:[%s5914_s5 + $0x110] sm:$0xff]  ;;  %666 = vst [vmem:[#allocation4 + $0x150] sm:$0xff] %v3369_v55 }
  0x58   : > { %668 = vst [vmem:[#allocation4 + $0xc8] sm:$0xff] %v3370_v56  ;;  %v3371_v57 = vld [vmem:[%s5914_s5 + $0x130] sm:$0xff] }
  0x59   : > { %v3372_v58 = vld [vmem:[%s5914_s5 + $0x150] sm:$0xff]  ;;  %670 = vst [vmem:[#allocation4] sm:$0xff] %v3371_v57 }
  0x5a   : > { %v3373_v59 = vld [vmem:[%s5914_s5 + $0x170] sm:$0xff]  ;;  %672 = vst [vmem:[#allocation4 + $0xa8] sm:$0xff] %v3372_v58 }
  0x5b   : > { %674 = vst [vmem:[#allocation4 + $0xf8] sm:$0xff] %v3373_v59  ;;  %v3374_v60 = vld [vmem:[%s5914_s5 + $0x190] sm:$0xff] }
  0x5c   : > { %v3375_v61 = vld [vmem:[%s5914_s5 + $0x1b0] sm:$0xff]  ;;  %676 = vst [vmem:[#allocation4 + $0x40] sm:$0xff] %v3374_v60 }
  0x5d   : > { %v3376_v62 = vld [vmem:[%s5914_s5 + $0x1d0] sm:$0xff]  ;;  %678 = vst [vmem:[#allocation4 + $0x60] sm:$0xff] %v3375_v61 }
  0x5e   : > { %680 = vst [vmem:[#allocation4 + $0x120] sm:$0xff] %v3376_v62  ;;  %v3377_v63 = vld [vmem:[%s5914_s5 + $0x1f0] sm:$0xff] }
  0x5f   : > { %v3378_v0 = vld [vmem:[%s5914_s5 + $0x210] sm:$0xff]  ;;  %682 = vst [vmem:[#allocation4 + $0x128] sm:$0xff] %v3377_v63 }
  0x60   : > { %v3379_v1 = vld [vmem:[%s5914_s5 + $0x230] sm:$0xff]  ;;  %684 = vst [vmem:[#allocation4 + $0x130] sm:$0xff] %v3378_v0 }
  0x61   : > { %686 = vst [vmem:[#allocation4 + $0x80] sm:$0xff] %v3379_v1  ;;  %v3380_v2 = vld [vmem:[%s5914_s5 + $0x250] sm:$0xff] }
  0x62   : > { %v3381_v3 = vld [vmem:[%s5914_s5 + $0x270] sm:$0xff]  ;;  %688 = vst [vmem:[#allocation4 + $0x98] sm:$0xff] %v3380_v2 }
  0x63   : > { %v3382_v4 = vld [vmem:[%s5914_s5 + $0x290] sm:$0xff]  ;;  %690 = vst [vmem:[#allocation4 + $0xa0] sm:$0xff] %v3381_v3 }
  0x64   : > { %692 = vst [vmem:[#allocation4 + $0x140] sm:$0xff] %v3382_v4  ;;  %v3383_v5 = vld [vmem:[%s5914_s5 + $0x2b0] sm:$0xff] }
  0x65   : > { %v3384_v6 = vld [vmem:[%s5914_s5 + $0x2d0] sm:$0xff]  ;;  %694 = vst [vmem:[#allocation4 + $0x170] sm:$0xff] %v3383_v5 }
  0x66   : > { %v3385_v7 = vld [vmem:[%s5914_s5 + $0x2f0] sm:$0xff]  ;;  %696 = vst [vmem:[#allocation4 + $0xe0] sm:$0xff] %v3384_v6 }
  0x67   : > { %698 = vst [vmem:[#allocation4 + $0xd0] sm:$0xff] %v3385_v7  ;;  %v3386_v8 = vld [vmem:[%s5914_s5 + $0x310] sm:$0xff] }
  0x68   : > { %v3387_v9 = vld [vmem:[%s5914_s5 + $0x330] sm:$0xff]  ;;  %700 = vst [vmem:[#allocation4 + $0x78] sm:$0xff] %v3386_v8 }
  0x69   : > { %v3388_v10 = vld [vmem:[%s5914_s5 + $0x350] sm:$0xff]  ;;  %702 = vst [vmem:[#allocation4 + $0x8] sm:$0xff] %v3387_v9 }
  0x6a   : > { %704 = vst [vmem:[#allocation4 + $0xb8] sm:$0xff] %v3388_v10  ;;  %v3389_v11 = vld [vmem:[%s5914_s5 + $0x370] sm:$0xff] }
  0x6b   : > { %v3390_v12 = vld [vmem:[%s5914_s5 + $0x390] sm:$0xff]  ;;  %706 = vst [vmem:[#allocation4 + $0xf0] sm:$0xff] %v3389_v11 }
  0x6c   : > { %v3391_v13 = vld [vmem:[%s5914_s5 + $0x3b0] sm:$0xff]  ;;  %708 = vst [vmem:[#allocation4 + $0x178] sm:$0xff] %v3390_v12 }
  0x6d   : > { %710 = vst [vmem:[#allocation4 + $0x158] sm:$0xff] %v3391_v13  ;;  %v3392_v14 = vld [vmem:[%s5914_s5 + $0x3d0] sm:$0xff] }
  0x6e   : > { %v3393_v15 = vld [vmem:[%s5914_s5 + $0x3f0] sm:$0xff]  ;;  %712 = vst [vmem:[#allocation4 + $0x160] sm:$0xff] %v3392_v14 }
  0x6f   : > { %v3394_v16 = vld [vmem:[%s5914_s5 + $0x410] sm:$0xff]  ;;  %714 = vst [vmem:[#allocation4 + $0x100] sm:$0xff] %v3393_v15 }
  0x70   : > { %716 = vst [vmem:[#allocation4 + $0x70] sm:$0xff] %v3394_v16  ;;  %v3395_v17 = vld [vmem:[%s5914_s5 + $0x430] sm:$0xff] }
  0x71   : > { %v3396_v18 = vld [vmem:[%s5914_s5 + $0x450] sm:$0xff]  ;;  %718 = vst [vmem:[#allocation4 + $0x20] sm:$0xff] %v3395_v17 }
  0x72   : > { %v3397_v19 = vld [vmem:[%s5914_s5 + $0x470] sm:$0xff]  ;;  %720 = vst [vmem:[#allocation4 + $0x48] sm:$0xff] %v3396_v18 }
  0x73   : > { %722 = vst [vmem:[#allocation4 + $0x168] sm:$0xff] %v3397_v19  ;;  %v3398_v20 = vld [vmem:[%s5914_s5 + $0x490] sm:$0xff] }
  0x74   : > { %v3399_v21 = vld [vmem:[%s5914_s5 + $0x4b0] sm:$0xff]  ;;  %724 = vst [vmem:[#allocation4 + $0x110] sm:$0xff] %v3398_v20 }
  0x75   : > { %v3400_v22 = vld [vmem:[%s5914_s5 + $0x4d0] sm:$0xff]  ;;  %726 = vst [vmem:[#allocation4 + $0x38] sm:$0xff] %v3399_v21 }
  0x76   : > { %728 = vst [vmem:[#allocation4 + $0xe8] sm:$0xff] %v3400_v22  ;;  %v3401_v23 = vld [vmem:[%s5914_s5 + $0x4f0] sm:$0xff] }
  0x77   : > { %v3402_v24 = vld [vmem:[%s5914_s5 + $0x510] sm:$0xff]  ;;  %730 = vst [vmem:[#allocation4 + $0xd8] sm:$0xff] %v3401_v23 }
  0x78   : > { %v3403_v25 = vld [vmem:[%s5914_s5 + $0x530] sm:$0xff]  ;;  %732 = vst [vmem:[#allocation4 + $0x68] sm:$0xff] %v3402_v24 }
  0x79   : > { %734 = vst [vmem:[#allocation4 + $0x50] sm:$0xff] %v3403_v25  ;;  %v3404_v26 = vld [vmem:[%s5914_s5 + $0x550] sm:$0xff] }
  0x7a   : > { %v3405_v27 = vld [vmem:[%s5914_s5 + $0x570] sm:$0xff]  ;;  %736 = vst [vmem:[#allocation4 + $0x10] sm:$0xff] %v3404_v26 }
  0x7b   : > { %v3406_v28 = vld [vmem:[%s5914_s5 + $0x590] sm:$0xff]  ;;  %738 = vst [vmem:[#allocation4 + $0x18] sm:$0xff] %v3405_v27 }
  0x7c   : > { %740 = vst [vmem:[#allocation4 + $0x148] sm:$0xff] %v3406_v28  ;;  %v3407_v29 = vld [vmem:[%s5914_s5 + $0x5b0] sm:$0xff] }
  0x7d   : > { %v3408_v30 = vld [vmem:[%s5914_s5 + $0x5d0] sm:$0xff]  ;;  %742 = vst [vmem:[#allocation4 + $0x30] sm:$0xff] %v3407_v29 }
  0x7e   : > { %v3409_v31 = vld [vmem:[%s5914_s5 + $0x5f0] sm:$0xff]  ;;  %744 = vst [vmem:[#allocation4 + $0x58] sm:$0xff] %v3408_v30 }
  0x7f   : > { %746 = vst [vmem:[#allocation4 + $0x138] sm:$0xff] %v3409_v31 }
  0x80 PF: > { %752 = sbr.rel (%p3312_p12) target bundleno = 142 (0x8e), region = 92 }
  0x85   : > { %v3411_v32 = vld [vmem:[%s5915_s6 + $0x8] sm:$0xff]  ;;  %v3412_v33 = vld [vmem:[%s5915_s6 + $0x18] sm:$0xff] }
  0x86   : > { %v3413_v34 = vld [vmem:[%s5915_s6 + $0x28] sm:$0xff]  ;;  %813 = vst [vmem:[#allocation5 + $0x18] sm:$0xff] %v3411_v32  ;;  %815 = vst [vmem:[#allocation5 + $0x48] sm:$0xff] %v3412_v33  ;;  %v3414_v35 = vld [vmem:[%s5915_s6 + $0x38] sm:$0xff] }
  0x87   : > { %817 = vst [vmem:[#allocation5 + $0x40] sm:$0xff] %v3413_v34  ;;  %v3415_v36 = vld [vmem:[%s5915_s6 + $0x48] sm:$0xff]  ;;  %v3416_v37 = vld [vmem:[%s5915_s6 + $0x58] sm:$0xff]  ;;  %819 = vst [vmem:[#allocation5 + $0x60] sm:$0xff] %v3414_v35 }
  0x88   : > { %821 = vst [vmem:[#allocation5 + $0x38] sm:$0xff] %v3415_v36  ;;  %823 = vst [vmem:[#allocation5 + $0x30] sm:$0xff] %v3416_v37  ;;  %v3417_v38 = vld [vmem:[%s5915_s6 + $0x68] sm:$0xff]  ;;  %v3418_v39 = vld [vmem:[%s5915_s6 + $0x78] sm:$0xff] }
  0x89   : > { %v3419_v40 = vld [vmem:[%s5915_s6 + $0x88] sm:$0xff]  ;;  %825 = vst [vmem:[#allocation5 + $0x10] sm:$0xff] %v3417_v38  ;;  %827 = vst [vmem:[#allocation5 + $0x58] sm:$0xff] %v3418_v39  ;;  %v3420_v41 = vld [vmem:[%s5915_s6 + $0x98] sm:$0xff] }
  0x8a   : > { %829 = vst [vmem:[#allocation5 + $0x28] sm:$0xff] %v3419_v40  ;;  %v3421_v42 = vld [vmem:[%s5915_s6 + $0xa8] sm:$0xff]  ;;  %v3422_v43 = vld [vmem:[%s5915_s6 + $0xb8] sm:$0xff]  ;;  %831 = vst [vmem:[#allocation5] sm:$0xff] %v3420_v41 }
  0x8b   : > { %833 = vst [vmem:[#allocation5 + $0x68] sm:$0xff] %v3421_v42  ;;  %835 = vst [vmem:[#allocation5 + $0x70] sm:$0xff] %v3422_v43  ;;  %v3423_v44 = vld [vmem:[%s5915_s6 + $0xc8] sm:$0xff]  ;;  %v3424_v45 = vld [vmem:[%s5915_s6 + $0xd8] sm:$0xff] }
  0x8c   : > { %v3425_v46 = vld [vmem:[%s5915_s6 + $0xe8] sm:$0xff]  ;;  %837 = vst [vmem:[#allocation5 + $0x20] sm:$0xff] %v3423_v44  ;;  %839 = vst [vmem:[#allocation5 + $0x78] sm:$0xff] %v3424_v45  ;;  %v3426_v47 = vld [vmem:[%s5915_s6 + $0xf8] sm:$0xff] }
  0x8d   : > { %841 = vst [vmem:[#allocation5 + $0x8] sm:$0xff] %v3425_v46  ;;  %843 = vst [vmem:[#allocation5 + $0x50] sm:$0xff] %v3426_v47 }
  0x8e PF: > { %849 = sbr.rel (%p3312_p12) target bundleno = 164 (0xa4), region = 130 }
  0x93   : > { %v3428_v48 = vld [vmem:[%s5916_s7 + $0x10] sm:$0xff]  ;;  %v3429_v49 = vld [vmem:[%s5916_s7 + $0x38] sm:$0xff]  ;;  %v3430_v50 = vld [vmem:[%s5916_s7 + $0x60] sm:$0xff] }
  0x94   : > { %942 = vst [vmem:[#allocation6 + $0xc0] sm:$0xff] %v3428_v48  ;;  %944 = vst [vmem:[#allocation6 + $0xc8] sm:$0xff] %v3429_v49  ;;  %v3431_v51 = vld [vmem:[%s5916_s7 + $0x88] sm:$0xff]  ;;  %v3432_v52 = vld [vmem:[%s5916_s7 + $0xb0] sm:$0xff] }
  0x95   : > { %946 = vst [vmem:[#allocation6 + $0x20] sm:$0xff] %v3430_v50  ;;  %v3433_v53 = vld [vmem:[%s5916_s7 + $0xd8] sm:$0xff]  ;;  %948 = vst [vmem:[#allocation6 + $0x8] sm:$0xff] %v3431_v51  ;;  %v3434_v54 = vld [vmem:[%s5916_s7 + $0x100] sm:$0xff] }
  0x96   : > { %950 = vst [vmem:[#allocation6 + $0x10] sm:$0xff] %v3432_v52  ;;  %952 = vst [vmem:[#allocation6 + $0x60] sm:$0xff] %v3433_v53  ;;  %v3435_v55 = vld [vmem:[%s5916_s7 + $0x128] sm:$0xff]  ;;  %v3436_v56 = vld [vmem:[%s5916_s7 + $0x150] sm:$0xff] }
  0x97   : > { %954 = vst [vmem:[#allocation6 + $0xd8] sm:$0xff] %v3434_v54  ;;  %956 = vst [vmem:[#allocation6 + $0x80] sm:$0xff] %v3435_v55  ;;  %v3437_v57 = vld [vmem:[%s5916_s7 + $0x178] sm:$0xff]  ;;  %v3438_v58 = vld [vmem:[%s5916_s7 + $0x1a0] sm:$0xff] }
  0x98   : > { %958 = vst [vmem:[#allocation6 + $0x50] sm:$0xff] %v3436_v56  ;;  %v3439_v59 = vld [vmem:[%s5916_s7 + $0x1c8] sm:$0xff]  ;;  %960 = vst [vmem:[#allocation6] sm:$0xff] %v3437_v57  ;;  %v3440_v60 = vld [vmem:[%s5916_s7 + $0x1f0] sm:$0xff] }
  0x99   : > { %962 = vst [vmem:[#allocation6 + $0xa0] sm:$0xff] %v3438_v58  ;;  %964 = vst [vmem:[#allocation6 + $0xf0] sm:$0xff] %v3439_v59  ;;  %v3441_v61 = vld [vmem:[%s5916_s7 + $0x218] sm:$0xff]  ;;  %v3442_v62 = vld [vmem:[%s5916_s7 + $0x240] sm:$0xff] }
  0x9a   : > { %966 = vst [vmem:[#allocation6 + $0x90] sm:$0xff] %v3440_v60  ;;  %968 = vst [vmem:[#allocation6 + $0x40] sm:$0xff] %v3441_v61  ;;  %v3443_v63 = vld [vmem:[%s5916_s7 + $0x268] sm:$0xff]  ;;  %v3444_v0 = vld [vmem:[%s5916_s7 + $0x290] sm:$0xff] }
  0x9b   : > { %970 = vst [vmem:[#allocation6 + $0xf8] sm:$0xff] %v3442_v62  ;;  %v3445_v1 = vld [vmem:[%s5916_s7 + $0x2b8] sm:$0xff]  ;;  %972 = vst [vmem:[#allocation6 + $0x98] sm:$0xff] %v3443_v63  ;;  %v3446_v2 = vld [vmem:[%s5916_s7 + $0x2e0] sm:$0xff] }
  0x9c   : > { %974 = vst [vmem:[#allocation6 + $0x28] sm:$0xff] %v3444_v0  ;;  %976 = vst [vmem:[#allocation6 + $0xb0] sm:$0xff] %v3445_v1  ;;  %v3447_v3 = vld [vmem:[%s5916_s7 + $0x308] sm:$0xff]  ;;  %v3448_v4 = vld [vmem:[%s5916_s7 + $0x330] sm:$0xff] }
  0x9d   : > { %978 = vst [vmem:[#allocation6 + $0xa8] sm:$0xff] %v3446_v2  ;;  %980 = vst [vmem:[#allocation6 + $0x70] sm:$0xff] %v3447_v3  ;;  %v3449_v5 = vld [vmem:[%s5916_s7 + $0x358] sm:$0xff]  ;;  %v3450_v6 = vld [vmem:[%s5916_s7 + $0x380] sm:$0xff] }
  0x9e   : > { %982 = vst [vmem:[#allocation6 + $0x88] sm:$0xff] %v3448_v4  ;;  %v3451_v7 = vld [vmem:[%s5916_s7 + $0x3a8] sm:$0xff]  ;;  %984 = vst [vmem:[#allocation6 + $0x78] sm:$0xff] %v3449_v5  ;;  %v3452_v8 = vld [vmem:[%s5916_s7 + $0x3d0] sm:$0xff] }
  0x9f   : > { %986 = vst [vmem:[#allocation6 + $0x38] sm:$0xff] %v3450_v6  ;;  %988 = vst [vmem:[#allocation6 + $0x58] sm:$0xff] %v3451_v7  ;;  %v3453_v9 = vld [vmem:[%s5916_s7 + $0x3f8] sm:$0xff]  ;;  %v3454_v10 = vld [vmem:[%s5916_s7 + $0x420] sm:$0xff] }
  0xa0   : > { %990 = vst [vmem:[#allocation6 + $0x18] sm:$0xff] %v3452_v8  ;;  %992 = vst [vmem:[#allocation6 + $0xe0] sm:$0xff] %v3453_v9  ;;  %v3455_v11 = vld [vmem:[%s5916_s7 + $0x448] sm:$0xff]  ;;  %v3456_v12 = vld [vmem:[%s5916_s7 + $0x470] sm:$0xff] }
  0xa1   : > { %994 = vst [vmem:[#allocation6 + $0xe8] sm:$0xff] %v3454_v10  ;;  %v3457_v13 = vld [vmem:[%s5916_s7 + $0x498] sm:$0xff]  ;;  %996 = vst [vmem:[#allocation6 + $0x48] sm:$0xff] %v3455_v11  ;;  %v3458_v14 = vld [vmem:[%s5916_s7 + $0x4c0] sm:$0xff] }
  0xa2   : > { %998 = vst [vmem:[#allocation6 + $0xb8] sm:$0xff] %v3456_v12  ;;  %1000 = vst [vmem:[#allocation6 + $0x30] sm:$0xff] %v3457_v13  ;;  %v3459_v15 = vld [vmem:[%s5916_s7 + $0x4e8] sm:$0xff] }
  0xa3   : > { %1002 = vst [vmem:[#allocation6 + $0xd0] sm:$0xff] %v3458_v14  ;;  %1004 = vst [vmem:[#allocation6 + $0x68] sm:$0xff] %v3459_v15 }
  0xa4 PF: > { %p3460_p13 = scmp.ge.s32.totalorder %s4371_s16, 3 }
  0xa6   : > { %1011 = sbr.rel (%p3460_p13) target bundleno = 196 (0xc4), region = 168 }
  0xab   : > { %1043 = sbr.rel (!%p4474_p5) target bundleno = 196 (0xc4), region = 184  ;;  %s1045_s22 = sand.u32 (%p4474_p5), 1, %s4367_s15  }
  0xac   : > { %s3462_s21 = sshll.u32 (%p4474_p5), %s4371_s16, 2  ;;  %s3461_s27 = sshll.u32 (%p4474_p5), %s1045_s22, 7 }
  0xad   : > { %s4943_s30 = scalar_lea.vmem (%p4474_p5), %s5912_s3, %s3462_s21  ;;  %s4947_s23 = scalar_lea.vmem (%p4474_p5), [#allocation2], %s3461_s27 }
  0xae   : > { %v1066_v16 = vld [vmem:[%s4943_s30] sm:$0xf] (%p4474_p5)  ;;  %v1068_v17 = vld [vmem:[%s4943_s30 + $0xc] sm:$0xf] (%p4474_p5)  ;;  %v1070_v18 = vld [vmem:[%s4943_s30 + $0x18] sm:$0xf] (%p4474_p5) }
  0xaf   : > { %1067 = vst [vmem:[%s4947_s23] sm:$0xf] (%p4474_p5), %v1066_v16  ;;  %1069 = vst [vmem:[%s4947_s23 + $0x4] sm:$0xf] (%p4474_p5), %v1068_v17  ;;  %v1072_v19 = vld [vmem:[%s4943_s30 + $0x24] sm:$0xf] (%p4474_p5) }
  0xb0   : > { %v1074_v20 = vld [vmem:[%s4943_s30 + $0x30] sm:$0xf]  ;;  %1071 = vst [vmem:[%s4947_s23 + $0x8] sm:$0xf] %v1070_v18  ;;  %1073 = vst [vmem:[%s4947_s23 + $0xc] sm:$0xf] %v1072_v19 }
  0xb1   : > { %1075 = vst [vmem:[%s4947_s23 + $0x10] sm:$0xf] %v1074_v20  ;;  %v1076_v21 = vld [vmem:[%s4943_s30 + $0x3c] sm:$0xf]  ;;  %v1078_v22 = vld [vmem:[%s4943_s30 + $0x48] sm:$0xf] }
  0xb2   : > { %v1080_v23 = vld [vmem:[%s4943_s30 + $0x54] sm:$0xf]  ;;  %1077 = vst [vmem:[%s4947_s23 + $0x14] sm:$0xf] %v1076_v21  ;;  %1079 = vst [vmem:[%s4947_s23 + $0x18] sm:$0xf] %v1078_v22 }
  0xb3   : > { %1081 = vst [vmem:[%s4947_s23 + $0x1c] sm:$0xf] %v1080_v23  ;;  %v1082_v24 = vld [vmem:[%s4943_s30 + $0x60] sm:$0xf]  ;;  %v1084_v25 = vld [vmem:[%s4943_s30 + $0x6c] sm:$0xf] }
  0xb4   : > { %v1086_v26 = vld [vmem:[%s4943_s30 + $0x78] sm:$0xf]  ;;  %1083 = vst [vmem:[%s4947_s23 + $0x20] sm:$0xf] %v1082_v24  ;;  %1085 = vst [vmem:[%s4947_s23 + $0x24] sm:$0xf] %v1084_v25 }
  0xb5   : > { %1087 = vst [vmem:[%s4947_s23 + $0x28] sm:$0xf] %v1086_v26  ;;  %v1088_v27 = vld [vmem:[%s4943_s30 + $0x84] sm:$0xf]  ;;  %v1090_v28 = vld [vmem:[%s4943_s30 + $0x90] sm:$0xf] }
  0xb6   : > { %v1092_v29 = vld [vmem:[%s4943_s30 + $0x9c] sm:$0xf]  ;;  %1089 = vst [vmem:[%s4947_s23 + $0x2c] sm:$0xf] %v1088_v27  ;;  %1091 = vst [vmem:[%s4947_s23 + $0x30] sm:$0xf] %v1090_v28 }
  0xb7   : > { %1093 = vst [vmem:[%s4947_s23 + $0x34] sm:$0xf] %v1092_v29  ;;  %v1094_v30 = vld [vmem:[%s4943_s30 + $0xa8] sm:$0xf]  ;;  %v1096_v31 = vld [vmem:[%s4943_s30 + $0xb4] sm:$0xf] }
  0xb8   : > { %v1098_v32 = vld [vmem:[%s4943_s30 + $0xc0] sm:$0xf]  ;;  %1095 = vst [vmem:[%s4947_s23 + $0x38] sm:$0xf] %v1094_v30  ;;  %1097 = vst [vmem:[%s4947_s23 + $0x3c] sm:$0xf] %v1096_v31 }
  0xb9   : > { %1099 = vst [vmem:[%s4947_s23 + $0x40] sm:$0xf] %v1098_v32  ;;  %v1100_v33 = vld [vmem:[%s4943_s30 + $0xcc] sm:$0xf]  ;;  %v1102_v34 = vld [vmem:[%s4943_s30 + $0xd8] sm:$0xf] }
  0xba   : > { %v1104_v35 = vld [vmem:[%s4943_s30 + $0xe4] sm:$0xf]  ;;  %1101 = vst [vmem:[%s4947_s23 + $0x44] sm:$0xf] %v1100_v33  ;;  %1103 = vst [vmem:[%s4947_s23 + $0x48] sm:$0xf] %v1102_v34 }
  0xbb   : > { %1105 = vst [vmem:[%s4947_s23 + $0x4c] sm:$0xf] %v1104_v35  ;;  %v1106_v36 = vld [vmem:[%s4943_s30 + $0xf0] sm:$0xf]  ;;  %v1108_v37 = vld [vmem:[%s4943_s30 + $0xfc] sm:$0xf] }
  0xbc   : > { %v1110_v38 = vld [vmem:[%s4943_s30 + $0x108] sm:$0xf]  ;;  %1107 = vst [vmem:[%s4947_s23 + $0x50] sm:$0xf] %v1106_v36  ;;  %1109 = vst [vmem:[%s4947_s23 + $0x54] sm:$0xf] %v1108_v37 }
  0xbd   : > { %1111 = vst [vmem:[%s4947_s23 + $0x58] sm:$0xf] %v1110_v38  ;;  %v1112_v39 = vld [vmem:[%s4943_s30 + $0x114] sm:$0xf]  ;;  %v1114_v40 = vld [vmem:[%s4943_s30 + $0x120] sm:$0xf] }
  0xbe   : > { %v1116_v41 = vld [vmem:[%s4943_s30 + $0x12c] sm:$0xf]  ;;  %1113 = vst [vmem:[%s4947_s23 + $0x5c] sm:$0xf] %v1112_v39  ;;  %1115 = vst [vmem:[%s4947_s23 + $0x60] sm:$0xf] %v1114_v40 }
  0xbf   : > { %1117 = vst [vmem:[%s4947_s23 + $0x64] sm:$0xf] %v1116_v41  ;;  %v1118_v42 = vld [vmem:[%s4943_s30 + $0x138] sm:$0xf]  ;;  %v1120_v43 = vld [vmem:[%s4943_s30 + $0x144] sm:$0xf] }
  0xc0   : > { %v1122_v44 = vld [vmem:[%s4943_s30 + $0x150] sm:$0xf]  ;;  %1119 = vst [vmem:[%s4947_s23 + $0x68] sm:$0xf] %v1118_v42  ;;  %1121 = vst [vmem:[%s4947_s23 + $0x6c] sm:$0xf] %v1120_v43 }
  0xc1   : > { %1123 = vst [vmem:[%s4947_s23 + $0x70] sm:$0xf] %v1122_v44  ;;  %v1124_v45 = vld [vmem:[%s4943_s30 + $0x15c] sm:$0xf]  ;;  %v1126_v46 = vld [vmem:[%s4943_s30 + $0x168] sm:$0xf] }
  0xc2   : > { %v1128_v47 = vld [vmem:[%s4943_s30 + $0x174] sm:$0xf]  ;;  %1125 = vst [vmem:[%s4947_s23 + $0x74] sm:$0xf] %v1124_v45  ;;  %1127 = vst [vmem:[%s4947_s23 + $0x78] sm:$0xf] %v1126_v46 }
  0xc3   : > { %1129 = vst [vmem:[%s4947_s23 + $0x7c] sm:$0xf] %v1128_v47 }
  0xc4 PF: > { %1238 = sbr.rel (%p4488_p11) target bundleno = 655 (0x28f), region = 233 }
  0xc9   : > { %v1477_v48 = vld [vmem:[#allocation3 + $0x140] sm:$0xff]  ;;  %v1493_v49 = vld [vmem:[#allocation3 + $0x150] sm:$0xff]  ;;  %v1461_v50 = vld [vmem:[#allocation3 + $0xd8] sm:$0xff]  ;;  %s1241_s11 = sand.u32 1, %s4363_s14   ;;  %s3466_s18 = sshll.u32 %s4456_s17, 4  ;;  %v4373_v47 = vmov 0  }
  0xca   : > { %3600 = vmatprep.subr.mxu0 %v1477_v48  ;;  %3936 = vmatprep.subr.mxu1 %v1493_v49  ;;  %v1476_v51 = vld [vmem:[#allocation3 + $0xf0] sm:$0xff]  ;;  %v1492_v52 = vld [vmem:[#allocation3 + $0x158] sm:$0xff]  ;;  %s5016_s12 = sshll.u32 %s1241_s11, 7  ;;  %v1459_v56 = vld [vmem:[#allocation3 + $0x100] sm:$0xff]  ;;  %p5028_p0 = scmp.lt.s32.totalorder %s3466_s18, 47 }
  0xcb   : > { %v1460_v53 = vld [vmem:[#allocation3 + $0x58] sm:$0xff]  ;;  %3601 = vmatpush3.msra.mxu0 %v1461_v50  ;;  %3937 = vmatpush3.msra.mxu1 %v1493_v49  ;;  %v1475_v54 = vld [vmem:[#allocation3 + $0x170] sm:$0xff]  ;;  %v1474_v57 = vld [vmem:[#allocation3 + $0xa0] sm:$0xff]  ;;  %s5019_s26 = scalar_lea.vmem [#allocation2], %s5016_s12 }
  0xcc   : > { %v1491_v55 = vld [vmem:[#allocation3 + $0x30] sm:$0xff]  ;;  %3602 = vmatprep.subr.mxu0 %v1476_v51  ;;  %3938 = vmatprep.subr.mxu1 %v1492_v52  ;;  %v3515_v59 = vld [vmem:[%s5019_s26] sm:$0xff]   ;;  %v1458_v61 = vld [vmem:[#allocation3 + $0x148] sm:$0xff]  ;;  %s6004_s18 = smov (!%p5028_p0, %s3466_s18), 47 }
  0xcd   : > { %3603 = vmatpush3.msra.mxu0 %v1460_v53  ;;  %3939 = vmatpush3.msra.mxu1 %v1492_v52  ;;  %v1490_v58 = vld [vmem:[#allocation3 + $0x70] sm:$0xff]  ;;  %v3592_v60 = vld [vmem:[%s5019_s26 + $0x40] sm:$0xff]   ;;  %v3516_v62 = vunpack.c.l.bf16 %v3515_v59  ;;  %v3517_v0 = vunpack.c.h.bf16 %v3515_v59  ;;  %v1473_v2 = vld [vmem:[#allocation3 + $0x88] sm:$0xff]  ;;  %s3473_s22 = sshll.u32 %s6004_s18, 3  ;;  %s4136_s29 = smul.u32 12, %s6004_s18 }
  0xce   : > { %3604 = vmatprep.subr.mxu0 %v1475_v54  ;;  %3940 = vmatprep.subr.mxu1 %v1491_v55  ;;  %v3548_v63 = vunpack.c.l.bf16 %v3592_v60  ;;  %v3549_v1 = vunpack.c.h.bf16 %v3592_v60  ;;  %v1489_v4 = vld [vmem:[#allocation3 + $0x68] sm:$0xff]  ;;  %v1457_v5 = vld [vmem:[#allocation3 + $0x118] sm:$0xff]  ;;  %v1472_v6 = vld [vmem:[#allocation3 + $0x20] sm:$0xff]  ;;  %s5046_s28 = scalar_lea.vmem %s5917_s8, %s3473_s22  ;;  %s4137_s21 = smul.u32 24, %s6004_s18 }
  0xcf   : > { %3605 = vmatpush3.msra.mxu0 %v1459_v56  ;;  %3941 = vmatpush3.msra.mxu1 %v1491_v55  ;;  %v3585_v7 = vld [vmem:[%s5019_s26 + $0x8] sm:$0xff]   ;;  %v1488_v8 = vld [vmem:[#allocation3 + $0x50] sm:$0xff]  ;;  %v1471_v14 = vld [vmem:[#allocation3 + $0xf8] sm:$0xff]  ;;  %s5056_s20 = scalar_lea.vmem %s5909_s0, %s4136_s29  ;;  %s5584_s29 = scalar_lea.vmem %s5918_s9, %s3473_s22 }
  0xd0   : > { %3606 = vmatprep.subr.mxu0 %v1474_v57  ;;  %3942 = vmatprep.subr.mxu1 %v1490_v58  ;;  %v4184_v3 = vpack.i.bf16 %v3516_v62, %v3548_v63  ;;  %v1456_v9 = vld [vmem:[#allocation3 + $0x90] sm:$0xff]  ;;  %v4186_v10 = vpack.i.bf16 %v3517_v0, %v3549_v1  ;;  %v3593_v11 = vld [vmem:[%s5019_s26 + $0x48] sm:$0xff]   ;;  %v3520_v12 = vunpack.c.l.bf16 %v3585_v7  ;;  %v1487_v15 = vld [vmem:[#allocation3 + $0x78] sm:$0xff]  ;;  %v3521_v21 = vunpack.c.h.bf16 %v3585_v7  ;;  %s5122_s30 = scalar_lea.vmem %s5910_s1, %s4137_s21 }
  0xd1   : > { %3607 = vmatpush3.msra.mxu0 %v1458_v61  ;;  %3943 = vmatpush3.msra.mxu1 %v1490_v58  ;;  %v3552_v13 = vunpack.c.l.bf16 %v3593_v11  ;;  %v1455_v16 = vld [vmem:[#allocation3 + $0x110] sm:$0xff]  ;;  %v1470_v17 = vld [vmem:[#allocation3 + $0xe8] sm:$0xff]  ;;  %v1486_v18 = vld [vmem:[#allocation3] sm:$0xff]  ;;  %v3553_v22 = vunpack.c.h.bf16 %v3593_v11 }
  0xd2   : > { %4185 = vxpose.xlu1.b32.start [1/16] %v4184_v3, 128  ;;  %3608 = vmatprep.subr.mxu0 %v1473_v2  ;;  %v1454_v19 = vld [vmem:[#allocation3 + $0x108] sm:$0xff]  ;;  %v1453_v25 = vld [vmem:[#allocation3 + $0x178] sm:$0xff]  ;;  %v3586_v26 = vld [vmem:[%s5019_s26 + $0x10] sm:$0xff]  }
  0xd3   : > { %3944 = vmatprep.subr.mxu1 %v1489_v4  ;;  %3609 = vmatpush3.msra.mxu0 %v1457_v5  ;;  %v4188_v20 = vpack.i.bf16 %v3520_v12, %v3552_v13  ;;  %v1469_v23 = vld [vmem:[#allocation3 + $0x168] sm:$0xff]  ;;  %v3594_v27 = vld [vmem:[%s5019_s26 + $0x50] sm:$0xff]   ;;  %v1468_v28 = vld [vmem:[#allocation3 + $0xb8] sm:$0xff]  ;;  %v4190_v31 = vpack.i.bf16 %v3521_v21, %v3553_v22  ;;  %v3524_v32 = vunpack.c.l.bf16 %v3586_v26  ;;  %v3525_v41 = vunpack.c.h.bf16 %v3586_v26 }
  0xd4   : > { %3945 = vmatpush3.msra.mxu1 %v1489_v4  ;;  %3610 = vmatprep.subr.mxu0 %v1472_v6  ;;  %v1485_v24 = vld [vmem:[#allocation3 + $0x8] sm:$0xff]  ;;  %v1484_v29 = vld [vmem:[#allocation3 + $0x98] sm:$0xff]  ;;  %v1452_v30 = vld [vmem:[#allocation3 + $0x40] sm:$0xff]  ;;  %v3556_v33 = vunpack.c.l.bf16 %v3594_v27  ;;  %v3557_v42 = vunpack.c.h.bf16 %v3594_v27 }
  0xd5   : > { %3946 = vmatprep.subr.mxu1 %v1488_v8  ;;  %3611 = vmatpush3.msra.mxu0 %v1456_v9  ;;  %v1467_v34 = vld [vmem:[#allocation3 + $0xa8] sm:$0xff]  ;;  %v1483_v35 = vld [vmem:[#allocation3 + $0x18] sm:$0xff]  ;;  %v1466_v37 = vld [vmem:[#allocation3 + $0xe0] sm:$0xff] }
  0xd6   : > { %3947 = vmatpush3.msra.mxu1 %v1488_v8  ;;  %4187 = vxpose.xlu1.b32.cont [2/16] %v4186_v10, 128  ;;  %v1451_v36 = vld [vmem:[#allocation3 + $0x128] sm:$0xff]  ;;  %v1482_v38 = vld [vmem:[#allocation3 + $0xc0] sm:$0xff]  ;;  %v4192_v40 = vpack.i.bf16 %v3524_v32, %v3556_v33  ;;  %v1481_v44 = vld [vmem:[#allocation3 + $0x38] sm:$0xff]  ;;  %v4194_v53 = vpack.i.bf16 %v3525_v41, %v3557_v42 }
  0xd7   : > { %3612 = vmatprep.subr.mxu0 %v1471_v14  ;;  %3948 = vmatprep.subr.mxu1 %v1487_v15  ;;  %v1450_v39 = vld [vmem:[#allocation3 + $0x160] sm:$0xff]  ;;  %v1449_v45 = vld [vmem:[#allocation3 + $0x48] sm:$0xff]  ;;  %v1464_v48 = vld [vmem:[#allocation3 + $0x138] sm:$0xff] }
  0xd8   : > { %3613 = vmatpush3.msra.mxu0 %v1455_v16  ;;  %3949 = vmatpush3.msra.mxu1 %v1487_v15  ;;  %v1465_v43 = vld [vmem:[#allocation3 + $0x120] sm:$0xff]  ;;  %v3587_v49 = vld [vmem:[%s5019_s26 + $0x18] sm:$0xff]   ;;  %v1480_v51 = vld [vmem:[#allocation3 + $0x28] sm:$0xff] }
  0xd9   : > { %3614 = vmatprep.subr.mxu0 %v1470_v17  ;;  %3950 = vmatprep.subr.mxu1 %v1486_v18  ;;  %v5050_v46 = vld [vmem:[%s5046_s28] sm:$0xff]  ;;  %v3595_v50 = vld [vmem:[%s5019_s26 + $0x58] sm:$0xff]   ;;  %v1448_v52 = vld [vmem:[#allocation3 + $0x10] sm:$0xff]  ;;  %v3528_v57 = vunpack.c.l.bf16 %v3587_v49  ;;  %v3529_v8 = vunpack.c.h.bf16 %v3587_v49 }
  0xda   : > { %3615 = vmatpush3.msra.mxu0 %v1454_v19  ;;  %3951 = vmatpush3.msra.mxu1 %v1486_v18  ;;  %v1463_v54 = vld [vmem:[#allocation3 + $0x130] sm:$0xff]  ;;  %v1479_v55 = vld [vmem:[#allocation3 + $0xc8] sm:$0xff]  ;;  %v1366_v56 = vld [vmem:[%s5056_s20] sm:$0xff]  ;;  %v3560_v58 = vunpack.c.l.bf16 %v3595_v50  ;;  %v3561_v9 = vunpack.c.h.bf16 %v3595_v50 }
  0xdb   : > { %4189 = vxpose.xlu1.b32.cont [3/16] %v4188_v20, 128  ;;  %3616 = vmatprep.subr.mxu0 %v1469_v23  ;;  %v1447_v59 = vld [vmem:[#allocation3 + $0xd0] sm:$0xff]  ;;  %v5064_v61 = vld [vmem:[%s5046_s28 + $0x8] sm:$0xff]  ;;  %v1462_v62 = vld [vmem:[#allocation3 + $0x80] sm:$0xff]  ;;  %v1399_v1 = vunpack.c.h.bf16 %v1366_v56  ;;  %v1398_v5 = vunpack.c.l.bf16 %v1366_v56 }
  0xdc   : > { %3952 = vmatprep.subr.mxu1 %v1485_v24  ;;  %3617 = vmatpush3.msra.mxu0 %v1453_v25  ;;  %v1367_v60 = vld [vmem:[%s5056_s20 + $0x8] ss:$12 sps:$4 sm:$0xff]   ;;  %v1478_v63 = vld [vmem:[#allocation3 + $0x60] sm:$0xff]  ;;  %v4196_v3 = vpack.i.bf16 %v3528_v57, %v3560_v58  ;;  %v1368_v4 = vld [vmem:[%s5056_s20 + $0xc] sm:$0xff]  ;;  %v4198_v18 = vpack.i.bf16 %v3529_v8, %v3561_v9 }
  0xdd   : > { %3953 = vmatpush3.msra.mxu1 %v1485_v24  ;;  %3618 = vmatprep.subr.mxu0 %v1468_v28  ;;  %v1446_v0 = vld [vmem:[#allocation3 + $0xb0] sm:$0xff]  ;;  %v1400_v2 = vunpack.c.l.bf16 %v1367_v60  ;;  %v1403_v6 = vunpack.c.h.bf16 %v1367_v60  ;;  %v1371_v7 = vld [vmem:[%s5056_s20 + $0x20] ss:$12 sps:$4 sm:$0xff]   ;;  %v1402_v12 = vunpack.c.h.bf16 %v1368_v4  ;;  %v1370_v19 = vld [vmem:[%s5056_s20 + $0x18] sm:$0xff]  ;;  %v1401_v21 = vunpack.c.l.bf16 %v1368_v4 }
  0xde   : > { %3954 = vmatprep.subr.mxu1 %v1484_v29  ;;  %3619 = vmatpush3.msra.mxu0 %v1452_v30  ;;  %v1991_v10 = vld [vmem:[#allocation4 + $0x100] sm:$0xff]  ;;  %v1975_v15 = vld [vmem:[#allocation4 + $0x128] sm:$0xff]  ;;  %v1406_v16 = vunpack.c.l.bf16 %v1371_v7  ;;  %v1409_v22 = vunpack.c.h.bf16 %v1371_v7  ;;  %v1989_v26 = vld [vmem:[#allocation4 + $0x158] sm:$0xff]  ;;  %v1405_v28 = vunpack.c.h.bf16 %v1370_v19 }
  0xdf   : > { %3955 = vmatpush3.msra.mxu1 %v1484_v29  ;;  %4191 = vxpose.xlu1.b32.cont [4/16] %v4190_v31, 128  ;;  %v5070_v11 = vld [vmem:[%s5046_s28 + $0x20] sm:$0xff]  ;;  %v5078_v27 = vld [vmem:[%s5046_s28 + $0x30] sm:$0xff]  ;;  %v1988_v31 = vld [vmem:[#allocation4 + $0x178] sm:$0xff] }
  0xe0   : > { %3620 = vmatprep.subr.mxu0 %v1467_v34  ;;  %3956 = vmatprep.subr.mxu1 %v1483_v35  ;;  %v3588_v13 = vld [vmem:[%s5019_s26 + $0x20] sm:$0xff]   ;;  %v1986_v49 = vld [vmem:[#allocation4 + $0xb8] sm:$0xff]  ;;  %v1985_v58 = vld [vmem:[#allocation4 + $0x8] sm:$0xff] }
  0xe1   : > { %3621 = vmatpush3.msra.mxu0 %v1451_v36  ;;  %3957 = vmatpush3.msra.mxu1 %v1483_v35  ;;  %v3596_v14 = vld [vmem:[%s5019_s26 + $0x60] sm:$0xff]   ;;  %v3532_v24 = vunpack.c.l.bf16 %v3588_v13  ;;  %v1404_v35 = vunpack.c.l.bf16 %v1370_v19  ;;  %v1983_v9 = vld [vmem:[#allocation4 + $0xd0] sm:$0xff]  ;;  %v1966_v19 = vld [vmem:[#allocation4 + $0x118] sm:$0xff] }
  0xe2   : > { %3622 = vmatprep.subr.mxu0 %v1466_v37  ;;  %3958 = vmatprep.subr.mxu1 %v1482_v38  ;;  %v1990_v17 = vld [vmem:[#allocation4 + $0x160] sm:$0xff]  ;;  %v3564_v25 = vunpack.c.l.bf16 %v3596_v14  ;;  %v1379_v37 = vld [vmem:[%s5056_s20 + $0x50] ss:$12 sps:$4 sm:$0xff]  }
  0xe3   : > { %3623 = vmatpush3.msra.mxu0 %v1450_v39  ;;  %3959 = vmatpush3.msra.mxu1 %v1482_v38  ;;  %v1974_v20 = vld [vmem:[#allocation4 + $0x120] sm:$0xff]  ;;  %v3533_v38 = vunpack.c.h.bf16 %v3588_v13  ;;  %v3565_v39 = vunpack.c.h.bf16 %v3596_v14  ;;  %v1967_v13 = vld [vmem:[#allocation4 + $0x150] sm:$0xff] }
  0xe4   : > { %4193 = vxpose.xlu1.b32.cont [5/16] %v4192_v40, 128  ;;  %4183 = vset.pattern.permute.xlu0 %v4373_v47  ;;  %v1375_v23 = vld [vmem:[%s5056_s20 + $0x38] ss:$12 sps:$4 sm:$0xff]   ;;  %v4200_v32 = vpack.i.bf16 %v3532_v24, %v3564_v25  ;;  %v1987_v40 = vld [vmem:[#allocation4 + $0xf0] sm:$0xff] }
  0xe5   : > { %3624 = vmatprep.subr.mxu0 %v1465_v43  ;;  %3960 = vmatprep.subr.mxu1 %v1481_v44  ;;  %v1973_v29 = vld [vmem:[#allocation4 + $0x60] sm:$0xff]  ;;  %v1412_v30 = vunpack.c.l.bf16 %v1375_v23  ;;  %v1415_v36 = vunpack.c.h.bf16 %v1375_v23  ;;  %v3589_v43 = vld [vmem:[%s5019_s26 + $0x28] sm:$0xff]   ;;  %v4202_v50 = vpack.i.bf16 %v3533_v38, %v3565_v39  ;;  %v1380_v38 = vld [vmem:[%s5056_s20 + $0x54] sm:$0xff] }
  0xe6   : > { %3625 = vmatpush3.msra.mxu0 %v1449_v45  ;;  %3961 = vmatpush3.msra.mxu1 %v1481_v44  ;;  %v1372_v33 = vld [vmem:[%s5056_s20 + $0x24] sm:$0xff]  ;;  %v1971_v45 = vld [vmem:[#allocation4 + $0xf8] sm:$0xff]  ;;  %v3536_v56 = vunpack.c.l.bf16 %v3589_v43  ;;  %v3537_v7 = vunpack.c.h.bf16 %v3589_v43 }
  0xe7   : > { %1802 = vperm.xlu0 %4183, %v5050_v46   ;;  %3626 = vmatprep.subr.mxu0 %v1464_v48  ;;  %v1972_v34 = vld [vmem:[#allocation4 + $0x40] sm:$0xff]  ;;  %v1408_v42 = vunpack.c.h.bf16 %v1372_v33  ;;  %v3597_v44 = vld [vmem:[%s5019_s26 + $0x68] sm:$0xff]   ;;  %v1418_v48 = vunpack.c.l.bf16 %v1379_v37  ;;  %v1395_v39 = vld [vmem:[%s5056_s20 + $0xb0] ss:$12 sps:$4 sm:$0xff]  }
  0xe8   : > { %3962 = vmatprep.subr.mxu1 %v1480_v51  ;;  %3627 = vmatpush3.msra.mxu0 %v1448_v52  ;;  %v5084_v41 = vld [vmem:[%s5046_s28 + $0x40] sm:$0xff]  ;;  %v1970_v52 = vld [vmem:[#allocation4 + $0xa8] sm:$0xff]  ;;  %v3568_v57 = vunpack.c.l.bf16 %v3597_v44  ;;  %v3569_v8 = vunpack.c.h.bf16 %v3597_v44  ;;  %v5112_v44 = vld [vmem:[%s5046_s28 + $0x78] sm:$0xff] }
  0xe9   : > { %3963 = vmatpush3.msra.mxu1 %v1480_v51  ;;  %4195 = vxpose.xlu1.b32.cont [6/16] %v4194_v53, 128  ;;  %v1374_v51 = vld [vmem:[%s5056_s20 + $0x30] sm:$0xff]  ;;  %v1407_v53 = vunpack.c.l.bf16 %v1372_v33  ;;  %v1391_v23 = vld [vmem:[%s5056_s20 + $0x98] ss:$12 sps:$4 sm:$0xff]  }
  0xea   : > { %3628 = vmatprep.subr.mxu0 %v1463_v54  ;;  %3964 = vmatprep.subr.mxu1 %v1479_v55  ;;  %v1421_v54 = vunpack.c.h.bf16 %v1379_v37  ;;  %v1411_v60 = vunpack.c.h.bf16 %v1374_v51  ;;  %v1410_v4 = vunpack.c.l.bf16 %v1374_v51  ;;  %v1436_v33 = vunpack.c.l.bf16 %v1391_v23  ;;  %v1979_v43 = vld [vmem:[#allocation4 + $0xa0] sm:$0xff] }
  0xeb   : > { %3629 = vmatpush3.msra.mxu0 %v1447_v59  ;;  %3965 = vmatpush3.msra.mxu1 %v1479_v55  ;;  %v1383_v55 = vld [vmem:[%s5056_s20 + $0x68] ss:$12 sps:$4 sm:$0xff]   ;;  %v1439_v37 = vunpack.c.h.bf16 %v1391_v23  ;;  %v1442_v51 = vunpack.c.l.bf16 %v1395_v39  ;;  %v2003_v23 = vld [vmem:[#allocation4 + $0x18] sm:$0xff] }
  0xec   : > { %1807 = vperm.xlu0 %4183, %v5064_v61   ;;  %3630 = vmatprep.subr.mxu0 %v1462_v62  ;;  %v5092_v59 = vld [vmem:[%s5046_s28 + $0x50] sm:$0xff]  ;;  %v1969_v62 = vld [vmem:[#allocation4] sm:$0xff] }
  0xed   : > { %3966 = vmatprep.subr.mxu1 %v1478_v63  ;;  %3631 = vmatpush3.msra.mxu0 %v1446_v0  ;;  %v1984_v0 = vld [vmem:[#allocation4 + $0x78] sm:$0xff] }
  0xee   : > { %1558 = vmatprep.mubr.f32.mxu0 %v1399_v1  ;;  %3967 = vmatpush3.msra.mxu1 %v1478_v63  ;;  %v1424_v63 = vunpack.c.l.bf16 %v1383_v55  ;;  %v4204_v1 = vpack.i.bf16 %v3536_v56, %v3568_v57  ;;  %v1419_v56 = vunpack.c.l.bf16 %v1380_v38  ;;  %v1445_v57 = vunpack.c.h.bf16 %v1395_v39 }
  0xef   : > { %3968 = vmatprep.mubr.f32.mxu1 %v1400_v2  ;;  %4197 = vxpose.xlu1.b32.cont [7/16] %v4196_v3, 128  ;;  %v1376_v2 = vld [vmem:[%s5056_s20 + $0x3c] sm:$0xff]  ;;  %v1968_v3 = vld [vmem:[#allocation4 + $0xc8] sm:$0xff] }
  0xf0   : > { %1559 = vmatmul.mubr.f32.vlgmr.msra.gmra.mxu0 %v1398_v5  ;;  %3969 = vmatmul.mubr.f32.vlgmr.msra.gmra.mxu1 %v1403_v6  ;;  %v1427_v5 = vunpack.c.h.bf16 %v1383_v55  ;;  %v1387_v6 = vld [vmem:[%s5056_s20 + $0x80] ss:$12 sps:$4 sm:$0xff]   ;;  %v3599_v55 = vld [vmem:[%s5019_s26 + $0x78] sm:$0xff]  }
  0xf1   : > { %3712 = vmatprep.subr.mxu1 %v1991_v10  ;;  %1822 = vperm.xlu0 %4183, %v5070_v11   ;;  %v5098_v10 = vld [vmem:[%s5046_s28 + $0x60] sm:$0xff]  ;;  %v1430_v14 = vunpack.c.l.bf16 %v1387_v6 }
  0xf2   : > { %3713 = vmatpush3.msra.mxu1 %v1975_v15  ;;  %1563 = vmatprep.mubr.f32.mxu0 %v1402_v12  ;;  %v1414_v12 = vunpack.c.h.bf16 %v1376_v2  ;;  %v3590_v15 = vld [vmem:[%s5019_s26 + $0x30] sm:$0xff]  }
  0xf3   : > { %3714 = vmatprep.subr.mxu1 %v1990_v17  ;;  %3971 = vmatprep.mubr.f32.mxu1 %v1406_v16  ;;  %v3598_v16 = vld [vmem:[%s5019_s26 + $0x70] sm:$0xff]   ;;  %v1982_v17 = vld [vmem:[#allocation4 + $0xe0] sm:$0xff]  ;;  %v3540_v24 = vunpack.c.l.bf16 %v3590_v15 }
  0xf4   : > { %3715 = vmatpush3.msra.mxu1 %v1974_v20  ;;  %4199 = vxpose.xlu1.b32.cont [8/16] %v4198_v18, 128  ;;  %v4206_v18 = vpack.i.bf16 %v3537_v7, %v3569_v8  ;;  %v1413_v20 = vunpack.c.l.bf16 %v1376_v2  ;;  %v3572_v25 = vunpack.c.l.bf16 %v3598_v16  ;;  %v2005_v2 = vld [vmem:[#allocation4 + $0x30] sm:$0xff]  ;;  %v1913_v7 = vld [vmem:[%s5122_s30 + $0x8] sm:$0xff] }
  0xf5   : > { %1564 = vmatmul.mubr.f32.gmra.mxu0 %v1401_v21  ;;  %3972 = vmatmul.mubr.f32.gmra.mxu1 %v1409_v22  ;;  %v1433_v21 = vunpack.c.h.bf16 %v1387_v6  ;;  %v1378_v22 = vld [vmem:[%s5056_s20 + $0x48] sm:$0xff] }
  0xf6   : > { %3716 = vmatprep.subr.mxu1 %v1989_v26  ;;  %1832 = vperm.xlu0 %4183, %v5078_v27   ;;  %v1981_v26 = vld [vmem:[#allocation4 + $0x170] sm:$0xff] }
  0xf7   : > { %3717 = vmatpush3.msra.mxu1 %v1973_v29  ;;  %1568 = vmatprep.mubr.f32.mxu0 %v1405_v28  ;;  %v5106_v28 = vld [vmem:[%s5046_s28 + $0x70] sm:$0xff] }
  0xf8   : > { %3718 = vmatprep.subr.mxu1 %v1988_v31  ;;  %3974 = vmatprep.mubr.f32.mxu1 %v1412_v30  ;;  %v1965_v29 = vld [vmem:[#allocation4 + $0x90] sm:$0xff]  ;;  %v2007_v30 = vld [vmem:[#allocation4 + $0x138] sm:$0xff]  ;;  %v1417_v31 = vunpack.c.h.bf16 %v1378_v22 }
  0xf9   : > { %3719 = vmatpush3.msra.mxu1 %v1972_v34  ;;  %4201 = vxpose.xlu1.b32.cont [9/16] %v4200_v32, 128  ;;  %v1980_v32 = vld [vmem:[#allocation4 + $0x140] sm:$0xff]  ;;  %v1964_v34 = vld [vmem:[#allocation4 + $0x28] sm:$0xff] }
  0xfa   : > { %1569 = vmatmul.mubr.f32.gmra.mxu0 %v1404_v35  ;;  %3975 = vmatmul.mubr.f32.gmra.mxu1 %v1415_v36  ;;  %v4208_v35 = vpack.i.bf16 %v3540_v24, %v3572_v25  ;;  %v1416_v36 = vunpack.c.l.bf16 %v1378_v22  ;;  %v1384_v6 = vld [vmem:[%s5056_s20 + $0x6c] sm:$0xff]  ;;  %v1388_v24 = vld [vmem:[%s5056_s20 + $0x84] sm:$0xff]  ;;  %v1919_v25 = vld [vmem:[%s5122_s30 + $0x38] sm:$0xff] }
  0xfb   : > { %3720 = vmatprep.subr.mxu1 %v1987_v40  ;;  %1842 = vperm.xlu0 %4183, %v5084_v41   ;;  %v3541_v40 = vunpack.c.h.bf16 %v3590_v15  ;;  %v1426_v15 = vunpack.c.h.bf16 %v1384_v6 }
  0xfc   : > { %3721 = vmatpush3.msra.mxu1 %v1971_v45  ;;  %1573 = vmatprep.mubr.f32.mxu0 %v1408_v42  ;;  %v3573_v42 = vunpack.c.h.bf16 %v3598_v16  ;;  %v1963_v45 = vld [vmem:[#allocation4 + $0x108] sm:$0xff] }
  0xfd   : > { %3722 = vmatprep.subr.mxu1 %v1986_v49  ;;  %3977 = vmatprep.mubr.f32.mxu1 %v1418_v48  ;;  %v2006_v48 = vld [vmem:[#allocation4 + $0x58] sm:$0xff]  ;;  %v1420_v49 = vunpack.c.h.bf16 %v1380_v38  ;;  %v2004_v16 = vld [vmem:[#allocation4 + $0x148] sm:$0xff] }
  0xfe   : > { %3723 = vmatpush3.msra.mxu1 %v1970_v52  ;;  %4203 = vxpose.xlu1.b32.cont [10/16] %v4202_v50, 128  ;;  %v1978_v50 = vld [vmem:[#allocation4 + $0x98] sm:$0xff]  ;;  %v1962_v52 = vld [vmem:[#allocation4 + $0x88] sm:$0xff] }
  0xff   : > { %1574 = vmatmul.mubr.f32.gmra.mxu0 %v1407_v53  ;;  %3978 = vmatmul.mubr.f32.gmra.mxu1 %v1421_v54  ;;  %v4210_v53 = vpack.i.bf16 %v3541_v40, %v3573_v42  ;;  %v3591_v54 = vld [vmem:[%s5019_s26 + $0x38] sm:$0xff]   ;;  %v2000_v38 = vld [vmem:[#allocation4 + $0x68] sm:$0xff]  ;;  %s3471_s26 = sshll.u32 %s6004_s18, 2  ;;  %s5773_s18 = scalar_lea.vmem [#allocation7], %s5016_s12 }
 0x100   : > { %3724 = vmatprep.subr.mxu1 %v1985_v58  ;;  %1852 = vperm.xlu0 %4183, %v5092_v59   ;;  %v1382_v58 = vld [vmem:[%s5056_s20 + $0x60] sm:$0xff]  ;;  %v1925_v40 = vld [vmem:[%s5122_s30 + $0x68] sm:$0xff]  ;;  %s5274_s21 = scalar_lea.vmem %s5911_s2, %s3471_s26  ;;  %s3481_s12 = sshll.u32 %s4456_s17, 11 }
 0x101   : > { %3725 = vmatpush3.msra.mxu1 %v1969_v62  ;;  %1578 = vmatprep.mubr.f32.mxu0 %v1411_v60  ;;  %v1977_v60 = vld [vmem:[#allocation4 + $0x80] sm:$0xff]  ;;  %v3544_v62 = vunpack.c.l.bf16 %v3591_v54  ;;  %s3130_s22 = sshll.u32 %s5773_s18, 4  ;;  %s5862_s23 = scalar_lea.hbm %s5919_s10, %s3481_s12  ;;  %s5864_s22 = int_to_ptr.vmem [resolvable:$true] %s3130_s22 }
 0x102   : > { %3726 = vmatprep.subr.mxu1 %v1984_v0  ;;  %3980 = vmatprep.mubr.f32.mxu1 %v1424_v63  ;;  %v3576_v63 = vunpack.c.l.bf16 %v3599_v55  ;;  %v1961_v0 = vld [vmem:[#allocation4 + $0xc0] sm:$0xff]  ;;  %s4377_s17 = smov [#allocation7]  }
 0x103   : > { %3727 = vmatpush3.msra.mxu1 %v1968_v3  ;;  %4205 = vxpose.xlu1.b32.cont [11/16] %v4204_v1, 128  ;;  %v1976_v1 = vld [vmem:[#allocation4 + $0x130] sm:$0xff]  ;;  %v1423_v3 = vunpack.c.h.bf16 %v1382_v58  ;;  %v1392_v42 = vld [vmem:[%s5056_s20 + $0x9c] sm:$0xff] }
 0x104   : > { %1579 = vmatmul.mubr.f32.gmra.mxu0 %v1410_v4  ;;  %3981 = vmatmul.mubr.f32.gmra.mxu1 %v1427_v5  ;;  %v4374_v4 = vmov 1   ;;  %v1960_v5 = vld [vmem:[#allocation4 + $0xb0] sm:$0xff]  ;;  %v4212_v8 = vpack.i.bf16 %v3544_v62, %v3576_v63 }
 0x105   : > { %3728 = vmatprep.subr.mxu1 %v1983_v9  ;;  %1862 = vperm.xlu0 %4183, %v5098_v10   ;;  %v1422_v9 = vunpack.c.l.bf16 %v1382_v58  ;;  %v1996_v58 = vld [vmem:[#allocation4 + $0x110] sm:$0xff] }
 0x106   : > { %3729 = vmatpush3.msra.mxu1 %v1967_v13  ;;  %1583 = vmatprep.mubr.f32.mxu0 %v1414_v12  ;;  %v3545_v12 = vunpack.c.h.bf16 %v3591_v54  ;;  %v3577_v13 = vunpack.c.h.bf16 %v3599_v55  ;;  %v1394_v54 = vld [vmem:[%s5056_s20 + $0xa8] sm:$0xff]  ;;  %v1927_v55 = vld [vmem:[%s5122_s30 + $0x78] sm:$0xff] }
 0x107   : > { %3730 = vmatprep.subr.mxu1 %v1982_v17  ;;  %3983 = vmatprep.mubr.f32.mxu1 %v1430_v14  ;;  %v1912_v14 = vld [vmem:[%s5122_s30] sm:$0xff]  ;;  %v1386_v17 = vld [vmem:[%s5056_s20 + $0x78] sm:$0xff]  ;;  %v1440_v62 = vunpack.c.l.bf16 %v1394_v54 }
 0x108   : > { %3731 = vmatpush3.msra.mxu1 %v1966_v19  ;;  %4207 = vxpose.xlu1.b32.cont [12/16] %v4206_v18, 128  ;;  %v4214_v18 = vpack.i.bf16 %v3545_v12, %v3577_v13  ;;  %v1425_v19 = vunpack.c.l.bf16 %v1384_v6  ;;  %v1429_v22 = vunpack.c.h.bf16 %v1386_v17  ;;  %v1396_v63 = vld [vmem:[%s5056_s20 + $0xb4] sm:$0xff] }
 0x109   : > { %1584 = vmatmul.mubr.f32.gmra.mxu0 %v1413_v20  ;;  %3984 = vmatmul.mubr.f32.gmra.mxu1 %v1433_v21  ;;  %v1915_v20 = vld [vmem:[%s5122_s30 + $0x18] sm:$0xff]  ;;  %v5133_v21 = vld [vmem:[%s5046_s28 + $0x10] sm:$0xff] }
 0x10a   : > { %3732 = vmatprep.subr.mxu1 %v1981_v26  ;;  %1872 = vperm.xlu0 %4183, %v5106_v28   ;;  %v1428_v26 = vunpack.c.l.bf16 %v1386_v17  ;;  %v1934_v6 = vld [vmem:[%s5122_s30 + $0xb0] sm:$0xff]  ;;  %v1936_v17 = vld [vmem:[%s5122_s30 + $0xc0] sm:$0xff] }
 0x10b   : > { %3733 = vmatpush3.msra.mxu1 %v1965_v29  ;;  %3992 = vmatprep.subr.mxu0 %v2007_v30  ;;  %v1918_v29 = vld [vmem:[%s5122_s30 + $0x30] sm:$0xff] }
 0x10c   : > { %3734 = vmatprep.subr.mxu1 %v1980_v32  ;;  %1588 = vmatprep.mubr.f32.mxu0 %v1417_v31  ;;  %v1432_v31 = vunpack.c.h.bf16 %v1388_v24  ;;  %v1922_v32 = vld [vmem:[%s5122_s30 + $0x50] sm:$0xff] }
 0x10d   : > { %3986 = vmatprep.mubr.f32.mxu1 %v1436_v33  ;;  %3735 = vmatpush3.msra.mxu1 %v1964_v34  ;;  %v1431_v33 = vunpack.c.l.bf16 %v1388_v24  ;;  %v1390_v34 = vld [vmem:[%s5056_s20 + $0x90] sm:$0xff]  ;;  %s5869_s20 = scalar_lea.sflag [#allocation8], %s1241_s11 }
 0x10e   : > { %3993 = vmatpush3.msra.mxu0 %v2007_v30  ;;  %4209 = vxpose.xlu1.b32.cont [13/16] %v4208_v35, 128  ;;  %v5140_v30 = vld [vmem:[%s5046_s28 + $0x18] sm:$0xff]  ;;  %v5144_v35 = vld [vmem:[#allocation6 + $0x68] sm:$0xff]  ;;  %v1435_v39 = vunpack.c.h.bf16 %v1390_v34  ;;  %v1992_v12 = vld [vmem:[#allocation4 + $0x70] sm:$0xff] }
 0x10f   : > { %1589 = vmatmul.mubr.f32.gmra.mxu0 %v1416_v36  ;;  %3987 = vmatmul.mubr.f32.gmra.mxu1 %v1439_v37  ;;  %v2001_v36 = vld [vmem:[#allocation4 + $0x50] sm:$0xff]  ;;  %v1921_v37 = vld [vmem:[%s5122_s30 + $0x48] sm:$0xff] }
 0x110   : > { %3736 = vmatprep.subr.mxu1 %v1979_v43  ;;  %1877 = vperm.xlu0 %4183, %v5112_v44   ;;  %v1434_v43 = vunpack.c.l.bf16 %v1390_v34  ;;  %v5179_v13 = vld [vmem:[#allocation6 + $0x30] sm:$0xff] }
 0x111   : > { %3737 = vmatpush3.msra.mxu1 %v1963_v45  ;;  %3994 = vmatprep.subr.mxu0 %v2006_v48  ;;  %v5151_v45 = vld [vmem:[#allocation6 + $0x98] sm:$0xff]  ;;  %v5199_v24 = vld [vmem:[#allocation6 + $0x90] sm:$0xff] }
 0x112   : > { %3738 = vmatprep.subr.mxu1 %v1978_v50  ;;  %1593 = vmatprep.mubr.f32.mxu0 %v1420_v49  ;;  %v1999_v49 = vld [vmem:[#allocation4 + $0xd8] sm:$0xff]  ;;  %v5156_v50 = vld [vmem:[%s5046_s28 + $0x28] sm:$0xff]  ;;  %v5209_v34 = vld [vmem:[#allocation6 + $0xf0] sm:$0xff] }
 0x113   : > { %3989 = vmatprep.mubr.f32.mxu1 %v1442_v51  ;;  %3739 = vmatpush3.msra.mxu1 %v1962_v52  ;;  %v1438_v51 = vunpack.c.h.bf16 %v1392_v42  ;;  %v1998_v52 = vld [vmem:[#allocation4 + $0xe8] sm:$0xff] }
 0x114   : > { %3995 = vmatpush3.msra.mxu0 %v2006_v48  ;;  %4211 = vxpose.xlu1.b32.cont [14/16] %v4210_v53, 128  ;;  %v1924_v48 = vld [vmem:[%s5122_s30 + $0x60] sm:$0xff] }
 0x115   : > { %1594 = vmatmul.mubr.f32.gmra.mxu0 %v1419_v56  ;;  %3990 = vmatmul.mubr.f32.gmra.mxu1 %v1445_v57  ;;  %v1928_v53 = vld [vmem:[%s5122_s30 + $0x80] sm:$0xff]  ;;  %v1997_v56 = vld [vmem:[#allocation4 + $0x38] sm:$0xff]  ;;  %v1441_v57 = vunpack.c.h.bf16 %v1394_v54 }
 0x116   : > { %3740 = vmatprep.subr.mxu1 %v1977_v60  ;;  %4297 = vset.pattern.permute.xlu0 %v4374_v4  ;;  %v1931_v60 = vld [vmem:[%s5122_s30 + $0x98] sm:$0xff]  ;;  %v1444_v4 = vunpack.c.h.bf16 %v1396_v63  ;;  %v5229_v54 = vld [vmem:[#allocation6 + $0xe0] sm:$0xff] }
 0x117   : > { %3741 = vmatpush3.msra.mxu1 %v1961_v0  ;;  %2299 = vperm.xlu0 %4297, %v5050_v46   ;;  %v1916_v46 = vld [vmem:[%s5122_s30 + $0x20] sm:$0xff]  ;;  %v1930_v0 = vld [vmem:[%s5122_s30 + $0x90] sm:$0xff] }
 0x118   : > { %3742 = vmatprep.subr.mxu1 %v1976_v1  ;;  %3996 = vmatprep.subr.mxu0 %v2005_v2  ;;  %v1995_v1 = vld [vmem:[#allocation4 + $0x168] sm:$0xff] }
 0x119   : > { %1598 = vmatprep.mubr.f32.mxu0 %v1423_v3  ;;  %3743 = vmatpush3.msra.mxu1 %v1960_v5  ;;  %v5170_v3 = vld [vmem:[#allocation6 + $0xd0] sm:$0xff]  ;;  %v1994_v5 = vld [vmem:[#allocation4 + $0x48] sm:$0xff] }
 0x11a   : > { %2072 = vmatprep.mubr.f32.mxu1 %v1913_v7  ;;  %3997 = vmatpush3.msra.mxu0 %v2005_v2  ;;  %v5168_v2 = vld [vmem:[%s5046_s28 + $0x38] sm:$0xff] }
 0x11b   : > { %4213 = vxpose.xlu1.b32.cont [15/16] %v4212_v8, 128  ;;  %1599 = vmatmul.mubr.f32.gmra.mxu0 %v1422_v9  ;;  %v5175_v7 = vld [vmem:[#allocation6 + $0xf8] sm:$0xff]  ;;  %v1933_v8 = vld [vmem:[%s5122_s30 + $0xa8] sm:$0xff]  ;;  %v1993_v9 = vld [vmem:[#allocation4 + $0x20] sm:$0xff] }
 0x11c   : > { %2073 = vmatmul.mubr.f32.vlgmr.msra.gmra.mxu1 %v1912_v14  ;;  %2303 = vperm.xlu0 %4297, %v5064_v61   ;;  %v2002_v61 = vld [vmem:[#allocation4 + $0x10] sm:$0xff]  ;;  %v1937_v14 = vld [vmem:[%s5122_s30 + $0xc8] sm:$0xff] }
 0x11d   : > { %3998 = vmatprep.subr.mxu0 %v2004_v16  ;;  %1603 = vmatprep.mubr.f32.mxu0 %v1426_v15  ;;  %v1914_v15 = vld [vmem:[%s5122_s30 + $0x10] sm:$0xff] }
 0x11e   : > { %2077 = vmatprep.mubr.f32.mxu1 %v1916_v46  ;;  %3999 = vmatpush3.msra.mxu0 %v2004_v16  ;;  %v5184_v16 = vld [vmem:[#allocation6 + $0x40] sm:$0xff]  ;;  %v1917_v46 = vld [vmem:[%s5122_s30 + $0x28] sm:$0xff] }
 0x11f   : > { %4215 = vxpose.xlu1.b32.end [16/16] %v4214_v18, 128  ;;  %1604 = vmatmul.mubr.f32.gmra.mxu0 %v1425_v19  ;;  %v2441_v18 = vld [vmem:[#allocation5 + $0x50] sm:$0xff]  ;;  %v5190_v19 = vld [vmem:[%s5046_s28 + $0x48] sm:$0xff] }
 0x120   : > { %2078 = vmatmul.mubr.f32.gmra.mxu1 %v1915_v20  ;;  %2307 = vperm.xlu0 %4297, %v5133_v21   ;;  %v2440_v20 = vld [vmem:[#allocation5 + $0x8] sm:$0xff] }
 0x121   : > { %4000 = vmatprep.subr.mxu0 %v2003_v23  ;;  %1608 = vmatprep.mubr.f32.mxu0 %v1429_v22  ;;  %v1940_v22 = vld [vmem:[%s5122_s30 + $0xe0] sm:$0xff] }
 0x122   : > { %2082 = vmatprep.mubr.f32.mxu1 %v1919_v25  ;;  %4001 = vmatpush3.msra.mxu0 %v2003_v23  ;;  %v1920_v23 = vld [vmem:[%s5122_s30 + $0x40] sm:$0xff]  ;;  %v1923_v25 = vld [vmem:[%s5122_s30 + $0x58] sm:$0xff] }
 0x123   : > { %1609 = vmatmul.mubr.f32.gmra.mxu0 %v1428_v26  ;;  %4002 = vmatprep.subr.mxu0 %v2002_v61  ;;  %v1939_v26 = vld [vmem:[%s5122_s30 + $0xd8] sm:$0xff] }
 0x124   : > { %2083 = vmatmul.mubr.f32.gmra.mxu1 %v1918_v29  ;;  %2311 = vperm.xlu0 %4297, %v5140_v30   ;;  %v2438_v29 = vld [vmem:[#allocation5 + $0x20] sm:$0xff] }
 0x125   : > { %1613 = vmatprep.mubr.f32.mxu0 %v1432_v31  ;;  %2087 = vmatprep.mubr.f32.mxu1 %v1922_v32  ;;  %v5204_v31 = vld [vmem:[#allocation6 + $0x48] sm:$0xff]  ;;  %v1943_v32 = vld [vmem:[%s5122_s30 + $0xf8] sm:$0xff] }
 0x126   : > { %4003 = vmatpush3.msra.mxu0 %v2002_v61  ;;  %4104 = vmatprep.subr.mxu1 %v5144_v35  ;;  %v2439_v61 = vld [vmem:[#allocation5 + $0x78] sm:$0xff] }
 0x127   : > { %1614 = vmatmul.mubr.f32.gmra.mxu0 %v1431_v33  ;;  %4004 = vmatprep.subr.mxu0 %v2001_v36  ;;  %v1926_v33 = vld [vmem:[%s5122_s30 + $0x70] sm:$0xff] }
 0x128   : > { %2088 = vmatmul.mubr.f32.gmra.mxu1 %v1921_v37  ;;  %4005 = vmatpush3.msra.mxu0 %v2001_v36  ;;  %v1942_v36 = vld [vmem:[%s5122_s30 + $0xf0] sm:$0xff]  ;;  %v1929_v37 = vld [vmem:[%s5122_s30 + $0x88] sm:$0xff] }
 0x129   : > { %2315 = vperm.xlu0 %4297, %v5070_v11   ;;  %4006 = vmatprep.subr.mxu0 %v2000_v38  ;;  %v1437_v11 = vunpack.c.l.bf16 %v1392_v42  ;;  %v1946_v42 = vld [vmem:[%s5122_s30 + $0x110] sm:$0xff] }
 0x12a   : > { %1618 = vmatprep.mubr.f32.mxu0 %v1435_v39  ;;  %2092 = vmatprep.mubr.f32.mxu1 %v1925_v40  ;;  %v5215_v39 = vld [vmem:[%s5046_s28 + $0x58] sm:$0xff]  ;;  %v2436_v40 = vld [vmem:[#allocation5 + $0x68] sm:$0xff] }
 0x12b   : > { %4007 = vmatpush3.msra.mxu0 %v2000_v38  ;;  %4120 = vmatpush3.msra.mxu1 %v5151_v45  ;;  %v2437_v38 = vld [vmem:[#allocation5 + $0x70] sm:$0xff] }
 0x12c   : > { %1619 = vmatmul.mubr.f32.gmra.mxu0 %v1434_v43  ;;  %2093 = vmatmul.mubr.f32.gmra.mxu1 %v1924_v48  ;;  %v1932_v43 = vld [vmem:[%s5122_s30 + $0xa0] sm:$0xff] }
 0x12d   : > { %4008 = vmatprep.subr.mxu0 %v1999_v49  ;;  %2319 = vperm.xlu0 %4297, %v5156_v50   ;;  %v5224_v48 = vld [vmem:[#allocation6 + $0xa0] sm:$0xff] }
 0x12e   : > { %4009 = vmatpush3.msra.mxu0 %v1999_v49  ;;  %1623 = vmatprep.mubr.f32.mxu0 %v1438_v51  ;;  %v1935_v49 = vld [vmem:[%s5122_s30 + $0xb8] sm:$0xff]  ;;  %v1945_v51 = vld [vmem:[%s5122_s30 + $0x108] sm:$0xff] }
 0x12f   : > { %4010 = vmatprep.subr.mxu0 %v1998_v52  ;;  %2097 = vmatprep.mubr.f32.mxu1 %v1928_v53  ;;  %v2434_v53 = vld [vmem:[#allocation5 + $0x28] sm:$0xff] }
 0x130   : > { %4011 = vmatpush3.msra.mxu0 %v1998_v52  ;;  %2098 = vmatmul.mubr.f32.gmra.mxu1 %v1927_v55  ;;  %v2435_v52 = vld [vmem:[#allocation5] sm:$0xff]  ;;  %v1938_v55 = vld [vmem:[%s5122_s30 + $0xd0] sm:$0xff] }
 0x131   : > { %1624 = vmatmul.mubr.f32.gmra.mxu0 %v1437_v11  ;;  %4012 = vmatprep.subr.mxu0 %v1997_v56  ;;  %v1949_v11 = vld [vmem:[%s5122_s30 + $0x128] sm:$0xff] }
 0x132   : > { %4013 = vmatpush3.msra.mxu0 %v1997_v56  ;;  %2323 = vperm.xlu0 %4297, %v5078_v27   ;;  %v1443_v27 = vunpack.c.l.bf16 %v1396_v63  ;;  %v5234_v56 = vld [vmem:[#allocation6] sm:$0xff]  ;;  %v2432_v63 = vld [vmem:[#allocation5 + $0x10] sm:$0xff] }
 0x133   : > { %4014 = vmatprep.subr.mxu0 %v1996_v58  ;;  %1628 = vmatprep.mubr.f32.mxu0 %v1441_v57  ;;  %v1948_v57 = vld [vmem:[%s5122_s30 + $0x120] sm:$0xff] }
 0x134   : > { %2102 = vmatprep.mubr.f32.mxu1 %v1931_v60  ;;  %4015 = vmatpush3.msra.mxu0 %v1996_v58  ;;  %v1941_v58 = vld [vmem:[%s5122_s30 + $0xe8] sm:$0xff]  ;;  %v2433_v60 = vld [vmem:[#allocation5 + $0x58] sm:$0xff] }
 0x135   : > { %1629 = vmatmul.mubr.f32.gmra.mxu0 %v1440_v62  ;;  %2103 = vmatmul.mubr.f32.gmra.mxu1 %v1930_v0  ;;  %v5240_v62 = vld [vmem:[%s5046_s28 + $0x68] sm:$0xff]  ;;  %v1952_v0 = vld [vmem:[%s5122_s30 + $0x140] sm:$0xff] }
 0x136   : > { %4016 = vmatprep.subr.mxu0 %v1995_v1  ;;  %2327 = vperm.xlu0 %4297, %v5168_v2  }
 0x137   : > { %4017 = vmatpush3.msra.mxu0 %v1995_v1  ;;  %4105 = vmatprep.subr.mxu1 %v5170_v3  ;;  %v1944_v1 = vld [vmem:[%s5122_s30 + $0x100] sm:$0xff] }
 0x138   : > { %4018 = vmatprep.subr.mxu0 %v1994_v5  ;;  %1633 = vmatprep.mubr.f32.mxu0 %v1444_v4  ;;  %v5249_v4 = vld [vmem:[#allocation6 + $0x50] sm:$0xff] }
 0x139   : > { %2107 = vmatprep.mubr.f32.mxu1 %v1934_v6  ;;  %4019 = vmatpush3.msra.mxu0 %v1994_v5  ;;  %v1947_v5 = vld [vmem:[%s5122_s30 + $0x118] sm:$0xff] }
 0x13a   : > { %4121 = vmatpush3.msra.mxu1 %v5175_v7  ;;  %1634 = vmatmul.mubr.f32.gmra.mxu0 %v1443_v27  ;;  %v1951_v6 = vld [vmem:[%s5122_s30 + $0x138] sm:$0xff]  ;;  %v2431_v27 = vld [vmem:[#allocation5 + $0x30] sm:$0xff] }
 0x13b   : > { %2108 = vmatmul.mubr.f32.gmra.mxu1 %v1933_v8  ;;  %4020 = vmatprep.subr.mxu0 %v1993_v9  ;;  %v2430_v8 = vld [vmem:[#allocation5 + $0x38] sm:$0xff] }
 0x13c   : > { %4021 = vmatpush3.msra.mxu0 %v1993_v9  ;;  %2331 = vperm.xlu0 %4297, %v5084_v41   ;;  %v5193_v41 = vld [vmem:[#allocation6 + $0xb8] sm:$0xff] }
 0x13d   : > { %4022 = vmatprep.subr.mxu0 %v1992_v12  ;;  %4106 = vmatprep.subr.mxu1 %v5179_v13  ;;  %v5254_v9 = vld [vmem:[#allocation6 + $0x58] sm:$0xff] }
 0x13e   : > { %2112 = vmatprep.mubr.f32.mxu1 %v1937_v14  ;;  %4023 = vmatpush3.msra.mxu0 %v1992_v12  ;;  %v1955_v12 = vld [vmem:[%s5122_s30 + $0x158] sm:$0xff]  ;;  %v1950_v14 = vld [vmem:[%s5122_s30 + $0x130] sm:$0xff] }
 0x13f   : > { %4024 = vmatprep.mubr.f32.mxu0 %v1914_v15  ;;  %4122 = vmatpush3.msra.mxu1 %v5184_v16  ;;  %v5259_v15 = vld [vmem:[#allocation6 + $0x80] sm:$0xff] }
 0x140   : > { %2113 = vmatmul.mubr.f32.gmra.mxu1 %v1936_v17  ;;  %4025 = vmatmul.mubr.f32.vlgmr.msra.gmra.mxu0 %v1917_v46  ;;  %v1954_v17 = vld [vmem:[%s5122_s30 + $0x150] sm:$0xff]  ;;  %v1953_v46 = vld [vmem:[%s5122_s30 + $0x148] sm:$0xff] }
 0x141   : > { %4048 = vmatprep.subr.mxu0 %v2441_v18  ;;  %2335 = vperm.xlu0 %4297, %v5190_v19  }
 0x142   : > { %4049 = vmatpush3.msra.mxu0 %v2441_v18  ;;  %4107 = vmatprep.subr.mxu1 %v5193_v41  ;;  %v2429_v18 = vld [vmem:[#allocation5 + $0x60] sm:$0xff] }
 0x143   : > { %4050 = vmatprep.subr.mxu0 %v2440_v20  ;;  %2117 = vmatprep.mubr.f32.mxu1 %v1940_v22  ;;  %v2428_v22 = vld [vmem:[#allocation5 + $0x40] sm:$0xff] }
 0x144   : > { %4027 = vmatprep.mubr.f32.mxu0 %v1920_v23  ;;  %4051 = vmatpush3.msra.mxu0 %v2440_v20  ;;  %v1958_v23 = vld [vmem:[%s5122_s30 + $0x170] sm:$0xff] }
 0x145   : > { %4123 = vmatpush3.msra.mxu1 %v5199_v24  ;;  %4028 = vmatmul.mubr.f32.gmra.mxu0 %v1923_v25  ;;  %v1956_v25 = vld [vmem:[%s5122_s30 + $0x160] sm:$0xff] }
 0x146   : > { %2118 = vmatmul.mubr.f32.gmra.mxu1 %v1939_v26  ;;  %4052 = vmatprep.subr.mxu0 %v2439_v61 }
 0x147   : > { %4053 = vmatpush3.msra.mxu0 %v2439_v61  ;;  %2339 = vperm.xlu0 %4297, %v5092_v59   ;;  %v5218_v59 = vld [vmem:[#allocation6 + $0xe8] sm:$0xff]  ;;  %v5281_v61 = vld [vmem:[#allocation6 + $0xd8] sm:$0xff] }
 0x148   : > { %4054 = vmatprep.subr.mxu0 %v2438_v29  ;;  %4108 = vmatprep.subr.mxu1 %v5204_v31 }
 0x149   : > { %2122 = vmatprep.mubr.f32.mxu1 %v1943_v32  ;;  %4030 = vmatprep.mubr.f32.mxu0 %v1926_v33  ;;  %v1957_v33 = vld [vmem:[%s5122_s30 + $0x168] sm:$0xff] }
 0x14a   : > { %4055 = vmatpush3.msra.mxu0 %v2438_v29  ;;  %4124 = vmatpush3.msra.mxu1 %v5209_v34  ;;  %v1959_v29 = vld [vmem:[%s5122_s30 + $0x178] sm:$0xff] }
 0x14b   : > { %2123 = vmatmul.mubr.f32.gmra.mxu1 %v1942_v36  ;;  %4031 = vmatmul.mubr.f32.gmra.mxu0 %v1929_v37  ;;  %v2427_v36 = vld [vmem:[#allocation5 + $0x48] sm:$0xff]  ;;  %v3483_v37 = vld [vmem:[%s5274_s21] sm:$0xff]  }
 0x14c   : > { %4056 = vmatprep.subr.mxu0 %v2437_v38  ;;  %2343 = vperm.xlu0 %4297, %v5215_v39  }
 0x14d   : > { %4057 = vmatpush3.msra.mxu0 %v2437_v38  ;;  %4109 = vmatprep.subr.mxu1 %v5218_v59  ;;  %v5289_v38 = vld [vmem:[#allocation6 + $0x78] sm:$0xff] }
 0x14e   : > { %4058 = vmatprep.subr.mxu0 %v2436_v40  ;;  %2127 = vmatprep.mubr.f32.mxu1 %v1946_v42 }
 0x14f   : > { %4033 = vmatprep.mubr.f32.mxu0 %v1932_v43  ;;  %4059 = vmatpush3.msra.mxu0 %v2436_v40  ;;  %v3484_v40 = vunpack.c.l.bf16 %v3483_v37 }
 0x150   : > { %4125 = vmatpush3.msra.mxu1 %v5224_v48  ;;  %4034 = vmatmul.mubr.f32.gmra.mxu0 %v1935_v49  ;;  %v3485_v49 = vunpack.c.h.bf16 %v3483_v37 }
 0x151   : > { %2128 = vmatmul.mubr.f32.gmra.mxu1 %v1945_v51  ;;  %4060 = vmatprep.subr.mxu0 %v2435_v52  ;;  %v5296_v51 = vld [vmem:[#allocation6 + $0x60] sm:$0xff] }
 0x152   : > { %4061 = vmatpush3.msra.mxu0 %v2435_v52  ;;  %2347 = vperm.xlu0 %4297, %v5098_v10   ;;  %v5243_v10 = vld [vmem:[#allocation6 + $0x18] sm:$0xff]  ;;  %v3578_v52 = vld [vmem:[%s5274_s21 + $0x8] sm:$0xff]  }
 0x153   : > { %4062 = vmatprep.subr.mxu0 %v2434_v53  ;;  %4110 = vmatprep.subr.mxu1 %v5229_v54 }
 0x154   : > { %2132 = vmatprep.mubr.f32.mxu1 %v1949_v11  ;;  %4036 = vmatprep.mubr.f32.mxu0 %v1938_v55  ;;  %v3488_v11 = vunpack.c.l.bf16 %v3578_v52 }
 0x155   : > { %4063 = vmatpush3.msra.mxu0 %v2434_v53  ;;  %4126 = vmatpush3.msra.mxu1 %v5234_v56  ;;  %v5301_v53 = vld [vmem:[#allocation6 + $0x88] sm:$0xff] }
 0x156   : > { %2133 = vmatmul.mubr.f32.gmra.mxu1 %v1948_v57  ;;  %4037 = vmatmul.mubr.f32.gmra.mxu0 %v1941_v58  ;;  %v5311_v58 = vld [vmem:[#allocation6 + $0x10] sm:$0xff] }
 0x157   : > { %4064 = vmatprep.subr.mxu0 %v2433_v60  ;;  %2351 = vperm.xlu0 %4297, %v5240_v62  }
 0x158   : > { %4065 = vmatpush3.msra.mxu0 %v2433_v60  ;;  %4111 = vmatprep.subr.mxu1 %v5243_v10  ;;  %v3579_v60 = vld [vmem:[%s5274_s21 + $0x10] sm:$0xff]  }
 0x159   : > { %4066 = vmatprep.subr.mxu0 %v2432_v63  ;;  %2137 = vmatprep.mubr.f32.mxu1 %v1952_v0  ;;  %v4375_v0 = vmov 2  }
 0x15a   : > { %4039 = vmatprep.mubr.f32.mxu0 %v1944_v1  ;;  %4067 = vmatpush3.msra.mxu0 %v2432_v63  ;;  %v5317_v63 = vld [vmem:[#allocation6 + $0x70] sm:$0xff]  ;;  %v3493_v1 = vunpack.c.h.bf16 %v3579_v60 }
 0x15b   : > { %4127 = vmatpush3.msra.mxu1 %v5249_v4  ;;  %4040 = vmatmul.mubr.f32.gmra.mxu0 %v1947_v5  ;;  %v3580_v5 = vld [vmem:[%s5274_s21 + $0x18] sm:$0xff]  }
 0x15c   : > { %2138 = vmatmul.mubr.f32.gmra.mxu1 %v1951_v6  ;;  %4068 = vmatprep.subr.mxu0 %v2431_v27 }
 0x15d   : > { %4069 = vmatpush3.msra.mxu0 %v2431_v27  ;;  %2355 = vperm.xlu0 %4297, %v5106_v28   ;;  %v5268_v28 = vld [vmem:[#allocation6 + $0x38] sm:$0xff]  ;;  %v3496_v27 = vunpack.c.l.bf16 %v3580_v5 }
 0x15e   : > { %4070 = vmatprep.subr.mxu0 %v2430_v8  ;;  %4112 = vmatprep.subr.mxu1 %v5254_v9 }
 0x15f   : > { %2142 = vmatprep.mubr.f32.mxu1 %v1955_v12  ;;  %4042 = vmatprep.mubr.f32.mxu0 %v1950_v14  ;;  %v5265_v20 = vpop.trf.xlu1  ;;  %v3497_v12 = vunpack.c.h.bf16 %v3580_v5  ;;  %v3581_v14 = vld [vmem:[%s5274_s21 + $0x20] sm:$0xff]  }
 0x160   : > { %4071 = vmatpush3.msra.mxu0 %v2430_v8  ;;  %4128 = vmatpush3.msra.mxu1 %v5259_v15  ;;  %v5348_v8 = vld [vmem:[#allocation6 + $0x20] sm:$0xff] }
 0x161   : > { %2143 = vmatmul.mubr.f32.gmra.mxu1 %v1954_v17  ;;  %4043 = vmatmul.mubr.f32.gmra.mxu0 %v1953_v46 }
 0x162   : > { %4072 = vmatprep.subr.mxu0 %v2429_v18  ;;  %2359 = vperm.xlu0 %4297, %v5112_v44   ;;  %v5278_v26 = vpop.permute.xlu0 %1802  ;;  %v2426_v44 = vld [vmem:[#allocation5 + $0x18] sm:$0xff] }
 0x163   : > { %4073 = vmatpush3.msra.mxu0 %v2429_v18  ;;  %4113 = vmatprep.subr.mxu1 %v5268_v28  ;;  %v5284_v32 = vpop.trf.xlu1  ;;  %v5370_v18 = vld [vmem:[#allocation6 + $0xc8] sm:$0xff] }
 0x164   : > { %4074 = vmatprep.subr.mxu0 %v2428_v22  ;;  %2147 = vmatprep.mubr.f32.mxu1 %v1958_v23  ;;  %v3582_v23 = vld [vmem:[%s5274_s21 + $0x28] sm:$0xff]  }
 0x165   : > { %4045 = vmatprep.mubr.f32.mxu0 %v1956_v25  ;;  %4075 = vmatpush3.msra.mxu0 %v2428_v22  ;;  %v3501_v22 = vunpack.c.h.bf16 %v3581_v14  ;;  %v3505_v25 = vunpack.c.h.bf16 %v3582_v23 }
 0x166   : > { %4129 = vmatpush3.msra.mxu1 %v5281_v61  ;;  %4046 = vmatmul.mubr.f32.gmra.mxu0 %v1959_v29  ;;  %v3583_v29 = vld [vmem:[%s5274_s21 + $0x30] sm:$0xff]  }
 0x167   : > { %2148 = vmatmul.mubr.f32.gmra.mxu1 %v1957_v33  ;;  %4076 = vmatprep.subr.mxu0 %v2427_v36  ;;  %v5291_v42 = vpop.trf.xlu1  ;;  %v5293_v43 = vpop.permute.xlu0 %1807  ;;  %v3509_v37 = vunpack.c.h.bf16 %v3583_v29 }
 0x168   : > { %4077 = vmatpush3.msra.mxu0 %v2427_v36  ;;  %4296 = vset.pattern.permute.xlu1 %v4373_v47  ;;  %v3489_v47 = vunpack.c.h.bf16 %v3578_v52 }
 0x169   : > { %4078 = vmatprep.subr.mxu0 %v2426_v44  ;;  %4114 = vmatprep.subr.mxu1 %v5289_v38 }
 0x16a   : > { %1812 = vperm.xlu1 %4296, %v5133_v21   ;;  %4079 = vmatpush3.msra.mxu0 %v2426_v44  ;;  %v3584_v44 = vld [vmem:[%s5274_s21 + $0x38] sm:$0xff]   ;;  %s4311_s21 = scalar_lea.vmem %s5864_s22, 2048 }
 0x16b   : > { %4080 = vmatprep.mubr.f32.mxu0 %v3484_v40  ;;  %4130 = vmatpush3.msra.mxu1 %v5296_v51  ;;  %v5304_v55 = vpop.trf.xlu1  ;;  %v3513_v52 = vunpack.c.h.bf16 %v3584_v44  ;;  %p4312_p1 = scmp.ne.s32.totalorder %s5864_s22, %s4311_s21 }
 0x16c   : > { %4081 = vmatmul.mubr.f32.vlgmr.msra.gmra.mxu0 %v3485_v49  ;;  %3856 = vmatprep.subr.mxu0 %v5144_v35  ;;  %v5307_v57 = vpop.permute.xlu0 %1822 }
 0x16d   : > { %3857 = vmatpush3.msra.mxu0 %v5151_v45  ;;  %4115 = vmatprep.subr.mxu1 %v5301_v53  ;;  %v3492_v45 = vunpack.c.l.bf16 %v3579_v60  ;;  %p4313_p2 = pnand %p4312_p1, %p4478_p6 }
 0x16e   : > { %3858 = vmatprep.subr.mxu0 %v5170_v3  ;;  %1817 = vperm.xlu1 %4296, %v5140_v30  }
 0x16f   : > { %4083 = vmatprep.mubr.f32.mxu0 %v3488_v11  ;;  %3859 = vmatpush3.msra.mxu0 %v5175_v7  ;;  %v5319_v35 = vpop.trf.xlu1  ;;  %v5328_v7 = vld [vmem:[#allocation6 + $0x8] sm:$0xff]  ;;  %p4314_p3 = pneg %p4313_p2 }
 0x170   : > { %4131 = vmatpush3.msra.mxu1 %v5311_v58  ;;  %4084 = vmatmul.mubr.f32.gmra.mxu0 %v3489_v47 }
 0x171   : > { %3860 = vmatprep.subr.mxu0 %v5179_v13  ;;  %4298 = vset.pattern.permute.xlu0 %v4375_v0  ;;  %v5324_v3 = vpop.permute.xlu0 %1832  ;;  %v5336_v13 = vld [vmem:[%s5046_s28] sm:$0xff] }
 0x172   : > { %3861 = vmatpush3.msra.mxu0 %v5184_v16  ;;  %4116 = vmatprep.subr.mxu1 %v5317_v63  ;;  %v5339_v16 = vld [vmem:[#allocation6 + $0xa8] sm:$0xff] }
 0x173   : > { %3862 = vmatprep.subr.mxu0 %v5193_v41  ;;  %1827 = vperm.xlu1 %4296, %v5156_v50   ;;  %v5333_v6 = vpop.trf.xlu1 }
 0x174   : > { %2588 = vperm.xlu0 %4298, %v5336_v13   ;;  %4086 = vmatprep.mubr.f32.mxu0 %v3492_v45  ;;  %v4220_v45 = vunpack.i.h.bf16 %v5265_v20 }
 0x175   : > { %3863 = vmatpush3.msra.mxu0 %v5199_v24  ;;  %4132 = vmatpush3.msra.mxu1 %v5328_v7  ;;  %v5356_v24 = vld [vmem:[%s5046_s28 + $0x8] sm:$0xff] }
 0x176   : > { %4087 = vmatmul.mubr.f32.gmra.mxu0 %v3493_v1  ;;  %3864 = vmatprep.subr.mxu0 %v5204_v31  ;;  %v5344_v41 = vpop.permute.xlu0 %1842  ;;  %v5359_v31 = vld [vmem:[#allocation6 + $0xb0] sm:$0xff] }
 0x177   : > { %3865 = vmatpush3.msra.mxu0 %v5209_v34  ;;  %4117 = vmatprep.subr.mxu1 %v5339_v16  ;;  %v5351_v17 = vpop.trf.xlu1  ;;  %v3500_v34 = vunpack.c.l.bf16 %v3581_v14 }
 0x178   : > { %3866 = vmatprep.subr.mxu0 %v5218_v59  ;;  %1837 = vperm.xlu1 %4296, %v5168_v2   ;;  %v4247_v11 = vunpack.i.l.bf16 %v5351_v17  ;;  %v4250_v60 = vunpack.i.h.bf16 %v5351_v17 }
 0x179   : > { %2592 = vperm.xlu0 %4298, %v5356_v24   ;;  %4089 = vmatprep.mubr.f32.mxu0 %v3496_v27  ;;  %v4225_v27 = vunpack.i.h.bf16 %v5284_v32 }
 0x17a   : > { %3867 = vmatpush3.msra.mxu0 %v5224_v48  ;;  %4133 = vmatpush3.msra.mxu1 %v5348_v8  ;;  %v2763_v48 = vld [vmem:[#allocation6 + $0x28] sm:$0xff] }
 0x17b   : > { %4090 = vmatmul.mubr.f32.gmra.mxu0 %v3497_v12  ;;  %3868 = vmatprep.subr.mxu0 %v5229_v54  ;;  %v5364_v46 = vpop.trf.xlu1  ;;  %v5366_v59 = vpop.permute.xlu0 %1852  ;;  %v3504_v54 = vunpack.c.l.bf16 %v3582_v23 }
 0x17c   : > { %5926 = vst [vmem:[#allocation11_spill] sm:$0xff] %v5366_v59  ;;  %3869 = vmatpush3.msra.mxu0 %v5234_v56  ;;  %4118 = vmatprep.subr.mxu1 %v5359_v31  ;;  %v4255_v1 = vunpack.i.h.bf16 %v5364_v46 }
 0x17d   : > { %3870 = vmatprep.subr.mxu0 %v5243_v10  ;;  %2596 = vperm.xlu0 %4298, %v5133_v21   ;;  %v2747_v10 = vld [vmem:[#allocation6 + $0xc0] sm:$0xff] }
 0x17e   : > { %4092 = vmatprep.mubr.f32.mxu0 %v3500_v34  ;;  %3871 = vmatpush3.msra.mxu0 %v5249_v4  ;;  %v4237_v4 = vunpack.i.l.bf16 %v5319_v35  ;;  %v5447_v34 = vld [vmem:[%s5046_s28 + $0x30] sm:$0xff] }
 0x17f   : > { %4134 = vmatpush3.msra.mxu1 %v5370_v18  ;;  %1847 = vperm.xlu1 %4296, %v5190_v19   ;;  %v5378_v56 = vpop.trf.xlu1 }
 0x180   : > { %4093 = vmatmul.mubr.f32.gmra.mxu0 %v3501_v22  ;;  %3872 = vmatprep.subr.mxu0 %v5254_v9  ;;  %v5382_v33 = vpop.permute.xlu0 %1862  ;;  %v3508_v9 = vunpack.c.l.bf16 %v3583_v29  ;;  %v4260_v12 = vunpack.i.h.bf16 %v5378_v56  ;;  %v4376_v29 = vmov 3  }
 0x181   : > { %5927 = vst [vmem:[#allocation12_spill] sm:$0xff] %v5382_v33  ;;  %3873 = vmatpush3.msra.mxu0 %v5259_v15  ;;  %4119 = vmatprep.subr.mxu1 %v2763_v48  ;;  %v4240_v15 = vunpack.i.h.bf16 %v5319_v35 }
 0x182   : > { %3874 = vmatprep.subr.mxu0 %v5268_v28  ;;  %2600 = vperm.xlu0 %4298, %v5140_v30   ;;  %v5396_v28 = vld [vmem:[%s5046_s28 + $0x20] sm:$0xff] }
 0x183   : > { %4095 = vmatprep.mubr.f32.mxu0 %v3504_v54  ;;  %3875 = vmatpush3.msra.mxu0 %v5281_v61  ;;  %v5389_v36 = vpop.trf.xlu1  ;;  %v4242_v61 = vunpack.i.l.bf16 %v5333_v6  ;;  %v5462_v54 = vld [vmem:[%s5046_s28 + $0x50] sm:$0xff] }
 0x184   : > { %4135 = vmatpush3.msra.mxu1 %v2747_v10  ;;  %4096 = vmatmul.mubr.f32.gmra.mxu0 %v3505_v25  ;;  %v4262_v14 = vunpack.i.l.bf16 %v5389_v36 }
 0x185   : > { %3876 = vmatprep.subr.mxu0 %v5289_v38  ;;  %2927 = vmatprep.mubr.f32.mxu1 %v4237_v4  ;;  %v5400_v40 = vpop.permute.xlu0 %1872  ;;  %v3512_v38 = vunpack.c.l.bf16 %v3584_v44 }
 0x186   : > { %3877 = vmatpush3.msra.mxu0 %v5296_v51  ;;  %2604 = vperm.xlu0 %4298, %v5396_v28   ;;  %5928 = vst [vmem:[#allocation13_spill] sm:$0xff] %v5400_v40  ;;  %v4245_v51 = vunpack.i.h.bf16 %v5333_v6  ;;  %v4257_v6 = vunpack.i.l.bf16 %v5378_v56 }
 0x187   : > { %3878 = vmatprep.subr.mxu0 %v5301_v53  ;;  %4098 = vmatprep.mubr.f32.mxu0 %v3508_v9  ;;  %v5403_v49 = vpop.trf.xlu1  ;;  %v5475_v9 = vld [vmem:[%s5046_s28 + $0x60] sm:$0xff] }
 0x188   : > { %3879 = vmatpush3.msra.mxu0 %v5311_v58  ;;  %1857 = vperm.xlu1 %4296, %v5215_v39   ;;  %v4217_v58 = vunpack.i.l.bf16 %v5265_v20  ;;  %v5436_v20 = vld [vmem:[%s5046_s28 + $0x40] sm:$0xff]  ;;  %v4270_v56 = vunpack.i.h.bf16 %v5403_v49 }
 0x189   : > { %2928 = vmatmul.mubr.f32.vlgmr.msra.gmra.mxu1 %v4240_v15  ;;  %4099 = vmatmul.mubr.f32.gmra.mxu0 %v3509_v37 }
 0x18a   : > { %3880 = vmatprep.subr.mxu0 %v5317_v63  ;;  %2932 = vmatprep.mubr.f32.mxu1 %v4242_v61  ;;  %v4252_v63 = vunpack.i.l.bf16 %v5364_v46  ;;  %v4265_v46 = vunpack.i.h.bf16 %v5389_v36  ;;  %v4310_v61 = vld [vmem:[%s5046_s28 + $0x78] sm:$0xff] }
 0x18b   : > { %3881 = vmatpush3.msra.mxu0 %v5328_v7  ;;  %2608 = vperm.xlu0 %4298, %v5156_v50   ;;  %v5411_v53 = vpop.trf.xlu1  ;;  %v5415_v47 = vpop.permute.xlu0 %1877  ;;  %v4222_v7 = vunpack.i.l.bf16 %v5284_v32  ;;  %v4230_v32 = vunpack.i.h.bf16 %v5291_v42 }
 0x18c   : > { %3882 = vmatprep.subr.mxu0 %v5339_v16  ;;  %4101 = vmatprep.mubr.f32.mxu0 %v3512_v38  ;;  %v4272_v25 = vunpack.i.l.bf16 %v5411_v53  ;;  %v4275_v4 = vunpack.i.h.bf16 %v5411_v53 }
 0x18d   : > { %3883 = vmatpush3.msra.mxu0 %v5348_v8  ;;  %2933 = vmatmul.mubr.f32.gmra.mxu1 %v4245_v51  ;;  %v4227_v8 = vunpack.i.l.bf16 %v5291_v42  ;;  %v4235_v42 = vunpack.i.h.bf16 %v5304_v55 }
 0x18e   : > { %4102 = vmatmul.mubr.f32.gmra.mxu0 %v3513_v52  ;;  %3884 = vmatprep.subr.mxu0 %v5359_v31 }
 0x18f   : > { %3885 = vmatpush3.msra.mxu0 %v5370_v18  ;;  %2907 = vmatprep.mubr.f32.mxu0 %v4217_v58  ;;  %v5423_v35 = vpop.trf.xlu1  ;;  %v4267_v18 = vunpack.i.l.bf16 %v5403_v49 }
 0x190   : > { %3886 = vmatprep.subr.mxu0 %v2763_v48  ;;  %2937 = vmatprep.mubr.f32.mxu1 %v4247_v11  ;;  %v5458_v48 = vld [vmem:[%s5046_s28 + $0x70] sm:$0xff]  ;;  %v4280_v36 = vunpack.i.h.bf16 %v5423_v35  ;;  %s4315_s28 = sshll.u32 %s4377_s17, 4  ;;  %s4316_s28 = int_to_ptr.vmem [resolvable:$false] %s4315_s28 }
 0x191   : > { %2616 = vperm.xlu0 %4298, %v5168_v2   ;;  %3887 = vmatpush3.msra.mxu0 %v2747_v10  ;;  %s4317_s27 = scalar_lea.vmem %s4316_s28, 4096  ;;  %p4318_p4 = scmp.lt.s32.totalorder %s5864_s22, %s4316_s28 }
 0x192   : > { %1867 = vperm.xlu1 %4296, %v5240_v62   ;;  %2938 = vmatmul.mubr.f32.gmra.mxu1 %v4250_v60  ;;  %v5430_v5 = vpop.permute.xlu0 %2299  ;;  %p4319_p5 = scmp.lt.s32.totalorder %s4317_s27, %s4311_s21 }
 0x193   : > { %2908 = vmatmul.mubr.f32.vlgmr.msra.gmra.mxu0 %v4220_v45  ;;  %2942 = vmatprep.mubr.f32.mxu1 %v4252_v63  ;;  %v5433_v16 = vpop.trf.xlu1 }
 0x194   : > { %2912 = vmatprep.mubr.f32.mxu0 %v4222_v7  ;;  %v4282_v15 = vunpack.i.l.bf16 %v5433_v16  ;;  %v4285_v37 = vunpack.i.h.bf16 %v5433_v16  ;;  %p4320_p7 = por %p4319_p5, %p4318_p4 }
 0x195   : > { %2620 = vperm.xlu0 %4298, %v5436_v20  }
 0x196   : > { %2943 = vmatmul.mubr.f32.gmra.mxu1 %v4255_v1  ;;  %4299 = vset.pattern.permute.xlu1 %v4375_v0  ;;  %v4232_v0 = vunpack.i.l.bf16 %v5304_v55  ;;  %v4277_v55 = vunpack.i.l.bf16 %v5423_v35  ;;  %p4321_p8 = pnand %p4320_p7, %p4314_p3 }
 0x197   : > { %2913 = vmatmul.mubr.f32.gmra.mxu0 %v4225_v27  ;;  %2947 = vmatprep.mubr.f32.mxu1 %v4257_v6  ;;  %v4286_v17 = vpop.trf.xlu1  ;;  %v5444_v31 = vpop.permute.xlu0 %2303 }
 0x198   : > { %2917 = vmatprep.mubr.f32.mxu0 %v4227_v8  ;;  %2612 = vperm.xlu1 %4299, %v5447_v34   ;;  %v4287_v44 = vunpack.i.l.bf16 %v4286_v17  ;;  %v4290_v49 = vunpack.i.h.bf16 %v4286_v17 }
 0x199   : > { %2624 = vperm.xlu0 %4298, %v5190_v19  }
 0x19a   : > { %2948 = vmatmul.mubr.f32.gmra.mxu1 %v4260_v12 }
 0x19b   : > { %2918 = vmatmul.mubr.f32.gmra.mxu0 %v4230_v32  ;;  %2952 = vmatprep.mubr.f32.mxu1 %v4262_v14  ;;  %v4291_v22 = vpop.trf.xlu1  ;;  %v5455_v23 = vpop.permute.xlu0 %2307 }
 0x19c   : > { %2922 = vmatprep.mubr.f32.mxu0 %v4232_v0  ;;  %2644 = vperm.xlu1 %4299, %v5458_v48   ;;  %v4292_v38 = vunpack.i.l.bf16 %v4291_v22 }
 0x19d   : > { %2628 = vperm.xlu0 %4298, %v5462_v54  }
 0x19e   : > { %2953 = vmatmul.mubr.f32.gmra.mxu1 %v4265_v46 }
 0x19f   : > { %2923 = vmatmul.mubr.f32.gmra.mxu0 %v4235_v42  ;;  %2957 = vmatprep.mubr.f32.mxu1 %v4267_v18  ;;  %v5469_v10 = vpop.permute.xlu0 %2311 }
 0x1a0   : > { %4300 = vset.pattern.permute.xlu1 %v4376_v29 }
 0x1a1   : > { %2632 = vperm.xlu0 %4298, %v5215_v39   ;;  %2989 = vperm.xlu1 %4300, %v5336_v13  }
 0x1a2   : > { %2958 = vmatmul.mubr.f32.gmra.mxu1 %v4270_v56 }
 0x1a3   : > { %2962 = vmatprep.mubr.f32.mxu1 %v4272_v25 }
 0x1a4   : > { %v5481_v13 = vpop.permute.xlu0 %2315 }
 0x1a5   : > { %2636 = vperm.xlu0 %4298, %v5475_v9   ;;  %2997 = vperm.xlu1 %4300, %v5133_v21  }
 0x1a6   : > { %2963 = vmatmul.mubr.f32.gmra.mxu1 %v4275_v4 }
 0x1a7   : > { %2967 = vmatprep.mubr.f32.mxu1 %v4277_v55 }
 0x1a8   : > { %v5487_v21 = vpop.permute.xlu0 %2319 }
 0x1a9   : > { %2640 = vperm.xlu0 %4298, %v5240_v62   ;;  %3001 = vperm.xlu1 %4300, %v5140_v30   ;;  %v4295_v30 = vunpack.i.h.bf16 %v4291_v22 }
 0x1aa   : > { %2968 = vmatmul.mubr.f32.gmra.mxu1 %v4280_v36 }
 0x1ab   : > { %2972 = vmatprep.mubr.f32.mxu1 %v4282_v15 }
 0x1ad   : > { %2648 = vperm.xlu0 %4298, %v4310_v61   ;;  %3009 = vperm.xlu1 %4300, %v5156_v50   ;;  %v5492_v58 = vpop.permute.xlu0 %2323 }
 0x1ae   : > { %2973 = vmatmul.mubr.f32.gmra.mxu1 %v4285_v37 }
 0x1af   : > { %2977 = vmatprep.mubr.f32.mxu1 %v4287_v44 }
 0x1b0   : > { %v3632_v51 = vpop.f32.mrf.mxu0  ;;  %v3970_v52 = vpop.f32.mrf.mxu1 }
 0x1b1   : > { %4301 = vset.pattern.permute.xlu0 %v4376_v29  ;;  %3017 = vperm.xlu1 %4300, %v5168_v2   ;;  %v5498_v1 = vpop.permute.xlu0 %2327 }
 0x1b2   : > { %2978 = vmatmul.mubr.f32.gmra.mxu1 %v4290_v49  ;;  %2993 = vperm.xlu0 %4301, %v5356_v24   ;;  %v3633_v53 = vpop.f32.mrf.mxu0  ;;  %v1705_v11 = vpop.f32.mrf.mxu1 }
 0x1b3   : > { %2982 = vmatprep.mubr.f32.mxu1 %v4292_v38  ;;  %v3634_v60 = vadd.f32 %v3633_v53, %v3632_v51 }
 0x1b5   : > { %3025 = vperm.xlu1 %4300, %v5190_v19   ;;  %v5495_v50 = vadd.f32 %v3634_v60, %v1705_v11  ;;  %v3635_v63 = vpop.f32.mrf.mxu0  ;;  %v3973_v35 = vpop.f32.mrf.mxu1 }
 0x1b6   : > { %2983 = vmatmul.mubr.f32.gmra.mxu1 %v4295_v30  ;;  %3005 = vperm.xlu0 %4301, %v5396_v28  }
 0x1b7   : > { %v3636_v2 = vpop.f32.mrf.mxu0  ;;  %v1715_v7 = vpop.f32.mrf.mxu1 }
 0x1b8   : > { %v3637_v45 = vadd.f32 %v3636_v2, %v3635_v63  ;;  %v5508_v17 = vpop.permute.xlu0 %2331 }
 0x1b9   : > { %3033 = vperm.xlu1 %4300, %v5215_v39   ;;  %5929 = vst [vmem:[#allocation14_spill] sm:$0xff] %v5508_v17 }
 0x1ba   : > { %3013 = vperm.xlu0 %4301, %v5447_v34   ;;  %v5502_v24 = vadd.f32 %v3970_v52, %v3637_v45  ;;  %v3638_v6 = vpop.f32.mrf.mxu0  ;;  %v3976_v19 = vpop.f32.mrf.mxu1 }
 0x1bc   : > { %v3639_v16 = vpop.f32.mrf.mxu0  ;;  %v1725_v8 = vpop.f32.mrf.mxu1 }
 0x1bd   : > { %3041 = vperm.xlu1 %4300, %v5240_v62   ;;  %v3640_v27 = vadd.f32 %v3639_v16, %v3638_v6  ;;  %v5514_v22 = vpop.permute.xlu0 %2335 }
 0x1be   : > { %3021 = vperm.xlu0 %4301, %v5436_v20   ;;  %5930 = vst [vmem:[#allocation15_spill] sm:$0xff] %v5514_v22 }
 0x1bf   : > { %v3641_v28 = vpop.f32.mrf.mxu0  ;;  %v3979_v12 = vpop.f32.mrf.mxu1  ;;  %v5506_v14 = vadd.f32 %v3640_v27, %v1715_v7 }
 0x1c1   : > { %3049 = vperm.xlu1 %4300, %v4310_v61   ;;  %v3642_v39 = vpop.f32.mrf.mxu0  ;;  %v1735_v34 = vpop.f32.mrf.mxu1 }
 0x1c2   : > { %3029 = vperm.xlu0 %4301, %v5462_v54   ;;  %v3643_v32 = vadd.f32 %v3642_v39, %v3641_v28  ;;  %v5519_v36 = vpop.permute.xlu0 %2339 }
 0x1c3   : > { %5931 = vst [vmem:[#allocation16_spill] sm:$0xff] %v5519_v36 }
 0x1c4   : > { %v3644_v0 = vpop.f32.mrf.mxu0  ;;  %v3982_v46 = vpop.f32.mrf.mxu1  ;;  %v5511_v18 = vadd.f32 %v3973_v35, %v3643_v32 }
 0x1c6   : > { %3037 = vperm.xlu0 %4301, %v5475_v9   ;;  %v3645_v62 = vpop.f32.mrf.mxu0  ;;  %v1745_v20 = vpop.f32.mrf.mxu1 }
 0x1c7   : > { %v3646_v42 = vadd.f32 %v3645_v62, %v3644_v0  ;;  %v5523_v38 = vpop.permute.xlu0 %2343 }
 0x1c8   : > { %5932 = vst [vmem:[#allocation17_spill] sm:$0xff] %v5523_v38 }
 0x1c9   : > { %v5516_v56 = vadd.f32 %v3646_v42, %v1725_v8  ;;  %v3647_v25 = vpop.f32.mrf.mxu0  ;;  %v3985_v29 = vpop.f32.mrf.mxu1 }
 0x1ca   : > { %3045 = vperm.xlu0 %4301, %v5458_v48  }
 0x1cb   : > { %v3648_v4 = vpop.f32.mrf.mxu0  ;;  %v1755_v54 = vpop.f32.mrf.mxu1 }
 0x1cc   : > { %v3649_v55 = vadd.f32 %v3648_v4, %v3647_v25 }
 0x1cd   : > { %v5529_v60 = vpop.permute.xlu0 %2347 }
 0x1ce   : > { %v5521_v15 = vadd.f32 %v3976_v19, %v3649_v55  ;;  %5933 = vst [vmem:[#allocation18_spill] sm:$0xff] %v5529_v60 }
 0x1cf   : > { %v3650_v37 = vpop.f32.mrf.mxu0  ;;  %v3988_v9 = vpop.f32.mrf.mxu1 }
 0x1d1   : > { %v3651_v44 = vpop.f32.mrf.mxu0  ;;  %v1765_v61 = vpop.f32.mrf.mxu1 }
 0x1d2   : > { %v3652_v49 = vadd.f32 %v3651_v44, %v3650_v37  ;;  %v5533_v19 = vpop.permute.xlu0 %2351 }
 0x1d4   : > { %v5525_v51 = vadd.f32 %v3652_v49, %v1735_v34 }
 0x1d5   : > { %v3653_v52 = vpop.f32.mrf.mxu0  ;;  %v5527_v30 = vpop.f32.mrf.mxu1 }
 0x1d7   : > { %v3654_v48 = vpop.f32.mrf.mxu0  ;;  %v1775_v11 = vpop.f32.mrf.mxu1 }
 0x1d8   : > { %v3655_v53 = vadd.f32 %v3654_v48, %v3653_v52  ;;  %v5541_v25 = vpop.permute.xlu0 %2355 }
 0x1d9   : > { %5935 = vst [vmem:[#allocation20_spill] sm:$0xff] %v5541_v25 }
 0x1da   : > { %v5531_v63 = vadd.f32 %v3979_v12, %v3655_v53 }
 0x1db   : > { %v3656_v35 = vpop.f32.mrf.mxu0 }
 0x1dc   : > { %v3744_v2 = vpop.f32.mrf.mxu1 }
 0x1dd   : > { %v3657_v45 = vpop.f32.mrf.mxu0 }
 0x1de   : > { %v3658_v7 = vadd.f32 %v3657_v45, %v3656_v35  ;;  %v3745_v6 = vpop.f32.mrf.mxu1 }
 0x1df   : > { %v5535_v16 = vadd.f32 %v3745_v6, %v3744_v2  ;;  %v3659_v27 = vpop.f32.mrf.mxu0  ;;  %v5547_v2 = vpop.permute.xlu0 %2359 }
 0x1e0   : > { %v5537_v8 = vadd.f32 %v3658_v7, %v1745_v20  ;;  %v3747_v28 = vpop.f32.mrf.mxu1 }
 0x1e1   : > { %v3660_v39 = vpop.f32.mrf.mxu0 }
 0x1e2   : > { %v3661_v34 = vadd.f32 %v3660_v39, %v3659_v27  ;;  %v3748_v32 = vpop.f32.mrf.mxu1 }
 0x1e3   : > { %v3749_v0 = vadd.f32 %v3748_v32, %v3747_v28  ;;  %v3662_v62 = vpop.f32.mrf.mxu0 }
 0x1e4   : > { %v3750_v12 = vpop.f32.mrf.mxu1  ;;  %v5539_v42 = vadd.f32 %v3982_v46, %v3661_v34 }
 0x1e5   : > { %v3663_v4 = vpop.f32.mrf.mxu0 }
 0x1e6   : > { %5934 = vst [vmem:[#allocation19_spill] sm:$0xff] %v5539_v42  ;;  %v3664_v55 = vadd.f32 %v3663_v4, %v3662_v62  ;;  %v3751_v37 = vpop.f32.mrf.mxu1 }
 0x1e7   : > { %v5543_v44 = vadd.f32 %v3751_v37, %v3750_v12  ;;  %v3665_v49 = vpop.f32.mrf.mxu0 }
 0x1e8   : > { %v5545_v52 = vadd.f32 %v3664_v55, %v1755_v54  ;;  %v3753_v20 = vpop.f32.mrf.mxu1 }
 0x1e9   : > { %v3666_v48 = vpop.f32.mrf.mxu0 }
 0x1ea   : > { %5936 = vst [vmem:[#allocation21_spill] sm:$0xff] %v5545_v52  ;;  %v3667_v53 = vadd.f32 %v3666_v48, %v3665_v49  ;;  %v3754_v35 = vpop.f32.mrf.mxu1  ;;  %v1352_v52 = vld [vmem:[%s5584_s29 + $0x10] sm:$0xff] }
 0x1eb   : > { %v3755_v45 = vadd.f32 %v3754_v35, %v3753_v20 }
 0x1ec   : > { %v3668_v7 = vpop.f32.mrf.mxu0  ;;  %v5549_v46 = vpop.f32.mrf.mxu1  ;;  %v5551_v6 = vadd.f32 %v3985_v29, %v3667_v53 }
 0x1ee   : > { %5937 = vst [vmem:[#allocation22_spill] sm:$0xff] %v5551_v6  ;;  %v3669_v27 = vpop.f32.mrf.mxu0  ;;  %v5553_v39 = vpop.f32.mrf.mxu1  ;;  %v1353_v6 = vld [vmem:[%s5584_s29 + $0x18] sm:$0xff] }
 0x1ef   : > { %v3670_v28 = vadd.f32 %v3669_v27, %v3668_v7  ;;  %v5555_v34 = vpop.permute.xlu0 %2588  ;;  %v1813_v27 = vpop.permute.xlu1 %1812 }
 0x1f0   : > { %v5559_v62 = vpop.f32.mrf.mxu1 }
 0x1f1   : > { %v5557_v54 = vadd.f32 %v3670_v28, %v1765_v61  ;;  %v3671_v32 = vpop.f32.mrf.mxu0 }
 0x1f2   : > { %v5561_v55 = vpop.f32.mrf.mxu1 }
 0x1f3   : > { %5938 = vst [vmem:[#allocation23_spill] sm:$0xff] %v5557_v54  ;;  %v3672_v12 = vpop.f32.mrf.mxu0 }
 0x1f4   : > { %v3673_v4 = vadd.f32 %v3672_v12, %v3671_v32  ;;  %v5567_v20 = vpop.permute.xlu0 %2592 }
 0x1f5   : > { %v3674_v37 = vpop.f32.mrf.mxu0  ;;  %v5563_v49 = vpop.f32.mrf.mxu1 }
 0x1f6   : > { %v5565_v29 = vadd.f32 %v3988_v9, %v3673_v4  ;;  %v1881_v9 = vmul.f32 %v5293_v43, %v5502_v24 }
 0x1f7   : > { %v3675_v48 = vpop.f32.mrf.mxu0  ;;  %v5569_v35 = vpop.f32.mrf.mxu1 }
 0x1f8   : > { %v3676_v53 = vadd.f32 %v3675_v48, %v3674_v37  ;;  %v5575_v12 = vpop.permute.xlu0 %2596  ;;  %v1351_v48 = vld [vmem:[%s5584_s29 + $0x8] sm:$0xff] }
 0x1fa   : > { %v5571_v61 = vadd.f32 %v3676_v53, %v1775_v11  ;;  %v3677_v7 = vpop.f32.mrf.mxu0  ;;  %v1880_v53 = vmul.f32 %v5278_v26, %v5495_v50 }
 0x1fb   : > { %v5573_v28 = vpop.f32.mrf.mxu1 }
 0x1fc   : > { %5939 = vst [vmem:[#allocation24_spill] sm:$0xff] %v5571_v61  ;;  %v3678_v32 = vpop.f32.mrf.mxu0  ;;  %v1350_v61 = vld [vmem:[%s5584_s29] sm:$0xff] }
 0x1fd   : > { %v3679_v25 = vadd.f32 %v3678_v32, %v3677_v7  ;;  %v5577_v40 = vpop.f32.mrf.mxu1  ;;  %v1818_v7 = vpop.permute.xlu1 %1817  ;;  %v1896_v38 = vadd.f32 %v1880_v53, %v1350_v61 }
 0x1fe   : > { %v5599_v54 = vpop.permute.xlu0 %2600 }
 0x1ff   : > { %v5589_v11 = vadd.f32 %v5527_v30, %v3679_v25  ;;  %v1897_v30 = vadd.f32 %v1881_v9, %v1351_v48  ;;  %v1883_v25 = vmul.f32 %v1818_v7, %v5511_v18 }
 0x200   : > { %v5591_v4 = vpop.f32.mrf.mxu1  ;;  %v4026_v37 = vpop.f32.mrf.mxu0 }
 0x201   : > { %v2225_v32 = vadd.f32 %v4026_v37, %v3749_v0  ;;  %v1882_v37 = vmul.f32 %v1813_v27, %v5506_v14 }
 0x202   : > { %v5597_v60 = vpop.f32.mrf.mxu1  ;;  %v2219_v33 = vpop.f32.mrf.mxu0 }
 0x203   : > { %v2363_v43 = vmul.f32 %v5444_v31, %v2225_v32  ;;  %v2220_v24 = vadd.f32 %v5535_v16, %v2219_v33  ;;  %v1899_v33 = vadd.f32 %v1883_v25, %v1353_v6  ;;  %v5620_v9 = vpop.permute.xlu0 %2604  ;;  %v1898_v48 = vadd.f32 %v1882_v37, %v1352_v52 }
 0x205   : > { %v2362_v26 = vmul.f32 %v5430_v5, %v2220_v24  ;;  %v4029_v50 = vpop.f32.mrf.mxu0  ;;  %v5606_v0 = vadd.f32 %v2363_v43, %v1897_v30  ;;  %v5618_v5 = vpop.permute.xlu1 %1827 }
 0x206   : > { %v5609_v36 = vpop.f32.mrf.mxu1  ;;  %v2235_v59 = vadd.f32 %v4029_v50, %v3755_v45 }
 0x207   : > { %v2229_v22 = vpop.f32.mrf.mxu0  ;;  %v5612_v31 = vadd.f32 %v2362_v26, %v1896_v38 }
 0x208   : > { %v2365_v16 = vmul.f32 %v5469_v10, %v2235_v59  ;;  %v5615_v18 = vpop.f32.mrf.mxu1  ;;  %v2230_v61 = vadd.f32 %v5543_v44, %v2229_v22  ;;  %v5633_v22 = vpop.permute.xlu0 %2608 }
 0x209   : > { %v5631_v10 = vpop.permute.xlu1 %1837 }
 0x20a   : > { %v2364_v14 = vmul.f32 %v5455_v23, %v2230_v61  ;;  %v2381_v27 = vadd.f32 %v2365_v16, %v1899_v33 }
 0x20b   : > { %v5623_v45 = vpop.f32.mrf.mxu1  ;;  %v5625_v53 = vpop.f32.mrf.mxu0 }
 0x20c   : > { %v2380_v38 = vadd.f32 %v2364_v14, %v1898_v48  ;;  %v5645_v43 = vpop.permute.xlu0 %2616 }
 0x20d   : > { %v5627_v6 = vpop.f32.mrf.mxu1  ;;  %v5629_v59 = vpop.f32.mrf.mxu0 }
 0x20e   : > { %5940 = vst [vmem:[#allocation25_spill] sm:$0xff] %v5627_v6  ;;  %v5643_v32 = vpop.permute.xlu1 %1847 }
 0x20f   : > { %5943 = vst [vmem:[#allocation28_spill] sm:$0xff] %v5643_v32 }
 0x210   : > { %v5635_v44 = vpop.f32.mrf.mxu0  ;;  %v5659_v33 = vpop.permute.xlu0 %2620 }
 0x211   : > { %v5637_v7 = vpop.f32.mrf.mxu1  ;;  %5949 = vst [vmem:[#allocation34_spill] sm:$0xff] %v5659_v33 }
 0x212   : > { %5941 = vst [vmem:[#allocation26_spill] sm:$0xff] %v5637_v7  ;;  %v5639_v52 = vpop.f32.mrf.mxu0  ;;  %v5653_v26 = vpop.permute.xlu1 %1857  ;;  %v1363_v7 = vld [vmem:[%s5584_s29 + $0x68] sm:$0xff] }
 0x213   : > { %v5641_v23 = vpop.f32.mrf.mxu1  ;;  %5947 = vst [vmem:[#allocation32_spill] sm:$0xff] %v5653_v26 }
 0x214   : > { %5942 = vst [vmem:[#allocation27_spill] sm:$0xff] %v5641_v23  ;;  %v5667_v26 = vpop.permute.xlu0 %2624 }
 0x215   : > { %5952 = vst [vmem:[#allocation37_spill] sm:$0xff] %v5667_v26 }
 0x216   : > { %v5647_v24 = vpop.f32.mrf.mxu1  ;;  %v5649_v30 = vpop.f32.mrf.mxu0 }
 0x217   : > { %5944 = vst [vmem:[#allocation29_spill] sm:$0xff] %v5647_v24  ;;  %5945 = vst [vmem:[#allocation30_spill] sm:$0xff] %v5649_v30  ;;  %v1868_v61 = vpop.permute.xlu1 %1867 }
 0x218   : > { %v5651_v25 = vpop.f32.mrf.mxu1  ;;  %v5655_v50 = vpop.f32.mrf.mxu0  ;;  %v1893_v24 = vmul.f32 %v1868_v61, %v5565_v29 }
 0x219   : > { %5946 = vst [vmem:[#allocation31_spill] sm:$0xff] %v5651_v25  ;;  %v5676_v29 = vpop.permute.xlu0 %2628 }
 0x21a   : > { %v1909_v33 = vadd.f32 %v1893_v24, %v1363_v7 }
 0x21b   : > { %v5657_v37 = vpop.f32.mrf.mxu0 }
 0x21c   : > { %5948 = vst [vmem:[#allocation33_spill] sm:$0xff] %v5657_v37  ;;  %v3783_v16 = vpop.f32.mrf.mxu1 }
 0x21d   : > { %v5661_v48 = vpop.f32.mrf.mxu0  ;;  %v5684_v24 = vpop.permute.xlu0 %2632 }
 0x21e   : > { %5950 = vst [vmem:[#allocation35_spill] sm:$0xff] %v5661_v48  ;;  %v3784_v14 = vpop.f32.mrf.mxu1 }
 0x21f   : > { %v3785_v23 = vadd.f32 %v3784_v14, %v3783_v16 }
 0x221   : > { %v5665_v32 = vpop.f32.mrf.mxu1  ;;  %v4044_v25 = vpop.f32.mrf.mxu0 }
 0x222   : > { %5951 = vst [vmem:[#allocation36_spill] sm:$0xff] %v5665_v32  ;;  %v2285_v42 = vadd.f32 %v4044_v25, %v3785_v23  ;;  %v1895_v32 = vmul.f32 %v5415_v47, %v5589_v11  ;;  %v1365_v25 = vld [vmem:[%s5584_s29 + $0x78] sm:$0xff]  ;;  %v5693_v47 = vpop.permute.xlu1 %2612 }
 0x223   : > { %v5669_v17 = vpop.f32.mrf.mxu1  ;;  %v5671_v37 = vpop.f32.mrf.mxu0 }
 0x224   : > { %5953 = vst [vmem:[#allocation38_spill] sm:$0xff] %v5669_v17  ;;  %5954 = vst [vmem:[#allocation39_spill] sm:$0xff] %v5671_v37  ;;  %v2375_v30 = vmul.f32 %v5533_v19, %v2285_v42 }
 0x226   : > { %v4047_v48 = vpop.f32.mrf.mxu0  ;;  %v5674_v6 = vadd.f32 %v2375_v30, %v1909_v33  ;;  %v1911_v30 = vadd.f32 %v1895_v32, %v1365_v25  ;;  %v5706_v32 = vpop.permute.xlu1 %2644  ;;  %v3761_v25 = vadd.f32 %v5561_v55, %v5559_v62  ;;  %v3764_v62 = vadd.f32 %v5569_v35, %v5563_v49 }
 0x227   : > { %v3789_v16 = vpop.f32.mrf.mxu1  ;;  %5958 = vst [vmem:[#allocation43_spill] sm:$0xff] %v5706_v32 }
 0x228   : > { %5955 = vst [vmem:[#allocation40_spill] sm:$0xff] %v5674_v6  ;;  %v5678_v61 = vpop.f32.mrf.mxu0 }
 0x229   : > { %5956 = vst [vmem:[#allocation41_spill] sm:$0xff] %v5678_v61  ;;  %v3790_v14 = vpop.f32.mrf.mxu1 }
 0x22a   : > { %v3791_v23 = vadd.f32 %v3790_v14, %v3789_v16 }
 0x22c   : > { %v2295_v17 = vadd.f32 %v4047_v48, %v3791_v23  ;;  %v4082_v26 = vpop.f32.mrf.mxu0 }
 0x22d   : > { %v2652_v7 = vmul.f32 %v4082_v26, %v5567_v20 }
 0x22e   : > { %v2377_v19 = vmul.f32 %v5547_v2, %v2295_v17  ;;  %v2508_v42 = vpop.f32.mrf.mxu0  ;;  %v5702_v2 = vpop.permute.xlu0 %2636 }
 0x22f   : > { %v5688_v33 = vadd.f32 %v2652_v7, %v5606_v0  ;;  %v2651_v6 = vmul.f32 %v5555_v34, %v2508_v42 }
 0x230   : > { %v4085_v61 = vpop.f32.mrf.mxu0  ;;  %v5691_v37 = vadd.f32 %v2377_v19, %v1911_v30  ;;  %v1354_v30 = vld [vmem:[%s5584_s29 + $0x20] sm:$0xff] }
 0x231   : > { %v5696_v11 = vadd.f32 %v2651_v6, %v5612_v31  ;;  %v2654_v20 = vmul.f32 %v4085_v61, %v5599_v54  ;;  %v5712_v6 = vpop.permute.xlu1 %2989 }
 0x232   : > { %5957 = vst [vmem:[#allocation42_spill] sm:$0xff] %v5691_v37  ;;  %v2518_v26 = vpop.f32.mrf.mxu0  ;;  %v5708_v14 = vpop.permute.xlu0 %2640 }
 0x233   : > { %v5699_v48 = vadd.f32 %v2654_v20, %v2381_v27  ;;  %v2653_v17 = vmul.f32 %v5575_v12, %v2518_v26  ;;  %5959 = vst [vmem:[#allocation44_spill] sm:$0xff] %v5708_v14  ;;  %v3758_v27 = vadd.f32 %v5553_v39, %v5549_v46  ;;  %v1884_v46 = vmul.f32 %v5307_v57, %v5516_v56 }
 0x234   : > { %v2245_v20 = vadd.f32 %v5625_v53, %v3761_v25  ;;  %v3767_v25 = vadd.f32 %v5577_v40, %v5573_v28  ;;  %v3770_v28 = vadd.f32 %v5597_v60, %v5591_v4  ;;  %v3773_v60 = vadd.f32 %v5615_v18, %v5609_v36 }
 0x235   : > { %v5704_v0 = vadd.f32 %v2653_v17, %v2380_v38  ;;  %v5722_v23 = vpop.permute.xlu1 %2997  ;;  %v2240_v7 = vadd.f32 %v3758_v27, %v5629_v59  ;;  %v1885_v17 = vmul.f32 %v5618_v5, %v5521_v15  ;;  %v1900_v27 = vadd.f32 %v1884_v46, %v1354_v30 }
 0x236   : > { %v4088_v34 = vpop.f32.mrf.mxu0  ;;  %v5716_v12 = vpop.permute.xlu0 %2648  ;;  %v2250_v15 = vadd.f32 %v3764_v62, %v5639_v52  ;;  %v1887_v62 = vmul.f32 %v5631_v10, %v5531_v63 }
 0x237   : > { %5960 = vst [vmem:[#allocation45_spill] sm:$0xff] %v5716_v12  ;;  %v2366_v26 = vmul.f32 %v5481_v13, %v2240_v7  ;;  %v1355_v12 = vld [vmem:[%s5584_s29 + $0x28] sm:$0xff]  ;;  %v2367_v13 = vmul.f32 %v5487_v21, %v2245_v20  ;;  %v1356_v20 = vld [vmem:[%s5584_s29 + $0x30] sm:$0xff] }
 0x238   : > { %v2528_v16 = vpop.f32.mrf.mxu0  ;;  %v1901_v7 = vadd.f32 %v1885_v17, %v1355_v12  ;;  %v2368_v52 = vmul.f32 %v5492_v58, %v2250_v15  ;;  %v1358_v15 = vld [vmem:[%s5584_s29 + $0x40] sm:$0xff] }
 0x239   : > { %v2655_v37 = vmul.f32 %v5620_v9, %v2528_v16  ;;  %v5745_v57 = vpop.permute.xlu1 %3001  ;;  %v2382_v49 = vadd.f32 %v2366_v26, %v1900_v27  ;;  %v2656_v9 = vmul.f32 %v4088_v34, %v5633_v22  ;;  %v2255_v22 = vadd.f32 %v5635_v44, %v3767_v25  ;;  %v1357_v27 = vld [vmem:[%s5584_s29 + $0x38] sm:$0xff] }
 0x23a   : > { %v5729_v42 = vpop.permute.xlu0 %2993  ;;  %v2383_v21 = vadd.f32 %v2367_v13, %v1901_v7 }
 0x23b   : > { %v5710_v31 = vpop.f32.mrf.mxu0  ;;  %v2671_v16 = vadd.f32 %v2655_v37, %v2382_v49  ;;  %v2369_v44 = vmul.f32 %v5498_v1, %v2255_v22  ;;  %v1903_v49 = vadd.f32 %v1887_v62, %v1357_v27  ;;  %v5968_v27 = vld [vmem:[#allocation26_spill] sm:$0xff] }
 0x23c   : > { %v2672_v34 = vadd.f32 %v2656_v9, %v2383_v21  ;;  %v5963_v9 = vld [vmem:[#allocation30_spill] sm:$0xff] }
 0x23d   : > { %v2538_v54 = vpop.f32.mrf.mxu0  ;;  %v3010_v37 = vpop.permute.xlu1 %3009 }
 0x23e   : > { %v3006_v56 = vpop.permute.xlu0 %3005 }
 0x240   : > { %v5718_v61 = vpop.f32.mrf.mxu0 }
 0x242   : > { %v5720_v38 = vpop.f32.mrf.mxu0  ;;  %v3014_v36 = vpop.permute.xlu0 %3013 }
 0x244   : > { %v5727_v19 = vpop.f32.mrf.mxu0 }
 0x246   : > { %v5733_v39 = vpop.f32.mrf.mxu0 }
 0x249   : > { %v3900_v55 = vpop.f32.mrf.mxu1  ;;  %v5740_v59 = vpop.f32.mrf.mxu0 }
 0x24a   : > { %5961 = vst [vmem:[#allocation46_spill] sm:$0xff] %v5740_v59  ;;  %v1886_v59 = vmul.f32 %v5324_v3, %v5525_v51 }
 0x24b   : > { %v3901_v32 = vpop.f32.mrf.mxu1  ;;  %v5748_v53 = vpop.f32.mrf.mxu0 }
 0x24c   : > { %v3902_v35 = vadd.f32 %v3901_v32, %v3900_v55  ;;  %v1902_v55 = vadd.f32 %v1886_v59, %v1356_v20  ;;  %v2385_v20 = vadd.f32 %v2369_v44, %v1903_v49 }
 0x24d   : > { %v3903_v5 = vpop.f32.mrf.mxu1 }
 0x24e   : > { %v3056_v46 = vmul.f32 %v3902_v35, %v3006_v56  ;;  %v5755_v30 = vpop.f32.mrf.mxu0  ;;  %v2260_v56 = vadd.f32 %v3770_v28, %v5655_v50  ;;  %v2384_v63 = vadd.f32 %v2368_v52, %v1902_v55  ;;  %v2658_v35 = vmul.f32 %v5710_v31, %v5645_v43  ;;  %v5962_v50 = vld [vmem:[#allocation25_spill] sm:$0xff]  ;;  %v5965_v31 = vld [vmem:[#allocation19_spill] sm:$0xff]  ;;  %v5966_v28 = vld [vmem:[#allocation28_spill] sm:$0xff] }
 0x24f   : > { %v3904_v14 = vpop.f32.mrf.mxu1  ;;  %v3776_v7 = vadd.f32 %v5962_v50, %v5623_v45  ;;  %v1889_v22 = vmul.f32 %v5966_v28, %v5965_v31  ;;  %v5978_v28 = vld [vmem:[#allocation16_spill] sm:$0xff] }
 0x250   : > { %v3072_v32 = vadd.f32 %v3056_v46, %v2671_v16  ;;  %v3905_v26 = vadd.f32 %v3904_v14, %v3903_v5  ;;  %v5760_v40 = vpop.f32.mrf.mxu0  ;;  %v2657_v14 = vmul.f32 %v5693_v47, %v2538_v54  ;;  %v1888_v54 = vmul.f32 %v5344_v41, %v5537_v8  ;;  %v5964_v46 = vld [vmem:[#allocation14_spill] sm:$0xff] }
 0x251   : > { %v2265_v16 = vadd.f32 %v5963_v9, %v3773_v60  ;;  %v2370_v21 = vmul.f32 %v5964_v46, %v2260_v56  ;;  %v5969_v60 = vld [vmem:[#allocation27_spill] sm:$0xff]  ;;  %v1360_v9 = vld [vmem:[%s5584_s29 + $0x50] sm:$0xff] }
 0x252   : > { %v3088_v12 = vmul.f32 0.2, %v3072_v32  ;;  %v3057_v3 = vmul.f32 %v3905_v26, %v3010_v37  ;;  %v3906_v51 = vpop.f32.mrf.mxu1  ;;  %v2673_v25 = vadd.f32 %v2657_v14, %v2384_v63  ;;  %v1904_v52 = vadd.f32 %v1888_v54, %v1358_v15  ;;  %v3018_v37 = vpop.permute.xlu1 %3017  ;;  %v5975_v46 = vld [vmem:[#allocation29_spill] sm:$0xff] }
 0x253   : > { %v3888_v17 = vpop.f32.mrf.mxu0 }
 0x254   : > { %3104 = vst [vmem:[%s5773_s18 + $0x20] sm:$0xff] %v3088_v12  ;;  %v3073_v58 = vadd.f32 %v3057_v3, %v2672_v34  ;;  %v3907_v4 = vpop.f32.mrf.mxu1  ;;  %v1359_v3 = vld [vmem:[%s5584_s29 + $0x48] sm:$0xff]  ;;  %v2386_v54 = vadd.f32 %v2370_v21, %v1904_v52  ;;  %v5976_v21 = vld [vmem:[#allocation31_spill] sm:$0xff] }
 0x255   : > { %v3908_v10 = vadd.f32 %v3907_v4, %v3906_v51  ;;  %v3889_v47 = vpop.f32.mrf.mxu0  ;;  %v2674_v51 = vadd.f32 %v2658_v35, %v2385_v20  ;;  %v5970_v4 = vld [vmem:[#allocation15_spill] sm:$0xff]  ;;  %v1905_v35 = vadd.f32 %v1889_v22, %v1359_v3  ;;  %v3782_v20 = vadd.f32 %v5976_v21, %v5975_v46 }
 0x256   : > { %v3089_v59 = vmul.f32 0.2, %v3073_v58  ;;  %v3890_v18 = vadd.f32 %v3889_v47, %v3888_v17  ;;  %v3909_v13 = vpop.f32.mrf.mxu1  ;;  %v3779_v58 = vadd.f32 %v5969_v60, %v5968_v27  ;;  %v2371_v44 = vmul.f32 %v5970_v4, %v2265_v16  ;;  %v5981_v4 = vld [vmem:[#allocation17_spill] sm:$0xff] }
 0x257   : > { %v3058_v1 = vmul.f32 %v3908_v10, %v3014_v36  ;;  %v3891_v5 = vpop.f32.mrf.mxu0  ;;  %v5971_v10 = vld [vmem:[#allocation35_spill] sm:$0xff]  ;;  %v2661_v27 = vmul.f32 %v5676_v29, %v5733_v39 }
 0x258   : > { %3105 = vst [vmem:[%s5773_s18 + $0x28] sm:$0xff] %v3089_v59  ;;  %v3052_v41 = vmul.f32 %v3890_v18, %v5712_v6  ;;  %v3910_v8 = vpop.f32.mrf.mxu1  ;;  %v5967_v6 = vld [vmem:[#allocation34_spill] sm:$0xff]  ;;  %v2270_v47 = vadd.f32 %v3776_v7, %v5971_v10  ;;  %v5972_v18 = vld [vmem:[#allocation21_spill] sm:$0xff]  ;;  %v2387_v52 = vadd.f32 %v2371_v44, %v1905_v35  ;;  %v5982_v10 = vld [vmem:[#allocation39_spill] sm:$0xff] }
 0x259   : > { %v3074_v32 = vadd.f32 %v3058_v1, %v2673_v25  ;;  %v3911_v26 = vadd.f32 %v3910_v8, %v3909_v13  ;;  %v3892_v43 = vpop.f32.mrf.mxu0  ;;  %v2659_v62 = vmul.f32 %v5967_v6, %v5720_v38  ;;  %v5973_v13 = vld [vmem:[#allocation11_spill] sm:$0xff]  ;;  %v3022_v25 = vpop.permute.xlu0 %3021 }
 0x25a   : > { %v3068_v45 = vadd.f32 %v3052_v41, %v5696_v11  ;;  %v3893_v34 = vadd.f32 %v3892_v43, %v3891_v5  ;;  %v3912_v12 = vpop.f32.mrf.mxu1  ;;  %v1890_v49 = vmul.f32 %v5973_v13, %v5972_v18  ;;  %v5974_v5 = vld [vmem:[#allocation37_spill] sm:$0xff]  ;;  %v2372_v22 = vmul.f32 %v5978_v28, %v2270_v47  ;;  %v3026_v6 = vpop.permute.xlu1 %3025 }
 0x25b   : > { %v3090_v55 = vmul.f32 0.2, %v3074_v32  ;;  %v3059_v14 = vmul.f32 %v3911_v26, %v3018_v37  ;;  %v3894_v17 = vpop.f32.mrf.mxu0  ;;  %v2660_v50 = vmul.f32 %v5718_v61, %v5974_v5  ;;  %v2675_v7 = vadd.f32 %v2659_v62, %v2386_v54  ;;  %v5977_v32 = vld [vmem:[#allocation33_spill] sm:$0xff] }
 0x25c   : > { %v3084_v56 = vmul.f32 0.2, %v3068_v45  ;;  %v3053_v11 = vmul.f32 %v3893_v34, %v5729_v42  ;;  %v3913_v63 = vpop.f32.mrf.mxu1  ;;  %v2275_v26 = vadd.f32 %v5977_v32, %v3779_v58  ;;  %v5979_v34 = vld [vmem:[#allocation22_spill] sm:$0xff]  ;;  %v2280_v47 = vadd.f32 %v3782_v20, %v5982_v10  ;;  %v5995_v10 = vld [vmem:[#allocation43_spill] sm:$0xff] }
 0x25d   : > { %3106 = vst [vmem:[%s5773_s18 + $0x30] sm:$0xff] %v3090_v55  ;;  %v3075_v59 = vadd.f32 %v3059_v14, %v2674_v51  ;;  %v3914_v38 = vadd.f32 %v3913_v63, %v3912_v12  ;;  %v3895_v36 = vpop.f32.mrf.mxu0  ;;  %v5980_v12 = vld [vmem:[#allocation32_spill] sm:$0xff]  ;;  %v1906_v51 = vadd.f32 %v1890_v49, %v1360_v9  ;;  %v3030_v39 = vpop.permute.xlu0 %3029  ;;  %v5986_v9 = vld [vmem:[#allocation38_spill] sm:$0xff]  ;;  %v2663_v32 = vmul.f32 %v5702_v2, %v5748_v53  ;;  %v1364_v2 = vld [vmem:[%s5584_s29 + $0x70] sm:$0xff] }
 0x25e   : > { %3100 = vst [vmem:[%s5773_s18] sm:$0xff] %v3084_v56  ;;  %v3069_v15 = vadd.f32 %v3053_v11, %v5688_v33  ;;  %v3896_v1 = vadd.f32 %v3895_v36, %v3894_v17  ;;  %v3915_v42 = vpop.f32.mrf.mxu1  ;;  %v1891_v3 = vmul.f32 %v5980_v12, %v5979_v34  ;;  %v2676_v17 = vadd.f32 %v2660_v50, %v2387_v52  ;;  %v5984_v36 = vld [vmem:[#allocation12_spill] sm:$0xff]  ;;  %v3034_v20 = vpop.permute.xlu1 %3033 }
 0x25f   : > { %v3091_v16 = vmul.f32 0.2, %v3075_v59  ;;  %v3060_v41 = vmul.f32 %v3914_v38, %v3022_v25  ;;  %v3897_v8 = vpop.f32.mrf.mxu0  ;;  %v2373_v44 = vmul.f32 %v5981_v4, %v2275_v26  ;;  %v5983_v38 = vld [vmem:[#allocation23_spill] sm:$0xff] }
 0x260   : > { %v3085_v43 = vmul.f32 0.2, %v3069_v15  ;;  %v3054_v33 = vmul.f32 %v3896_v1, %v5722_v23  ;;  %v3916_v31 = vpop.f32.mrf.mxu1  ;;  %v1361_v23 = vld [vmem:[%s5584_s29 + $0x58] sm:$0xff]  ;;  %v1892_v18 = vmul.f32 %v5984_v36, %v5983_v38  ;;  %v1362_v25 = vld [vmem:[%s5584_s29 + $0x60] sm:$0xff] }
 0x261   : > { %3107 = vst [vmem:[%s5773_s18 + $0x38] sm:$0xff] %v3091_v16  ;;  %v3076_v61 = vadd.f32 %v3060_v41, %v2675_v7  ;;  %v3917_v37 = vadd.f32 %v3916_v31, %v3915_v42  ;;  %v3898_v45 = vpop.f32.mrf.mxu0  ;;  %v1907_v29 = vadd.f32 %v1891_v3, %v1361_v23  ;;  %v5985_v7 = vld [vmem:[#allocation36_spill] sm:$0xff]  ;;  %v5987_v41 = vld [vmem:[#allocation18_spill] sm:$0xff]  ;;  %v5988_v31 = vld [vmem:[#allocation41_spill] sm:$0xff]  ;;  %v3038_v12 = vpop.permute.xlu0 %3037 }
 0x262   : > { %3101 = vst [vmem:[%s5773_s18 + $0x8] sm:$0xff] %v3085_v43  ;;  %v3070_v62 = vadd.f32 %v3054_v33, %v5704_v0  ;;  %v3899_v55 = vadd.f32 %v3898_v45, %v3897_v8  ;;  %v3918_v14 = vpop.f32.mrf.mxu1  ;;  %v2388_v0 = vadd.f32 %v2372_v22, %v1906_v51  ;;  %v3788_v16 = vadd.f32 %v5986_v9, %v5985_v7  ;;  %v5990_v45 = vld [vmem:[#allocation13_spill] sm:$0xff]  ;;  %v5991_v51 = vld [vmem:[#allocation44_spill] sm:$0xff] }
 0x263   : > { %v3092_v60 = vmul.f32 0.2, %v3076_v61  ;;  %v3061_v58 = vmul.f32 %v3917_v37, %v3026_v6  ;;  %v2389_v42 = vadd.f32 %v2373_v44, %v1907_v29  ;;  %v2374_v8 = vmul.f32 %v5987_v41, %v2280_v47  ;;  %v5989_v37 = vld [vmem:[#allocation24_spill] sm:$0xff]  ;;  %v5992_v6 = vld [vmem:[#allocation46_spill] sm:$0xff]  ;;  %v3042_v44 = vpop.permute.xlu1 %3041 }
 0x264   : > { %v3086_v56 = vmul.f32 0.2, %v3070_v62  ;;  %v3055_v11 = vmul.f32 %v3899_v55, %v5745_v57  ;;  %v3919_v63 = vpop.f32.mrf.mxu1  ;;  %v2662_v57 = vmul.f32 %v5727_v19, %v5684_v24  ;;  %v2677_v35 = vadd.f32 %v2661_v27, %v2388_v0 }
 0x265   : > { %3108 = vst [vmem:[%s5773_s18 + $0x40] sm:$0xff] %v3092_v60  ;;  %v3077_v54 = vadd.f32 %v3061_v58, %v2676_v17  ;;  %v3920_v59 = vadd.f32 %v3919_v63, %v3918_v14  ;;  %v1908_v21 = vadd.f32 %v1892_v18, %v1362_v25  ;;  %v2290_v28 = vadd.f32 %v3788_v16, %v5988_v31  ;;  %v5993_v17 = vld [vmem:[#allocation20_spill] sm:$0xff]  ;;  %v3046_v29 = vpop.permute.xlu0 %3045 }
 0x266   : > { %3102 = vst [vmem:[%s5773_s18 + $0x10] sm:$0xff] %v3086_v56  ;;  %v3071_v13 = vadd.f32 %v3055_v11, %v5699_v48  ;;  %v3921_v49 = vpop.f32.mrf.mxu1  ;;  %v2678_v19 = vadd.f32 %v2662_v57, %v2389_v42  ;;  %v1894_v34 = vmul.f32 %v5990_v45, %v5989_v37  ;;  %v2664_v62 = vmul.f32 %v5992_v6, %v5991_v51  ;;  %v5994_v11 = vld [vmem:[#allocation40_spill] sm:$0xff] }
 0x267   : > { %v3093_v15 = vmul.f32 0.2, %v3077_v54  ;;  %v3062_v1 = vmul.f32 %v3920_v59, %v3030_v39  ;;  %v2390_v22 = vadd.f32 %v2374_v8, %v1908_v21  ;;  %v2376_v27 = vmul.f32 %v5993_v17, %v2290_v28  ;;  %v3050_v42 = vpop.permute.xlu1 %3049 }
 0x268   : > { %v3087_v5 = vmul.f32 0.2, %v3071_v13  ;;  %v3922_v50 = vpop.f32.mrf.mxu1  ;;  %v1910_v4 = vadd.f32 %v1894_v34, %v1364_v2  ;;  %v2680_v63 = vadd.f32 %v2664_v62, %v5994_v11  ;;  %v2665_v47 = vmul.f32 %v5995_v10, %v5760_v40  ;;  %v5996_v13 = vld [vmem:[#allocation45_spill] sm:$0xff] }
 0x269   : > { %3109 = vst [vmem:[%s5773_s18 + $0x48] sm:$0xff] %v3093_v15  ;;  %v3078_v48 = vadd.f32 %v3062_v1, %v2677_v35  ;;  %v3923_v46 = vadd.f32 %v3922_v50, %v3921_v49  ;;  %v2679_v55 = vadd.f32 %v2663_v32, %v2390_v22  ;;  %v2666_v49 = vmul.f32 %v5755_v30, %v5996_v13 }
 0x26a   : > { %3103 = vst [vmem:[%s5773_s18 + $0x18] sm:$0xff] %v3087_v5  ;;  %v3924_v24 = vpop.f32.mrf.mxu1  ;;  %v2392_v38 = vadd.f32 %v2376_v27, %v1910_v4  ;;  %v5997_v5 = vld [vmem:[#allocation42_spill] sm:$0xff] }
 0x26b   : > { %v3094_v26 = vmul.f32 0.2, %v3078_v48  ;;  %v3063_v43 = vmul.f32 %v3923_v46, %v3034_v20  ;;  %v2682_v50 = vadd.f32 %v2666_v49, %v5997_v5 }
 0x26c   : > { %v3925_v33 = vpop.f32.mrf.mxu1  ;;  %v2681_v57 = vadd.f32 %v2665_v47, %v2392_v38 }
 0x26d   : > { %3110 = vst [vmem:[%s5773_s18 + $0x50] sm:$0xff] %v3094_v26  ;;  %v3079_v52 = vadd.f32 %v3063_v43, %v2678_v19  ;;  %v3926_v61 = vadd.f32 %v3925_v33, %v3924_v24 }
 0x26e   : > { %v3927_v3 = vpop.f32.mrf.mxu1 }
 0x26f   : > { %v3095_v53 = vmul.f32 0.2, %v3079_v52  ;;  %v3064_v14 = vmul.f32 %v3926_v61, %v3038_v12 }
 0x270   : > { %v3928_v23 = vpop.f32.mrf.mxu1 }
 0x271   : > { %3111 = vst [vmem:[%s5773_s18 + $0x58] sm:$0xff] %v3095_v53  ;;  %v3080_v60 = vadd.f32 %v3064_v14, %v2679_v55  ;;  %v3929_v58 = vadd.f32 %v3928_v23, %v3927_v3 }
 0x272   : > { %v3930_v56 = vpop.f32.mrf.mxu1 }
 0x273   : > { %v3096_v0 = vmul.f32 0.2, %v3080_v60  ;;  %v3065_v54 = vmul.f32 %v3929_v58, %v3042_v44 }
 0x274   : > { %v3931_v59 = vpop.f32.mrf.mxu1 }
 0x275   : > { %3112 = vst [vmem:[%s5773_s18 + $0x60] sm:$0xff] %v3096_v0  ;;  %v3081_v36 = vadd.f32 %v3065_v54, %v2680_v63  ;;  %v3932_v18 = vadd.f32 %v3931_v59, %v3930_v56 }
 0x276   : > { %v3933_v39 = vpop.f32.mrf.mxu1 }
 0x277   : > { %v3097_v35 = vmul.f32 0.2, %v3081_v36  ;;  %v3066_v25 = vmul.f32 %v3932_v18, %v3046_v29 }
 0x278   : > { %v3934_v40 = vpop.f32.mrf.mxu1 }
 0x279   : > { %3113 = vst [vmem:[%s5773_s18 + $0x68] sm:$0xff] %v3097_v35  ;;  %v3082_v15 = vadd.f32 %v3066_v25, %v2681_v57  ;;  %v3935_v1 = vadd.f32 %v3934_v40, %v3933_v39 }
 0x27b   : > { %v3098_v7 = vmul.f32 0.2, %v3082_v15  ;;  %v3067_v9 = vmul.f32 %v3935_v1, %v3050_v42 }
 0x27d   : > { %3114 = vst [vmem:[%s5773_s18 + $0x70] sm:$0xff] %v3098_v7  ;;  %v3083_v16 = vadd.f32 %v3067_v9, %v2682_v50 }
 0x27f   : > { %v3099_v30 = vmul.f32 0.2, %v3083_v16 }
 0x281   : > { %3115 = vst [vmem:[%s5773_s18 + $0x78] sm:$0xff] %v3099_v30 }
 0x282   : > { %4324 = shalt.err (!%p4321_p8)
}
 0x283   : > { %s4325_s11 = scalar_lea.hbm %s5862_s23, 2048  ;;  %s4329_s12 = scalar_lea.hbm %s5919_s10, 6144 }
 0x284   : > { %p4326_p9 = scmp.ne.s32.totalorder %s5862_s23, %s4325_s11  ;;  %p4330_p13 = scmp.lt.s32.totalorder %s5862_s23, %s5919_s10 }
 0x285   : > { %p4331_p0 = scmp.lt.s32.totalorder %s4329_s12, %s4325_s11 }
 0x286   : > { %p4327_p11 = pnand %p4326_p9, %p4478_p6 }
 0x287   : > { %p4332_p1 = por %p4331_p0, %p4330_p13 }
 0x288   : > { %p4328_p12 = pneg %p4327_p11 }
 0x28a   : > { %p4333_p2 = pnand %p4332_p1, %p4328_p12 }
 0x28c   : > { %4336 = shalt.err (!%p4333_p2)
}
 0x28d   : > { %s4378_s21 = smov 128   ;;  %s4379_s17 = smov 8  }
 0x28e   : > { %4138 = dma.vmem_to_hbm [thread:$0]  (%p4478_p6), %s5864_s22, 2048, %s5862_s23, %s5869_s20, %s4378_s21, %s4378_s21, %s4379_s17  }
 0x28f PF: > { %p4144_p3 = scmp.ge.s32.totalorder %s4371_s16, 2  ;;  %s3145_s28 = sand.u32 1, %s4359_s13  }
 0x290   : > { %s3146_s27 = scalar_lea.sflag [#allocation8], %s3145_s28 }
 0x291   : > { %p4141_p4 = pnand %p4144_p3, %p4484_p10 }
 0x293   : > { %p4142_p5 = pneg %p4141_p4 }
 0x295   : > { %4354 = dma.done.wait (%p4142_p5), %s3146_s27, 2048  }
 0x296   : > { %4356 = vsyncadd (%p4142_p5), %s3146_s27, 4294965248  ;;  %s5998_s11 = sld [smem:[#allocation10_spill]]  ;;  %p20_p7 = scmp.ge.s32.totalorder %s4460_s19, 5  }
 0x297   : > { %s5999_s13 = smov %s4363_s14  ;;  %s6000_s14 = smov %s4367_s15 }
 0x298   : > { %s6002_s16 = smov %s4460_s19  ;;  %22 = sbr.rel (!%p20_p7) target bundleno = 3 (0x3), region = 328 }
 0x29c   : > { %s6001_s15 = smov %s5998_s11 }
 0x29d   :  { %3151 = vsyncpa [#allocation8], 1 }
 0x29e   :  { %3153 = vsyncpa [#allocation8 + $0x1], 1 }

</bundles_post_ra>
